<compile_context>
chip_gen: v5e
topology: v5e:2x2
jax: 0.10.0
libtpu: 0.0.40
codegen_flags: <defaults>
</compile_context>

<pallas_src>
import numpy as np
import jax
import jax.numpy as jnp
from jax.experimental import pallas as pl
from jax.experimental.pallas import tpu as pltpu

BN_EPS = 1e-5
CONV_K = 7
CONV_PAD = (CONV_K - 1) // 2
N_TAPS = 2 * CONV_K * CONV_K          # 2 in-channels x 7 x 7 = 98 taps


def _sigmoid(x):
    return 1.0 / (1.0 + jnp.exp(-x))


# ---------------- stage 1 (fused): channel gate + ChannelPool + 7x7 conv -----------
def _make_channel_spatial_kernel(b_tile, hgt, wid):
    hw = hgt * wid

    def kernel(x_ref, w1_ref, b1_ref, w2_ref, b2_ref, wmask_ref, xcg_ref, conv_ref):
        """x_ref: (B, C, HW); wmask_ref: (98, HW) weight*validity per conv tap.

        Outputs: xcg_ref (B, C, HW) channel-gated x; conv_ref (B, 1, HW) raw conv.
        """
        c = x_ref.shape[1]
        inv_hw = 1.0 / hw
        inv_c = 1.0 / c

        # Spatial avg/max pooling (lane reductions) for every element of the tile.
        xs = []
        pooled_cols = []
        for b in range(b_tile):
            x_b = x_ref[b]                                          # (C, HW)
            xs.append(x_b)
            avg_p = jnp.sum(x_b, axis=1, keepdims=True) * inv_hw    # (C, 1)
            max_p = jnp.max(x_b, axis=1, keepdims=True)             # (C, 1)
            pooled_cols.append(avg_p)
            pooled_cols.append(max_p)
        pooled = jnp.concatenate(pooled_cols, axis=1)               # (C, 2*B)

        # Shared MLP batched over the whole tile: one pair of MXU passes per step.
        h = jnp.dot(w1_ref[...], pooled,
                    preferred_element_type=jnp.float32) + b1_ref[...]
        h = jnp.maximum(h, 0.0)                                     # (Cr, 2*B)
        att = jnp.dot(w2_ref[...], h,
                      preferred_element_type=jnp.float32)           # (C, 2*B)

        for b in range(b_tile):
            # mlp(avg) + mlp(max): second-layer bias is added once per branch.
            att_b = att[:, 2 * b:2 * b + 2]                         # (C, 2)
            att_sum = jnp.sum(att_b, axis=1, keepdims=True) + 2.0 * b2_ref[...]
            gate = _sigmoid(att_sum)                                # (C, 1)
            xcg_b = xs[b] * gate                                    # (C, HW)
            xcg_ref[b] = xcg_b

            # ChannelPool for the spatial gate: [max over C, mean over C].
            cmax = jnp.max(xcg_b, axis=0, keepdims=True)            # (1, HW)
            cmean = jnp.sum(xcg_b, axis=0, keepdims=True) * inv_c   # (1, HW)

            # 7x7 conv (2 -> 1 ch, pad 3, no bias), lane-dense:
            # out[p] = sum_taps wmask[tap][p] * comp[(p + dh*W + dw) mod HW]
            # where wmask already contains weight * in-bounds validity.
            acc = jnp.zeros((1, hw), jnp.float32)
            idx = 0
            for cm in (cmax, cmean):
                for kh in range(CONV_K):
                    dh = kh - CONV_PAD
                    for kw in range(CONV_K):
                        dw = kw - CONV_PAD
                        shift = (-(dh * wid + dw)) % hw
                        src = cm if shift == 0 else pltpu.roll(cm, shift=shift, axis=1)
                        acc = acc + src * wmask_ref[idx:idx + 1, :]
                        idx += 1
            conv_ref[b] = acc

    return kernel


# ---------------- stage 2: BN affine + sigmoid + spatial scale (streaming) ---------
def _make_bn_apply_kernel(b_tile):
    def kernel(xcg_ref, conv_ref, bn_ref, out_ref):
        """xcg_ref (B, C, HW); conv_ref (B, 1, HW); bn_ref SMEM (2,) = [scale, bias]."""
        scale = bn_ref[0]
        bias = bn_ref[1]
        for b in range(b_tile):
            y = conv_ref[b] * scale + bias                          # (1, HW)
            gate = _sigmoid(y)
            out_ref[b] = (xcg_ref[b] * gate).astype(out_ref.dtype)  # broadcast over C
    return kernel


def _pick_b_tile(n, c, hw, max_tile=4, max_bytes=1 << 20):
    """Largest divisor of n (capped) keeping one block <= ~1 MiB."""
    best = 1
    for t in range(1, min(n, max_tile) + 1):
        if n % t == 0 and t * c * hw * 4 <= max_bytes:
            best = t
    return best


# ----------------------------------- wrapper ---------------------------------------
@jax.jit
def cbam_forward(x, w1, b1, w2, b2, conv_w, bn_gamma, bn_beta):
    """CBAM forward.  x: (N, C, H, W) float32.

    w1: (C//r, C), b1: (C//r,)  -- ChannelGate MLP layer 1 (PyTorch Linear layout)
    w2: (C, C//r), b2: (C,)     -- ChannelGate MLP layer 2
    conv_w: (1, 2, 7, 7)        -- SpatialGate BasicConv conv weight (bias=False)
    bn_gamma, bn_beta: scalars  -- SpatialGate BatchNorm2d(1) affine params
    """
    n, c, hgt, wid = x.shape
    hw = hgt * wid
    cr = w1.shape[0]
    xf = x.astype(jnp.float32).reshape(n, c, hw)
    b_tile = _pick_b_tile(n, c, hw)
    grid = (n // b_tile,)
    parallel = pltpu.CompilerParams(dimension_semantics=("parallel",))

    # Per-tap validity masks (conv "padding=3" semantics) with the conv weight folded
    # in, so the in-kernel conv is just rolls + FMAs.  Constant wrt data; built once
    # per trace with numpy, multiplied by the (traced) conv weight.
    p = np.arange(hw)
    hh = p // wid
    ww = p % wid
    valid = np.zeros((N_TAPS, hw), np.float32)
    idx = 0
    for _ci in range(2):
        for kh in range(CONV_K):
            dh = kh - CONV_PAD
            vh = (hh + dh >= 0) & (hh + dh < hgt)
            for kw in range(CONV_K):
                dw = kw - CONV_PAD
                vw = (ww + dw >= 0) & (ww + dw < wid)
                valid[idx] = (vh & vw).astype(np.float32)
                idx += 1
    wmask = jnp.asarray(valid) * conv_w.astype(jnp.float32).reshape(N_TAPS, 1)

    # ---- fused stage 1: channel gate + ChannelPool + 7x7 spatial conv -------------
    xcg3, conv3 = pl.pallas_call(
        _make_channel_spatial_kernel(b_tile, hgt, wid),
        grid=grid,
        in_specs=[
            pl.BlockSpec((b_tile, c, hw), lambda i: (i, 0, 0)),
            pl.BlockSpec((cr, c), lambda i: (0, 0)),
            pl.BlockSpec((cr, 1), lambda i: (0, 0)),
            pl.BlockSpec((c, cr), lambda i: (0, 0)),
            pl.BlockSpec((c, 1), lambda i: (0, 0)),
            pl.BlockSpec((N_TAPS, hw), lambda i: (0, 0)),
        ],
        out_specs=[
            pl.BlockSpec((b_tile, c, hw), lambda i: (i, 0, 0)),
            pl.BlockSpec((b_tile, 1, hw), lambda i: (i, 0, 0)),
        ],
        out_shape=[
            jax.ShapeDtypeStruct((n, c, hw), jnp.float32),
            jax.ShapeDtypeStruct((n, 1, hw), jnp.float32),
        ],
        compiler_params=parallel,
    )(
        xf,
        w1.astype(jnp.float32),
        b1.astype(jnp.float32).reshape(cr, 1),
        w2.astype(jnp.float32),
        b2.astype(jnp.float32).reshape(c, 1),
        wmask,
    )

    # ---- BatchNorm2d(1) training-mode batch statistics, hoisted out of the grid ----
    mean = jnp.mean(conv3)
    var = jnp.mean(jnp.square(conv3 - mean))          # biased (training) variance
    inv_std = jax.lax.rsqrt(var + BN_EPS)
    g = jnp.asarray(bn_gamma, jnp.float32).reshape(())
    bta = jnp.asarray(bn_beta, jnp.float32).reshape(())
    scale_s = g * inv_std
    bias_s = bta - mean * scale_s
    bn_ab = jnp.stack([scale_s, bias_s])              # (2,) SMEM scalars for stage 2

    # ---- stage 2: BN affine + sigmoid + spatial scale (pure streaming pass) --------
    out3 = pl.pallas_call(
        _make_bn_apply_kernel(b_tile),
        grid=grid,
        in_specs=[
            pl.BlockSpec((b_tile, c, hw), lambda i: (i, 0, 0)),
            pl.BlockSpec((b_tile, 1, hw), lambda i: (i, 0, 0)),
            pl.BlockSpec(memory_space=pltpu.MemorySpace.SMEM),
        ],
        out_specs=pl.BlockSpec((b_tile, c, hw), lambda i: (i, 0, 0)),
        out_shape=jax.ShapeDtypeStruct((n, c, hw), x.dtype),
        compiler_params=parallel,
    )(xcg3, conv3, bn_ab)

    return out3.reshape(n, c, hgt, wid)


# ---------------------------------- reference --------------------------------------
def cbam_ref(x, w1, b1, w2, b2, conv_w, bn_gamma, bn_beta):
    """Pure-JAX reference mirroring the PyTorch CBAM forward (training-mode BN)."""
    n, c, hgt, wid = x.shape
    x = x.astype(jnp.float32)
    flat = x.reshape(n, c, hgt * wid)
    avg_p = jnp.mean(flat, axis=2)
    max_p = jnp.max(flat, axis=2)

    def mlp(v):
        h = jnp.maximum(v @ w1.T + b1, 0.0)
        return h @ w2.T + b2

    att = mlp(avg_p) + mlp(max_p)                               # (N, C)
    xcg = x * _sigmoid(att)[:, :, None, None]

    comp = jnp.stack([jnp.max(xcg, axis=1), jnp.mean(xcg, axis=1)], axis=1)  # (N,2,H,W)
    conv = jax.lax.conv_general_dilated(
        comp, conv_w.astype(jnp.float32), window_strides=(1, 1),
        padding=((CONV_PAD, CONV_PAD), (CONV_PAD, CONV_PAD)),
        dimension_numbers=("NCHW", "OIHW", "NCHW"))             # (N, 1, H, W)
    mean = jnp.mean(conv)
    var = jnp.mean((conv - mean) ** 2)                          # biased, training-mode BN
    conv_n = (conv - mean) / jnp.sqrt(var + BN_EPS) * bn_gamma + bn_beta
    return xcg * _sigmoid(conv_n)


if __name__ == "__main__":
    N, C, H, W = 2, 16, 16, 16
    RED = 4                        # reduction_ratio -> hidden width C // RED = 4
    CR = C // RED

    key = jax.random.PRNGKey(0)
    kx, k1, kb1, k2, kb2, kc, kg, kb = jax.random.split(key, 8)

    x = jax.random.normal(kx, (N, C, H, W), dtype=jnp.float32)

    # ChannelGate MLP params (PyTorch nn.Linear layouts: weight is (out, in)).
    lim1 = 1.0 / jnp.sqrt(jnp.float32(C))
    w1 = jax.random.uniform(k1, (CR, C), jnp.float32, -lim1, lim1)
    b1 = jax.random.uniform(kb1, (CR,), jnp.float32, -lim1, lim1)
    lim2 = 1.0 / jnp.sqrt(jnp.float32(CR))
    w2 = jax.random.uniform(k2, (C, CR), jnp.float32, -lim2, lim2)
    b2 = jax.random.uniform(kb2, (C,), jnp.float32, -lim2, lim2)

    # SpatialGate BasicConv: Conv2d(2, 1, 7, padding=3, bias=False) + BatchNorm2d(1).
    conv_w = 0.1 * jax.random.normal(kc, (1, 2, CONV_K, CONV_K), dtype=jnp.float32)
    bn_gamma = 1.0 + 0.1 * jax.random.normal(kg, (), dtype=jnp.float32)
    bn_beta = 0.1 * jax.random.normal(kb, (), dtype=jnp.float32)

    out = jax.block_until_ready(
        cbam_forward(x, w1, b1, w2, b2, conv_w, bn_gamma, bn_beta))
    ref = jax.block_until_ready(
        cbam_ref(x, w1, b1, w2, b2, conv_w, bn_gamma, bn_beta))

    assert out.shape == (N, C, H, W)
    assert jnp.allclose(out, ref, atol=1e-4, rtol=1e-4), (
        "mismatch vs reference: max abs err = %e"
        % float(jnp.max(jnp.abs(out - ref))))
    print("KERNEL_OK")
</pallas_src>

<mosaic_0001>
module attributes {stable_mosaic.version = 11 : i64} {
  func.func @kernel(%arg0: i32, %arg1: memref<2x16x256xf32, #tpu.memory_space<vmem>>, %arg2: memref<2x1x256xf32, #tpu.memory_space<vmem>>, %arg3: memref<2xf32, #tpu.memory_space<smem>>, %arg4: memref<2x16x256xf32, #tpu.memory_space<vmem>>) attributes {dimension_semantics = [#tpu.dimension_semantics<parallel>], iteration_bounds = array<i64: 1>, scalar_prefetch = 0 : i64, scratch_operands = 0 : i64, tpu.core_type = #tpu.core_type<tc>, window_params = [{transform_indices = @transform_0, window_bounds = array<i64: 2, 16, 256>}, {transform_indices = @transform_1, window_bounds = array<i64: 2, 1, 256>}, {transform_indices = @transform_2, window_bounds = array<i64: 2>}, {transform_indices = @transform_3, window_bounds = array<i64: 2, 16, 256>}]} {
    %c0 = arith.constant 0 : index
    %0 = memref.load %arg3[%c0] : memref<2xf32, #tpu.memory_space<smem>>
    %c1 = arith.constant 1 : index
    %1 = memref.load %arg3[%c1] : memref<2xf32, #tpu.memory_space<smem>>
    %c0_0 = arith.constant 0 : index
    %c0_1 = arith.constant 0 : index
    %c0_2 = arith.constant 0 : index
    %2 = vector.load %arg2[%c0_0, %c0_1, %c0_2] : memref<2x1x256xf32, #tpu.memory_space<vmem>>, vector<1x1x256xf32>
    %3 = vector.shape_cast %2 : vector<1x1x256xf32> to vector<1x256xf32>
    %4 = vector.broadcast %0 : f32 to vector<1x256xf32>
    %5 = arith.mulf %3, %4 : vector<1x256xf32>
    %6 = vector.broadcast %1 : f32 to vector<1x256xf32>
    %7 = arith.addf %5, %6 : vector<1x256xf32>
    %cst = arith.constant 0.000000e+00 : f32
    %8 = vector.broadcast %cst : f32 to vector<1x256xf32>
    %9 = arith.subf %8, %7 : vector<1x256xf32>
    %10 = math.exp %9 : vector<1x256xf32>
    %cst_3 = arith.constant 1.000000e+00 : f32
    %11 = vector.broadcast %cst_3 : f32 to vector<1x256xf32>
    %12 = arith.addf %11, %10 : vector<1x256xf32>
    %cst_4 = arith.constant 1.000000e+00 : f32
    %13 = vector.broadcast %cst_4 : f32 to vector<1x256xf32>
    %14 = arith.divf %13, %12 : vector<1x256xf32>
    %c0_5 = arith.constant 0 : index
    %c0_6 = arith.constant 0 : index
    %c0_7 = arith.constant 0 : index
    %15 = vector.load %arg1[%c0_5, %c0_6, %c0_7] : memref<2x16x256xf32, #tpu.memory_space<vmem>>, vector<1x16x256xf32>
    %16 = vector.shape_cast %15 : vector<1x16x256xf32> to vector<16x256xf32>
    %17 = vector.broadcast %14 : vector<1x256xf32> to vector<16x256xf32>
    %18 = arith.mulf %16, %17 : vector<16x256xf32>
    %c0_8 = arith.constant 0 : index
    %c0_9 = arith.constant 0 : index
    %c0_10 = arith.constant 0 : index
    %19 = vector.load %arg4[%c0_8, %c0_9, %c0_10] : memref<2x16x256xf32, #tpu.memory_space<vmem>>, vector<1x16x256xf32>
    %20 = vector.shape_cast %19 : vector<1x16x256xf32> to vector<16x256xf32>
    %21 = vector.shape_cast %18 : vector<16x256xf32> to vector<1x16x256xf32>
    tpu.vector_store %arg4[%c0_8, %c0_9, %c0_10], %21 {strides = array<i32>} : memref<2x16x256xf32, #tpu.memory_space<vmem>>, vector<1x16x256xf32>,
    %c1_11 = arith.constant 1 : index
    %c0_12 = arith.constant 0 : index
    %c0_13 = arith.constant 0 : index
    %22 = vector.load %arg2[%c1_11, %c0_12, %c0_13] : memref<2x1x256xf32, #tpu.memory_space<vmem>>, vector<1x1x256xf32>
    %23 = vector.shape_cast %22 : vector<1x1x256xf32> to vector<1x256xf32>
    %24 = vector.broadcast %0 : f32 to vector<1x256xf32>
    %25 = arith.mulf %23, %24 : vector<1x256xf32>
    %26 = vector.broadcast %1 : f32 to vector<1x256xf32>
    %27 = arith.addf %25, %26 : vector<1x256xf32>
    %cst_14 = arith.constant 0.000000e+00 : f32
    %28 = vector.broadcast %cst_14 : f32 to vector<1x256xf32>
    %29 = arith.subf %28, %27 : vector<1x256xf32>
    %30 = math.exp %29 : vector<1x256xf32>
    %cst_15 = arith.constant 1.000000e+00 : f32
    %31 = vector.broadcast %cst_15 : f32 to vector<1x256xf32>
    %32 = arith.addf %31, %30 : vector<1x256xf32>
    %cst_16 = arith.constant 1.000000e+00 : f32
    %33 = vector.broadcast %cst_16 : f32 to vector<1x256xf32>
    %34 = arith.divf %33, %32 : vector<1x256xf32>
    %c1_17 = arith.constant 1 : index
    %c0_18 = arith.constant 0 : index
    %c0_19 = arith.constant 0 : index
    %35 = vector.load %arg1[%c1_17, %c0_18, %c0_19] : memref<2x16x256xf32, #tpu.memory_space<vmem>>, vector<1x16x256xf32>
    %36 = vector.shape_cast %35 : vector<1x16x256xf32> to vector<16x256xf32>
    %37 = vector.broadcast %34 : vector<1x256xf32> to vector<16x256xf32>
    %38 = arith.mulf %36, %37 : vector<16x256xf32>
    %c1_20 = arith.constant 1 : index
    %c0_21 = arith.constant 0 : index
    %c0_22 = arith.constant 0 : index
    %39 = vector.load %arg4[%c1_20, %c0_21, %c0_22] : memref<2x16x256xf32, #tpu.memory_space<vmem>>, vector<1x16x256xf32>
    %40 = vector.shape_cast %39 : vector<1x16x256xf32> to vector<16x256xf32>
    %41 = vector.shape_cast %38 : vector<16x256xf32> to vector<1x16x256xf32>
    tpu.vector_store %arg4[%c1_20, %c0_21, %c0_22], %41 {strides = array<i32>} : memref<2x16x256xf32, #tpu.memory_space<vmem>>, vector<1x16x256xf32>,
    return
  }
  func.func @transform_0(%arg0: i32) -> (i32, i32, i32) {
    %c0_i32 = arith.constant 0 : i32
    %c0_i32_0 = arith.constant 0 : i32
    %c0_i32_1 = arith.constant 0 : i32
    return %arg0, %c0_i32, %c0_i32_0 : i32, i32, i32
  }
  func.func @transform_1(%arg0: i32) -> (i32, i32, i32) {
    %c0_i32 = arith.constant 0 : i32
    %c0_i32_0 = arith.constant 0 : i32
    %c0_i32_1 = arith.constant 0 : i32
    return %arg0, %c0_i32, %c0_i32_0 : i32, i32, i32
  }
  func.func @transform_2(%arg0: i32) -> i32 {
    %c0_i32 = arith.constant 0 : i32
    %c0_i32_0 = arith.constant 0 : i32
    return %c0_i32 : i32
  }
  func.func @transform_3(%arg0: i32) -> (i32, i32, i32) {
    %c0_i32 = arith.constant 0 : i32
    %c0_i32_0 = arith.constant 0 : i32
    %c0_i32_1 = arith.constant 0 : i32
    return %arg0, %c0_i32, %c0_i32_0 : i32, i32, i32
  }
}

module attributes {stable_mosaic.version = 11 : i64} {
  func.func @kernel(%arg0: i32, %arg1: memref<2x16x256xf32, #tpu.memory_space<vmem>>, %arg2: memref<4x16xf32, #tpu.memory_space<vmem>>, %arg3: memref<4x1xf32, #tpu.memory_space<vmem>>, %arg4: memref<16x4xf32, #tpu.memory_space<vmem>>, %arg5: memref<16x1xf32, #tpu.memory_space<vmem>>, %arg6: memref<98x256xf32, #tpu.memory_space<vmem>>, %arg7: memref<2x16x256xf32, #tpu.memory_space<vmem>>, %arg8: memref<2x1x256xf32, #tpu.memory_space<vmem>>) attributes {dimension_semantics = [#tpu.dimension_semantics<parallel>], iteration_bounds = array<i64: 1>, scalar_prefetch = 0 : i64, scratch_operands = 0 : i64, tpu.core_type = #tpu.core_type<tc>, window_params = [{transform_indices = @transform_0, window_bounds = array<i64: 2, 16, 256>}, {pipeline_mode = #tpu.pipeline_mode<synchronous>, transform_indices = @transform_1, window_bounds = array<i64: 4, 16>}, {pipeline_mode = #tpu.pipeline_mode<synchronous>, transform_indices = @transform_2, window_bounds = array<i64: 4, 1>}, {pipeline_mode = #tpu.pipeline_mode<synchronous>, transform_indices = @transform_3, window_bounds = array<i64: 16, 4>}, {pipeline_mode = #tpu.pipeline_mode<synchronous>, transform_indices = @transform_4, window_bounds = array<i64: 16, 1>}, {pipeline_mode = #tpu.pipeline_mode<synchronous>, transform_indices = @transform_5, window_bounds = array<i64: 98, 256>}, {transform_indices = @transform_6, window_bounds = array<i64: 2, 16, 256>}, {transform_indices = @transform_7, window_bounds = array<i64: 2, 1, 256>}]} {
    %c0 = arith.constant 0 : index
    %c0_0 = arith.constant 0 : index
    %c0_1 = arith.constant 0 : index
    %0 = vector.load %arg1[%c0, %c0_0, %c0_1] : memref<2x16x256xf32, #tpu.memory_space<vmem>>, vector<1x16x256xf32>
    %1 = vector.shape_cast %0 : vector<1x16x256xf32> to vector<16x256xf32>
    %cst = arith.constant dense<0.000000e+00> : vector<16xf32>
    %2 = vector.multi_reduction <add>, %1, %cst [1] : vector<16x256xf32> to vector<16xf32>
    %3 = vector.shape_cast %2 : vector<16xf32> to vector<16x1xf32>
    %cst_2 = arith.constant 3.906250e-03 : f32
    %4 = vector.broadcast %cst_2 : f32 to vector<16x1xf32>
    %5 = arith.mulf %3, %4 : vector<16x1xf32>
    %cst_3 = arith.constant dense<0xFF800000> : vector<16xf32>
    %6 = vector.multi_reduction <maximumf>, %1, %cst_3 [1] : vector<16x256xf32> to vector<16xf32>
    %7 = vector.shape_cast %6 : vector<16xf32> to vector<16x1xf32>
    %c1 = arith.constant 1 : index
    %c0_4 = arith.constant 0 : index
    %c0_5 = arith.constant 0 : index
    %8 = vector.load %arg1[%c1, %c0_4, %c0_5] : memref<2x16x256xf32, #tpu.memory_space<vmem>>, vector<1x16x256xf32>
    %9 = vector.shape_cast %8 : vector<1x16x256xf32> to vector<16x256xf32>
    %cst_6 = arith.constant dense<0.000000e+00> : vector<16xf32>
    %10 = vector.multi_reduction <add>, %9, %cst_6 [1] : vector<16x256xf32> to vector<16xf32>
    %11 = vector.shape_cast %10 : vector<16xf32> to vector<16x1xf32>
    %cst_7 = arith.constant 3.906250e-03 : f32
    %12 = vector.broadcast %cst_7 : f32 to vector<16x1xf32>
    %13 = arith.mulf %11, %12 : vector<16x1xf32>
    %cst_8 = arith.constant dense<0xFF800000> : vector<16xf32>
    %14 = vector.multi_reduction <maximumf>, %9, %cst_8 [1] : vector<16x256xf32> to vector<16xf32>
    %15 = vector.shape_cast %14 : vector<16xf32> to vector<16x1xf32>
    %16 = tpu.concatenate %5, %7, %13, %15 in 1 : vector<16x1xf32>, vector<16x1xf32>, vector<16x1xf32>, vector<16x1xf32> -> vector<16x4xf32>
    %c0_9 = arith.constant 0 : index
    %c0_10 = arith.constant 0 : index
    %17 = vector.load %arg2[%c0_9, %c0_10] : memref<4x16xf32, #tpu.memory_space<vmem>>, vector<4x16xf32>
    %cst_11 = arith.constant dense<0.000000e+00> : vector<4x4xf32>
    %18 = tpu.matmul %17, %16, %cst_11 {dimension_numbers = #tpu.dot_dimension_numbers<[1], [0], [0], [1], [0, 0, 1, 1], [], []>} : vector<4x16xf32>, vector<16x4xf32>, vector<4x4xf32> -> vector<4x4xf32>
    %c0_12 = arith.constant 0 : index
    %c0_13 = arith.constant 0 : index
    %19 = vector.load %arg3[%c0_12, %c0_13] : memref<4x1xf32, #tpu.memory_space<vmem>>, vector<4x1xf32>
    %20 = vector.broadcast %19 : vector<4x1xf32> to vector<4x4xf32>
    %21 = arith.addf %18, %20 : vector<4x4xf32>
    %cst_14 = arith.constant 0.000000e+00 : f32
    %22 = vector.broadcast %cst_14 : f32 to vector<4x4xf32>
    %23 = arith.maximumf %21, %22 : vector<4x4xf32>
    %c0_15 = arith.constant 0 : index
    %c0_16 = arith.constant 0 : index
    %24 = vector.load %arg4[%c0_15, %c0_16] : memref<16x4xf32, #tpu.memory_space<vmem>>, vector<16x4xf32>
    %cst_17 = arith.constant dense<0.000000e+00> : vector<16x4xf32>
    %25 = tpu.matmul %24, %23, %cst_17 {dimension_numbers = #tpu.dot_dimension_numbers<[1], [0], [0], [1], [0, 0, 1, 1], [], []>} : vector<16x4xf32>, vector<4x4xf32>, vector<16x4xf32> -> vector<16x4xf32>
    %26 = vector.extract_strided_slice %25 {offsets = [0, 0], sizes = [16, 2], strides = [1, 1]} : vector<16x4xf32> to vector<16x2xf32>
    %cst_18 = arith.constant dense<0.000000e+00> : vector<16xf32>
    %27 = vector.multi_reduction <add>, %26, %cst_18 [1] : vector<16x2xf32> to vector<16xf32>
    %28 = vector.shape_cast %27 : vector<16xf32> to vector<16x1xf32>
    %c0_19 = arith.constant 0 : index
    %c0_20 = arith.constant 0 : index
    %29 = vector.load %arg5[%c0_19, %c0_20] : memref<16x1xf32, #tpu.memory_space<vmem>>, vector<16x1xf32>
    %cst_21 = arith.constant 2.000000e+00 : f32
    %30 = vector.broadcast %cst_21 : f32 to vector<16x1xf32>
    %31 = arith.mulf %30, %29 : vector<16x1xf32>
    %32 = arith.addf %28, %31 : vector<16x1xf32>
    %cst_22 = arith.constant 0.000000e+00 : f32
    %33 = vector.broadcast %cst_22 : f32 to vector<16x1xf32>
    %34 = arith.subf %33, %32 : vector<16x1xf32>
    %35 = math.exp %34 : vector<16x1xf32>
    %cst_23 = arith.constant 1.000000e+00 : f32
    %36 = vector.broadcast %cst_23 : f32 to vector<16x1xf32>
    %37 = arith.addf %36, %35 : vector<16x1xf32>
    %cst_24 = arith.constant 1.000000e+00 : f32
    %38 = vector.broadcast %cst_24 : f32 to vector<16x1xf32>
    %39 = arith.divf %38, %37 : vector<16x1xf32>
    %40 = vector.broadcast %39 : vector<16x1xf32> to vector<16x256xf32>
    %41 = arith.mulf %1, %40 : vector<16x256xf32>
    %c0_25 = arith.constant 0 : index
    %c0_26 = arith.constant 0 : index
    %c0_27 = arith.constant 0 : index
    %42 = vector.load %arg7[%c0_25, %c0_26, %c0_27] : memref<2x16x256xf32, #tpu.memory_space<vmem>>, vector<1x16x256xf32>
    %43 = vector.shape_cast %42 : vector<1x16x256xf32> to vector<16x256xf32>
    %44 = vector.shape_cast %41 : vector<16x256xf32> to vector<1x16x256xf32>
    tpu.vector_store %arg7[%c0_25, %c0_26, %c0_27], %44 {strides = array<i32>} : memref<2x16x256xf32, #tpu.memory_space<vmem>>, vector<1x16x256xf32>,
    %cst_28 = arith.constant dense<0xFF800000> : vector<256xf32>
    %45 = vector.multi_reduction <maximumf>, %41, %cst_28 [0] : vector<16x256xf32> to vector<256xf32>
    %46 = vector.shape_cast %45 : vector<256xf32> to vector<1x256xf32>
    %cst_29 = arith.constant dense<0.000000e+00> : vector<256xf32>
    %47 = vector.multi_reduction <add>, %41, %cst_29 [0] : vector<16x256xf32> to vector<256xf32>
    %48 = vector.shape_cast %47 : vector<256xf32> to vector<1x256xf32>
    %cst_30 = arith.constant 6.250000e-02 : f32
    %49 = vector.broadcast %cst_30 : f32 to vector<1x256xf32>
    %50 = arith.mulf %48, %49 : vector<1x256xf32>
    %cst_31 = arith.constant 0.000000e+00 : f32
    %51 = vector.broadcast %cst_31 : f32 to vector<1x256xf32>
    %c51_i32 = arith.constant 51 : i32
    %52 = tpu.dynamic_rotate %46 by %c51_i32 dim 1 : vector<1x256xf32>, i32 -> vector<1x256xf32>
    %c0_32 = arith.constant 0 : index
    %c0_33 = arith.constant 0 : index
    %53 = vector.load %arg6[%c0_32, %c0_33] : memref<98x256xf32, #tpu.memory_space<vmem>>, vector<1x256xf32>
    %54 = arith.mulf %52, %53 : vector<1x256xf32>
    %55 = arith.addf %51, %54 : vector<1x256xf32>
    %c50_i32 = arith.constant 50 : i32
    %56 = tpu.dynamic_rotate %46 by %c50_i32 dim 1 : vector<1x256xf32>, i32 -> vector<1x256xf32>
    %c1_34 = arith.constant 1 : index
    %c0_35 = arith.constant 0 : index
    %57 = vector.load %arg6[%c1_34, %c0_35] : memref<98x256xf32, #tpu.memory_space<vmem>>, vector<1x256xf32>
    %58 = arith.mulf %56, %57 : vector<1x256xf32>
    %59 = arith.addf %55, %58 : vector<1x256xf32>
    %c49_i32 = arith.constant 49 : i32
    %60 = tpu.dynamic_rotate %46 by %c49_i32 dim 1 : vector<1x256xf32>, i32 -> vector<1x256xf32>
    %c2 = arith.constant 2 : index
    %c0_36 = arith.constant 0 : index
    %61 = vector.load %arg6[%c2, %c0_36] : memref<98x256xf32, #tpu.memory_space<vmem>>, vector<1x256xf32>
    %62 = arith.mulf %60, %61 : vector<1x256xf32>
    %63 = arith.addf %59, %62 : vector<1x256xf32>
    %c48_i32 = arith.constant 48 : i32
    %64 = tpu.dynamic_rotate %46 by %c48_i32 dim 1 : vector<1x256xf32>, i32 -> vector<1x256xf32>
    %c3 = arith.constant 3 : index
    %c0_37 = arith.constant 0 : index
    %65 = vector.load %arg6[%c3, %c0_37] : memref<98x256xf32, #tpu.memory_space<vmem>>, vector<1x256xf32>
    %66 = arith.mulf %64, %65 : vector<1x256xf32>
    %67 = arith.addf %63, %66 : vector<1x256xf32>
    %c47_i32 = arith.constant 47 : i32
    %68 = tpu.dynamic_rotate %46 by %c47_i32 dim 1 : vector<1x256xf32>, i32 -> vector<1x256xf32>
    %c4 = arith.constant 4 : index
    %c0_38 = arith.constant 0 : index
    %69 = vector.load %arg6[%c4, %c0_38] : memref<98x256xf32, #tpu.memory_space<vmem>>, vector<1x256xf32>
    %70 = arith.mulf %68, %69 : vector<1x256xf32>
    %71 = arith.addf %67, %70 : vector<1x256xf32>
    %c46_i32 = arith.constant 46 : i32
    %72 = tpu.dynamic_rotate %46 by %c46_i32 dim 1 : vector<1x256xf32>, i32 -> vector<1x256xf32>
    %c5 = arith.constant 5 : index
    %c0_39 = arith.constant 0 : index
    %73 = vector.load %arg6[%c5, %c0_39] : memref<98x256xf32, #tpu.memory_space<vmem>>, vector<1x256xf32>
    %74 = arith.mulf %72, %73 : vector<1x256xf32>
    %75 = arith.addf %71, %74 : vector<1x256xf32>
    %c45_i32 = arith.constant 45 : i32
    %76 = tpu.dynamic_rotate %46 by %c45_i32 dim 1 : vector<1x256xf32>, i32 -> vector<1x256xf32>
    %c6 = arith.constant 6 : index
    %c0_40 = arith.constant 0 : index
    %77 = vector.load %arg6[%c6, %c0_40] : memref<98x256xf32, #tpu.memory_space<vmem>>, vector<1x256xf32>
    %78 = arith.mulf %76, %77 : vector<1x256xf32>
    %79 = arith.addf %75, %78 : vector<1x256xf32>
    %c35_i32 = arith.constant 35 : i32
    %80 = tpu.dynamic_rotate %46 by %c35_i32 dim 1 : vector<1x256xf32>, i32 -> vector<1x256xf32>
    %c7 = arith.constant 7 : index
    %c0_41 = arith.constant 0 : index
    %81 = vector.load %arg6[%c7, %c0_41] : memref<98x256xf32, #tpu.memory_space<vmem>>, vector<1x256xf32>
    %82 = arith.mulf %80, %81 : vector<1x256xf32>
    %83 = arith.addf %79, %82 : vector<1x256xf32>
    %c34_i32 = arith.constant 34 : i32
    %84 = tpu.dynamic_rotate %46 by %c34_i32 dim 1 : vector<1x256xf32>, i32 -> vector<1x256xf32>
    %c8 = arith.constant 8 : index
    %c0_42 = arith.constant 0 : index
    %85 = vector.load %arg6[%c8, %c0_42] : memref<98x256xf32, #tpu.memory_space<vmem>>, vector<1x256xf32>
    %86 = arith.mulf %84, %85 : vector<1x256xf32>
    %87 = arith.addf %83, %86 : vector<1x256xf32>
    %c33_i32 = arith.constant 33 : i32
    %88 = tpu.dynamic_rotate %46 by %c33_i32 dim 1 : vector<1x256xf32>, i32 -> vector<1x256xf32>
    %c9 = arith.constant 9 : index
    %c0_43 = arith.constant 0 : index
    %89 = vector.load %arg6[%c9, %c0_43] : memref<98x256xf32, #tpu.memory_space<vmem>>, vector<1x256xf32>
    %90 = arith.mulf %88, %89 : vector<1x256xf32>
    %91 = arith.addf %87, %90 : vector<1x256xf32>
    %c32_i32 = arith.constant 32 : i32
    %92 = tpu.dynamic_rotate %46 by %c32_i32 dim 1 : vector<1x256xf32>, i32 -> vector<1x256xf32>
    %c10 = arith.constant 10 : index
    %c0_44 = arith.constant 0 : index
    %93 = vector.load %arg6[%c10, %c0_44] : memref<98x256xf32, #tpu.memory_space<vmem>>, vector<1x256xf32>
    %94 = arith.mulf %92, %93 : vector<1x256xf32>
    %95 = arith.addf %91, %94 : vector<1x256xf32>
    %c31_i32 = arith.constant 31 : i32
    %96 = tpu.dynamic_rotate %46 by %c31_i32 dim 1 : vector<1x256xf32>, i32 -> vector<1x256xf32>
    %c11 = arith.constant 11 : index
    %c0_45 = arith.constant 0 : index
    %97 = vector.load %arg6[%c11, %c0_45] : memref<98x256xf32, #tpu.memory_space<vmem>>, vector<1x256xf32>
    %98 = arith.mulf %96, %97 : vector<1x256xf32>
    %99 = arith.addf %95, %98 : vector<1x256xf32>
    %c30_i32 = arith.constant 30 : i32
    %100 = tpu.dynamic_rotate %46 by %c30_i32 dim 1 : vector<1x256xf32>, i32 -> vector<1x256xf32>
    %c12 = arith.constant 12 : index
    %c0_46 = arith.constant 0 : index
    %101 = vector.load %arg6[%c12, %c0_46] : memref<98x256xf32, #tpu.memory_space<vmem>>, vector<1x256xf32>
    %102 = arith.mulf %100, %101 : vector<1x256xf32>
    %103 = arith.addf %99, %102 : vector<1x256xf32>
    %c29_i32 = arith.constant 29 : i32
    %104 = tpu.dynamic_rotate %46 by %c29_i32 dim 1 : vector<1x256xf32>, i32 -> vector<1x256xf32>
    %c13 = arith.constant 13 : index
    %c0_47 = arith.constant 0 : index
    %105 = vector.load %arg6[%c13, %c0_47] : memref<98x256xf32, #tpu.memory_space<vmem>>, vector<1x256xf32>
    %106 = arith.mulf %104, %105 : vector<1x256xf32>
    %107 = arith.addf %103, %106 : vector<1x256xf32>
    %c19_i32 = arith.constant 19 : i32
    %108 = tpu.dynamic_rotate %46 by %c19_i32 dim 1 : vector<1x256xf32>, i32 -> vector<1x256xf32>
    %c14 = arith.constant 14 : index
    %c0_48 = arith.constant 0 : index
    %109 = vector.load %arg6[%c14, %c0_48] : memref<98x256xf32, #tpu.memory_space<vmem>>, vector<1x256xf32>
    %110 = arith.mulf %108, %109 : vector<1x256xf32>
    %111 = arith.addf %107, %110 : vector<1x256xf32>
    %c18_i32 = arith.constant 18 : i32
    %112 = tpu.dynamic_rotate %46 by %c18_i32 dim 1 : vector<1x256xf32>, i32 -> vector<1x256xf32>
    %c15 = arith.constant 15 : index
    %c0_49 = arith.constant 0 : index
    %113 = vector.load %arg6[%c15, %c0_49] : memref<98x256xf32, #tpu.memory_space<vmem>>, vector<1x256xf32>
    %114 = arith.mulf %112, %113 : vector<1x256xf32>
    %115 = arith.addf %111, %114 : vector<1x256xf32>
    %c17_i32 = arith.constant 17 : i32
    %116 = tpu.dynamic_rotate %46 by %c17_i32 dim 1 : vector<1x256xf32>, i32 -> vector<1x256xf32>
    %c16 = arith.constant 16 : index
    %c0_50 = arith.constant 0 : index
    %117 = vector.load %arg6[%c16, %c0_50] : memref<98x256xf32, #tpu.memory_space<vmem>>, vector<1x256xf32>
    %118 = arith.mulf %116, %117 : vector<1x256xf32>
    %119 = arith.addf %115, %118 : vector<1x256xf32>
    %c16_i32 = arith.constant 16 : i32
    %120 = tpu.dynamic_rotate %46 by %c16_i32 dim 1 : vector<1x256xf32>, i32 -> vector<1x256xf32>
    %c17 = arith.constant 17 : index
    %c0_51 = arith.constant 0 : index
    %121 = vector.load %arg6[%c17, %c0_51] : memref<98x256xf32, #tpu.memory_space<vmem>>, vector<1x256xf32>
    %122 = arith.mulf %120, %121 : vector<1x256xf32>
    %123 = arith.addf %119, %122 : vector<1x256xf32>
    %c15_i32 = arith.constant 15 : i32
    %124 = tpu.dynamic_rotate %46 by %c15_i32 dim 1 : vector<1x256xf32>, i32 -> vector<1x256xf32>
    %c18 = arith.constant 18 : index
    %c0_52 = arith.constant 0 : index
    %125 = vector.load %arg6[%c18, %c0_52] : memref<98x256xf32, #tpu.memory_space<vmem>>, vector<1x256xf32>
    %126 = arith.mulf %124, %125 : vector<1x256xf32>
    %127 = arith.addf %123, %126 : vector<1x256xf32>
    %c14_i32 = arith.constant 14 : i32
    %128 = tpu.dynamic_rotate %46 by %c14_i32 dim 1 : vector<1x256xf32>, i32 -> vector<1x256xf32>
    %c19 = arith.constant 19 : index
    %c0_53 = arith.constant 0 : index
    %129 = vector.load %arg6[%c19, %c0_53] : memref<98x256xf32, #tpu.memory_space<vmem>>, vector<1x256xf32>
    %130 = arith.mulf %128, %129 : vector<1x256xf32>
    %131 = arith.addf %127, %130 : vector<1x256xf32>
    %c13_i32 = arith.constant 13 : i32
    %132 = tpu.dynamic_rotate %46 by %c13_i32 dim 1 : vector<1x256xf32>, i32 -> vector<1x256xf32>
    %c20 = arith.constant 20 : index
    %c0_54 = arith.constant 0 : index
    %133 = vector.load %arg6[%c20, %c0_54] : memref<98x256xf32, #tpu.memory_space<vmem>>, vector<1x256xf32>
    %134 = arith.mulf %132, %133 : vector<1x256xf32>
    %135 = arith.addf %131, %134 : vector<1x256xf32>
    %c3_i32 = arith.constant 3 : i32
    %136 = tpu.dynamic_rotate %46 by %c3_i32 dim 1 : vector<1x256xf32>, i32 -> vector<1x256xf32>
    %c21 = arith.constant 21 : index
    %c0_55 = arith.constant 0 : index
    %137 = vector.load %arg6[%c21, %c0_55] : memref<98x256xf32, #tpu.memory_space<vmem>>, vector<1x256xf32>
    %138 = arith.mulf %136, %137 : vector<1x256xf32>
    %139 = arith.addf %135, %138 : vector<1x256xf32>
    %c2_i32 = arith.constant 2 : i32
    %140 = tpu.dynamic_rotate %46 by %c2_i32 dim 1 : vector<1x256xf32>, i32 -> vector<1x256xf32>
    %c22 = arith.constant 22 : index
    %c0_56 = arith.constant 0 : index
    %141 = vector.load %arg6[%c22, %c0_56] : memref<98x256xf32, #tpu.memory_space<vmem>>, vector<1x256xf32>
    %142 = arith.mulf %140, %141 : vector<1x256xf32>
    %143 = arith.addf %139, %142 : vector<1x256xf32>
    %c1_i32 = arith.constant 1 : i32
    %144 = tpu.dynamic_rotate %46 by %c1_i32 dim 1 : vector<1x256xf32>, i32 -> vector<1x256xf32>
    %c23 = arith.constant 23 : index
    %c0_57 = arith.constant 0 : index
    %145 = vector.load %arg6[%c23, %c0_57] : memref<98x256xf32, #tpu.memory_space<vmem>>, vector<1x256xf32>
    %146 = arith.mulf %144, %145 : vector<1x256xf32>
    %147 = arith.addf %143, %146 : vector<1x256xf32>
    %c24 = arith.constant 24 : index
    %c0_58 = arith.constant 0 : index
    %148 = vector.load %arg6[%c24, %c0_58] : memref<98x256xf32, #tpu.memory_space<vmem>>, vector<1x256xf32>
    %149 = arith.mulf %46, %148 : vector<1x256xf32>
    %150 = arith.addf %147, %149 : vector<1x256xf32>
    %c255_i32 = arith.constant 255 : i32
    %151 = tpu.dynamic_rotate %46 by %c255_i32 dim 1 : vector<1x256xf32>, i32 -> vector<1x256xf32>
    %c25 = arith.constant 25 : index
    %c0_59 = arith.constant 0 : index
    %152 = vector.load %arg6[%c25, %c0_59] : memref<98x256xf32, #tpu.memory_space<vmem>>, vector<1x256xf32>
    %153 = arith.mulf %151, %152 : vector<1x256xf32>
    %154 = arith.addf %150, %153 : vector<1x256xf32>
    %c254_i32 = arith.constant 254 : i32
    %155 = tpu.dynamic_rotate %46 by %c254_i32 dim 1 : vector<1x256xf32>, i32 -> vector<1x256xf32>
    %c26 = arith.constant 26 : index
    %c0_60 = arith.constant 0 : index
    %156 = vector.load %arg6[%c26, %c0_60] : memref<98x256xf32, #tpu.memory_space<vmem>>, vector<1x256xf32>
    %157 = arith.mulf %155, %156 : vector<1x256xf32>
    %158 = arith.addf %154, %157 : vector<1x256xf32>
    %c253_i32 = arith.constant 253 : i32
    %159 = tpu.dynamic_rotate %46 by %c253_i32 dim 1 : vector<1x256xf32>, i32 -> vector<1x256xf32>
    %c27 = arith.constant 27 : index
    %c0_61 = arith.constant 0 : index
    %160 = vector.load %arg6[%c27, %c0_61] : memref<98x256xf32, #tpu.memory_space<vmem>>, vector<1x256xf32>
    %161 = arith.mulf %159, %160 : vector<1x256xf32>
    %162 = arith.addf %158, %161 : vector<1x256xf32>
    %c243_i32 = arith.constant 243 : i32
    %163 = tpu.dynamic_rotate %46 by %c243_i32 dim 1 : vector<1x256xf32>, i32 -> vector<1x256xf32>
    %c28 = arith.constant 28 : index
    %c0_62 = arith.constant 0 : index
    %164 = vector.load %arg6[%c28, %c0_62] : memref<98x256xf32, #tpu.memory_space<vmem>>, vector<1x256xf32>
    %165 = arith.mulf %163, %164 : vector<1x256xf32>
    %166 = arith.addf %162, %165 : vector<1x256xf32>
    %c242_i32 = arith.constant 242 : i32
    %167 = tpu.dynamic_rotate %46 by %c242_i32 dim 1 : vector<1x256xf32>, i32 -> vector<1x256xf32>
    %c29 = arith.constant 29 : index
    %c0_63 = arith.constant 0 : index
    %168 = vector.load %arg6[%c29, %c0_63] : memref<98x256xf32, #tpu.memory_space<vmem>>, vector<1x256xf32>
    %169 = arith.mulf %167, %168 : vector<1x256xf32>
    %170 = arith.addf %166, %169 : vector<1x256xf32>
    %c241_i32 = arith.constant 241 : i32
    %171 = tpu.dynamic_rotate %46 by %c241_i32 dim 1 : vector<1x256xf32>, i32 -> vector<1x256xf32>
    %c30 = arith.constant 30 : index
    %c0_64 = arith.constant 0 : index
    %172 = vector.load %arg6[%c30, %c0_64] : memref<98x256xf32, #tpu.memory_space<vmem>>, vector<1x256xf32>
    %173 = arith.mulf %171, %172 : vector<1x256xf32>
    %174 = arith.addf %170, %173 : vector<1x256xf32>
    %c240_i32 = arith.constant 240 : i32
    %175 = tpu.dynamic_rotate %46 by %c240_i32 dim 1 : vector<1x256xf32>, i32 -> vector<1x256xf32>
    %c31 = arith.constant 31 : index
    %c0_65 = arith.constant 0 : index
    %176 = vector.load %arg6[%c31, %c0_65] : memref<98x256xf32, #tpu.memory_space<vmem>>, vector<1x256xf32>
    %177 = arith.mulf %175, %176 : vector<1x256xf32>
    %178 = arith.addf %174, %177 : vector<1x256xf32>
    %c239_i32 = arith.constant 239 : i32
    %179 = tpu.dynamic_rotate %46 by %c239_i32 dim 1 : vector<1x256xf32>, i32 -> vector<1x256xf32>
    %c32 = arith.constant 32 : index
    %c0_66 = arith.constant 0 : index
    %180 = vector.load %arg6[%c32, %c0_66] : memref<98x256xf32, #tpu.memory_space<vmem>>, vector<1x256xf32>
    %181 = arith.mulf %179, %180 : vector<1x256xf32>
    %182 = arith.addf %178, %181 : vector<1x256xf32>
    %c238_i32 = arith.constant 238 : i32
    %183 = tpu.dynamic_rotate %46 by %c238_i32 dim 1 : vector<1x256xf32>, i32 -> vector<1x256xf32>
    %c33 = arith.constant 33 : index
    %c0_67 = arith.constant 0 : index
    %184 = vector.load %arg6[%c33, %c0_67] : memref<98x256xf32, #tpu.memory_space<vmem>>, vector<1x256xf32>
    %185 = arith.mulf %183, %184 : vector<1x256xf32>
    %186 = arith.addf %182, %185 : vector<1x256xf32>
    %c237_i32 = arith.constant 237 : i32
    %187 = tpu.dynamic_rotate %46 by %c237_i32 dim 1 : vector<1x256xf32>, i32 -> vector<1x256xf32>
    %c34 = arith.constant 34 : index
    %c0_68 = arith.constant 0 : index
    %188 = vector.load %arg6[%c34, %c0_68] : memref<98x256xf32, #tpu.memory_space<vmem>>, vector<1x256xf32>
    %189 = arith.mulf %187, %188 : vector<1x256xf32>
    %190 = arith.addf %186, %189 : vector<1x256xf32>
    %c227_i32 = arith.constant 227 : i32
    %191 = tpu.dynamic_rotate %46 by %c227_i32 dim 1 : vector<1x256xf32>, i32 -> vector<1x256xf32>
    %c35 = arith.constant 35 : index
    %c0_69 = arith.constant 0 : index
    %192 = vector.load %arg6[%c35, %c0_69] : memref<98x256xf32, #tpu.memory_space<vmem>>, vector<1x256xf32>
    %193 = arith.mulf %191, %192 : vector<1x256xf32>
    %194 = arith.addf %190, %193 : vector<1x256xf32>
    %c226_i32 = arith.constant 226 : i32
    %195 = tpu.dynamic_rotate %46 by %c226_i32 dim 1 : vector<1x256xf32>, i32 -> vector<1x256xf32>
    %c36 = arith.constant 36 : index
    %c0_70 = arith.constant 0 : index
    %196 = vector.load %arg6[%c36, %c0_70] : memref<98x256xf32, #tpu.memory_space<vmem>>, vector<1x256xf32>
    %197 = arith.mulf %195, %196 : vector<1x256xf32>
    %198 = arith.addf %194, %197 : vector<1x256xf32>
    %c225_i32 = arith.constant 225 : i32
    %199 = tpu.dynamic_rotate %46 by %c225_i32 dim 1 : vector<1x256xf32>, i32 -> vector<1x256xf32>
    %c37 = arith.constant 37 : index
    %c0_71 = arith.constant 0 : index
    %200 = vector.load %arg6[%c37, %c0_71] : memref<98x256xf32, #tpu.memory_space<vmem>>, vector<1x256xf32>
    %201 = arith.mulf %199, %200 : vector<1x256xf32>
    %202 = arith.addf %198, %201 : vector<1x256xf32>
    %c224_i32 = arith.constant 224 : i32
    %203 = tpu.dynamic_rotate %46 by %c224_i32 dim 1 : vector<1x256xf32>, i32 -> vector<1x256xf32>
    %c38 = arith.constant 38 : index
    %c0_72 = arith.constant 0 : index
    %204 = vector.load %arg6[%c38, %c0_72] : memref<98x256xf32, #tpu.memory_space<vmem>>, vector<1x256xf32>
    %205 = arith.mulf %203, %204 : vector<1x256xf32>
    %206 = arith.addf %202, %205 : vector<1x256xf32>
    %c223_i32 = arith.constant 223 : i32
    %207 = tpu.dynamic_rotate %46 by %c223_i32 dim 1 : vector<1x256xf32>, i32 -> vector<1x256xf32>
    %c39 = arith.constant 39 : index
    %c0_73 = arith.constant 0 : index
    %208 = vector.load %arg6[%c39, %c0_73] : memref<98x256xf32, #tpu.memory_space<vmem>>, vector<1x256xf32>
    %209 = arith.mulf %207, %208 : vector<1x256xf32>
    %210 = arith.addf %206, %209 : vector<1x256xf32>
    %c222_i32 = arith.constant 222 : i32
    %211 = tpu.dynamic_rotate %46 by %c222_i32 dim 1 : vector<1x256xf32>, i32 -> vector<1x256xf32>
    %c40 = arith.constant 40 : index
    %c0_74 = arith.constant 0 : index
    %212 = vector.load %arg6[%c40, %c0_74] : memref<98x256xf32, #tpu.memory_space<vmem>>, vector<1x256xf32>
    %213 = arith.mulf %211, %212 : vector<1x256xf32>
    %214 = arith.addf %210, %213 : vector<1x256xf32>
    %c221_i32 = arith.constant 221 : i32
    %215 = tpu.dynamic_rotate %46 by %c221_i32 dim 1 : vector<1x256xf32>, i32 -> vector<1x256xf32>
    %c41 = arith.constant 41 : index
    %c0_75 = arith.constant 0 : index
    %216 = vector.load %arg6[%c41, %c0_75] : memref<98x256xf32, #tpu.memory_space<vmem>>, vector<1x256xf32>
    %217 = arith.mulf %215, %216 : vector<1x256xf32>
    %218 = arith.addf %214, %217 : vector<1x256xf32>
    %c211_i32 = arith.constant 211 : i32
    %219 = tpu.dynamic_rotate %46 by %c211_i32 dim 1 : vector<1x256xf32>, i32 -> vector<1x256xf32>
    %c42 = arith.constant 42 : index
    %c0_76 = arith.constant 0 : index
    %220 = vector.load %arg6[%c42, %c0_76] : memref<98x256xf32, #tpu.memory_space<vmem>>, vector<1x256xf32>
    %221 = arith.mulf %219, %220 : vector<1x256xf32>
    %222 = arith.addf %218, %221 : vector<1x256xf32>
    %c210_i32 = arith.constant 210 : i32
    %223 = tpu.dynamic_rotate %46 by %c210_i32 dim 1 : vector<1x256xf32>, i32 -> vector<1x256xf32>
    %c43 = arith.constant 43 : index
    %c0_77 = arith.constant 0 : index
    %224 = vector.load %arg6[%c43, %c0_77] : memref<98x256xf32, #tpu.memory_space<vmem>>, vector<1x256xf32>
    %225 = arith.mulf %223, %224 : vector<1x256xf32>
    %226 = arith.addf %222, %225 : vector<1x256xf32>
    %c209_i32 = arith.constant 209 : i32
    %227 = tpu.dynamic_rotate %46 by %c209_i32 dim 1 : vector<1x256xf32>, i32 -> vector<1x256xf32>
    %c44 = arith.constant 44 : index
    %c0_78 = arith.constant 0 : index
    %228 = vector.load %arg6[%c44, %c0_78] : memref<98x256xf32, #tpu.memory_space<vmem>>, vector<1x256xf32>
    %229 = arith.mulf %227, %228 : vector<1x256xf32>
    %230 = arith.addf %226, %229 : vector<1x256xf32>
    %c208_i32 = arith.constant 208 : i32
    %231 = tpu.dynamic_rotate %46 by %c208_i32 dim 1 : vector<1x256xf32>, i32 -> vector<1x256xf32>
    %c45 = arith.constant 45 : index
    %c0_79 = arith.constant 0 : index
    %232 = vector.load %arg6[%c45, %c0_79] : memref<98x256xf32, #tpu.memory_space<vmem>>, vector<1x256xf32>
    %233 = arith.mulf %231, %232 : vector<1x256xf32>
    %234 = arith.addf %230, %233 : vector<1x256xf32>
    %c207_i32 = arith.constant 207 : i32
    %235 = tpu.dynamic_rotate %46 by %c207_i32 dim 1 : vector<1x256xf32>, i32 -> vector<1x256xf32>
    %c46 = arith.constant 46 : index
    %c0_80 = arith.constant 0 : index
    %236 = vector.load %arg6[%c46, %c0_80] : memref<98x256xf32, #tpu.memory_space<vmem>>, vector<1x256xf32>
    %237 = arith.mulf %235, %236 : vector<1x256xf32>
    %238 = arith.addf %234, %237 : vector<1x256xf32>
    %c206_i32 = arith.constant 206 : i32
    %239 = tpu.dynamic_rotate %46 by %c206_i32 dim 1 : vector<1x256xf32>, i32 -> vector<1x256xf32>
    %c47 = arith.constant 47 : index
    %c0_81 = arith.constant 0 : index
    %240 = vector.load %arg6[%c47, %c0_81] : memref<98x256xf32, #tpu.memory_space<vmem>>, vector<1x256xf32>
    %241 = arith.mulf %239, %240 : vector<1x256xf32>
    %242 = arith.addf %238, %241 : vector<1x256xf32>
    %c205_i32 = arith.constant 205 : i32
    %243 = tpu.dynamic_rotate %46 by %c205_i32 dim 1 : vector<1x256xf32>, i32 -> vector<1x256xf32>
    %c48 = arith.constant 48 : index
    %c0_82 = arith.constant 0 : index
    %244 = vector.load %arg6[%c48, %c0_82] : memref<98x256xf32, #tpu.memory_space<vmem>>, vector<1x256xf32>
    %245 = arith.mulf %243, %244 : vector<1x256xf32>
    %246 = arith.addf %242, %245 : vector<1x256xf32>
    %c51_i32_83 = arith.constant 51 : i32
    %247 = tpu.dynamic_rotate %50 by %c51_i32_83 dim 1 : vector<1x256xf32>, i32 -> vector<1x256xf32>
    %c49 = arith.constant 49 : index
    %c0_84 = arith.constant 0 : index
    %248 = vector.load %arg6[%c49, %c0_84] : memref<98x256xf32, #tpu.memory_space<vmem>>, vector<1x256xf32>
    %249 = arith.mulf %247, %248 : vector<1x256xf32>
    %250 = arith.addf %246, %249 : vector<1x256xf32>
    %c50_i32_85 = arith.constant 50 : i32
    %251 = tpu.dynamic_rotate %50 by %c50_i32_85 dim 1 : vector<1x256xf32>, i32 -> vector<1x256xf32>
    %c50 = arith.constant 50 : index
    %c0_86 = arith.constant 0 : index
    %252 = vector.load %arg6[%c50, %c0_86] : memref<98x256xf32, #tpu.memory_space<vmem>>, vector<1x256xf32>
    %253 = arith.mulf %251, %252 : vector<1x256xf32>
    %254 = arith.addf %250, %253 : vector<1x256xf32>
    %c49_i32_87 = arith.constant 49 : i32
    %255 = tpu.dynamic_rotate %50 by %c49_i32_87 dim 1 : vector<1x256xf32>, i32 -> vector<1x256xf32>
    %c51 = arith.constant 51 : index
    %c0_88 = arith.constant 0 : index
    %256 = vector.load %arg6[%c51, %c0_88] : memref<98x256xf32, #tpu.memory_space<vmem>>, vector<1x256xf32>
    %257 = arith.mulf %255, %256 : vector<1x256xf32>
    %258 = arith.addf %254, %257 : vector<1x256xf32>
    %c48_i32_89 = arith.constant 48 : i32
    %259 = tpu.dynamic_rotate %50 by %c48_i32_89 dim 1 : vector<1x256xf32>, i32 -> vector<1x256xf32>
    %c52 = arith.constant 52 : index
    %c0_90 = arith.constant 0 : index
    %260 = vector.load %arg6[%c52, %c0_90] : memref<98x256xf32, #tpu.memory_space<vmem>>, vector<1x256xf32>
    %261 = arith.mulf %259, %260 : vector<1x256xf32>
    %262 = arith.addf %258, %261 : vector<1x256xf32>
    %c47_i32_91 = arith.constant 47 : i32
    %263 = tpu.dynamic_rotate %50 by %c47_i32_91 dim 1 : vector<1x256xf32>, i32 -> vector<1x256xf32>
    %c53 = arith.constant 53 : index
    %c0_92 = arith.constant 0 : index
    %264 = vector.load %arg6[%c53, %c0_92] : memref<98x256xf32, #tpu.memory_space<vmem>>, vector<1x256xf32>
    %265 = arith.mulf %263, %264 : vector<1x256xf32>
    %266 = arith.addf %262, %265 : vector<1x256xf32>
    %c46_i32_93 = arith.constant 46 : i32
    %267 = tpu.dynamic_rotate %50 by %c46_i32_93 dim 1 : vector<1x256xf32>, i32 -> vector<1x256xf32>
    %c54 = arith.constant 54 : index
    %c0_94 = arith.constant 0 : index
    %268 = vector.load %arg6[%c54, %c0_94] : memref<98x256xf32, #tpu.memory_space<vmem>>, vector<1x256xf32>
    %269 = arith.mulf %267, %268 : vector<1x256xf32>
    %270 = arith.addf %266, %269 : vector<1x256xf32>
    %c45_i32_95 = arith.constant 45 : i32
    %271 = tpu.dynamic_rotate %50 by %c45_i32_95 dim 1 : vector<1x256xf32>, i32 -> vector<1x256xf32>
    %c55 = arith.constant 55 : index
    %c0_96 = arith.constant 0 : index
    %272 = vector.load %arg6[%c55, %c0_96] : memref<98x256xf32, #tpu.memory_space<vmem>>, vector<1x256xf32>
    %273 = arith.mulf %271, %272 : vector<1x256xf32>
    %274 = arith.addf %270, %273 : vector<1x256xf32>
    %c35_i32_97 = arith.constant 35 : i32
    %275 = tpu.dynamic_rotate %50 by %c35_i32_97 dim 1 : vector<1x256xf32>, i32 -> vector<1x256xf32>
    %c56 = arith.constant 56 : index
    %c0_98 = arith.constant 0 : index
    %276 = vector.load %arg6[%c56, %c0_98] : memref<98x256xf32, #tpu.memory_space<vmem>>, vector<1x256xf32>
    %277 = arith.mulf %275, %276 : vector<1x256xf32>
    %278 = arith.addf %274, %277 : vector<1x256xf32>
    %c34_i32_99 = arith.constant 34 : i32
    %279 = tpu.dynamic_rotate %50 by %c34_i32_99 dim 1 : vector<1x256xf32>, i32 -> vector<1x256xf32>
    %c57 = arith.constant 57 : index
    %c0_100 = arith.constant 0 : index
    %280 = vector.load %arg6[%c57, %c0_100] : memref<98x256xf32, #tpu.memory_space<vmem>>, vector<1x256xf32>
    %281 = arith.mulf %279, %280 : vector<1x256xf32>
    %282 = arith.addf %278, %281 : vector<1x256xf32>
    %c33_i32_101 = arith.constant 33 : i32
    %283 = tpu.dynamic_rotate %50 by %c33_i32_101 dim 1 : vector<1x256xf32>, i32 -> vector<1x256xf32>
    %c58 = arith.constant 58 : index
    %c0_102 = arith.constant 0 : index
    %284 = vector.load %arg6[%c58, %c0_102] : memref<98x256xf32, #tpu.memory_space<vmem>>, vector<1x256xf32>
    %285 = arith.mulf %283, %284 : vector<1x256xf32>
    %286 = arith.addf %282, %285 : vector<1x256xf32>
    %c32_i32_103 = arith.constant 32 : i32
    %287 = tpu.dynamic_rotate %50 by %c32_i32_103 dim 1 : vector<1x256xf32>, i32 -> vector<1x256xf32>
    %c59 = arith.constant 59 : index
    %c0_104 = arith.constant 0 : index
    %288 = vector.load %arg6[%c59, %c0_104] : memref<98x256xf32, #tpu.memory_space<vmem>>, vector<1x256xf32>
    %289 = arith.mulf %287, %288 : vector<1x256xf32>
    %290 = arith.addf %286, %289 : vector<1x256xf32>
    %c31_i32_105 = arith.constant 31 : i32
    %291 = tpu.dynamic_rotate %50 by %c31_i32_105 dim 1 : vector<1x256xf32>, i32 -> vector<1x256xf32>
    %c60 = arith.constant 60 : index
    %c0_106 = arith.constant 0 : index
    %292 = vector.load %arg6[%c60, %c0_106] : memref<98x256xf32, #tpu.memory_space<vmem>>, vector<1x256xf32>
    %293 = arith.mulf %291, %292 : vector<1x256xf32>
    %294 = arith.addf %290, %293 : vector<1x256xf32>
    %c30_i32_107 = arith.constant 30 : i32
    %295 = tpu.dynamic_rotate %50 by %c30_i32_107 dim 1 : vector<1x256xf32>, i32 -> vector<1x256xf32>
    %c61 = arith.constant 61 : index
    %c0_108 = arith.constant 0 : index
    %296 = vector.load %arg6[%c61, %c0_108] : memref<98x256xf32, #tpu.memory_space<vmem>>, vector<1x256xf32>
    %297 = arith.mulf %295, %296 : vector<1x256xf32>
    %298 = arith.addf %294, %297 : vector<1x256xf32>
    %c29_i32_109 = arith.constant 29 : i32
    %299 = tpu.dynamic_rotate %50 by %c29_i32_109 dim 1 : vector<1x256xf32>, i32 -> vector<1x256xf32>
    %c62 = arith.constant 62 : index
    %c0_110 = arith.constant 0 : index
    %300 = vector.load %arg6[%c62, %c0_110] : memref<98x256xf32, #tpu.memory_space<vmem>>, vector<1x256xf32>
    %301 = arith.mulf %299, %300 : vector<1x256xf32>
    %302 = arith.addf %298, %301 : vector<1x256xf32>
    %c19_i32_111 = arith.constant 19 : i32
    %303 = tpu.dynamic_rotate %50 by %c19_i32_111 dim 1 : vector<1x256xf32>, i32 -> vector<1x256xf32>
    %c63 = arith.constant 63 : index
    %c0_112 = arith.constant 0 : index
    %304 = vector.load %arg6[%c63, %c0_112] : memref<98x256xf32, #tpu.memory_space<vmem>>, vector<1x256xf32>
    %305 = arith.mulf %303, %304 : vector<1x256xf32>
    %306 = arith.addf %302, %305 : vector<1x256xf32>
    %c18_i32_113 = arith.constant 18 : i32
    %307 = tpu.dynamic_rotate %50 by %c18_i32_113 dim 1 : vector<1x256xf32>, i32 -> vector<1x256xf32>
    %c64 = arith.constant 64 : index
    %c0_114 = arith.constant 0 : index
    %308 = vector.load %arg6[%c64, %c0_114] : memref<98x256xf32, #tpu.memory_space<vmem>>, vector<1x256xf32>
    %309 = arith.mulf %307, %308 : vector<1x256xf32>
    %310 = arith.addf %306, %309 : vector<1x256xf32>
    %c17_i32_115 = arith.constant 17 : i32
    %311 = tpu.dynamic_rotate %50 by %c17_i32_115 dim 1 : vector<1x256xf32>, i32 -> vector<1x256xf32>
    %c65 = arith.constant 65 : index
    %c0_116 = arith.constant 0 : index
    %312 = vector.load %arg6[%c65, %c0_116] : memref<98x256xf32, #tpu.memory_space<vmem>>, vector<1x256xf32>
    %313 = arith.mulf %311, %312 : vector<1x256xf32>
    %314 = arith.addf %310, %313 : vector<1x256xf32>
    %c16_i32_117 = arith.constant 16 : i32
    %315 = tpu.dynamic_rotate %50 by %c16_i32_117 dim 1 : vector<1x256xf32>, i32 -> vector<1x256xf32>
    %c66 = arith.constant 66 : index
    %c0_118 = arith.constant 0 : index
    %316 = vector.load %arg6[%c66, %c0_118] : memref<98x256xf32, #tpu.memory_space<vmem>>, vector<1x256xf32>
    %317 = arith.mulf %315, %316 : vector<1x256xf32>
    %318 = arith.addf %314, %317 : vector<1x256xf32>
    %c15_i32_119 = arith.constant 15 : i32
    %319 = tpu.dynamic_rotate %50 by %c15_i32_119 dim 1 : vector<1x256xf32>, i32 -> vector<1x256xf32>
    %c67 = arith.constant 67 : index
    %c0_120 = arith.constant 0 : index
    %320 = vector.load %arg6[%c67, %c0_120] : memref<98x256xf32, #tpu.memory_space<vmem>>, vector<1x256xf32>
    %321 = arith.mulf %319, %320 : vector<1x256xf32>
    %322 = arith.addf %318, %321 : vector<1x256xf32>
    %c14_i32_121 = arith.constant 14 : i32
    %323 = tpu.dynamic_rotate %50 by %c14_i32_121 dim 1 : vector<1x256xf32>, i32 -> vector<1x256xf32>
    %c68 = arith.constant 68 : index
    %c0_122 = arith.constant 0 : index
    %324 = vector.load %arg6[%c68, %c0_122] : memref<98x256xf32, #tpu.memory_space<vmem>>, vector<1x256xf32>
    %325 = arith.mulf %323, %324 : vector<1x256xf32>
    %326 = arith.addf %322, %325 : vector<1x256xf32>
    %c13_i32_123 = arith.constant 13 : i32
    %327 = tpu.dynamic_rotate %50 by %c13_i32_123 dim 1 : vector<1x256xf32>, i32 -> vector<1x256xf32>
    %c69 = arith.constant 69 : index
    %c0_124 = arith.constant 0 : index
    %328 = vector.load %arg6[%c69, %c0_124] : memref<98x256xf32, #tpu.memory_space<vmem>>, vector<1x256xf32>
    %329 = arith.mulf %327, %328 : vector<1x256xf32>
    %330 = arith.addf %326, %329 : vector<1x256xf32>
    %c3_i32_125 = arith.constant 3 : i32
    %331 = tpu.dynamic_rotate %50 by %c3_i32_125 dim 1 : vector<1x256xf32>, i32 -> vector<1x256xf32>
    %c70 = arith.constant 70 : index
    %c0_126 = arith.constant 0 : index
    %332 = vector.load %arg6[%c70, %c0_126] : memref<98x256xf32, #tpu.memory_space<vmem>>, vector<1x256xf32>
    %333 = arith.mulf %331, %332 : vector<1x256xf32>
    %334 = arith.addf %330, %333 : vector<1x256xf32>
    %c2_i32_127 = arith.constant 2 : i32
    %335 = tpu.dynamic_rotate %50 by %c2_i32_127 dim 1 : vector<1x256xf32>, i32 -> vector<1x256xf32>
    %c71 = arith.constant 71 : index
    %c0_128 = arith.constant 0 : index
    %336 = vector.load %arg6[%c71, %c0_128] : memref<98x256xf32, #tpu.memory_space<vmem>>, vector<1x256xf32>
    %337 = arith.mulf %335, %336 : vector<1x256xf32>
    %338 = arith.addf %334, %337 : vector<1x256xf32>
    %c1_i32_129 = arith.constant 1 : i32
    %339 = tpu.dynamic_rotate %50 by %c1_i32_129 dim 1 : vector<1x256xf32>, i32 -> vector<1x256xf32>
    %c72 = arith.constant 72 : index
    %c0_130 = arith.constant 0 : index
    %340 = vector.load %arg6[%c72, %c0_130] : memref<98x256xf32, #tpu.memory_space<vmem>>, vector<1x256xf32>
    %341 = arith.mulf %339, %340 : vector<1x256xf32>
    %342 = arith.addf %338, %341 : vector<1x256xf32>
    %c73 = arith.constant 73 : index
    %c0_131 = arith.constant 0 : index
    %343 = vector.load %arg6[%c73, %c0_131] : memref<98x256xf32, #tpu.memory_space<vmem>>, vector<1x256xf32>
    %344 = arith.mulf %50, %343 : vector<1x256xf32>
    %345 = arith.addf %342, %344 : vector<1x256xf32>
    %c255_i32_132 = arith.constant 255 : i32
    %346 = tpu.dynamic_rotate %50 by %c255_i32_132 dim 1 : vector<1x256xf32>, i32 -> vector<1x256xf32>
    %c74 = arith.constant 74 : index
    %c0_133 = arith.constant 0 : index
    %347 = vector.load %arg6[%c74, %c0_133] : memref<98x256xf32, #tpu.memory_space<vmem>>, vector<1x256xf32>
    %348 = arith.mulf %346, %347 : vector<1x256xf32>
    %349 = arith.addf %345, %348 : vector<1x256xf32>
    %c254_i32_134 = arith.constant 254 : i32
    %350 = tpu.dynamic_rotate %50 by %c254_i32_134 dim 1 : vector<1x256xf32>, i32 -> vector<1x256xf32>
    %c75 = arith.constant 75 : index
    %c0_135 = arith.constant 0 : index
    %351 = vector.load %arg6[%c75, %c0_135] : memref<98x256xf32, #tpu.memory_space<vmem>>, vector<1x256xf32>
    %352 = arith.mulf %350, %351 : vector<1x256xf32>
    %353 = arith.addf %349, %352 : vector<1x256xf32>
    %c253_i32_136 = arith.constant 253 : i32
    %354 = tpu.dynamic_rotate %50 by %c253_i32_136 dim 1 : vector<1x256xf32>, i32 -> vector<1x256xf32>
    %c76 = arith.constant 76 : index
    %c0_137 = arith.constant 0 : index
    %355 = vector.load %arg6[%c76, %c0_137] : memref<98x256xf32, #tpu.memory_space<vmem>>, vector<1x256xf32>
    %356 = arith.mulf %354, %355 : vector<1x256xf32>
    %357 = arith.addf %353, %356 : vector<1x256xf32>
    %c243_i32_138 = arith.constant 243 : i32
    %358 = tpu.dynamic_rotate %50 by %c243_i32_138 dim 1 : vector<1x256xf32>, i32 -> vector<1x256xf32>
    %c77 = arith.constant 77 : index
    %c0_139 = arith.constant 0 : index
    %359 = vector.load %arg6[%c77, %c0_139] : memref<98x256xf32, #tpu.memory_space<vmem>>, vector<1x256xf32>
    %360 = arith.mulf %358, %359 : vector<1x256xf32>
    %361 = arith.addf %357, %360 : vector<1x256xf32>
    %c242_i32_140 = arith.constant 242 : i32
    %362 = tpu.dynamic_rotate %50 by %c242_i32_140 dim 1 : vector<1x256xf32>, i32 -> vector<1x256xf32>
    %c78 = arith.constant 78 : index
    %c0_141 = arith.constant 0 : index
    %363 = vector.load %arg6[%c78, %c0_141] : memref<98x256xf32, #tpu.memory_space<vmem>>, vector<1x256xf32>
    %364 = arith.mulf %362, %363 : vector<1x256xf32>
    %365 = arith.addf %361, %364 : vector<1x256xf32>
    %c241_i32_142 = arith.constant 241 : i32
    %366 = tpu.dynamic_rotate %50 by %c241_i32_142 dim 1 : vector<1x256xf32>, i32 -> vector<1x256xf32>
    %c79 = arith.constant 79 : index
    %c0_143 = arith.constant 0 : index
    %367 = vector.load %arg6[%c79, %c0_143] : memref<98x256xf32, #tpu.memory_space<vmem>>, vector<1x256xf32>
    %368 = arith.mulf %366, %367 : vector<1x256xf32>
    %369 = arith.addf %365, %368 : vector<1x256xf32>
    %c240_i32_144 = arith.constant 240 : i32
    %370 = tpu.dynamic_rotate %50 by %c240_i32_144 dim 1 : vector<1x256xf32>, i32 -> vector<1x256xf32>
    %c80 = arith.constant 80 : index
    %c0_145 = arith.constant 0 : index
    %371 = vector.load %arg6[%c80, %c0_145] : memref<98x256xf32, #tpu.memory_space<vmem>>, vector<1x256xf32>
    %372 = arith.mulf %370, %371 : vector<1x256xf32>
    %373 = arith.addf %369, %372 : vector<1x256xf32>
    %c239_i32_146 = arith.constant 239 : i32
    %374 = tpu.dynamic_rotate %50 by %c239_i32_146 dim 1 : vector<1x256xf32>, i32 -> vector<1x256xf32>
    %c81 = arith.constant 81 : index
    %c0_147 = arith.constant 0 : index
    %375 = vector.load %arg6[%c81, %c0_147] : memref<98x256xf32, #tpu.memory_space<vmem>>, vector<1x256xf32>
    %376 = arith.mulf %374, %375 : vector<1x256xf32>
    %377 = arith.addf %373, %376 : vector<1x256xf32>
    %c238_i32_148 = arith.constant 238 : i32
    %378 = tpu.dynamic_rotate %50 by %c238_i32_148 dim 1 : vector<1x256xf32>, i32 -> vector<1x256xf32>
    %c82 = arith.constant 82 : index
    %c0_149 = arith.constant 0 : index
    %379 = vector.load %arg6[%c82, %c0_149] : memref<98x256xf32, #tpu.memory_space<vmem>>, vector<1x256xf32>
    %380 = arith.mulf %378, %379 : vector<1x256xf32>
    %381 = arith.addf %377, %380 : vector<1x256xf32>
    %c237_i32_150 = arith.constant 237 : i32
    %382 = tpu.dynamic_rotate %50 by %c237_i32_150 dim 1 : vector<1x256xf32>, i32 -> vector<1x256xf32>
    %c83 = arith.constant 83 : index
    %c0_151 = arith.constant 0 : index
    %383 = vector.load %arg6[%c83, %c0_151] : memref<98x256xf32, #tpu.memory_space<vmem>>, vector<1x256xf32>
    %384 = arith.mulf %382, %383 : vector<1x256xf32>
    %385 = arith.addf %381, %384 : vector<1x256xf32>
    %c227_i32_152 = arith.constant 227 : i32
    %386 = tpu.dynamic_rotate %50 by %c227_i32_152 dim 1 : vector<1x256xf32>, i32 -> vector<1x256xf32>
    %c84 = arith.constant 84 : index
    %c0_153 = arith.constant 0 : index
    %387 = vector.load %arg6[%c84, %c0_153] : memref<98x256xf32, #tpu.memory_space<vmem>>, vector<1x256xf32>
    %388 = arith.mulf %386, %387 : vector<1x256xf32>
    %389 = arith.addf %385, %388 : vector<1x256xf32>
    %c226_i32_154 = arith.constant 226 : i32
    %390 = tpu.dynamic_rotate %50 by %c226_i32_154 dim 1 : vector<1x256xf32>, i32 -> vector<1x256xf32>
    %c85 = arith.constant 85 : index
    %c0_155 = arith.constant 0 : index
    %391 = vector.load %arg6[%c85, %c0_155] : memref<98x256xf32, #tpu.memory_space<vmem>>, vector<1x256xf32>
    %392 = arith.mulf %390, %391 : vector<1x256xf32>
    %393 = arith.addf %389, %392 : vector<1x256xf32>
    %c225_i32_156 = arith.constant 225 : i32
    %394 = tpu.dynamic_rotate %50 by %c225_i32_156 dim 1 : vector<1x256xf32>, i32 -> vector<1x256xf32>
    %c86 = arith.constant 86 : index
    %c0_157 = arith.constant 0 : index
    %395 = vector.load %arg6[%c86, %c0_157] : memref<98x256xf32, #tpu.memory_space<vmem>>, vector<1x256xf32>
    %396 = arith.mulf %394, %395 : vector<1x256xf32>
    %397 = arith.addf %393, %396 : vector<1x256xf32>
    %c224_i32_158 = arith.constant 224 : i32
    %398 = tpu.dynamic_rotate %50 by %c224_i32_158 dim 1 : vector<1x256xf32>, i32 -> vector<1x256xf32>
    %c87 = arith.constant 87 : index
    %c0_159 = arith.constant 0 : index
    %399 = vector.load %arg6[%c87, %c0_159] : memref<98x256xf32, #tpu.memory_space<vmem>>, vector<1x256xf32>
    %400 = arith.mulf %398, %399 : vector<1x256xf32>
    %401 = arith.addf %397, %400 : vector<1x256xf32>
    %c223_i32_160 = arith.constant 223 : i32
    %402 = tpu.dynamic_rotate %50 by %c223_i32_160 dim 1 : vector<1x256xf32>, i32 -> vector<1x256xf32>
    %c88 = arith.constant 88 : index
    %c0_161 = arith.constant 0 : index
    %403 = vector.load %arg6[%c88, %c0_161] : memref<98x256xf32, #tpu.memory_space<vmem>>, vector<1x256xf32>
    %404 = arith.mulf %402, %403 : vector<1x256xf32>
    %405 = arith.addf %401, %404 : vector<1x256xf32>
    %c222_i32_162 = arith.constant 222 : i32
    %406 = tpu.dynamic_rotate %50 by %c222_i32_162 dim 1 : vector<1x256xf32>, i32 -> vector<1x256xf32>
    %c89 = arith.constant 89 : index
    %c0_163 = arith.constant 0 : index
    %407 = vector.load %arg6[%c89, %c0_163] : memref<98x256xf32, #tpu.memory_space<vmem>>, vector<1x256xf32>
    %408 = arith.mulf %406, %407 : vector<1x256xf32>
    %409 = arith.addf %405, %408 : vector<1x256xf32>
    %c221_i32_164 = arith.constant 221 : i32
    %410 = tpu.dynamic_rotate %50 by %c221_i32_164 dim 1 : vector<1x256xf32>, i32 -> vector<1x256xf32>
    %c90 = arith.constant 90 : index
    %c0_165 = arith.constant 0 : index
    %411 = vector.load %arg6[%c90, %c0_165] : memref<98x256xf32, #tpu.memory_space<vmem>>, vector<1x256xf32>
    %412 = arith.mulf %410, %411 : vector<1x256xf32>
    %413 = arith.addf %409, %412 : vector<1x256xf32>
    %c211_i32_166 = arith.constant 211 : i32
    %414 = tpu.dynamic_rotate %50 by %c211_i32_166 dim 1 : vector<1x256xf32>, i32 -> vector<1x256xf32>
    %c91 = arith.constant 91 : index
    %c0_167 = arith.constant 0 : index
    %415 = vector.load %arg6[%c91, %c0_167] : memref<98x256xf32, #tpu.memory_space<vmem>>, vector<1x256xf32>
    %416 = arith.mulf %414, %415 : vector<1x256xf32>
    %417 = arith.addf %413, %416 : vector<1x256xf32>
    %c210_i32_168 = arith.constant 210 : i32
    %418 = tpu.dynamic_rotate %50 by %c210_i32_168 dim 1 : vector<1x256xf32>, i32 -> vector<1x256xf32>
    %c92 = arith.constant 92 : index
    %c0_169 = arith.constant 0 : index
    %419 = vector.load %arg6[%c92, %c0_169] : memref<98x256xf32, #tpu.memory_space<vmem>>, vector<1x256xf32>
    %420 = arith.mulf %418, %419 : vector<1x256xf32>
    %421 = arith.addf %417, %420 : vector<1x256xf32>
    %c209_i32_170 = arith.constant 209 : i32
    %422 = tpu.dynamic_rotate %50 by %c209_i32_170 dim 1 : vector<1x256xf32>, i32 -> vector<1x256xf32>
    %c93 = arith.constant 93 : index
    %c0_171 = arith.constant 0 : index
    %423 = vector.load %arg6[%c93, %c0_171] : memref<98x256xf32, #tpu.memory_space<vmem>>, vector<1x256xf32>
    %424 = arith.mulf %422, %423 : vector<1x256xf32>
    %425 = arith.addf %421, %424 : vector<1x256xf32>
    %c208_i32_172 = arith.constant 208 : i32
    %426 = tpu.dynamic_rotate %50 by %c208_i32_172 dim 1 : vector<1x256xf32>, i32 -> vector<1x256xf32>
    %c94 = arith.constant 94 : index
    %c0_173 = arith.constant 0 : index
    %427 = vector.load %arg6[%c94, %c0_173] : memref<98x256xf32, #tpu.memory_space<vmem>>, vector<1x256xf32>
    %428 = arith.mulf %426, %427 : vector<1x256xf32>
    %429 = arith.addf %425, %428 : vector<1x256xf32>
    %c207_i32_174 = arith.constant 207 : i32
    %430 = tpu.dynamic_rotate %50 by %c207_i32_174 dim 1 : vector<1x256xf32>, i32 -> vector<1x256xf32>
    %c95 = arith.constant 95 : index
    %c0_175 = arith.constant 0 : index
    %431 = vector.load %arg6[%c95, %c0_175] : memref<98x256xf32, #tpu.memory_space<vmem>>, vector<1x256xf32>
    %432 = arith.mulf %430, %431 : vector<1x256xf32>
    %433 = arith.addf %429, %432 : vector<1x256xf32>
    %c206_i32_176 = arith.constant 206 : i32
    %434 = tpu.dynamic_rotate %50 by %c206_i32_176 dim 1 : vector<1x256xf32>, i32 -> vector<1x256xf32>
    %c96 = arith.constant 96 : index
    %c0_177 = arith.constant 0 : index
    %435 = vector.load %arg6[%c96, %c0_177] : memref<98x256xf32, #tpu.memory_space<vmem>>, vector<1x256xf32>
    %436 = arith.mulf %434, %435 : vector<1x256xf32>
    %437 = arith.addf %433, %436 : vector<1x256xf32>
    %c205_i32_178 = arith.constant 205 : i32
    %438 = tpu.dynamic_rotate %50 by %c205_i32_178 dim 1 : vector<1x256xf32>, i32 -> vector<1x256xf32>
    %c97 = arith.constant 97 : index
    %c0_179 = arith.constant 0 : index
    %439 = vector.load %arg6[%c97, %c0_179] : memref<98x256xf32, #tpu.memory_space<vmem>>, vector<1x256xf32>
    %440 = arith.mulf %438, %439 : vector<1x256xf32>
    %441 = arith.addf %437, %440 : vector<1x256xf32>
    %c0_180 = arith.constant 0 : index
    %c0_181 = arith.constant 0 : index
    %c0_182 = arith.constant 0 : index
    %442 = vector.load %arg8[%c0_180, %c0_181, %c0_182] : memref<2x1x256xf32, #tpu.memory_space<vmem>>, vector<1x1x256xf32>
    %443 = vector.shape_cast %442 : vector<1x1x256xf32> to vector<1x256xf32>
    %444 = vector.shape_cast %441 : vector<1x256xf32> to vector<1x1x256xf32>
    tpu.vector_store %arg8[%c0_180, %c0_181, %c0_182], %444 {strides = array<i32>} : memref<2x1x256xf32, #tpu.memory_space<vmem>>, vector<1x1x256xf32>,
    %445 = vector.extract_strided_slice %25 {offsets = [0, 2], sizes = [16, 2], strides = [1, 1]} : vector<16x4xf32> to vector<16x2xf32>
    %cst_183 = arith.constant dense<0.000000e+00> : vector<16xf32>
    %446 = vector.multi_reduction <add>, %445, %cst_183 [1] : vector<16x2xf32> to vector<16xf32>
    %447 = vector.shape_cast %446 : vector<16xf32> to vector<16x1xf32>
    %c0_184 = arith.constant 0 : index
    %c0_185 = arith.constant 0 : index
    %448 = vector.load %arg5[%c0_184, %c0_185] : memref<16x1xf32, #tpu.memory_space<vmem>>, vector<16x1xf32>
    %cst_186 = arith.constant 2.000000e+00 : f32
    %449 = vector.broadcast %cst_186 : f32 to vector<16x1xf32>
    %450 = arith.mulf %449, %448 : vector<16x1xf32>
    %451 = arith.addf %447, %450 : vector<16x1xf32>
    %cst_187 = arith.constant 0.000000e+00 : f32
    %452 = vector.broadcast %cst_187 : f32 to vector<16x1xf32>
    %453 = arith.subf %452, %451 : vector<16x1xf32>
    %454 = math.exp %453 : vector<16x1xf32>
    %cst_188 = arith.constant 1.000000e+00 : f32
    %455 = vector.broadcast %cst_188 : f32 to vector<16x1xf32>
    %456 = arith.addf %455, %454 : vector<16x1xf32>
    %cst_189 = arith.constant 1.000000e+00 : f32
    %457 = vector.broadcast %cst_189 : f32 to vector<16x1xf32>
    %458 = arith.divf %457, %456 : vector<16x1xf32>
    %459 = vector.broadcast %458 : vector<16x1xf32> to vector<16x256xf32>
    %460 = arith.mulf %9, %459 : vector<16x256xf32>
    %c1_190 = arith.constant 1 : index
    %c0_191 = arith.constant 0 : index
    %c0_192 = arith.constant 0 : index
    %461 = vector.load %arg7[%c1_190, %c0_191, %c0_192] : memref<2x16x256xf32, #tpu.memory_space<vmem>>, vector<1x16x256xf32>
    %462 = vector.shape_cast %461 : vector<1x16x256xf32> to vector<16x256xf32>
    %463 = vector.shape_cast %460 : vector<16x256xf32> to vector<1x16x256xf32>
    tpu.vector_store %arg7[%c1_190, %c0_191, %c0_192], %463 {strides = array<i32>} : memref<2x16x256xf32, #tpu.memory_space<vmem>>, vector<1x16x256xf32>,
    %cst_193 = arith.constant dense<0xFF800000> : vector<256xf32>
    %464 = vector.multi_reduction <maximumf>, %460, %cst_193 [0] : vector<16x256xf32> to vector<256xf32>
    %465 = vector.shape_cast %464 : vector<256xf32> to vector<1x256xf32>
    %cst_194 = arith.constant dense<0.000000e+00> : vector<256xf32>
    %466 = vector.multi_reduction <add>, %460, %cst_194 [0] : vector<16x256xf32> to vector<256xf32>
    %467 = vector.shape_cast %466 : vector<256xf32> to vector<1x256xf32>
    %cst_195 = arith.constant 6.250000e-02 : f32
    %468 = vector.broadcast %cst_195 : f32 to vector<1x256xf32>
    %469 = arith.mulf %467, %468 : vector<1x256xf32>
    %cst_196 = arith.constant 0.000000e+00 : f32
    %470 = vector.broadcast %cst_196 : f32 to vector<1x256xf32>
    %c51_i32_197 = arith.constant 51 : i32
    %471 = tpu.dynamic_rotate %465 by %c51_i32_197 dim 1 : vector<1x256xf32>, i32 -> vector<1x256xf32>
    %c0_198 = arith.constant 0 : index
    %c0_199 = arith.constant 0 : index
    %472 = vector.load %arg6[%c0_198, %c0_199] : memref<98x256xf32, #tpu.memory_space<vmem>>, vector<1x256xf32>
    %473 = arith.mulf %471, %472 : vector<1x256xf32>
    %474 = arith.addf %470, %473 : vector<1x256xf32>
    %c50_i32_200 = arith.constant 50 : i32
    %475 = tpu.dynamic_rotate %465 by %c50_i32_200 dim 1 : vector<1x256xf32>, i32 -> vector<1x256xf32>
    %c1_201 = arith.constant 1 : index
    %c0_202 = arith.constant 0 : index
    %476 = vector.load %arg6[%c1_201, %c0_202] : memref<98x256xf32, #tpu.memory_space<vmem>>, vector<1x256xf32>
    %477 = arith.mulf %475, %476 : vector<1x256xf32>
    %478 = arith.addf %474, %477 : vector<1x256xf32>
    %c49_i32_203 = arith.constant 49 : i32
    %479 = tpu.dynamic_rotate %465 by %c49_i32_203 dim 1 : vector<1x256xf32>, i32 -> vector<1x256xf32>
    %c2_204 = arith.constant 2 : index
    %c0_205 = arith.constant 0 : index
    %480 = vector.load %arg6[%c2_204, %c0_205] : memref<98x256xf32, #tpu.memory_space<vmem>>, vector<1x256xf32>
    %481 = arith.mulf %479, %480 : vector<1x256xf32>
    %482 = arith.addf %478, %481 : vector<1x256xf32>
    %c48_i32_206 = arith.constant 48 : i32
    %483 = tpu.dynamic_rotate %465 by %c48_i32_206 dim 1 : vector<1x256xf32>, i32 -> vector<1x256xf32>
    %c3_207 = arith.constant 3 : index
    %c0_208 = arith.constant 0 : index
    %484 = vector.load %arg6[%c3_207, %c0_208] : memref<98x256xf32, #tpu.memory_space<vmem>>, vector<1x256xf32>
    %485 = arith.mulf %483, %484 : vector<1x256xf32>
    %486 = arith.addf %482, %485 : vector<1x256xf32>
    %c47_i32_209 = arith.constant 47 : i32
    %487 = tpu.dynamic_rotate %465 by %c47_i32_209 dim 1 : vector<1x256xf32>, i32 -> vector<1x256xf32>
    %c4_210 = arith.constant 4 : index
    %c0_211 = arith.constant 0 : index
    %488 = vector.load %arg6[%c4_210, %c0_211] : memref<98x256xf32, #tpu.memory_space<vmem>>, vector<1x256xf32>
    %489 = arith.mulf %487, %488 : vector<1x256xf32>
    %490 = arith.addf %486, %489 : vector<1x256xf32>
    %c46_i32_212 = arith.constant 46 : i32
    %491 = tpu.dynamic_rotate %465 by %c46_i32_212 dim 1 : vector<1x256xf32>, i32 -> vector<1x256xf32>
    %c5_213 = arith.constant 5 : index
    %c0_214 = arith.constant 0 : index
    %492 = vector.load %arg6[%c5_213, %c0_214] : memref<98x256xf32, #tpu.memory_space<vmem>>, vector<1x256xf32>
    %493 = arith.mulf %491, %492 : vector<1x256xf32>
    %494 = arith.addf %490, %493 : vector<1x256xf32>
    %c45_i32_215 = arith.constant 45 : i32
    %495 = tpu.dynamic_rotate %465 by %c45_i32_215 dim 1 : vector<1x256xf32>, i32 -> vector<1x256xf32>
    %c6_216 = arith.constant 6 : index
    %c0_217 = arith.constant 0 : index
    %496 = vector.load %arg6[%c6_216, %c0_217] : memref<98x256xf32, #tpu.memory_space<vmem>>, vector<1x256xf32>
    %497 = arith.mulf %495, %496 : vector<1x256xf32>
    %498 = arith.addf %494, %497 : vector<1x256xf32>
    %c35_i32_218 = arith.constant 35 : i32
    %499 = tpu.dynamic_rotate %465 by %c35_i32_218 dim 1 : vector<1x256xf32>, i32 -> vector<1x256xf32>
    %c7_219 = arith.constant 7 : index
    %c0_220 = arith.constant 0 : index
    %500 = vector.load %arg6[%c7_219, %c0_220] : memref<98x256xf32, #tpu.memory_space<vmem>>, vector<1x256xf32>
    %501 = arith.mulf %499, %500 : vector<1x256xf32>
    %502 = arith.addf %498, %501 : vector<1x256xf32>
    %c34_i32_221 = arith.constant 34 : i32
    %503 = tpu.dynamic_rotate %465 by %c34_i32_221 dim 1 : vector<1x256xf32>, i32 -> vector<1x256xf32>
    %c8_222 = arith.constant 8 : index
    %c0_223 = arith.constant 0 : index
    %504 = vector.load %arg6[%c8_222, %c0_223] : memref<98x256xf32, #tpu.memory_space<vmem>>, vector<1x256xf32>
    %505 = arith.mulf %503, %504 : vector<1x256xf32>
    %506 = arith.addf %502, %505 : vector<1x256xf32>
    %c33_i32_224 = arith.constant 33 : i32
    %507 = tpu.dynamic_rotate %465 by %c33_i32_224 dim 1 : vector<1x256xf32>, i32 -> vector<1x256xf32>
    %c9_225 = arith.constant 9 : index
    %c0_226 = arith.constant 0 : index
    %508 = vector.load %arg6[%c9_225, %c0_226] : memref<98x256xf32, #tpu.memory_space<vmem>>, vector<1x256xf32>
    %509 = arith.mulf %507, %508 : vector<1x256xf32>
    %510 = arith.addf %506, %509 : vector<1x256xf32>
    %c32_i32_227 = arith.constant 32 : i32
    %511 = tpu.dynamic_rotate %465 by %c32_i32_227 dim 1 : vector<1x256xf32>, i32 -> vector<1x256xf32>
    %c10_228 = arith.constant 10 : index
    %c0_229 = arith.constant 0 : index
    %512 = vector.load %arg6[%c10_228, %c0_229] : memref<98x256xf32, #tpu.memory_space<vmem>>, vector<1x256xf32>
    %513 = arith.mulf %511, %512 : vector<1x256xf32>
    %514 = arith.addf %510, %513 : vector<1x256xf32>
    %c31_i32_230 = arith.constant 31 : i32
    %515 = tpu.dynamic_rotate %465 by %c31_i32_230 dim 1 : vector<1x256xf32>, i32 -> vector<1x256xf32>
    %c11_231 = arith.constant 11 : index
    %c0_232 = arith.constant 0 : index
    %516 = vector.load %arg6[%c11_231, %c0_232] : memref<98x256xf32, #tpu.memory_space<vmem>>, vector<1x256xf32>
    %517 = arith.mulf %515, %516 : vector<1x256xf32>
    %518 = arith.addf %514, %517 : vector<1x256xf32>
    %c30_i32_233 = arith.constant 30 : i32
    %519 = tpu.dynamic_rotate %465 by %c30_i32_233 dim 1 : vector<1x256xf32>, i32 -> vector<1x256xf32>
    %c12_234 = arith.constant 12 : index
    %c0_235 = arith.constant 0 : index
    %520 = vector.load %arg6[%c12_234, %c0_235] : memref<98x256xf32, #tpu.memory_space<vmem>>, vector<1x256xf32>
    %521 = arith.mulf %519, %520 : vector<1x256xf32>
    %522 = arith.addf %518, %521 : vector<1x256xf32>
    %c29_i32_236 = arith.constant 29 : i32
    %523 = tpu.dynamic_rotate %465 by %c29_i32_236 dim 1 : vector<1x256xf32>, i32 -> vector<1x256xf32>
    %c13_237 = arith.constant 13 : index
    %c0_238 = arith.constant 0 : index
    %524 = vector.load %arg6[%c13_237, %c0_238] : memref<98x256xf32, #tpu.memory_space<vmem>>, vector<1x256xf32>
    %525 = arith.mulf %523, %524 : vector<1x256xf32>
    %526 = arith.addf %522, %525 : vector<1x256xf32>
    %c19_i32_239 = arith.constant 19 : i32
    %527 = tpu.dynamic_rotate %465 by %c19_i32_239 dim 1 : vector<1x256xf32>, i32 -> vector<1x256xf32>
    %c14_240 = arith.constant 14 : index
    %c0_241 = arith.constant 0 : index
    %528 = vector.load %arg6[%c14_240, %c0_241] : memref<98x256xf32, #tpu.memory_space<vmem>>, vector<1x256xf32>
    %529 = arith.mulf %527, %528 : vector<1x256xf32>
    %530 = arith.addf %526, %529 : vector<1x256xf32>
    %c18_i32_242 = arith.constant 18 : i32
    %531 = tpu.dynamic_rotate %465 by %c18_i32_242 dim 1 : vector<1x256xf32>, i32 -> vector<1x256xf32>
    %c15_243 = arith.constant 15 : index
    %c0_244 = arith.constant 0 : index
    %532 = vector.load %arg6[%c15_243, %c0_244] : memref<98x256xf32, #tpu.memory_space<vmem>>, vector<1x256xf32>
    %533 = arith.mulf %531, %532 : vector<1x256xf32>
    %534 = arith.addf %530, %533 : vector<1x256xf32>
    %c17_i32_245 = arith.constant 17 : i32
    %535 = tpu.dynamic_rotate %465 by %c17_i32_245 dim 1 : vector<1x256xf32>, i32 -> vector<1x256xf32>
    %c16_246 = arith.constant 16 : index
    %c0_247 = arith.constant 0 : index
    %536 = vector.load %arg6[%c16_246, %c0_247] : memref<98x256xf32, #tpu.memory_space<vmem>>, vector<1x256xf32>
    %537 = arith.mulf %535, %536 : vector<1x256xf32>
    %538 = arith.addf %534, %537 : vector<1x256xf32>
    %c16_i32_248 = arith.constant 16 : i32
    %539 = tpu.dynamic_rotate %465 by %c16_i32_248 dim 1 : vector<1x256xf32>, i32 -> vector<1x256xf32>
    %c17_249 = arith.constant 17 : index
    %c0_250 = arith.constant 0 : index
    %540 = vector.load %arg6[%c17_249, %c0_250] : memref<98x256xf32, #tpu.memory_space<vmem>>, vector<1x256xf32>
    %541 = arith.mulf %539, %540 : vector<1x256xf32>
    %542 = arith.addf %538, %541 : vector<1x256xf32>
    %c15_i32_251 = arith.constant 15 : i32
    %543 = tpu.dynamic_rotate %465 by %c15_i32_251 dim 1 : vector<1x256xf32>, i32 -> vector<1x256xf32>
    %c18_252 = arith.constant 18 : index
    %c0_253 = arith.constant 0 : index
    %544 = vector.load %arg6[%c18_252, %c0_253] : memref<98x256xf32, #tpu.memory_space<vmem>>, vector<1x256xf32>
    %545 = arith.mulf %543, %544 : vector<1x256xf32>
    %546 = arith.addf %542, %545 : vector<1x256xf32>
    %c14_i32_254 = arith.constant 14 : i32
    %547 = tpu.dynamic_rotate %465 by %c14_i32_254 dim 1 : vector<1x256xf32>, i32 -> vector<1x256xf32>
    %c19_255 = arith.constant 19 : index
    %c0_256 = arith.constant 0 : index
    %548 = vector.load %arg6[%c19_255, %c0_256] : memref<98x256xf32, #tpu.memory_space<vmem>>, vector<1x256xf32>
    %549 = arith.mulf %547, %548 : vector<1x256xf32>
    %550 = arith.addf %546, %549 : vector<1x256xf32>
    %c13_i32_257 = arith.constant 13 : i32
    %551 = tpu.dynamic_rotate %465 by %c13_i32_257 dim 1 : vector<1x256xf32>, i32 -> vector<1x256xf32>
    %c20_258 = arith.constant 20 : index
    %c0_259 = arith.constant 0 : index
    %552 = vector.load %arg6[%c20_258, %c0_259] : memref<98x256xf32, #tpu.memory_space<vmem>>, vector<1x256xf32>
    %553 = arith.mulf %551, %552 : vector<1x256xf32>
    %554 = arith.addf %550, %553 : vector<1x256xf32>
    %c3_i32_260 = arith.constant 3 : i32
    %555 = tpu.dynamic_rotate %465 by %c3_i32_260 dim 1 : vector<1x256xf32>, i32 -> vector<1x256xf32>
    %c21_261 = arith.constant 21 : index
    %c0_262 = arith.constant 0 : index
    %556 = vector.load %arg6[%c21_261, %c0_262] : memref<98x256xf32, #tpu.memory_space<vmem>>, vector<1x256xf32>
    %557 = arith.mulf %555, %556 : vector<1x256xf32>
    %558 = arith.addf %554, %557 : vector<1x256xf32>
    %c2_i32_263 = arith.constant 2 : i32
    %559 = tpu.dynamic_rotate %465 by %c2_i32_263 dim 1 : vector<1x256xf32>, i32 -> vector<1x256xf32>
    %c22_264 = arith.constant 22 : index
    %c0_265 = arith.constant 0 : index
    %560 = vector.load %arg6[%c22_264, %c0_265] : memref<98x256xf32, #tpu.memory_space<vmem>>, vector<1x256xf32>
    %561 = arith.mulf %559, %560 : vector<1x256xf32>
    %562 = arith.addf %558, %561 : vector<1x256xf32>
    %c1_i32_266 = arith.constant 1 : i32
    %563 = tpu.dynamic_rotate %465 by %c1_i32_266 dim 1 : vector<1x256xf32>, i32 -> vector<1x256xf32>
    %c23_267 = arith.constant 23 : index
    %c0_268 = arith.constant 0 : index
    %564 = vector.load %arg6[%c23_267, %c0_268] : memref<98x256xf32, #tpu.memory_space<vmem>>, vector<1x256xf32>
    %565 = arith.mulf %563, %564 : vector<1x256xf32>
    %566 = arith.addf %562, %565 : vector<1x256xf32>
    %c24_269 = arith.constant 24 : index
    %c0_270 = arith.constant 0 : index
    %567 = vector.load %arg6[%c24_269, %c0_270] : memref<98x256xf32, #tpu.memory_space<vmem>>, vector<1x256xf32>
    %568 = arith.mulf %465, %567 : vector<1x256xf32>
    %569 = arith.addf %566, %568 : vector<1x256xf32>
    %c255_i32_271 = arith.constant 255 : i32
    %570 = tpu.dynamic_rotate %465 by %c255_i32_271 dim 1 : vector<1x256xf32>, i32 -> vector<1x256xf32>
    %c25_272 = arith.constant 25 : index
    %c0_273 = arith.constant 0 : index
    %571 = vector.load %arg6[%c25_272, %c0_273] : memref<98x256xf32, #tpu.memory_space<vmem>>, vector<1x256xf32>
    %572 = arith.mulf %570, %571 : vector<1x256xf32>
    %573 = arith.addf %569, %572 : vector<1x256xf32>
    %c254_i32_274 = arith.constant 254 : i32
    %574 = tpu.dynamic_rotate %465 by %c254_i32_274 dim 1 : vector<1x256xf32>, i32 -> vector<1x256xf32>
    %c26_275 = arith.constant 26 : index
    %c0_276 = arith.constant 0 : index
    %575 = vector.load %arg6[%c26_275, %c0_276] : memref<98x256xf32, #tpu.memory_space<vmem>>, vector<1x256xf32>
    %576 = arith.mulf %574, %575 : vector<1x256xf32>
    %577 = arith.addf %573, %576 : vector<1x256xf32>
    %c253_i32_277 = arith.constant 253 : i32
    %578 = tpu.dynamic_rotate %465 by %c253_i32_277 dim 1 : vector<1x256xf32>, i32 -> vector<1x256xf32>
    %c27_278 = arith.constant 27 : index
    %c0_279 = arith.constant 0 : index
    %579 = vector.load %arg6[%c27_278, %c0_279] : memref<98x256xf32, #tpu.memory_space<vmem>>, vector<1x256xf32>
    %580 = arith.mulf %578, %579 : vector<1x256xf32>
    %581 = arith.addf %577, %580 : vector<1x256xf32>
    %c243_i32_280 = arith.constant 243 : i32
    %582 = tpu.dynamic_rotate %465 by %c243_i32_280 dim 1 : vector<1x256xf32>, i32 -> vector<1x256xf32>
    %c28_281 = arith.constant 28 : index
    %c0_282 = arith.constant 0 : index
    %583 = vector.load %arg6[%c28_281, %c0_282] : memref<98x256xf32, #tpu.memory_space<vmem>>, vector<1x256xf32>
    %584 = arith.mulf %582, %583 : vector<1x256xf32>
    %585 = arith.addf %581, %584 : vector<1x256xf32>
    %c242_i32_283 = arith.constant 242 : i32
    %586 = tpu.dynamic_rotate %465 by %c242_i32_283 dim 1 : vector<1x256xf32>, i32 -> vector<1x256xf32>
    %c29_284 = arith.constant 29 : index
    %c0_285 = arith.constant 0 : index
    %587 = vector.load %arg6[%c29_284, %c0_285] : memref<98x256xf32, #tpu.memory_space<vmem>>, vector<1x256xf32>
    %588 = arith.mulf %586, %587 : vector<1x256xf32>
    %589 = arith.addf %585, %588 : vector<1x256xf32>
    %c241_i32_286 = arith.constant 241 : i32
    %590 = tpu.dynamic_rotate %465 by %c241_i32_286 dim 1 : vector<1x256xf32>, i32 -> vector<1x256xf32>
    %c30_287 = arith.constant 30 : index
    %c0_288 = arith.constant 0 : index
    %591 = vector.load %arg6[%c30_287, %c0_288] : memref<98x256xf32, #tpu.memory_space<vmem>>, vector<1x256xf32>
    %592 = arith.mulf %590, %591 : vector<1x256xf32>
    %593 = arith.addf %589, %592 : vector<1x256xf32>
    %c240_i32_289 = arith.constant 240 : i32
    %594 = tpu.dynamic_rotate %465 by %c240_i32_289 dim 1 : vector<1x256xf32>, i32 -> vector<1x256xf32>
    %c31_290 = arith.constant 31 : index
    %c0_291 = arith.constant 0 : index
    %595 = vector.load %arg6[%c31_290, %c0_291] : memref<98x256xf32, #tpu.memory_space<vmem>>, vector<1x256xf32>
    %596 = arith.mulf %594, %595 : vector<1x256xf32>
    %597 = arith.addf %593, %596 : vector<1x256xf32>
    %c239_i32_292 = arith.constant 239 : i32
    %598 = tpu.dynamic_rotate %465 by %c239_i32_292 dim 1 : vector<1x256xf32>, i32 -> vector<1x256xf32>
    %c32_293 = arith.constant 32 : index
    %c0_294 = arith.constant 0 : index
    %599 = vector.load %arg6[%c32_293, %c0_294] : memref<98x256xf32, #tpu.memory_space<vmem>>, vector<1x256xf32>
    %600 = arith.mulf %598, %599 : vector<1x256xf32>
    %601 = arith.addf %597, %600 : vector<1x256xf32>
    %c238_i32_295 = arith.constant 238 : i32
    %602 = tpu.dynamic_rotate %465 by %c238_i32_295 dim 1 : vector<1x256xf32>, i32 -> vector<1x256xf32>
    %c33_296 = arith.constant 33 : index
    %c0_297 = arith.constant 0 : index
    %603 = vector.load %arg6[%c33_296, %c0_297] : memref<98x256xf32, #tpu.memory_space<vmem>>, vector<1x256xf32>
    %604 = arith.mulf %602, %603 : vector<1x256xf32>
    %605 = arith.addf %601, %604 : vector<1x256xf32>
    %c237_i32_298 = arith.constant 237 : i32
    %606 = tpu.dynamic_rotate %465 by %c237_i32_298 dim 1 : vector<1x256xf32>, i32 -> vector<1x256xf32>
    %c34_299 = arith.constant 34 : index
    %c0_300 = arith.constant 0 : index
    %607 = vector.load %arg6[%c34_299, %c0_300] : memref<98x256xf32, #tpu.memory_space<vmem>>, vector<1x256xf32>
    %608 = arith.mulf %606, %607 : vector<1x256xf32>
    %609 = arith.addf %605, %608 : vector<1x256xf32>
    %c227_i32_301 = arith.constant 227 : i32
    %610 = tpu.dynamic_rotate %465 by %c227_i32_301 dim 1 : vector<1x256xf32>, i32 -> vector<1x256xf32>
    %c35_302 = arith.constant 35 : index
    %c0_303 = arith.constant 0 : index
    %611 = vector.load %arg6[%c35_302, %c0_303] : memref<98x256xf32, #tpu.memory_space<vmem>>, vector<1x256xf32>
    %612 = arith.mulf %610, %611 : vector<1x256xf32>
    %613 = arith.addf %609, %612 : vector<1x256xf32>
    %c226_i32_304 = arith.constant 226 : i32
    %614 = tpu.dynamic_rotate %465 by %c226_i32_304 dim 1 : vector<1x256xf32>, i32 -> vector<1x256xf32>
    %c36_305 = arith.constant 36 : index
    %c0_306 = arith.constant 0 : index
    %615 = vector.load %arg6[%c36_305, %c0_306] : memref<98x256xf32, #tpu.memory_space<vmem>>, vector<1x256xf32>
    %616 = arith.mulf %614, %615 : vector<1x256xf32>
    %617 = arith.addf %613, %616 : vector<1x256xf32>
    %c225_i32_307 = arith.constant 225 : i32
    %618 = tpu.dynamic_rotate %465 by %c225_i32_307 dim 1 : vector<1x256xf32>, i32 -> vector<1x256xf32>
    %c37_308 = arith.constant 37 : index
    %c0_309 = arith.constant 0 : index
    %619 = vector.load %arg6[%c37_308, %c0_309] : memref<98x256xf32, #tpu.memory_space<vmem>>, vector<1x256xf32>
    %620 = arith.mulf %618, %619 : vector<1x256xf32>
    %621 = arith.addf %617, %620 : vector<1x256xf32>
    %c224_i32_310 = arith.constant 224 : i32
    %622 = tpu.dynamic_rotate %465 by %c224_i32_310 dim 1 : vector<1x256xf32>, i32 -> vector<1x256xf32>
    %c38_311 = arith.constant 38 : index
    %c0_312 = arith.constant 0 : index
    %623 = vector.load %arg6[%c38_311, %c0_312] : memref<98x256xf32, #tpu.memory_space<vmem>>, vector<1x256xf32>
    %624 = arith.mulf %622, %623 : vector<1x256xf32>
    %625 = arith.addf %621, %624 : vector<1x256xf32>
    %c223_i32_313 = arith.constant 223 : i32
    %626 = tpu.dynamic_rotate %465 by %c223_i32_313 dim 1 : vector<1x256xf32>, i32 -> vector<1x256xf32>
    %c39_314 = arith.constant 39 : index
    %c0_315 = arith.constant 0 : index
    %627 = vector.load %arg6[%c39_314, %c0_315] : memref<98x256xf32, #tpu.memory_space<vmem>>, vector<1x256xf32>
    %628 = arith.mulf %626, %627 : vector<1x256xf32>
    %629 = arith.addf %625, %628 : vector<1x256xf32>
    %c222_i32_316 = arith.constant 222 : i32
    %630 = tpu.dynamic_rotate %465 by %c222_i32_316 dim 1 : vector<1x256xf32>, i32 -> vector<1x256xf32>
    %c40_317 = arith.constant 40 : index
    %c0_318 = arith.constant 0 : index
    %631 = vector.load %arg6[%c40_317, %c0_318] : memref<98x256xf32, #tpu.memory_space<vmem>>, vector<1x256xf32>
    %632 = arith.mulf %630, %631 : vector<1x256xf32>
    %633 = arith.addf %629, %632 : vector<1x256xf32>
    %c221_i32_319 = arith.constant 221 : i32
    %634 = tpu.dynamic_rotate %465 by %c221_i32_319 dim 1 : vector<1x256xf32>, i32 -> vector<1x256xf32>
    %c41_320 = arith.constant 41 : index
    %c0_321 = arith.constant 0 : index
    %635 = vector.load %arg6[%c41_320, %c0_321] : memref<98x256xf32, #tpu.memory_space<vmem>>, vector<1x256xf32>
    %636 = arith.mulf %634, %635 : vector<1x256xf32>
    %637 = arith.addf %633, %636 : vector<1x256xf32>
    %c211_i32_322 = arith.constant 211 : i32
    %638 = tpu.dynamic_rotate %465 by %c211_i32_322 dim 1 : vector<1x256xf32>, i32 -> vector<1x256xf32>
    %c42_323 = arith.constant 42 : index
    %c0_324 = arith.constant 0 : index
    %639 = vector.load %arg6[%c42_323, %c0_324] : memref<98x256xf32, #tpu.memory_space<vmem>>, vector<1x256xf32>
    %640 = arith.mulf %638, %639 : vector<1x256xf32>
    %641 = arith.addf %637, %640 : vector<1x256xf32>
    %c210_i32_325 = arith.constant 210 : i32
    %642 = tpu.dynamic_rotate %465 by %c210_i32_325 dim 1 : vector<1x256xf32>, i32 -> vector<1x256xf32>
    %c43_326 = arith.constant 43 : index
    %c0_327 = arith.constant 0 : index
    %643 = vector.load %arg6[%c43_326, %c0_327] : memref<98x256xf32, #tpu.memory_space<vmem>>, vector<1x256xf32>
    %644 = arith.mulf %642, %643 : vector<1x256xf32>
    %645 = arith.addf %641, %644 : vector<1x256xf32>
    %c209_i32_328 = arith.constant 209 : i32
    %646 = tpu.dynamic_rotate %465 by %c209_i32_328 dim 1 : vector<1x256xf32>, i32 -> vector<1x256xf32>
    %c44_329 = arith.constant 44 : index
    %c0_330 = arith.constant 0 : index
    %647 = vector.load %arg6[%c44_329, %c0_330] : memref<98x256xf32, #tpu.memory_space<vmem>>, vector<1x256xf32>
    %648 = arith.mulf %646, %647 : vector<1x256xf32>
    %649 = arith.addf %645, %648 : vector<1x256xf32>
    %c208_i32_331 = arith.constant 208 : i32
    %650 = tpu.dynamic_rotate %465 by %c208_i32_331 dim 1 : vector<1x256xf32>, i32 -> vector<1x256xf32>
    %c45_332 = arith.constant 45 : index
    %c0_333 = arith.constant 0 : index
    %651 = vector.load %arg6[%c45_332, %c0_333] : memref<98x256xf32, #tpu.memory_space<vmem>>, vector<1x256xf32>
    %652 = arith.mulf %650, %651 : vector<1x256xf32>
    %653 = arith.addf %649, %652 : vector<1x256xf32>
    %c207_i32_334 = arith.constant 207 : i32
    %654 = tpu.dynamic_rotate %465 by %c207_i32_334 dim 1 : vector<1x256xf32>, i32 -> vector<1x256xf32>
    %c46_335 = arith.constant 46 : index
    %c0_336 = arith.constant 0 : index
    %655 = vector.load %arg6[%c46_335, %c0_336] : memref<98x256xf32, #tpu.memory_space<vmem>>, vector<1x256xf32>
    %656 = arith.mulf %654, %655 : vector<1x256xf32>
    %657 = arith.addf %653, %656 : vector<1x256xf32>
    %c206_i32_337 = arith.constant 206 : i32
    %658 = tpu.dynamic_rotate %465 by %c206_i32_337 dim 1 : vector<1x256xf32>, i32 -> vector<1x256xf32>
    %c47_338 = arith.constant 47 : index
    %c0_339 = arith.constant 0 : index
    %659 = vector.load %arg6[%c47_338, %c0_339] : memref<98x256xf32, #tpu.memory_space<vmem>>, vector<1x256xf32>
    %660 = arith.mulf %658, %659 : vector<1x256xf32>
    %661 = arith.addf %657, %660 : vector<1x256xf32>
    %c205_i32_340 = arith.constant 205 : i32
    %662 = tpu.dynamic_rotate %465 by %c205_i32_340 dim 1 : vector<1x256xf32>, i32 -> vector<1x256xf32>
    %c48_341 = arith.constant 48 : index
    %c0_342 = arith.constant 0 : index
    %663 = vector.load %arg6[%c48_341, %c0_342] : memref<98x256xf32, #tpu.memory_space<vmem>>, vector<1x256xf32>
    %664 = arith.mulf %662, %663 : vector<1x256xf32>
    %665 = arith.addf %661, %664 : vector<1x256xf32>
    %c51_i32_343 = arith.constant 51 : i32
    %666 = tpu.dynamic_rotate %469 by %c51_i32_343 dim 1 : vector<1x256xf32>, i32 -> vector<1x256xf32>
    %c49_344 = arith.constant 49 : index
    %c0_345 = arith.constant 0 : index
    %667 = vector.load %arg6[%c49_344, %c0_345] : memref<98x256xf32, #tpu.memory_space<vmem>>, vector<1x256xf32>
    %668 = arith.mulf %666, %667 : vector<1x256xf32>
    %669 = arith.addf %665, %668 : vector<1x256xf32>
    %c50_i32_346 = arith.constant 50 : i32
    %670 = tpu.dynamic_rotate %469 by %c50_i32_346 dim 1 : vector<1x256xf32>, i32 -> vector<1x256xf32>
    %c50_347 = arith.constant 50 : index
    %c0_348 = arith.constant 0 : index
    %671 = vector.load %arg6[%c50_347, %c0_348] : memref<98x256xf32, #tpu.memory_space<vmem>>, vector<1x256xf32>
    %672 = arith.mulf %670, %671 : vector<1x256xf32>
    %673 = arith.addf %669, %672 : vector<1x256xf32>
    %c49_i32_349 = arith.constant 49 : i32
    %674 = tpu.dynamic_rotate %469 by %c49_i32_349 dim 1 : vector<1x256xf32>, i32 -> vector<1x256xf32>
    %c51_350 = arith.constant 51 : index
    %c0_351 = arith.constant 0 : index
    %675 = vector.load %arg6[%c51_350, %c0_351] : memref<98x256xf32, #tpu.memory_space<vmem>>, vector<1x256xf32>
    %676 = arith.mulf %674, %675 : vector<1x256xf32>
    %677 = arith.addf %673, %676 : vector<1x256xf32>
    %c48_i32_352 = arith.constant 48 : i32
    %678 = tpu.dynamic_rotate %469 by %c48_i32_352 dim 1 : vector<1x256xf32>, i32 -> vector<1x256xf32>
    %c52_353 = arith.constant 52 : index
    %c0_354 = arith.constant 0 : index
    %679 = vector.load %arg6[%c52_353, %c0_354] : memref<98x256xf32, #tpu.memory_space<vmem>>, vector<1x256xf32>
    %680 = arith.mulf %678, %679 : vector<1x256xf32>
    %681 = arith.addf %677, %680 : vector<1x256xf32>
    %c47_i32_355 = arith.constant 47 : i32
    %682 = tpu.dynamic_rotate %469 by %c47_i32_355 dim 1 : vector<1x256xf32>, i32 -> vector<1x256xf32>
    %c53_356 = arith.constant 53 : index
    %c0_357 = arith.constant 0 : index
    %683 = vector.load %arg6[%c53_356, %c0_357] : memref<98x256xf32, #tpu.memory_space<vmem>>, vector<1x256xf32>
    %684 = arith.mulf %682, %683 : vector<1x256xf32>
    %685 = arith.addf %681, %684 : vector<1x256xf32>
    %c46_i32_358 = arith.constant 46 : i32
    %686 = tpu.dynamic_rotate %469 by %c46_i32_358 dim 1 : vector<1x256xf32>, i32 -> vector<1x256xf32>
    %c54_359 = arith.constant 54 : index
    %c0_360 = arith.constant 0 : index
    %687 = vector.load %arg6[%c54_359, %c0_360] : memref<98x256xf32, #tpu.memory_space<vmem>>, vector<1x256xf32>
    %688 = arith.mulf %686, %687 : vector<1x256xf32>
    %689 = arith.addf %685, %688 : vector<1x256xf32>
    %c45_i32_361 = arith.constant 45 : i32
    %690 = tpu.dynamic_rotate %469 by %c45_i32_361 dim 1 : vector<1x256xf32>, i32 -> vector<1x256xf32>
    %c55_362 = arith.constant 55 : index
    %c0_363 = arith.constant 0 : index
    %691 = vector.load %arg6[%c55_362, %c0_363] : memref<98x256xf32, #tpu.memory_space<vmem>>, vector<1x256xf32>
    %692 = arith.mulf %690, %691 : vector<1x256xf32>
    %693 = arith.addf %689, %692 : vector<1x256xf32>
    %c35_i32_364 = arith.constant 35 : i32
    %694 = tpu.dynamic_rotate %469 by %c35_i32_364 dim 1 : vector<1x256xf32>, i32 -> vector<1x256xf32>
    %c56_365 = arith.constant 56 : index
    %c0_366 = arith.constant 0 : index
    %695 = vector.load %arg6[%c56_365, %c0_366] : memref<98x256xf32, #tpu.memory_space<vmem>>, vector<1x256xf32>
    %696 = arith.mulf %694, %695 : vector<1x256xf32>
    %697 = arith.addf %693, %696 : vector<1x256xf32>
    %c34_i32_367 = arith.constant 34 : i32
    %698 = tpu.dynamic_rotate %469 by %c34_i32_367 dim 1 : vector<1x256xf32>, i32 -> vector<1x256xf32>
    %c57_368 = arith.constant 57 : index
    %c0_369 = arith.constant 0 : index
    %699 = vector.load %arg6[%c57_368, %c0_369] : memref<98x256xf32, #tpu.memory_space<vmem>>, vector<1x256xf32>
    %700 = arith.mulf %698, %699 : vector<1x256xf32>
    %701 = arith.addf %697, %700 : vector<1x256xf32>
    %c33_i32_370 = arith.constant 33 : i32
    %702 = tpu.dynamic_rotate %469 by %c33_i32_370 dim 1 : vector<1x256xf32>, i32 -> vector<1x256xf32>
    %c58_371 = arith.constant 58 : index
    %c0_372 = arith.constant 0 : index
    %703 = vector.load %arg6[%c58_371, %c0_372] : memref<98x256xf32, #tpu.memory_space<vmem>>, vector<1x256xf32>
    %704 = arith.mulf %702, %703 : vector<1x256xf32>
    %705 = arith.addf %701, %704 : vector<1x256xf32>
    %c32_i32_373 = arith.constant 32 : i32
    %706 = tpu.dynamic_rotate %469 by %c32_i32_373 dim 1 : vector<1x256xf32>, i32 -> vector<1x256xf32>
    %c59_374 = arith.constant 59 : index
    %c0_375 = arith.constant 0 : index
    %707 = vector.load %arg6[%c59_374, %c0_375] : memref<98x256xf32, #tpu.memory_space<vmem>>, vector<1x256xf32>
    %708 = arith.mulf %706, %707 : vector<1x256xf32>
    %709 = arith.addf %705, %708 : vector<1x256xf32>
    %c31_i32_376 = arith.constant 31 : i32
    %710 = tpu.dynamic_rotate %469 by %c31_i32_376 dim 1 : vector<1x256xf32>, i32 -> vector<1x256xf32>
    %c60_377 = arith.constant 60 : index
    %c0_378 = arith.constant 0 : index
    %711 = vector.load %arg6[%c60_377, %c0_378] : memref<98x256xf32, #tpu.memory_space<vmem>>, vector<1x256xf32>
    %712 = arith.mulf %710, %711 : vector<1x256xf32>
    %713 = arith.addf %709, %712 : vector<1x256xf32>
    %c30_i32_379 = arith.constant 30 : i32
    %714 = tpu.dynamic_rotate %469 by %c30_i32_379 dim 1 : vector<1x256xf32>, i32 -> vector<1x256xf32>
    %c61_380 = arith.constant 61 : index
    %c0_381 = arith.constant 0 : index
    %715 = vector.load %arg6[%c61_380, %c0_381] : memref<98x256xf32, #tpu.memory_space<vmem>>, vector<1x256xf32>
    %716 = arith.mulf %714, %715 : vector<1x256xf32>
    %717 = arith.addf %713, %716 : vector<1x256xf32>
    %c29_i32_382 = arith.constant 29 : i32
    %718 = tpu.dynamic_rotate %469 by %c29_i32_382 dim 1 : vector<1x256xf32>, i32 -> vector<1x256xf32>
    %c62_383 = arith.constant 62 : index
    %c0_384 = arith.constant 0 : index
    %719 = vector.load %arg6[%c62_383, %c0_384] : memref<98x256xf32, #tpu.memory_space<vmem>>, vector<1x256xf32>
    %720 = arith.mulf %718, %719 : vector<1x256xf32>
    %721 = arith.addf %717, %720 : vector<1x256xf32>
    %c19_i32_385 = arith.constant 19 : i32
    %722 = tpu.dynamic_rotate %469 by %c19_i32_385 dim 1 : vector<1x256xf32>, i32 -> vector<1x256xf32>
    %c63_386 = arith.constant 63 : index
    %c0_387 = arith.constant 0 : index
    %723 = vector.load %arg6[%c63_386, %c0_387] : memref<98x256xf32, #tpu.memory_space<vmem>>, vector<1x256xf32>
    %724 = arith.mulf %722, %723 : vector<1x256xf32>
    %725 = arith.addf %721, %724 : vector<1x256xf32>
    %c18_i32_388 = arith.constant 18 : i32
    %726 = tpu.dynamic_rotate %469 by %c18_i32_388 dim 1 : vector<1x256xf32>, i32 -> vector<1x256xf32>
    %c64_389 = arith.constant 64 : index
    %c0_390 = arith.constant 0 : index
    %727 = vector.load %arg6[%c64_389, %c0_390] : memref<98x256xf32, #tpu.memory_space<vmem>>, vector<1x256xf32>
    %728 = arith.mulf %726, %727 : vector<1x256xf32>
    %729 = arith.addf %725, %728 : vector<1x256xf32>
    %c17_i32_391 = arith.constant 17 : i32
    %730 = tpu.dynamic_rotate %469 by %c17_i32_391 dim 1 : vector<1x256xf32>, i32 -> vector<1x256xf32>
    %c65_392 = arith.constant 65 : index
    %c0_393 = arith.constant 0 : index
    %731 = vector.load %arg6[%c65_392, %c0_393] : memref<98x256xf32, #tpu.memory_space<vmem>>, vector<1x256xf32>
    %732 = arith.mulf %730, %731 : vector<1x256xf32>
    %733 = arith.addf %729, %732 : vector<1x256xf32>
    %c16_i32_394 = arith.constant 16 : i32
    %734 = tpu.dynamic_rotate %469 by %c16_i32_394 dim 1 : vector<1x256xf32>, i32 -> vector<1x256xf32>
    %c66_395 = arith.constant 66 : index
    %c0_396 = arith.constant 0 : index
    %735 = vector.load %arg6[%c66_395, %c0_396] : memref<98x256xf32, #tpu.memory_space<vmem>>, vector<1x256xf32>
    %736 = arith.mulf %734, %735 : vector<1x256xf32>
    %737 = arith.addf %733, %736 : vector<1x256xf32>
    %c15_i32_397 = arith.constant 15 : i32
    %738 = tpu.dynamic_rotate %469 by %c15_i32_397 dim 1 : vector<1x256xf32>, i32 -> vector<1x256xf32>
    %c67_398 = arith.constant 67 : index
    %c0_399 = arith.constant 0 : index
    %739 = vector.load %arg6[%c67_398, %c0_399] : memref<98x256xf32, #tpu.memory_space<vmem>>, vector<1x256xf32>
    %740 = arith.mulf %738, %739 : vector<1x256xf32>
    %741 = arith.addf %737, %740 : vector<1x256xf32>
    %c14_i32_400 = arith.constant 14 : i32
    %742 = tpu.dynamic_rotate %469 by %c14_i32_400 dim 1 : vector<1x256xf32>, i32 -> vector<1x256xf32>
    %c68_401 = arith.constant 68 : index
    %c0_402 = arith.constant 0 : index
    %743 = vector.load %arg6[%c68_401, %c0_402] : memref<98x256xf32, #tpu.memory_space<vmem>>, vector<1x256xf32>
    %744 = arith.mulf %742, %743 : vector<1x256xf32>
    %745 = arith.addf %741, %744 : vector<1x256xf32>
    %c13_i32_403 = arith.constant 13 : i32
    %746 = tpu.dynamic_rotate %469 by %c13_i32_403 dim 1 : vector<1x256xf32>, i32 -> vector<1x256xf32>
    %c69_404 = arith.constant 69 : index
    %c0_405 = arith.constant 0 : index
    %747 = vector.load %arg6[%c69_404, %c0_405] : memref<98x256xf32, #tpu.memory_space<vmem>>, vector<1x256xf32>
    %748 = arith.mulf %746, %747 : vector<1x256xf32>
    %749 = arith.addf %745, %748 : vector<1x256xf32>
    %c3_i32_406 = arith.constant 3 : i32
    %750 = tpu.dynamic_rotate %469 by %c3_i32_406 dim 1 : vector<1x256xf32>, i32 -> vector<1x256xf32>
    %c70_407 = arith.constant 70 : index
    %c0_408 = arith.constant 0 : index
    %751 = vector.load %arg6[%c70_407, %c0_408] : memref<98x256xf32, #tpu.memory_space<vmem>>, vector<1x256xf32>
    %752 = arith.mulf %750, %751 : vector<1x256xf32>
    %753 = arith.addf %749, %752 : vector<1x256xf32>
    %c2_i32_409 = arith.constant 2 : i32
    %754 = tpu.dynamic_rotate %469 by %c2_i32_409 dim 1 : vector<1x256xf32>, i32 -> vector<1x256xf32>
    %c71_410 = arith.constant 71 : index
    %c0_411 = arith.constant 0 : index
    %755 = vector.load %arg6[%c71_410, %c0_411] : memref<98x256xf32, #tpu.memory_space<vmem>>, vector<1x256xf32>
    %756 = arith.mulf %754, %755 : vector<1x256xf32>
    %757 = arith.addf %753, %756 : vector<1x256xf32>
    %c1_i32_412 = arith.constant 1 : i32
    %758 = tpu.dynamic_rotate %469 by %c1_i32_412 dim 1 : vector<1x256xf32>, i32 -> vector<1x256xf32>
    %c72_413 = arith.constant 72 : index
    %c0_414 = arith.constant 0 : index
    %759 = vector.load %arg6[%c72_413, %c0_414] : memref<98x256xf32, #tpu.memory_space<vmem>>, vector<1x256xf32>
    %760 = arith.mulf %758, %759 : vector<1x256xf32>
    %761 = arith.addf %757, %760 : vector<1x256xf32>
    %c73_415 = arith.constant 73 : index
    %c0_416 = arith.constant 0 : index
    %762 = vector.load %arg6[%c73_415, %c0_416] : memref<98x256xf32, #tpu.memory_space<vmem>>, vector<1x256xf32>
    %763 = arith.mulf %469, %762 : vector<1x256xf32>
    %764 = arith.addf %761, %763 : vector<1x256xf32>
    %c255_i32_417 = arith.constant 255 : i32
    %765 = tpu.dynamic_rotate %469 by %c255_i32_417 dim 1 : vector<1x256xf32>, i32 -> vector<1x256xf32>
    %c74_418 = arith.constant 74 : index
    %c0_419 = arith.constant 0 : index
    %766 = vector.load %arg6[%c74_418, %c0_419] : memref<98x256xf32, #tpu.memory_space<vmem>>, vector<1x256xf32>
    %767 = arith.mulf %765, %766 : vector<1x256xf32>
    %768 = arith.addf %764, %767 : vector<1x256xf32>
    %c254_i32_420 = arith.constant 254 : i32
    %769 = tpu.dynamic_rotate %469 by %c254_i32_420 dim 1 : vector<1x256xf32>, i32 -> vector<1x256xf32>
    %c75_421 = arith.constant 75 : index
    %c0_422 = arith.constant 0 : index
    %770 = vector.load %arg6[%c75_421, %c0_422] : memref<98x256xf32, #tpu.memory_space<vmem>>, vector<1x256xf32>
    %771 = arith.mulf %769, %770 : vector<1x256xf32>
    %772 = arith.addf %768, %771 : vector<1x256xf32>
    %c253_i32_423 = arith.constant 253 : i32
    %773 = tpu.dynamic_rotate %469 by %c253_i32_423 dim 1 : vector<1x256xf32>, i32 -> vector<1x256xf32>
    %c76_424 = arith.constant 76 : index
    %c0_425 = arith.constant 0 : index
    %774 = vector.load %arg6[%c76_424, %c0_425] : memref<98x256xf32, #tpu.memory_space<vmem>>, vector<1x256xf32>
    %775 = arith.mulf %773, %774 : vector<1x256xf32>
    %776 = arith.addf %772, %775 : vector<1x256xf32>
    %c243_i32_426 = arith.constant 243 : i32
    %777 = tpu.dynamic_rotate %469 by %c243_i32_426 dim 1 : vector<1x256xf32>, i32 -> vector<1x256xf32>
    %c77_427 = arith.constant 77 : index
    %c0_428 = arith.constant 0 : index
    %778 = vector.load %arg6[%c77_427, %c0_428] : memref<98x256xf32, #tpu.memory_space<vmem>>, vector<1x256xf32>
    %779 = arith.mulf %777, %778 : vector<1x256xf32>
    %780 = arith.addf %776, %779 : vector<1x256xf32>
    %c242_i32_429 = arith.constant 242 : i32
    %781 = tpu.dynamic_rotate %469 by %c242_i32_429 dim 1 : vector<1x256xf32>, i32 -> vector<1x256xf32>
    %c78_430 = arith.constant 78 : index
    %c0_431 = arith.constant 0 : index
    %782 = vector.load %arg6[%c78_430, %c0_431] : memref<98x256xf32, #tpu.memory_space<vmem>>, vector<1x256xf32>
    %783 = arith.mulf %781, %782 : vector<1x256xf32>
    %784 = arith.addf %780, %783 : vector<1x256xf32>
    %c241_i32_432 = arith.constant 241 : i32
    %785 = tpu.dynamic_rotate %469 by %c241_i32_432 dim 1 : vector<1x256xf32>, i32 -> vector<1x256xf32>
    %c79_433 = arith.constant 79 : index
    %c0_434 = arith.constant 0 : index
    %786 = vector.load %arg6[%c79_433, %c0_434] : memref<98x256xf32, #tpu.memory_space<vmem>>, vector<1x256xf32>
    %787 = arith.mulf %785, %786 : vector<1x256xf32>
    %788 = arith.addf %784, %787 : vector<1x256xf32>
    %c240_i32_435 = arith.constant 240 : i32
    %789 = tpu.dynamic_rotate %469 by %c240_i32_435 dim 1 : vector<1x256xf32>, i32 -> vector<1x256xf32>
    %c80_436 = arith.constant 80 : index
    %c0_437 = arith.constant 0 : index
    %790 = vector.load %arg6[%c80_436, %c0_437] : memref<98x256xf32, #tpu.memory_space<vmem>>, vector<1x256xf32>
    %791 = arith.mulf %789, %790 : vector<1x256xf32>
    %792 = arith.addf %788, %791 : vector<1x256xf32>
    %c239_i32_438 = arith.constant 239 : i32
    %793 = tpu.dynamic_rotate %469 by %c239_i32_438 dim 1 : vector<1x256xf32>, i32 -> vector<1x256xf32>
    %c81_439 = arith.constant 81 : index
    %c0_440 = arith.constant 0 : index
    %794 = vector.load %arg6[%c81_439, %c0_440] : memref<98x256xf32, #tpu.memory_space<vmem>>, vector<1x256xf32>
    %795 = arith.mulf %793, %794 : vector<1x256xf32>
    %796 = arith.addf %792, %795 : vector<1x256xf32>
    %c238_i32_441 = arith.constant 238 : i32
    %797 = tpu.dynamic_rotate %469 by %c238_i32_441 dim 1 : vector<1x256xf32>, i32 -> vector<1x256xf32>
    %c82_442 = arith.constant 82 : index
    %c0_443 = arith.constant 0 : index
    %798 = vector.load %arg6[%c82_442, %c0_443] : memref<98x256xf32, #tpu.memory_space<vmem>>, vector<1x256xf32>
    %799 = arith.mulf %797, %798 : vector<1x256xf32>
    %800 = arith.addf %796, %799 : vector<1x256xf32>
    %c237_i32_444 = arith.constant 237 : i32
    %801 = tpu.dynamic_rotate %469 by %c237_i32_444 dim 1 : vector<1x256xf32>, i32 -> vector<1x256xf32>
    %c83_445 = arith.constant 83 : index
    %c0_446 = arith.constant 0 : index
    %802 = vector.load %arg6[%c83_445, %c0_446] : memref<98x256xf32, #tpu.memory_space<vmem>>, vector<1x256xf32>
    %803 = arith.mulf %801, %802 : vector<1x256xf32>
    %804 = arith.addf %800, %803 : vector<1x256xf32>
    %c227_i32_447 = arith.constant 227 : i32
    %805 = tpu.dynamic_rotate %469 by %c227_i32_447 dim 1 : vector<1x256xf32>, i32 -> vector<1x256xf32>
    %c84_448 = arith.constant 84 : index
    %c0_449 = arith.constant 0 : index
    %806 = vector.load %arg6[%c84_448, %c0_449] : memref<98x256xf32, #tpu.memory_space<vmem>>, vector<1x256xf32>
    %807 = arith.mulf %805, %806 : vector<1x256xf32>
    %808 = arith.addf %804, %807 : vector<1x256xf32>
    %c226_i32_450 = arith.constant 226 : i32
    %809 = tpu.dynamic_rotate %469 by %c226_i32_450 dim 1 : vector<1x256xf32>, i32 -> vector<1x256xf32>
    %c85_451 = arith.constant 85 : index
    %c0_452 = arith.constant 0 : index
    %810 = vector.load %arg6[%c85_451, %c0_452] : memref<98x256xf32, #tpu.memory_space<vmem>>, vector<1x256xf32>
    %811 = arith.mulf %809, %810 : vector<1x256xf32>
    %812 = arith.addf %808, %811 : vector<1x256xf32>
    %c225_i32_453 = arith.constant 225 : i32
    %813 = tpu.dynamic_rotate %469 by %c225_i32_453 dim 1 : vector<1x256xf32>, i32 -> vector<1x256xf32>
    %c86_454 = arith.constant 86 : index
    %c0_455 = arith.constant 0 : index
    %814 = vector.load %arg6[%c86_454, %c0_455] : memref<98x256xf32, #tpu.memory_space<vmem>>, vector<1x256xf32>
    %815 = arith.mulf %813, %814 : vector<1x256xf32>
    %816 = arith.addf %812, %815 : vector<1x256xf32>
    %c224_i32_456 = arith.constant 224 : i32
    %817 = tpu.dynamic_rotate %469 by %c224_i32_456 dim 1 : vector<1x256xf32>, i32 -> vector<1x256xf32>
    %c87_457 = arith.constant 87 : index
    %c0_458 = arith.constant 0 : index
    %818 = vector.load %arg6[%c87_457, %c0_458] : memref<98x256xf32, #tpu.memory_space<vmem>>, vector<1x256xf32>
    %819 = arith.mulf %817, %818 : vector<1x256xf32>
    %820 = arith.addf %816, %819 : vector<1x256xf32>
    %c223_i32_459 = arith.constant 223 : i32
    %821 = tpu.dynamic_rotate %469 by %c223_i32_459 dim 1 : vector<1x256xf32>, i32 -> vector<1x256xf32>
    %c88_460 = arith.constant 88 : index
    %c0_461 = arith.constant 0 : index
    %822 = vector.load %arg6[%c88_460, %c0_461] : memref<98x256xf32, #tpu.memory_space<vmem>>, vector<1x256xf32>
    %823 = arith.mulf %821, %822 : vector<1x256xf32>
    %824 = arith.addf %820, %823 : vector<1x256xf32>
    %c222_i32_462 = arith.constant 222 : i32
    %825 = tpu.dynamic_rotate %469 by %c222_i32_462 dim 1 : vector<1x256xf32>, i32 -> vector<1x256xf32>
    %c89_463 = arith.constant 89 : index
    %c0_464 = arith.constant 0 : index
    %826 = vector.load %arg6[%c89_463, %c0_464] : memref<98x256xf32, #tpu.memory_space<vmem>>, vector<1x256xf32>
    %827 = arith.mulf %825, %826 : vector<1x256xf32>
    %828 = arith.addf %824, %827 : vector<1x256xf32>
    %c221_i32_465 = arith.constant 221 : i32
    %829 = tpu.dynamic_rotate %469 by %c221_i32_465 dim 1 : vector<1x256xf32>, i32 -> vector<1x256xf32>
    %c90_466 = arith.constant 90 : index
    %c0_467 = arith.constant 0 : index
    %830 = vector.load %arg6[%c90_466, %c0_467] : memref<98x256xf32, #tpu.memory_space<vmem>>, vector<1x256xf32>
    %831 = arith.mulf %829, %830 : vector<1x256xf32>
    %832 = arith.addf %828, %831 : vector<1x256xf32>
    %c211_i32_468 = arith.constant 211 : i32
    %833 = tpu.dynamic_rotate %469 by %c211_i32_468 dim 1 : vector<1x256xf32>, i32 -> vector<1x256xf32>
    %c91_469 = arith.constant 91 : index
    %c0_470 = arith.constant 0 : index
    %834 = vector.load %arg6[%c91_469, %c0_470] : memref<98x256xf32, #tpu.memory_space<vmem>>, vector<1x256xf32>
    %835 = arith.mulf %833, %834 : vector<1x256xf32>
    %836 = arith.addf %832, %835 : vector<1x256xf32>
    %c210_i32_471 = arith.constant 210 : i32
    %837 = tpu.dynamic_rotate %469 by %c210_i32_471 dim 1 : vector<1x256xf32>, i32 -> vector<1x256xf32>
    %c92_472 = arith.constant 92 : index
    %c0_473 = arith.constant 0 : index
    %838 = vector.load %arg6[%c92_472, %c0_473] : memref<98x256xf32, #tpu.memory_space<vmem>>, vector<1x256xf32>
    %839 = arith.mulf %837, %838 : vector<1x256xf32>
    %840 = arith.addf %836, %839 : vector<1x256xf32>
    %c209_i32_474 = arith.constant 209 : i32
    %841 = tpu.dynamic_rotate %469 by %c209_i32_474 dim 1 : vector<1x256xf32>, i32 -> vector<1x256xf32>
    %c93_475 = arith.constant 93 : index
    %c0_476 = arith.constant 0 : index
    %842 = vector.load %arg6[%c93_475, %c0_476] : memref<98x256xf32, #tpu.memory_space<vmem>>, vector<1x256xf32>
    %843 = arith.mulf %841, %842 : vector<1x256xf32>
    %844 = arith.addf %840, %843 : vector<1x256xf32>
    %c208_i32_477 = arith.constant 208 : i32
    %845 = tpu.dynamic_rotate %469 by %c208_i32_477 dim 1 : vector<1x256xf32>, i32 -> vector<1x256xf32>
    %c94_478 = arith.constant 94 : index
    %c0_479 = arith.constant 0 : index
    %846 = vector.load %arg6[%c94_478, %c0_479] : memref<98x256xf32, #tpu.memory_space<vmem>>, vector<1x256xf32>
    %847 = arith.mulf %845, %846 : vector<1x256xf32>
    %848 = arith.addf %844, %847 : vector<1x256xf32>
    %c207_i32_480 = arith.constant 207 : i32
    %849 = tpu.dynamic_rotate %469 by %c207_i32_480 dim 1 : vector<1x256xf32>, i32 -> vector<1x256xf32>
    %c95_481 = arith.constant 95 : index
    %c0_482 = arith.constant 0 : index
    %850 = vector.load %arg6[%c95_481, %c0_482] : memref<98x256xf32, #tpu.memory_space<vmem>>, vector<1x256xf32>
    %851 = arith.mulf %849, %850 : vector<1x256xf32>
    %852 = arith.addf %848, %851 : vector<1x256xf32>
    %c206_i32_483 = arith.constant 206 : i32
    %853 = tpu.dynamic_rotate %469 by %c206_i32_483 dim 1 : vector<1x256xf32>, i32 -> vector<1x256xf32>
    %c96_484 = arith.constant 96 : index
    %c0_485 = arith.constant 0 : index
    %854 = vector.load %arg6[%c96_484, %c0_485] : memref<98x256xf32, #tpu.memory_space<vmem>>, vector<1x256xf32>
    %855 = arith.mulf %853, %854 : vector<1x256xf32>
    %856 = arith.addf %852, %855 : vector<1x256xf32>
    %c205_i32_486 = arith.constant 205 : i32
    %857 = tpu.dynamic_rotate %469 by %c205_i32_486 dim 1 : vector<1x256xf32>, i32 -> vector<1x256xf32>
    %c97_487 = arith.constant 97 : index
    %c0_488 = arith.constant 0 : index
    %858 = vector.load %arg6[%c97_487, %c0_488] : memref<98x256xf32, #tpu.memory_space<vmem>>, vector<1x256xf32>
    %859 = arith.mulf %857, %858 : vector<1x256xf32>
    %860 = arith.addf %856, %859 : vector<1x256xf32>
    %c1_489 = arith.constant 1 : index
    %c0_490 = arith.constant 0 : index
    %c0_491 = arith.constant 0 : index
    %861 = vector.load %arg8[%c1_489, %c0_490, %c0_491] : memref<2x1x256xf32, #tpu.memory_space<vmem>>, vector<1x1x256xf32>
    %862 = vector.shape_cast %861 : vector<1x1x256xf32> to vector<1x256xf32>
    %863 = vector.shape_cast %860 : vector<1x256xf32> to vector<1x1x256xf32>
    tpu.vector_store %arg8[%c1_489, %c0_490, %c0_491], %863 {strides = array<i32>} : memref<2x1x256xf32, #tpu.memory_space<vmem>>, vector<1x1x256xf32>,
    return
  }
  func.func @transform_0(%arg0: i32) -> (i32, i32, i32) {
    %c0_i32 = arith.constant 0 : i32
    %c0_i32_0 = arith.constant 0 : i32
    %c0_i32_1 = arith.constant 0 : i32
    return %arg0, %c0_i32, %c0_i32_0 : i32, i32, i32
  }
  func.func @transform_1(%arg0: i32) -> (i32, i32) {
    %c0_i32 = arith.constant 0 : i32
    %c0_i32_0 = arith.constant 0 : i32
    %c0_i32_1 = arith.constant 0 : i32
    return %c0_i32, %c0_i32_0 : i32, i32
  }
  func.func @transform_2(%arg0: i32) -> (i32, i32) {
    %c0_i32 = arith.constant 0 : i32
    %c0_i32_0 = arith.constant 0 : i32
    %c0_i32_1 = arith.constant 0 : i32
    return %c0_i32, %c0_i32_0 : i32, i32
  }
  func.func @transform_3(%arg0: i32) -> (i32, i32) {
    %c0_i32 = arith.constant 0 : i32
    %c0_i32_0 = arith.constant 0 : i32
    %c0_i32_1 = arith.constant 0 : i32
    return %c0_i32, %c0_i32_0 : i32, i32
  }
  func.func @transform_4(%arg0: i32) -> (i32, i32) {
    %c0_i32 = arith.constant 0 : i32
    %c0_i32_0 = arith.constant 0 : i32
    %c0_i32_1 = arith.constant 0 : i32
    return %c0_i32, %c0_i32_0 : i32, i32
  }
  func.func @transform_5(%arg0: i32) -> (i32, i32) {
    %c0_i32 = arith.constant 0 : i32
    %c0_i32_0 = arith.constant 0 : i32
    %c0_i32_1 = arith.constant 0 : i32
    return %c0_i32, %c0_i32_0 : i32, i32
  }
  func.func @transform_6(%arg0: i32) -> (i32, i32, i32) {
    %c0_i32 = arith.constant 0 : i32
    %c0_i32_0 = arith.constant 0 : i32
    %c0_i32_1 = arith.constant 0 : i32
    return %arg0, %c0_i32, %c0_i32_0 : i32, i32, i32
  }
  func.func @transform_7(%arg0: i32) -> (i32, i32, i32) {
    %c0_i32 = arith.constant 0 : i32
    %c0_i32_0 = arith.constant 0 : i32
    %c0_i32_1 = arith.constant 0 : i32
    return %arg0, %c0_i32, %c0_i32_0 : i32, i32, i32
  }
}

</mosaic_0001>

<bundles_post_ra>
// kernel: mul.7
= control target key start
LH: loop header
LB: loop body
LE: loop exit
PB: predicated region body
PF: predicated region fallthrough
CT: control target
= control target key end

     0   :  { %s115_s10 = smov 91   ;;  %s116_s11 = smov 77   ;;  %vm3_vm0 = vcmask 56320   ;;  %vm9_vm1 = vcmask 802520   ;;  %vm15_vm2 = vcmask 745120   ;;  %vm21_vm3 = vcmask 687720   ;;  %s183_s0 = inlined_call_operand.vmem [shape: f32[1,2,7,7], index: 0, kind: input, shape index: {}]   ;;  %s184_s1 = inlined_call_operand.vmem [shape: f32[98], index: 1, kind: output, shape index: {}]  }
   0x1   :  { %v89_v0 = vld [vmem:[%s183_s0 + $0xe] sm:$0x1]   ;;  %v91_v1 = vld [vmem:[%s183_s0 + $0xc] sm:$0x1]   ;;  %v93_v2 = vld [vmem:[%s183_s0 + $0xa] sm:$0x1]  }
   0x2   :  { %7 = vrot.lane.b32.xlu0 %v89_v0, %s115_s10  ;;  %19 = vrot.lane.b32.xlu1 %v91_v1, %s116_s11  ;;  %s117_s14 = smov 63   ;;  %v90_v3 = vld [vmem:[%s183_s0 + $0xd] sm:$0x1]   ;;  %v92_v4 = vld [vmem:[%s183_s0 + $0xb] sm:$0x1]   ;;  %s118_s19 = smov 84  }
   0x3   :  { %31 = vrot.lane.b32.xlu2 %v93_v2, %s117_s14  ;;  %s119_s20 = smov 70   ;;  %v94_v5 = vld [vmem:[%s183_s0 + $0x9] sm:$0x1]   ;;  %s120_s23 = smov 56   ;;  %v95_v6 = vld [vmem:[%s183_s0 + $0x8] sm:$0x1]  }
   0x4   :  { %v96_v7 = vld [vmem:[%s183_s0 + $0x6] sm:$0x1]   ;;  %s121_s28 = smov 49   ;;  %s122_s29 = smov 42   ;;  %v97_v8 = vld [vmem:[%s183_s0 + $0x5] sm:$0x1]  }
   0x5   :  { %s123_s3 = smov 35   ;;  %v98_v9 = vld [vmem:[%s183_s0 + $0x4] sm:$0x1]   ;;  %v99_v10 = vld [vmem:[%s183_s0 + $0x3] sm:$0x1]   ;;  %s124_s8 = smov 28  }
   0x6   :  { %s125_s9 = smov 21   ;;  %v100_v11 = vld [vmem:[%s183_s0 + $0x2] sm:$0x1]   ;;  %s126_s12 = smov 14   ;;  %v101_v12 = vld [vmem:[%s183_s0 + $0x1] sm:$0x1]  }
   0x7   :  { %s127_s15 = smov 7   ;;  %v2_v13 = vld [vmem:[%s183_s0] sm:$0x1]   ;;  %vm27_vm4 = vcmask 630320   ;;  %vm33_vm5 = vcmask 572920   ;;  %vm39_vm6 = vcmask 515520  }
   0x8   :  { %4 = vst.msk [vmem:[#allocation0] sm:$0x1] %vm3_vm0, %v2_v13   ;;  %vm45_vm7 = vcmask 458120   ;;  %vm51_vm8 = vcmask 400720   ;;  %vm57_vm9 = vcmask 343320   ;;  %vm63_vm10 = vcmask 285920  }
   0x9   :  { %vm69_vm11 = vcmask 228520   ;;  %vm75_vm12 = vcmask 171120   ;;  %vm81_vm13 = vcmask 113720  }
   0xa   :  { %13 = vrot.lane.b32.xlu0 %v90_v3, %s118_s19  ;;  %25 = vrot.lane.b32.xlu1 %v92_v4, %s119_s20 }
   0xb   :  { %37 = vrot.lane.b32.xlu2 %v94_v5, %s120_s23 }
  0x12   :  { %43 = vrot.lane.b32.xlu0 %v95_v6, %s121_s28  ;;  %49 = vrot.lane.b32.xlu1 %v96_v7, %s122_s29 }
  0x13   :  { %55 = vrot.lane.b32.xlu2 %v97_v8, %s123_s3 }
  0x1a   :  { %61 = vrot.lane.b32.xlu0 %v98_v9, %s124_s8  ;;  %67 = vrot.lane.b32.xlu1 %v99_v10, %s125_s9 }
  0x1b   :  { %73 = vrot.lane.b32.xlu2 %v100_v11, %s126_s12 }
  0x22   :  { %79 = vrot.lane.b32.xlu0 %v101_v12, %s127_s15 }
  0x5d   :  { %v32_v14 = vpop.permute.xlu2 %31  }
  0x65   :  { %v38_v15 = vpop.permute.xlu2 %37  }
  0x6d   :  { %v56_v16 = vpop.permute.xlu2 %55  }
  0x74   :  { %v8_v17 = vpop.permute.xlu0 %7   ;;  %v20_v18 = vpop.permute.xlu1 %19  }
  0x75   :  { %10 = vst.msk [vmem:[#allocation0] sm:$0x1] %vm9_vm1, %v8_v17   ;;  %v74_v19 = vpop.permute.xlu2 %73  }
  0x7c   :  { %v14_v20 = vpop.permute.xlu0 %13   ;;  %v26_v21 = vpop.permute.xlu1 %25  }
  0x7d   :  { %16 = vst.msk [vmem:[#allocation0] sm:$0x1] %vm15_vm2, %v14_v20  }
  0x7e   :  { %22 = vst.msk [vmem:[#allocation0] sm:$0x1] %vm21_vm3, %v20_v18  }
  0x7f   :  { %28 = vst.msk [vmem:[#allocation0] sm:$0x1] %vm27_vm4, %v26_v21  }
  0x80   :  { %34 = vst.msk [vmem:[#allocation0] sm:$0x1] %vm33_vm5, %v32_v14  }
  0x81   :  { %40 = vst.msk [vmem:[#allocation0] sm:$0x1] %vm39_vm6, %v38_v15  }
  0x84   :  { %v44_v22 = vpop.permute.xlu0 %43   ;;  %v50_v23 = vpop.permute.xlu1 %49  }
  0x85   :  { %46 = vst.msk [vmem:[#allocation0] sm:$0x1] %vm45_vm7, %v44_v22  }
  0x86   :  { %52 = vst.msk [vmem:[#allocation0] sm:$0x1] %vm51_vm8, %v50_v23  }
  0x87   :  { %58 = vst.msk [vmem:[#allocation0] sm:$0x1] %vm57_vm9, %v56_v16  }
  0x8c   :  { %v62_v24 = vpop.permute.xlu0 %61   ;;  %v68_v25 = vpop.permute.xlu1 %67  }
  0x8d   :  { %64 = vst.msk [vmem:[#allocation0] sm:$0x1] %vm63_vm10, %v62_v24  }
  0x8e   :  { %70 = vst.msk [vmem:[#allocation0] sm:$0x1] %vm69_vm11, %v68_v25  }
  0x8f   :  { %76 = vst.msk [vmem:[#allocation0] sm:$0x1] %vm75_vm12, %v74_v19  }
  0x94   :  { %v80_v26 = vpop.permute.xlu0 %79  }
  0x95   :  { %82 = vst.msk [vmem:[#allocation0] sm:$0x1] %vm81_vm13, %v80_v26  }
  0x9c   :  { %v85_v27 = vld [vmem:[#allocation0] sm:$0x1] }
  0x9d   :  { %88 = vst [vmem:[%s184_s1] sm:$0x1] %v85_v27 }

// kernel: cbam_forward.3
= control target key start
LH: loop header
LB: loop body
LE: loop exit
PB: predicated region body
PF: predicated region fallthrough
CT: control target
= control target key end

     0   :  { %8 = vsyncpa [#allocation3], 0  ;;  %s150_s15 = smov [#allocation2]   ;;  %s228_s0 = inlined_call_operand.vmem [shape: f32[2,16,256], index: 0, kind: input, shape index: {}]   ;;  %s229_s1 = inlined_call_operand.vmem [shape: f32[2,1,256], index: 1, kind: input, shape index: {}]   ;;  %s230_s2 = inlined_call_operand.vmem [shape: f32[2], index: 2, kind: input, shape index: {}]   ;;  %s231_s3 = inlined_call_operand.vmem [shape: f32[2,16,256], index: 3, kind: output, shape index: {}]  }
   0x1   :  { %s18_s14 = sshll.u32 %s230_s2, 4  ;;  %s19_s14 = int_to_ptr.vmem [resolvable:$true] %s18_s14 }
   0x2   :  { %21 = dma.vmem_to_smem %s19_s14, 16, %s150_s15, [#allocation3]  }
   0x3   :  { %148 = dma.done.wait [#allocation3], 16  }
   0x4   :  { %149 = vsyncadd [#allocation3], 4294967280 }
   0x5   :  { %26 = sfence }
   0x6   :  { %s27_s16 = sld [smem:[#allocation2]]  ;;  %v29_v0 = vld [vmem:[%s229_s1] sm:$0x3]  ;;  %v118_v1 = vld [vmem:[%s229_s1 + $0x2] sm:$0x3]  ;;  %v54_v35 = vld [vmem:[%s228_s0 + $0x8] sm:$0xff] }
   0x7   :  { %s117_s17 = sld [smem:[#allocation2 + $0x1]]  ;;  %v53_v34 = vld [vmem:[%s228_s0] sm:$0xff]  ;;  %v55_v36 = vld [vmem:[%s228_s0 + $0x10] sm:$0xff]  ;;  %v56_v40 = vld [vmem:[%s228_s0 + $0x18] sm:$0xff] }
   0x8   :  { %v119_v42 = vld [vmem:[%s228_s0 + $0x20] sm:$0xff]  ;;  %v120_v48 = vld [vmem:[%s228_s0 + $0x28] sm:$0xff]  ;;  %v121_v50 = vld [vmem:[%s228_s0 + $0x30] sm:$0xff] }
   0x9   :  { %v122_v52 = vld [vmem:[%s228_s0 + $0x38] sm:$0xff] }
   0xc   :  { %v30_v2 = vstv %s27_s16 }
   0xd   :  { %v31_v3 = vmul.f32 %v30_v2, %v29_v0  ;;  %v32_v4 = vstv %s117_s17  ;;  %v72_v5 = vmul.f32 %v118_v1, %v30_v2 }
   0xf   :  { %v33_v6 = vadd.f32 %v32_v4, %v31_v3  ;;  %v73_v7 = vadd.f32 %v72_v5, %v32_v4 }
  0x11   :  { %v34_v8 = vsub.f32 0.0, %v33_v6  ;;  %v74_v9 = vsub.f32 0.0, %v73_v7 }
  0x13   :  { %v35_v10 = vmul.f32 1.442695, %v34_v8  ;;  %v75_v11 = vmul.f32 1.442695, %v74_v9 }
  0x15   :  { %128 = vpow2.f32 %v35_v10 }
  0x16   :  { %130 = vpow2.f32 %v75_v11 }
  0x1b   :  { %v129_v12 = vpop.eup %128 }
  0x1c   :  { %v131_v13 = vpop.eup %130  ;;  %v37_v14 = vadd.f32 1.0, %v129_v12 }
  0x1d   :  { %v77_v15 = vadd.f32 1.0, %v131_v13 }
  0x1e   :  { %132 = vrcp.f32 %v37_v14  ;;  %vm43_vm0 = vweird.f32 %v37_v14  ;;  %v49_v19 = vand.u32 2147483648, %v37_v14  ;;  %v47_v22 = vand.u32 2147483647, %v37_v14 }
  0x1f   :  { %134 = vrcp.f32 %v77_v15  ;;  %v89_v23 = vand.u32 2147483648, %v77_v15  ;;  %vm83_vm2 = vweird.f32 %v77_v15  ;;  %v87_v25 = vand.u32 2147483647, %v77_v15 }
  0x20   :  { %v50_v27 = vor.u32 1.1754944e-38, %v49_v19  ;;  %vm48_vm5 = vcmp.eq.f32.partialorder %v47_v22, 8.507059e+37 }
  0x21   :  { %v90_v30 = vor.u32 1.1754944e-38, %v89_v23  ;;  %vm88_vm7 = vcmp.eq.f32.partialorder %v87_v25, 8.507059e+37 }
  0x24   :  { %v133_v16 = vpop.eup %132 }
  0x25   :  { %v135_v17 = vpop.eup %134  ;;  %v39_v18 = vmul.f32 %v133_v16, %v37_v14  ;;  %vm44_vm1 = vweird.f32 %v133_v16 }
  0x26   :  { %v79_v20 = vmul.f32 %v135_v17, %v77_v15  ;;  %vm84_vm3 = vweird.f32 %v135_v17  ;;  %vm45_vm4 = vmor %vm43_vm0, %vm44_vm1 }
  0x27   :  { %v40_v21 = vsub.f32 1.0, %v39_v18  ;;  %vm85_vm6 = vmor %vm83_vm2, %vm84_vm3 }
  0x28   :  { %v80_v24 = vsub.f32 1.0, %v79_v20 }
  0x29   :  { %v41_v26 = vmul.f32 %v133_v16, %v40_v21 }
  0x2a   :  { %v81_v28 = vmul.f32 %v135_v17, %v80_v24 }
  0x2b   :  { %v42_v29 = vadd.f32 %v133_v16, %v41_v26 }
  0x2c   :  { %v82_v31 = vadd.f32 %v135_v17, %v81_v28 }
  0x2d   :  { %v46_v32 = vsel %vm45_vm4, %v133_v16, %v42_v29 }
  0x2e   :  { %v51_v33 = vsel %vm48_vm5, %v50_v27, %v46_v32  ;;  %v86_v37 = vsel %vm85_vm6, %v135_v17, %v82_v31 }
  0x2f   :  { %v58_v38 = vperm.slane %v51_v33, 0  ;;  %v59_v39 = vperm.slane %v51_v33, 1  ;;  %v91_v41 = vsel %vm88_vm7, %v90_v30, %v86_v37 }
  0x30   :  { %v99_v43 = vperm.slane %v91_v41, 0  ;;  %v100_v44 = vperm.slane %v91_v41, 1 }
  0x31   :  { %v62_v45 = vmul.f32 %v58_v38, %v53_v34  ;;  %v63_v46 = vmul.f32 %v59_v39, %v54_v35  ;;  %v64_v47 = vmul.f32 %v58_v38, %v55_v36  ;;  %v65_v49 = vmul.f32 %v59_v39, %v56_v40 }
  0x32   :  { %v103_v51 = vmul.f32 %v119_v42, %v99_v43  ;;  %v104_v53 = vmul.f32 %v120_v48, %v100_v44  ;;  %v105_v54 = vmul.f32 %v121_v50, %v99_v43  ;;  %v106_v55 = vmul.f32 %v122_v52, %v100_v44 }
  0x33   :  { %66 = vst [vmem:[%s231_s3] sm:$0xff] %v62_v45 }
  0x34   :  { %67 = vst [vmem:[%s231_s3 + $0x8] sm:$0xff] %v63_v46 }
  0x35   :  { %68 = vst [vmem:[%s231_s3 + $0x10] sm:$0xff] %v64_v47 }
  0x36   :  { %69 = vst [vmem:[%s231_s3 + $0x18] sm:$0xff] %v65_v49 }
  0x37   :  { %123 = vst [vmem:[%s231_s3 + $0x20] sm:$0xff] %v103_v51 }
  0x38   :  { %124 = vst [vmem:[%s231_s3 + $0x28] sm:$0xff] %v104_v53 }
  0x39   :  { %125 = vst [vmem:[%s231_s3 + $0x30] sm:$0xff] %v105_v54 }
  0x3a   :  { %126 = vst [vmem:[%s231_s3 + $0x38] sm:$0xff] %v106_v55 }
  0x3b   :  { %116 = vsyncpa [#allocation3], 1 }

// kernel: cbam_forward.2
= control target key start
LH: loop header
LB: loop body
LE: loop exit
PB: predicated region body
PF: predicated region fallthrough
CT: control target
= control target key end

     0   :  { %v3905_v17 = vmov 0   ;;  %vm62_vm0 = vcmask 7168   ;;  %vm68_vm1 = vcmask 23552   ;;  %vm65_vm2 = vcmask 15360   ;;  %s7723_s10 = smov 50   ;;  %s7638_s11 = smov 48   ;;  %s7551_s0 = inlined_call_operand.vmem [shape: f32[2,16,256], index: 0, kind: input, shape index: {}]   ;;  %s7552_s2 = inlined_call_operand.vmem [shape: f32[4,1], index: 2, kind: input, shape index: {}]   ;;  %s7553_s1 = inlined_call_operand.vmem [shape: f32[4,16], index: 1, kind: input, shape index: {}]   ;;  %s7554_s3 = inlined_call_operand.vmem [shape: f32[16,4], index: 3, kind: input, shape index: {}]   ;;  %s7555_s4 = inlined_call_operand.vmem [shape: f32[16,1], index: 4, kind: input, shape index: {}]   ;;  %s7556_s6 = inlined_call_operand.vmem [shape: f32[2,16,256], index: 6, kind: output, shape index: {0}]   ;;  %s7557_s5 = inlined_call_operand.vmem [shape: f32[98,256], index: 5, kind: input, shape index: {}]   ;;  %s7558_s7 = inlined_call_operand.vmem [shape: f32[2,1,256], index: 7, kind: output, shape index: {1}]  }
   0x1   :  { %7803 = sst [smem:[#allocation63_spill]] %s7558_s7  ;;  %v3997_v0 = vld [vmem:[%s7551_s0] sm:$0xff]  ;;  %v4002_v1 = vld [vmem:[%s7551_s0 + $0x8] sm:$0xff]  ;;  %v4023_v7 = vld [vmem:[%s7551_s0 + $0x10] sm:$0xff]  ;;  %3886 = vset.pattern.permute.xlu2 %v3905_v17  ;;  %3888 = vset.pattern.permute.xlu1 %v3905_v17  ;;  %vm78_vm3 = vcmask 130048   ;;  %vm112_vm4 = vcmask 1043456  }
   0x2   :  { %v4007_v2 = vld [vmem:[%s7551_s0 + $0x20] sm:$0xff]  ;;  %v37_v3 = vmax.f32 %v3997_v0, %v4002_v1  ;;  %v29_v4 = vadd.f32 %v4002_v1, %v3997_v0  ;;  %v4016_v5 = vld [vmem:[%s7551_s0 + $0x28] sm:$0xff]  ;;  %v4028_v8 = vld [vmem:[%s7551_s0 + $0x18] sm:$0xff]  ;;  %3887 = vset.pattern.permute.xlu0 %v3905_v17  ;;  %vm105_vm5 = vcmask 31744   ;;  %s7697_s12 = smov 51   ;;  %s7762_s13 = smov 49  }
   0x3   :  { %v48_v6 = vadd.f32 %v4016_v5, %v4007_v2  ;;  %v4033_v9 = vld [vmem:[%s7551_s0 + $0x30] sm:$0xff]  ;;  %v4038_v10 = vld [vmem:[%s7551_s0 + $0x38] sm:$0xff]  ;;  %v40_v11 = vmax.f32 %v4023_v7, %v4028_v8  ;;  %v32_v12 = vadd.f32 %v4028_v8, %v4023_v7  ;;  %v56_v15 = vmax.f32 %v4007_v2, %v4016_v5  ;;  %v72_v16 = vld [vmem:[%s7552_s2] sm:$0xf]  ;;  %s7739_s14 = smov 47   ;;  %s7712_s15 = smov 45  }
   0x4   :  { %38 = vmax.xlane.f32.xlu1 %v37_v3  ;;  %30 = vadd.xlane.f32.xlu0 %v29_v4  ;;  %v51_v13 = vadd.f32 %v4038_v10, %v4033_v9  ;;  %v59_v14 = vmax.f32 %v4033_v9, %v4038_v10  ;;  %v71_v35 = vld [vmem:[%s7553_s1] sm:$0xf]  ;;  %v104_v42 = vld [vmem:[%s7554_s3 + $0x8] sm:$0xff]  ;;  %s7559_s1 = smov 126   ;;  %s7705_s16 = smov 46  }
   0x5   :  { %49 = vadd.xlane.f32.xlu2 %v48_v6  ;;  %v103_v41 = vld [vmem:[%s7554_s3] sm:$0xff]  ;;  %v146_v51 = vld [vmem:[%s7555_s4 + $0x8] sm:$0xff]  ;;  %s7710_s0 = smov 35   ;;  %s7699_s17 = smov 33  }
   0x6   :  { %v148_v52 = vmul.f32 2.0, %v146_v51  ;;  %v145_v6 = vld [vmem:[%s7555_s4] sm:$0xff]  ;;  %s7688_s21 = smov 34   ;;  %s7692_s22 = smov 32  }
   0x7   :  { %s7685_s4 = smov 30   ;;  %s7644_s26 = smov 31  }
   0x8   :  { %s7647_s27 = smov 29   ;;  %s7642_s28 = smov 19  }
   0x9   :  { %s7636_s29 = smov 17   ;;  %s7673_s30 = smov 15  }
   0xa   :  { %s7671_s8 = smov 16   ;;  %s7649_s9 = smov 14  }
   0xb   :  { %s7677_s2 = smov 3   ;;  %s7675_s18 = smov 13  }
   0xc   :  { %41 = vmax.xlane.f32.xlu1 %v40_v11  ;;  %33 = vadd.xlane.f32.xlu0 %v32_v12  ;;  %s7563_s19 = smov 2   ;;  %s7569_s20 = smov 127  }
   0xd   :  { %52 = vadd.xlane.f32.xlu2 %v51_v13  ;;  %v147_v13 = vmul.f32 2.0, %v145_v6  ;;  %s7561_s3 = smov 1   ;;  %s7575_s23 = smov 115  }
   0xe   :  { %s7567_s24 = smov 125   ;;  %s7565_s25 = smov 114  }
  0x14   :  { %60 = vmax.xlane.f32.xlu1 %v59_v14  ;;  %57 = vmax.xlane.f32.xlu0 %v56_v15 }
  0x25   :  { %75 = vperm.xlu2 %3886, %v72_v16  }
  0x77   :  { %v39_v18 = vpop.xlane.xlu1 %38  ;;  %v31_v19 = vpop.xlane.xlu0 %30 }
  0x78   :  { %v50_v20 = vpop.xlane.xlu2 %49  ;;  %v35_v25 = vmul.f32 0.00390625, %v31_v19 }
  0x79   :  { %v54_v28 = vmul.f32 0.00390625, %v50_v20 }
  0x7a   :  { %v63_v29 = vsel %vm62_vm0, %v35_v25, %v39_v18 }
  0x7b   :  { %v66_v34 = vsel %vm65_vm2, %v63_v29, %v54_v28 }
  0x7f   :  { %v42_v21 = vpop.xlane.xlu1 %41  ;;  %v34_v22 = vpop.xlane.xlu0 %33 }
  0x80   :  { %v36_v23 = vmul.f32 0.00390625, %v34_v22  ;;  %v53_v24 = vpop.xlane.xlu2 %52 }
  0x81   :  { %v55_v26 = vmul.f32 0.00390625, %v53_v24 }
  0x82   :  { %v64_v27 = vsel %vm62_vm0, %v36_v23, %v42_v21 }
  0x83   :  { %v67_v32 = vsel %vm65_vm2, %v64_v27, %v55_v26 }
  0x87   :  { %v61_v30 = vpop.xlane.xlu1 %60  ;;  %v58_v31 = vpop.xlane.xlu0 %57 }
  0x88   :  { %v70_v33 = vsel %vm68_vm1, %v67_v32, %v61_v30  ;;  %v69_v36 = vsel %vm68_vm1, %v66_v34, %v58_v31  ;;  %v76_v37 = vpop.permute.xlu2 %75 }
  0x89   :  { %96 = vmatpush.msra.mxu0 %v70_v33 }
  0x8b   :  { %97 = vmatpush.msra.mxu0 %v69_v36 }
  0x8c   :  { %3633 = vmatmul.msk.f32.vlgmr.msra.gmra.mxu0 %vm78_vm3, %v71_v35 }
 0x109   :  { %v99_v38 = vpop.f32.mrf.mxu0 }
 0x10a   :  { %v100_v39 = vadd.f32 %v99_v38, %v76_v37 }
 0x10c   :  { %v102_v40 = vmax.f32 %v100_v39, 0.0 }
 0x10e   :  { %3634 = vmatpush.msk.msra.mxu1 %vm112_vm4, %v102_v40  ;;  %3836 = vmatpush.msk.msra.mxu2 %vm112_vm4, %v102_v40 }
 0x10f   :  { %3635 = vmatmul.msk.f32.vlgmr.msra.gmra.mxu1 %vm105_vm5, %v103_v41  ;;  %3636 = vmatmul.msk.f32.vlgmr.msra.gmra.mxu2 %vm105_vm5, %v104_v42 }
 0x18c   :  { %v133_v43 = vpop.f32.mrf.mxu1 }
 0x18d   :  { %1953 = vrot.lane.b32.xlu0 %v133_v43, %s7559_s1  ;;  %v139_v46 = vsel %vm65_vm2, %v133_v43, 0.0 }
 0x192   :  { %v136_v44 = vpop.f32.mrf.mxu2 }
 0x193   :  { %1955 = vrot.lane.b32.xlu2 %v136_v44, %s7559_s1  ;;  %v142_v45 = vsel %vm65_vm2, %v136_v44, 0.0 }
 0x194   :  { %143 = vadd.xlane.f32.xlu1 %v142_v45 }
 0x1b7   :  { %140 = vadd.xlane.f32.xlu0 %v139_v46 }
 0x1ed   :  { %v1956_v47 = vpop.permute.xlu2 %1955 }
 0x1ee   :  { %v1962_v48 = vsel %vm65_vm2, %v1956_v47, 0.0 }
 0x1ef   :  { %1963 = vadd.xlane.f32.xlu0 %v1962_v48 }
 0x1ff   :  { %v1954_v49 = vpop.permute.xlu0 %1953 }
 0x200   :  { %v1959_v50 = vsel %vm65_vm2, %v1954_v49, 0.0 }
 0x201   :  { %1960 = vadd.xlane.f32.xlu1 %v1959_v50 }
 0x207   :  { %v144_v53 = vpop.xlane.xlu1 %143 }
 0x208   :  { %v150_v54 = vadd.f32 %v148_v52, %v144_v53 }
 0x20a   :  { %v152_v55 = vsub.f32 0.0, %v150_v54 }
 0x20c   :  { %v155_v56 = vmul.f32 1.442695, %v152_v55 }
 0x20e   :  { %3889 = vpow2.f32 %v155_v56 }
 0x214   :  { %v3890_v57 = vpop.eup %3889 }
 0x215   :  { %v158_v58 = vadd.f32 1.0, %v3890_v57 }
 0x217   :  { %3891 = vrcp.f32 %v158_v58  ;;  %v185_v61 = vand.u32 2147483648, %v158_v58  ;;  %vm179_vm6 = vweird.f32 %v158_v58  ;;  %v183_v63 = vand.u32 2147483647, %v158_v58 }
 0x219   :  { %v186_v4 = vor.u32 1.1754944e-38, %v185_v61  ;;  %vm184_vm9 = vcmp.eq.f32.partialorder %v183_v63, 8.507059e+37 }
 0x21d   :  { %v3892_v59 = vpop.eup %3891 }
 0x21e   :  { %v175_v60 = vmul.f32 %v3892_v59, %v158_v58  ;;  %vm180_vm7 = vweird.f32 %v3892_v59 }
 0x21f   :  { %vm181_vm8 = vmor %vm179_vm6, %vm180_vm7 }
 0x220   :  { %v176_v62 = vsub.f32 1.0, %v175_v60 }
 0x222   :  { %v177_v3 = vmul.f32 %v3892_v59, %v176_v62 }
 0x224   :  { %v178_v11 = vadd.f32 %v3892_v59, %v177_v3 }
 0x226   :  { %v182_v12 = vsel %vm181_vm8, %v3892_v59, %v178_v11 }
 0x227   :  { %v187_v14 = vsel %vm184_vm9, %v186_v4, %v182_v12 }
 0x228   :  { %196 = vperm.xlu1 %3888, %v187_v14  }
 0x22a   :  { %v141_v15 = vpop.xlane.xlu0 %140 }
 0x22b   :  { %v149_v16 = vadd.f32 %v147_v13, %v141_v15 }
 0x22d   :  { %v151_v17 = vsub.f32 0.0, %v149_v16 }
 0x22f   :  { %v153_v18 = vmul.f32 1.442695, %v151_v17 }
 0x231   :  { %3893 = vpow2.f32 %v153_v18 }
 0x237   :  { %v3894_v19 = vpop.eup %3893 }
 0x238   :  { %v157_v20 = vadd.f32 1.0, %v3894_v19 }
 0x23a   :  { %3895 = vrcp.f32 %v157_v20  ;;  %v170_v24 = vand.u32 2147483648, %v157_v20  ;;  %v168_v26 = vand.u32 2147483647, %v157_v20  ;;  %vm164_vm11 = vweird.f32 %v157_v20 }
 0x23c   :  { %v171_v28 = vor.u32 1.1754944e-38, %v170_v24  ;;  %vm169_vm13 = vcmp.eq.f32.partialorder %v168_v26, 8.507059e+37 }
 0x240   :  { %v3896_v21 = vpop.eup %3895 }
 0x241   :  { %v160_v22 = vmul.f32 %v3896_v21, %v157_v20  ;;  %vm165_vm10 = vweird.f32 %v3896_v21 }
 0x242   :  { %vm166_vm12 = vmor %vm164_vm11, %vm165_vm10 }
 0x243   :  { %v161_v23 = vsub.f32 1.0, %v160_v22 }
 0x245   :  { %v162_v25 = vmul.f32 %v3896_v21, %v161_v23 }
 0x247   :  { %v163_v27 = vadd.f32 %v3896_v21, %v162_v25 }
 0x249   :  { %v167_v29 = vsel %vm166_vm12, %v3896_v21, %v163_v27 }
 0x24a   :  { %v172_v30 = vsel %vm169_vm13, %v171_v28, %v167_v29 }
 0x24b   :  { %191 = vperm.xlu0 %3887, %v172_v30  }
 0x262   :  { %v1964_v31 = vpop.xlane.xlu0 %1963 }
 0x263   :  { %v1970_v32 = vadd.f32 %v1964_v31, %v148_v52 }
 0x265   :  { %v1972_v33 = vsub.f32 0.0, %v1970_v32 }
 0x267   :  { %v1975_v34 = vmul.f32 1.442695, %v1972_v33 }
 0x269   :  { %3897 = vpow2.f32 %v1975_v34 }
 0x26f   :  { %v3898_v38 = vpop.eup %3897 }
 0x270   :  { %v1978_v40 = vadd.f32 1.0, %v3898_v38 }
 0x272   :  { %vm1999_vm2 = vweird.f32 %v1978_v40  ;;  %v2005_v57 = vand.u32 2147483648, %v1978_v40  ;;  %v2003_v59 = vand.u32 2147483647, %v1978_v40 }
 0x274   :  { %v1961_v35 = vpop.xlane.xlu1 %1960  ;;  %v2006_v60 = vor.u32 1.1754944e-38, %v2005_v57  ;;  %vm2004_vm5 = vcmp.eq.f32.partialorder %v2003_v59, 8.507059e+37 }
 0x275   :  { %v1969_v36 = vadd.f32 %v1961_v35, %v147_v13 }
 0x277   :  { %v1971_v37 = vsub.f32 0.0, %v1969_v36 }
 0x279   :  { %v1973_v39 = vmul.f32 1.442695, %v1971_v37 }
 0x27b   :  { %3899 = vpow2.f32 %v1973_v39 }
 0x27c   :  { %3901 = vrcp.f32 %v1978_v40 }
 0x281   :  { %v3900_v41 = vpop.eup %3899 }
 0x282   :  { %v1977_v42 = vadd.f32 1.0, %v3900_v41  ;;  %v3902_v43 = vpop.eup %3901 }
 0x283   :  { %v1995_v44 = vmul.f32 %v3902_v43, %v1978_v40  ;;  %vm2000_vm3 = vweird.f32 %v3902_v43 }
 0x284   :  { %3903 = vrcp.f32 %v1977_v42  ;;  %v1990_v49 = vand.u32 2147483648, %v1977_v42  ;;  %v1988_v51 = vand.u32 2147483647, %v1977_v42  ;;  %vm1984_vm15 = vweird.f32 %v1977_v42  ;;  %vm2001_vm4 = vmor %vm1999_vm2, %vm2000_vm3 }
 0x285   :  { %v1996_v48 = vsub.f32 1.0, %v1995_v44 }
 0x286   :  { %v1991_v54 = vor.u32 1.1754944e-38, %v1990_v49  ;;  %vm1989_vm1 = vcmp.eq.f32.partialorder %v1988_v51, 8.507059e+37 }
 0x287   :  { %v1997_v53 = vmul.f32 %v3902_v43, %v1996_v48 }
 0x289   :  { %v1998_v58 = vadd.f32 %v3902_v43, %v1997_v53 }
 0x28a   :  { %v3904_v45 = vpop.eup %3903 }
 0x28b   :  { %v1980_v46 = vmul.f32 %v3904_v45, %v1977_v42  ;;  %vm1985_vm14 = vweird.f32 %v3904_v45  ;;  %v2002_v61 = vsel %vm2001_vm4, %v3902_v43, %v1998_v58 }
 0x28c   :  { %vm1986_vm0 = vmor %vm1984_vm15, %vm1985_vm14  ;;  %v2007_v4 = vsel %vm2004_vm5, %v2006_v60, %v2002_v61 }
 0x28d   :  { %v1981_v47 = vsub.f32 1.0, %v1980_v46 }
 0x28f   :  { %v1982_v50 = vmul.f32 %v3904_v45, %v1981_v47 }
 0x291   :  { %v1983_v52 = vadd.f32 %v3904_v45, %v1982_v50 }
 0x293   :  { %v1987_v55 = vsel %vm1986_vm0, %v3904_v45, %v1983_v52 }
 0x294   :  { %v1992_v56 = vsel %vm1989_vm1, %v1991_v54, %v1987_v55 }
 0x295   :  { %2011 = vperm.xlu2 %3886, %v1992_v56  }
 0x29a   :  { %v197_v62 = vpop.permute.xlu1 %196 }
 0x29b   :  { %v201_v63 = vmul.f32 %v197_v62, %v4023_v7  ;;  %v202_v3 = vmul.f32 %v197_v62, %v4028_v8 }
 0x29d   :  { %2016 = vperm.xlu2 %3886, %v2007_v4   ;;  %205 = vst [vmem:[%s7556_s6 + $0x10] sm:$0xff] %v201_v63 }
 0x29e   :  { %206 = vst [vmem:[%s7556_s6 + $0x18] sm:$0xff] %v202_v3 }
 0x2bd   :  { %v192_v6 = vpop.permute.xlu0 %191 }
 0x2be   :  { %v199_v11 = vmul.f32 %v192_v6, %v3997_v0  ;;  %v200_v12 = vmul.f32 %v192_v6, %v4002_v1 }
 0x2c0   :  { %203 = vst [vmem:[%s7556_s6] sm:$0xff] %v199_v11  ;;  %v207_v7 = vmax.f32 %v199_v11, %v201_v63  ;;  %v214_v8 = vmax.f32 %v200_v12, %v202_v3  ;;  %v4089_v13 = vadd.f32 %v201_v63, %v199_v11  ;;  %v4091_v14 = vadd.f32 %v202_v3, %v200_v12 }
 0x2c1   :  { %204 = vst [vmem:[%s7556_s6 + $0x8] sm:$0xff] %v200_v12 }
 0x2c2   :  { %v208_v15 = vrot.slane %v207_v7, 4  ;;  %v215_v16 = vrot.slane %v214_v8, 4 }
 0x2c4   :  { %v209_v17 = vmax.f32 %v207_v7, %v208_v15  ;;  %v216_v0 = vmax.f32 %v214_v8, %v215_v16 }
 0x2c6   :  { %v210_v18 = vrot.slane %v209_v17, 2  ;;  %v217_v1 = vrot.slane %v216_v0, 2 }
 0x2c8   :  { %v211_v19 = vmax.f32 %v209_v17, %v210_v18  ;;  %v218_v20 = vmax.f32 %v216_v0, %v217_v1  ;;  %v222_v17 = vrot.slane %v4089_v13, 4 }
 0x2ca   :  { %v212_v21 = vrot.slane %v211_v19, 1  ;;  %v219_v22 = vrot.slane %v218_v20, 1  ;;  %v223_v18 = vadd.f32 %v222_v17, %v4089_v13 }
 0x2cc   :  { %v4096_v23 = vmax.f32 %v211_v19, %v212_v21  ;;  %v4098_v24 = vmax.f32 %v218_v20, %v219_v22  ;;  %v224_v20 = vrot.slane %v223_v18, 2  ;;  %v229_v21 = vrot.slane %v4091_v14, 4 }
 0x2ce   :  { %7804 = vst [vmem:[#allocation2_spill] sm:$0xff] %v4096_v23  ;;  %258 = vrot.lane.b32.xlu1 %v4098_v24, %s7723_s10  ;;  %292 = vrot.lane.b32.xlu0 %v4096_v23, %s7638_s11  ;;  %v225_v13 = vadd.f32 %v224_v20, %v223_v18 }
 0x2cf   :  { %7805 = vst [vmem:[#allocation3_spill] sm:$0xff] %v4098_v24  ;;  %237 = vrot.lane.b32.xlu2 %v4096_v23, %s7697_s12 }
 0x2d6   :  { %276 = vrot.lane.b32.xlu1 %v4098_v24, %s7762_s13  ;;  %312 = vrot.lane.b32.xlu0 %v4098_v24, %s7739_s14 }
 0x2d7   :  { %239 = vrot.lane.b32.xlu2 %v4098_v24, %s7697_s12 }
 0x2de   :  { %310 = vrot.lane.b32.xlu1 %v4096_v23, %s7739_s14  ;;  %346 = vrot.lane.b32.xlu0 %v4096_v23, %s7712_s15 }
 0x2df   :  { %256 = vrot.lane.b32.xlu2 %v4096_v23, %s7723_s10 }
 0x2e6   :  { %330 = vrot.lane.b32.xlu1 %v4098_v24, %s7705_s16  ;;  %366 = vrot.lane.b32.xlu0 %v4098_v24, %s7710_s0 }
 0x2e7   :  { %274 = vrot.lane.b32.xlu2 %v4096_v23, %s7762_s13 }
 0x2ee   :  { %364 = vrot.lane.b32.xlu1 %v4096_v23, %s7710_s0  ;;  %400 = vrot.lane.b32.xlu0 %v4096_v23, %s7699_s17 }
 0x2ef   :  { %294 = vrot.lane.b32.xlu2 %v4098_v24, %s7638_s11  ;;  %v2012_v25 = vpop.permute.xlu2 %2011 }
 0x2f0   :  { %v2019_v26 = vmul.f32 %v4007_v2, %v2012_v25  ;;  %v2020_v27 = vmul.f32 %v4016_v5, %v2012_v25  ;;  %v230_v25 = vadd.f32 %v229_v21, %v4091_v14 }
 0x2f2   :  { %3734 = vst [vmem:[%s7556_s6 + $0x20] sm:$0xff] %v2019_v26 }
 0x2f3   :  { %3735 = vst [vmem:[%s7556_s6 + $0x28] sm:$0xff] %v2020_v27 }
 0x2f6   :  { %384 = vrot.lane.b32.xlu1 %v4098_v24, %s7688_s21  ;;  %420 = vrot.lane.b32.xlu0 %v4098_v24, %s7692_s22 }
 0x2f7   :  { %328 = vrot.lane.b32.xlu2 %v4096_v23, %s7705_s16  ;;  %v2017_v2 = vpop.permute.xlu2 %2016 }
 0x2f8   :  { %v2021_v5 = vmul.f32 %v4033_v9, %v2017_v2  ;;  %v2022_v28 = vmul.f32 %v4038_v10, %v2017_v2  ;;  %v226_v2 = vrot.slane %v225_v13, 1 }
 0x2fa   :  { %3736 = vst [vmem:[%s7556_s6 + $0x30] sm:$0xff] %v2021_v5  ;;  %v4149_v29 = vmax.f32 %v2019_v26, %v2021_v5  ;;  %v4151_v30 = vmax.f32 %v2020_v27, %v2022_v28  ;;  %v4153_v31 = vadd.f32 %v2021_v5, %v2019_v26  ;;  %v4155_v32 = vadd.f32 %v2022_v28, %v2020_v27 }
 0x2fb   :  { %3737 = vst [vmem:[%s7556_s6 + $0x38] sm:$0xff] %v2022_v28  ;;  %s7680_s6 = smov 18   ;;  %v231_v5 = vrot.slane %v230_v25, 2  ;;  %v227_v14 = vadd.f32 %v226_v2, %v225_v13 }
 0x2fc   :  { %7806 = vst [vmem:[#allocation4_spill] sm:$0xff] %v4149_v29 }
 0x2fd   :  { %7807 = vst [vmem:[#allocation5_spill] sm:$0xff] %v4151_v30  ;;  %v232_v17 = vadd.f32 %v231_v5, %v230_v25 }
 0x2fe   :  { %7808 = vst [vmem:[#allocation6_spill] sm:$0xff] %v4153_v31  ;;  %418 = vrot.lane.b32.xlu1 %v4096_v23, %s7692_s22  ;;  %454 = vrot.lane.b32.xlu0 %v4096_v23, %s7685_s4 }
 0x2ff   :  { %7809 = vst [vmem:[#allocation7_spill] sm:$0xff] %v4155_v32  ;;  %348 = vrot.lane.b32.xlu2 %v4098_v24, %s7712_s15  ;;  %v233_v21 = vrot.slane %v232_v17, 1  ;;  %v4410_v32 = vmul.f32 0.0625, %v227_v14 }
 0x301   :  { %v234_v13 = vadd.f32 %v233_v21, %v232_v17 }
 0x303   :  { %v4424_v5 = vmul.f32 0.0625, %v234_v13 }
 0x306   :  { %438 = vrot.lane.b32.xlu1 %v4098_v24, %s7644_s26  ;;  %474 = vrot.lane.b32.xlu0 %v4098_v24, %s7647_s27 }
 0x307   :  { %382 = vrot.lane.b32.xlu2 %v4096_v23, %s7688_s21 }
 0x30e   :  { %472 = vrot.lane.b32.xlu1 %v4096_v23, %s7647_s27  ;;  %508 = vrot.lane.b32.xlu0 %v4096_v23, %s7680_s6 }
 0x30f   :  { %402 = vrot.lane.b32.xlu2 %v4098_v24, %s7699_s17 }
 0x316   :  { %492 = vrot.lane.b32.xlu1 %v4098_v24, %s7642_s28  ;;  %528 = vrot.lane.b32.xlu0 %v4098_v24, %s7636_s29 }
 0x317   :  { %436 = vrot.lane.b32.xlu2 %v4096_v23, %s7644_s26 }
 0x31e   :  { %526 = vrot.lane.b32.xlu1 %v4096_v23, %s7636_s29  ;;  %562 = vrot.lane.b32.xlu0 %v4096_v23, %s7673_s30 }
 0x31f   :  { %456 = vrot.lane.b32.xlu2 %v4098_v24, %s7685_s4 }
 0x326   :  { %546 = vrot.lane.b32.xlu1 %v4098_v24, %s7671_s8  ;;  %582 = vrot.lane.b32.xlu0 %v4098_v24, %s7649_s9 }
 0x327   :  { %490 = vrot.lane.b32.xlu2 %v4096_v23, %s7642_s28 }
 0x329   :  { %v4196_v9 = vpop.permute.xlu2 %237 }
 0x32e   :  { %580 = vrot.lane.b32.xlu1 %v4096_v23, %s7649_s9  ;;  %616 = vrot.lane.b32.xlu0 %v4096_v23, %s7677_s2 }
 0x32f   :  { %510 = vrot.lane.b32.xlu2 %v4098_v24, %s7680_s6 }
 0x331   :  { %v4204_v10 = vpop.permute.xlu2 %239 }
 0x336   :  { %600 = vrot.lane.b32.xlu1 %v4098_v24, %s7675_s18  ;;  %636 = vrot.lane.b32.xlu0 %v4098_v24, %s7563_s19 }
 0x337   :  { %544 = vrot.lane.b32.xlu2 %v4096_v23, %s7671_s8 }
 0x339   :  { %v4212_v33 = vpop.permute.xlu2 %256 }
 0x33e   :  { %634 = vrot.lane.b32.xlu1 %v4096_v23, %s7563_s19  ;;  %681 = vrot.lane.b32.xlu0 %v4096_v23, %s7569_s20  ;;  %s7571_s19 = smov 111  }
 0x33f   :  { %564 = vrot.lane.b32.xlu2 %v4098_v24, %s7673_s30 }
 0x340   :  { %v4220_v34 = vpop.permute.xlu1 %258  ;;  %v4222_v35 = vpop.permute.xlu0 %292 }
 0x341   :  { %v4224_v36 = vpop.permute.xlu2 %274 }
 0x346   :  { %654 = vrot.lane.b32.xlu1 %v4098_v24, %s7561_s3  ;;  %701 = vrot.lane.b32.xlu0 %v4098_v24, %s7559_s1 }
 0x347   :  { %598 = vrot.lane.b32.xlu2 %v4096_v23, %s7675_s18 }
 0x348   :  { %v4232_v37 = vpop.permute.xlu1 %276  ;;  %v4234_v38 = vpop.permute.xlu0 %312 }
 0x349   :  { %v4236_v39 = vpop.permute.xlu2 %294 }
 0x34e   :  { %699 = vrot.lane.b32.xlu1 %v4096_v23, %s7559_s1  ;;  %735 = vrot.lane.b32.xlu0 %v4096_v23, %s7575_s23  ;;  %s7581_s1 = smov 112  }
 0x34f   :  { %618 = vrot.lane.b32.xlu2 %v4098_v24, %s7677_s2 }
 0x350   :  { %v4244_v40 = vpop.permute.xlu1 %310  ;;  %v4246_v41 = vpop.permute.xlu0 %346 }
 0x351   :  { %v4248_v42 = vpop.permute.xlu2 %328 }
 0x356   :  { %719 = vrot.lane.b32.xlu1 %v4098_v24, %s7567_s24  ;;  %755 = vrot.lane.b32.xlu0 %v4098_v24, %s7565_s25 }
 0x357   :  { %652 = vrot.lane.b32.xlu2 %v4096_v23, %s7561_s3  ;;  %s7573_s3 = smov 113  }
 0x358   :  { %v4256_v43 = vpop.permute.xlu1 %330  ;;  %v4258_v44 = vpop.permute.xlu0 %366 }
 0x359   :  { %v4260_v45 = vpop.permute.xlu2 %348 }
 0x35e   :  { %753 = vrot.lane.b32.xlu1 %v4096_v23, %s7565_s25  ;;  %789 = vrot.lane.b32.xlu0 %v4096_v23, %s7581_s1  ;;  %s7721_s25 = smov 109  }
 0x35f   :  { %683 = vrot.lane.b32.xlu2 %v4098_v24, %s7569_s20  ;;  %s7577_s20 = smov 99  }
 0x360   :  { %v4268_v46 = vpop.permute.xlu1 %364  ;;  %v4270_v47 = vpop.permute.xlu0 %400 }
 0x361   :  { %v4272_v48 = vpop.permute.xlu2 %382 }
 0x366   :  { %773 = vrot.lane.b32.xlu1 %v4098_v24, %s7573_s3  ;;  %809 = vrot.lane.b32.xlu0 %v4098_v24, %s7571_s19 }
 0x367   :  { %717 = vrot.lane.b32.xlu2 %v4096_v23, %s7567_s24  ;;  %s7579_s24 = smov 110  }
 0x368   :  { %v4280_v49 = vpop.permute.xlu1 %384  ;;  %v4282_v50 = vpop.permute.xlu0 %420 }
 0x369   :  { %v4284_v51 = vpop.permute.xlu2 %402 }
 0x36e   :  { %807 = vrot.lane.b32.xlu1 %v4096_v23, %s7571_s19  ;;  %843 = vrot.lane.b32.xlu0 %v4096_v23, %s7721_s25  ;;  %s7589_s19 = smov 97  }
 0x36f   :  { %737 = vrot.lane.b32.xlu2 %v4098_v24, %s7575_s23  ;;  %s7583_s23 = smov 96  }
 0x370   :  { %v4292_v52 = vpop.permute.xlu1 %418  ;;  %v4294_v53 = vpop.permute.xlu0 %454 }
 0x371   :  { %v4296_v54 = vpop.permute.xlu2 %436 }
 0x376   :  { %827 = vrot.lane.b32.xlu1 %v4098_v24, %s7579_s24  ;;  %863 = vrot.lane.b32.xlu0 %v4098_v24, %s7577_s20 }
 0x377   :  { %771 = vrot.lane.b32.xlu2 %v4096_v23, %s7573_s3  ;;  %s7585_s3 = smov 98  }
 0x378   :  { %v4304_v55 = vpop.permute.xlu1 %438  ;;  %v4306_v56 = vpop.permute.xlu0 %474 }
 0x379   :  { %v4308_v57 = vpop.permute.xlu2 %456 }
 0x37e   :  { %861 = vrot.lane.b32.xlu1 %v4096_v23, %s7577_s20  ;;  %897 = vrot.lane.b32.xlu0 %v4096_v23, %s7589_s19  ;;  %s7750_s20 = smov 94  }
 0x37f   :  { %791 = vrot.lane.b32.xlu2 %v4098_v24, %s7581_s1  ;;  %s7587_s1 = smov 93  }
 0x380   :  { %v4316_v58 = vpop.permute.xlu1 %472  ;;  %v4318_v59 = vpop.permute.xlu0 %508 }
 0x381   :  { %v4320_v60 = vpop.permute.xlu2 %490 }
 0x386   :  { %881 = vrot.lane.b32.xlu1 %v4098_v24, %s7585_s3  ;;  %917 = vrot.lane.b32.xlu0 %v4098_v24, %s7583_s23 }
 0x387   :  { %825 = vrot.lane.b32.xlu2 %v4096_v23, %s7579_s24  ;;  %s7591_s24 = smov 95  }
 0x388   :  { %v4328_v61 = vpop.permute.xlu1 %492  ;;  %v4330_v62 = vpop.permute.xlu0 %528 }
 0x389   :  { %v4332_v63 = vpop.permute.xlu2 %510 }
 0x38e   :  { %915 = vrot.lane.b32.xlu1 %v4096_v23, %s7583_s23  ;;  %951 = vrot.lane.b32.xlu0 %v4096_v23, %s7750_s20  ;;  %s7760_s23 = smov 82  }
 0x38f   :  { %845 = vrot.lane.b32.xlu2 %v4098_v24, %s7721_s25 }
 0x390   :  { %v4340_v3 = vpop.permute.xlu1 %526  ;;  %v4342_v4 = vpop.permute.xlu0 %562 }
 0x391   :  { %v4344_v6 = vpop.permute.xlu2 %544 }
 0x396   :  { %935 = vrot.lane.b32.xlu1 %v4098_v24, %s7591_s24  ;;  %971 = vrot.lane.b32.xlu0 %v4098_v24, %s7587_s1 }
 0x397   :  { %879 = vrot.lane.b32.xlu2 %v4096_v23, %s7585_s3  ;;  %s7597_s3 = smov 83  }
 0x398   :  { %v4352_v11 = vpop.permute.xlu1 %546  ;;  %v4354_v12 = vpop.permute.xlu0 %582 }
 0x399   :  { %v4356_v7 = vpop.permute.xlu2 %564 }
 0x39e   :  { %969 = vrot.lane.b32.xlu1 %v4096_v23, %s7587_s1  ;;  %1005 = vrot.lane.b32.xlu0 %v4096_v23, %s7760_s23  ;;  %s7593_s1 = smov 81  }
 0x39f   :  { %899 = vrot.lane.b32.xlu2 %v4098_v24, %s7589_s19  ;;  %s7752_s19 = smov 79  }
 0x3a0   :  { %v4364_v8 = vpop.permute.xlu1 %580  ;;  %v4366_v15 = vpop.permute.xlu0 %616 }
 0x3a1   :  { %7810 = vst [vmem:[#allocation8_spill] sm:$0xff] %v4366_v15  ;;  %v4368_v16 = vpop.permute.xlu2 %598 }
 0x3a6   :  { %989 = vrot.lane.b32.xlu1 %v4098_v24, %s7597_s3  ;;  %1025 = vrot.lane.b32.xlu0 %v4098_v24, %s7593_s1 }
 0x3a7   :  { %933 = vrot.lane.b32.xlu2 %v4096_v23, %s7591_s24  ;;  %s7756_s24 = smov 80  }
 0x3a8   :  { %v4377_v0 = vpop.permute.xlu1 %600  ;;  %v4380_v1 = vpop.permute.xlu0 %636 }
 0x3a9   :  { %7811 = vst [vmem:[#allocation9_spill] sm:$0xff] %v4380_v1  ;;  %v4382_v19 = vpop.permute.xlu2 %618 }
 0x3aa   :  { %7812 = vst [vmem:[#allocation10_spill] sm:$0xff] %v4382_v19 }
 0x3ae   :  { %1023 = vrot.lane.b32.xlu1 %v4096_v23, %s7593_s1  ;;  %1059 = vrot.lane.b32.xlu0 %v4096_v23, %s7752_s19  ;;  %s7758_s1 = smov 78  }
 0x3af   :  { %953 = vrot.lane.b32.xlu2 %v4098_v24, %s7750_s20 }
 0x3b0   :  { %v4391_v22 = vpop.permute.xlu1 %634  ;;  %v4394_v26 = vpop.permute.xlu0 %681 }
 0x3b1   :  { %7813 = vst [vmem:[#allocation11_spill] sm:$0xff] %v4391_v22  ;;  %v4396_v27 = vpop.permute.xlu2 %652 }
 0x3b2   :  { %7814 = vst [vmem:[#allocation12_spill] sm:$0xff] %v4394_v26 }
 0x3b3   :  { %7815 = vst [vmem:[#allocation13_spill] sm:$0xff] %v4396_v27 }
 0x3b6   :  { %1043 = vrot.lane.b32.xlu1 %v4098_v24, %s7756_s24  ;;  %1079 = vrot.lane.b32.xlu0 %v4098_v24, %s7758_s1 }
 0x3b7   :  { %987 = vrot.lane.b32.xlu2 %v4096_v23, %s7597_s3  ;;  %s7741_s3 = smov 77  }
 0x3b8   :  { %v4404_v28 = vpop.permute.xlu1 %654  ;;  %v4406_v18 = vpop.permute.xlu0 %701 }
 0x3b9   :  { %7816 = vst [vmem:[#allocation14_spill] sm:$0xff] %v4404_v28  ;;  %v4408_v20 = vpop.permute.xlu2 %683 }
 0x3ba   :  { %7817 = vst [vmem:[#allocation15_spill] sm:$0xff] %v4406_v18 }
 0x3bb   :  { %7818 = vst [vmem:[#allocation16_spill] sm:$0xff] %v4408_v20 }
 0x3be   :  { %1077 = vrot.lane.b32.xlu1 %v4096_v23, %s7758_s1  ;;  %1113 = vrot.lane.b32.xlu0 %v4410_v32, %s7697_s12 }
 0x3bf   :  { %1007 = vrot.lane.b32.xlu2 %v4098_v24, %s7760_s23 }
 0x3c0   :  { %v4418_v31 = vpop.permute.xlu1 %699  ;;  %v4420_v25 = vpop.permute.xlu0 %735 }
 0x3c1   :  { %7819 = vst [vmem:[#allocation17_spill] sm:$0xff] %v4418_v31  ;;  %v4422_v2 = vpop.permute.xlu2 %717 }
 0x3c2   :  { %7820 = vst [vmem:[#allocation18_spill] sm:$0xff] %v4420_v25 }
 0x3c3   :  { %7821 = vst [vmem:[#allocation19_spill] sm:$0xff] %v4422_v2 }
 0x3c6   :  { %1097 = vrot.lane.b32.xlu1 %v4098_v24, %s7741_s3  ;;  %1132 = vrot.lane.b32.xlu0 %v4424_v5, %s7723_s10 }
 0x3c7   :  { %1041 = vrot.lane.b32.xlu2 %v4096_v23, %s7756_s24 }
 0x3c8   :  { %v4432_v14 = vpop.permute.xlu1 %719  ;;  %v4434_v29 = vpop.permute.xlu0 %755 }
 0x3c9   :  { %7822 = vst [vmem:[#allocation20_spill] sm:$0xff] %v4432_v14  ;;  %v4436_v17 = vpop.permute.xlu2 %737 }
 0x3ca   :  { %7823 = vst [vmem:[#allocation21_spill] sm:$0xff] %v4434_v29 }
 0x3cb   :  { %7824 = vst [vmem:[#allocation22_spill] sm:$0xff] %v4436_v17 }
 0x3ce   :  { %1130 = vrot.lane.b32.xlu1 %v4410_v32, %s7723_s10  ;;  %1164 = vrot.lane.b32.xlu0 %v4410_v32, %s7638_s11  ;;  %s8014_s10 = smov 31  }
 0x3cf   :  { %1061 = vrot.lane.b32.xlu2 %v4098_v24, %s7752_s19 }
 0x3d0   :  { %v4444_v21 = vpop.permute.xlu1 %753  ;;  %v4446_v13 = vpop.permute.xlu0 %789 }
 0x3d1   :  { %7825 = vst [vmem:[#allocation23_spill] sm:$0xff] %v4444_v21  ;;  %v4448_v30 = vpop.permute.xlu2 %771 }
 0x3d2   :  { %7826 = vst [vmem:[#allocation24_spill] sm:$0xff] %v4446_v13 }
 0x3d3   :  { %7827 = vst [vmem:[#allocation25_spill] sm:$0xff] %v4448_v30 }
 0x3d6   :  { %1149 = vrot.lane.b32.xlu1 %v4424_v5, %s7762_s13  ;;  %1183 = vrot.lane.b32.xlu0 %v4424_v5, %s7739_s14 }
 0x3d7   :  { %1095 = vrot.lane.b32.xlu2 %v4096_v23, %s7741_s3  ;;  %s7960_s3 = smov 50  }
 0x3d8   :  { %v4456_v29 = vpop.permute.xlu1 %773  ;;  %v4458_v17 = vpop.permute.xlu0 %809 }
 0x3d9   :  { %7828 = vst [vmem:[#allocation26_spill] sm:$0xff] %v4456_v29  ;;  %v4460_v25 = vpop.permute.xlu2 %791 }
 0x3da   :  { %7829 = vst [vmem:[#allocation27_spill] sm:$0xff] %v4458_v17 }
 0x3db   :  { %7830 = vst [vmem:[#allocation28_spill] sm:$0xff] %v4460_v25 }
 0x3de   :  { %1181 = vrot.lane.b32.xlu1 %v4410_v32, %s7739_s14  ;;  %1215 = vrot.lane.b32.xlu0 %v4410_v32, %s7712_s15  ;;  %s8030_s14 = smov 19  }
 0x3df   :  { %1115 = vrot.lane.b32.xlu2 %v4424_v5, %s7697_s12  ;;  %s7888_s12 = smov 99  }
 0x3e0   :  { %v4468_v13 = vpop.permute.xlu1 %807  ;;  %v4470_v30 = vpop.permute.xlu0 %843 }
 0x3e1   :  { %7831 = vst [vmem:[#allocation29_spill] sm:$0xff] %v4468_v13  ;;  %v4472_v21 = vpop.permute.xlu2 %825 }
 0x3e2   :  { %7832 = vst [vmem:[#allocation30_spill] sm:$0xff] %v4470_v30 }
 0x3e3   :  { %7833 = vst [vmem:[#allocation31_spill] sm:$0xff] %v4472_v21 }
 0x3e6   :  { %1200 = vrot.lane.b32.xlu1 %v4424_v5, %s7705_s16  ;;  %1234 = vrot.lane.b32.xlu0 %v4424_v5, %s7710_s0 }
 0x3e7   :  { %1147 = vrot.lane.b32.xlu2 %v4410_v32, %s7762_s13 }
 0x3e8   :  { %v4480_v17 = vpop.permute.xlu1 %827  ;;  %v4482_v25 = vpop.permute.xlu0 %863 }
 0x3e9   :  { %7834 = vst [vmem:[#allocation32_spill] sm:$0xff] %v4480_v17  ;;  %v4484_v29 = vpop.permute.xlu2 %845 }
 0x3ea   :  { %7835 = vst [vmem:[#allocation33_spill] sm:$0xff] %v4482_v25 }
 0x3eb   :  { %7836 = vst [vmem:[#allocation34_spill] sm:$0xff] %v4484_v29 }
 0x3ee   :  { %1232 = vrot.lane.b32.xlu1 %v4410_v32, %s7710_s0  ;;  %1266 = vrot.lane.b32.xlu0 %v4410_v32, %s7699_s17  ;;  %s7941_s0 = smov 81  }
 0x3ef   :  { %1166 = vrot.lane.b32.xlu2 %v4424_v5, %s7638_s11  ;;  %s7866_s11 = smov 127  }
 0x3f0   :  { %v4492_v30 = vpop.permute.xlu1 %861  ;;  %v4494_v21 = vpop.permute.xlu0 %897 }
 0x3f1   :  { %7837 = vst [vmem:[#allocation35_spill] sm:$0xff] %v4492_v30  ;;  %v4496_v13 = vpop.permute.xlu2 %879 }
 0x3f2   :  { %7838 = vst [vmem:[#allocation36_spill] sm:$0xff] %v4494_v21 }
 0x3f3   :  { %7839 = vst [vmem:[#allocation37_spill] sm:$0xff] %v4496_v13 }
 0x3f6   :  { %1251 = vrot.lane.b32.xlu1 %v4424_v5, %s7688_s21  ;;  %1285 = vrot.lane.b32.xlu0 %v4424_v5, %s7692_s22 }
 0x3f7   :  { %1198 = vrot.lane.b32.xlu2 %v4410_v32, %s7705_s16  ;;  %s7898_s16 = smov 98  }
 0x3f8   :  { %v4504_v25 = vpop.permute.xlu1 %881  ;;  %v4506_v29 = vpop.permute.xlu0 %917 }
 0x3f9   :  { %7840 = vst [vmem:[#allocation38_spill] sm:$0xff] %v4504_v25  ;;  %v4508_v17 = vpop.permute.xlu2 %899 }
 0x3fa   :  { %7841 = vst [vmem:[#allocation39_spill] sm:$0xff] %v4506_v29 }
 0x3fb   :  { %7842 = vst [vmem:[#allocation40_spill] sm:$0xff] %v4508_v17 }
 0x3fe   :  { %1283 = vrot.lane.b32.xlu1 %v4410_v32, %s7692_s22  ;;  %1317 = vrot.lane.b32.xlu0 %v4410_v32, %s7685_s4  ;;  %s7874_s22 = smov 111  }
 0x3ff   :  { %1217 = vrot.lane.b32.xlu2 %v4424_v5, %s7712_s15  ;;  %s7935_s15 = smov 83  }
 0x400   :  { %v4516_v21 = vpop.permute.xlu1 %915  ;;  %v4518_v13 = vpop.permute.xlu0 %951 }
 0x401   :  { %7843 = vst [vmem:[#allocation41_spill] sm:$0xff] %v4516_v21  ;;  %v4520_v30 = vpop.permute.xlu2 %933 }
 0x402   :  { %7844 = vst [vmem:[#allocation42_spill] sm:$0xff] %v4518_v13 }
 0x403   :  { %7845 = vst [vmem:[#allocation43_spill] sm:$0xff] %v4520_v30 }
 0x406   :  { %1302 = vrot.lane.b32.xlu1 %v4424_v5, %s7644_s26  ;;  %1336 = vrot.lane.b32.xlu0 %v4424_v5, %s7647_s27 }
 0x407   :  { %1249 = vrot.lane.b32.xlu2 %v4410_v32, %s7688_s21  ;;  %s7873_s21 = smov 113  }
 0x408   :  { %v4528_v29 = vpop.permute.xlu1 %935  ;;  %v4530_v17 = vpop.permute.xlu0 %971 }
 0x409   :  { %7846 = vst [vmem:[#allocation44_spill] sm:$0xff] %v4528_v29  ;;  %v4532_v25 = vpop.permute.xlu2 %953 }
 0x40a   :  { %7847 = vst [vmem:[#allocation45_spill] sm:$0xff] %v4530_v17 }
 0x40b   :  { %7848 = vst [vmem:[#allocation46_spill] sm:$0xff] %v4532_v25 }
 0x40e   :  { %1334 = vrot.lane.b32.xlu1 %v4410_v32, %s7647_s27  ;;  %1368 = vrot.lane.b32.xlu0 %v4410_v32, %s7680_s6  ;;  %s7915_s27 = smov 95  }
 0x40f   :  { %1268 = vrot.lane.b32.xlu2 %v4424_v5, %s7699_s17  ;;  %s7920_s17 = smov 93  }
 0x410   :  { %v4540_v13 = vpop.permute.xlu1 %969  ;;  %v4542_v30 = vpop.permute.xlu0 %1005 }
 0x411   :  { %7849 = vst [vmem:[#allocation47_spill] sm:$0xff] %v4540_v13  ;;  %v4544_v21 = vpop.permute.xlu2 %987 }
 0x412   :  { %7850 = vst [vmem:[#allocation48_spill] sm:$0xff] %v4542_v30 }
 0x413   :  { %7851 = vst [vmem:[#allocation49_spill] sm:$0xff] %v4544_v21 }
 0x416   :  { %1353 = vrot.lane.b32.xlu1 %v4424_v5, %s7642_s28  ;;  %1387 = vrot.lane.b32.xlu0 %v4424_v5, %s7636_s29 }
 0x417   :  { %1300 = vrot.lane.b32.xlu2 %v4410_v32, %s7644_s26  ;;  %s7895_s26 = smov 97  }
 0x418   :  { %v4552_v17 = vpop.permute.xlu1 %989  ;;  %v4554_v25 = vpop.permute.xlu0 %1025 }
 0x419   :  { %7852 = vst [vmem:[#allocation50_spill] sm:$0xff] %v4552_v17  ;;  %v4556_v29 = vpop.permute.xlu2 %1007 }
 0x41a   :  { %7853 = vst [vmem:[#allocation51_spill] sm:$0xff] %v4554_v25 }
 0x41b   :  { %7854 = vst [vmem:[#allocation52_spill] sm:$0xff] %v4556_v29 }
 0x41e   :  { %1385 = vrot.lane.b32.xlu1 %v4410_v32, %s7636_s29  ;;  %1419 = vrot.lane.b32.xlu0 %v4410_v32, %s7673_s30  ;;  %s7864_s29 = smov 2  }
 0x41f   :  { %1319 = vrot.lane.b32.xlu2 %v4424_v5, %s7685_s4  ;;  %s7872_s4 = smov 112  }
 0x420   :  { %v4564_v30 = vpop.permute.xlu1 %1023  ;;  %v4566_v21 = vpop.permute.xlu0 %1059 }
 0x421   :  { %7855 = vst [vmem:[#allocation53_spill] sm:$0xff] %v4564_v30  ;;  %v4568_v13 = vpop.permute.xlu2 %1041  ;;  %v7646_v30 = vlaneseq }
 0x422   :  { %7856 = vst [vmem:[#allocation54_spill] sm:$0xff] %v4566_v21 }
 0x423   :  { %7857 = vst [vmem:[#allocation55_spill] sm:$0xff] %v4568_v13  ;;  %v4583_v21 = vand.u32 127, %v7646_v30  ;;  %v3637_v13 = vld [vmem:[%s7557_s5 + $0x1] ss:$8 sm:$0x3] }
 0x424   :  { %v246_v30 = vld [vmem:[%s7557_s5] ss:$8 sm:$0x3]  ;;  %v267_v2 = vperm.slane %v3637_v13, 1  ;;  %v266_v20 = vperm.slane %v3637_v13, 0 }
 0x425   :  { %vm260_vm6 = vcmp.lt.s32.totalorder %v4583_v21, 50  ;;  %vm243_vm7 = vcmp.lt.s32.totalorder %v4583_v21, 51  ;;  %vm278_vm8 = vcmp.lt.s32.totalorder %v4583_v21, 49  ;;  %v248_v18 = vperm.slane %v246_v30, 0 }
 0x426   :  { %1404 = vrot.lane.b32.xlu1 %v4424_v5, %s7671_s8  ;;  %1438 = vrot.lane.b32.xlu0 %v4424_v5, %s7649_s9  ;;  %v249_v31 = vperm.slane %v246_v30, 1  ;;  %v279_v24 = vsel %vm278_vm8, %v4224_v36, %v4232_v37  ;;  %v3639_v30 = vld [vmem:[%s7557_s5 + $0x3] ss:$8 sm:$0x3]  ;;  %vm296_vm9 = vcmp.lt.s32.totalorder %v4583_v21, 48  ;;  %vm314_vm10 = vcmp.lt.s32.totalorder %v4583_v21, 47 }
 0x427   :  { %1351 = vrot.lane.b32.xlu2 %v4410_v32, %s7642_s28  ;;  %v3640_v13 = vld [vmem:[%s7557_s5 + $0x4] ss:$8 sm:$0x3]  ;;  %vm332_vm11 = vcmp.lt.s32.totalorder %v4583_v21, 46  ;;  %vm350_vm12 = vcmp.lt.s32.totalorder %v4583_v21, 45  ;;  %vm368_vm13 = vcmp.lt.s32.totalorder %v4583_v21, 35 }
 0x428   :  { %v4576_v25 = vpop.permute.xlu1 %1043  ;;  %v4578_v29 = vpop.permute.xlu0 %1079  ;;  %vm7776_vm14 = vcmp.lt.s32.totalorder %v4583_v21, 34  ;;  %vm7766_vm15 = vcmp.lt.s32.totalorder %v4583_v21, 33  ;;  %vm7765_vm0 = vcmp.lt.s32.totalorder %v4583_v21, 32  ;;  %vm7764_vm1 = vcmp.lt.s32.totalorder %v4583_v21, 31  ;;  %s7882_s28 = smov 110  }
 0x429   :  { %7858 = vst [vmem:[#allocation56_spill] sm:$0xff] %v4576_v25  ;;  %v4580_v17 = vpop.permute.xlu2 %1061  ;;  %vm7704_vm2 = vcmp.lt.s32.totalorder %v4583_v21, 30  ;;  %vm7679_vm3 = vcmp.lt.s32.totalorder %v4583_v21, 29  ;;  %vm7682_vm4 = vcmp.lt.s32.totalorder %v4583_v21, 19  ;;  %vm7684_vm5 = vcmp.lt.s32.totalorder %v4583_v21, 18 }
 0x42a   :  { %7859 = vst [vmem:[#allocation57_spill] sm:$0xff] %v4578_v29 }
 0x42b   :  { %7860 = vst [vmem:[#allocation58_spill] sm:$0xff] %v4580_v17  ;;  %v3638_v17 = vld [vmem:[%s7557_s5 + $0x2] ss:$8 sm:$0x3] }
 0x42c   :  { %v285_v26 = vperm.slane %v3638_v17, 1  ;;  %v284_v23 = vperm.slane %v3638_v17, 0 }
 0x42e   :  { %1436 = vrot.lane.b32.xlu1 %v4410_v32, %s7649_s9  ;;  %1470 = vrot.lane.b32.xlu0 %v4410_v32, %s7677_s2  ;;  %v289_v17 = vmul.f32 %v285_v26, %v279_v24  ;;  %v302_v24 = vperm.slane %v3639_v30, 0  ;;  %v315_v26 = vsel %vm314_vm10, %v4244_v40, %v4234_v38  ;;  %s7903_s9 = smov 96  }
 0x42f   :  { %1370 = vrot.lane.b32.xlu2 %v4424_v5, %s7680_s6  ;;  %s7871_s6 = smov 114  }
 0x430   :  { %v4595_v29 = vpop.permute.xlu1 %1077  ;;  %v4603_v25 = vpop.permute.xlu0 %1113 }
 0x431   :  { %7861 = vst [vmem:[#allocation59_spill] sm:$0xff] %v4595_v29  ;;  %v4605_v14 = vpop.permute.xlu2 %1095  ;;  %v261_v29 = vsel %vm260_vm6, %v4212_v33, %v4220_v34 }
 0x432   :  { %7862 = vst [vmem:[#allocation60_spill] sm:$0xff] %v4603_v25  ;;  %v244_v25 = vsel %vm243_vm7, %v4196_v9, %v4204_v10  ;;  %v271_v27 = vmul.f32 %v267_v2, %v261_v29  ;;  %v280_v29 = vsel %vm278_vm8, %v4232_v37, %v4224_v36  ;;  %v3641_v36 = vld [vmem:[%s7557_s5 + $0x5] ss:$8 sm:$0x3] }
 0x433   :  { %7863 = vst [vmem:[#allocation61_spill] sm:$0xff] %v4605_v14  ;;  %v262_v14 = vsel %vm260_vm6, %v4220_v34, %v4212_v33  ;;  %v245_v33 = vsel %vm243_vm7, %v4204_v10, %v4196_v9  ;;  %v253_v34 = vmul.f32 %v249_v31, %v244_v25  ;;  %v303_v9 = vperm.slane %v3639_v30, 1 }
 0x434   :  { %v270_v2 = vmul.f32 %v266_v20, %v262_v14  ;;  %v321_v10 = vperm.slane %v3640_v13, 1  ;;  %v252_v1 = vmul.f32 %v248_v18, %v245_v33  ;;  %v288_v19 = vmul.f32 %v284_v23, %v280_v29  ;;  %v3642_v33 = vld [vmem:[%s7557_s5 + $0x6] ss:$8 sm:$0x3] }
 0x435   :  { %v273_v15 = vadd.f32 %v271_v27, %v253_v34  ;;  %v297_v31 = vsel %vm296_vm9, %v4222_v35, %v4236_v39  ;;  %v320_v14 = vperm.slane %v3640_v13, 0  ;;  %v298_v23 = vsel %vm296_vm9, %v4236_v39, %v4222_v35  ;;  %v3643_v35 = vld [vmem:[%s7557_s5 + $0x7] ss:$8 sm:$0x3] }
 0x436   :  { %1455 = vrot.lane.b32.xlu1 %v4424_v5, %s7675_s18  ;;  %1489 = vrot.lane.b32.xlu0 %v4424_v5, %s7864_s29  ;;  %v272_v20 = vadd.f32 %v270_v2, %v252_v1  ;;  %v316_v27 = vsel %vm314_vm10, %v4234_v38, %v4244_v40  ;;  %v338_v18 = vperm.slane %v3641_v36, 0  ;;  %v333_v30 = vsel %vm332_vm11, %v4248_v42, %v4256_v43 }
 0x437   :  { %1402 = vrot.lane.b32.xlu2 %v4410_v32, %s7671_s8  ;;  %v291_v25 = vadd.f32 %v289_v17, %v273_v15  ;;  %v307_v15 = vmul.f32 %v303_v9, %v297_v31  ;;  %v325_v13 = vmul.f32 %v321_v10, %v315_v26  ;;  %v334_v38 = vsel %vm332_vm11, %v4256_v43, %v4248_v42  ;;  %v3644_v42 = vld [vmem:[%s7557_s5 + $0x10] ss:$8 sm:$0x3]  ;;  %s7867_s8 = smov 1  }
 0x438   :  { %v4647_v28 = vpop.permute.xlu1 %1097  ;;  %v4652_v37 = vpop.permute.xlu0 %1132  ;;  %v290_v1 = vadd.f32 %v288_v19, %v272_v20  ;;  %v306_v39 = vmul.f32 %v302_v24, %v298_v23  ;;  %v324_v19 = vmul.f32 %v320_v14, %v316_v27  ;;  %v357_v2 = vperm.slane %v3642_v33, 1 }
 0x439   :  { %7865 = vst [vmem:[#allocation62_spill] sm:$0xff] %v4652_v37  ;;  %v4654_v22 = vpop.permute.xlu2 %1115  ;;  %v339_v37 = vperm.slane %v3641_v36, 1  ;;  %v309_v40 = vadd.f32 %v307_v15, %v291_v25  ;;  %v375_v17 = vperm.slane %v3643_v35, 1  ;;  %v342_v31 = vmul.f32 %v338_v18, %v334_v38 }
 0x43a   :  { %v308_v10 = vadd.f32 %v306_v39, %v290_v1  ;;  %v356_v24 = vperm.slane %v3642_v33, 0  ;;  %v369_v26 = vsel %vm368_vm13, %v4268_v46, %v4258_v44  ;;  %v374_v14 = vperm.slane %v3643_v35, 0  ;;  %v3645_v35 = vld [vmem:[%s7557_s5 + $0x11] ss:$8 sm:$0x3] }
 0x43b   :  { %v343_v29 = vmul.f32 %v339_v37, %v333_v30  ;;  %v327_v36 = vadd.f32 %v325_v13, %v309_v40  ;;  %v351_v37 = vsel %vm350_vm12, %v4246_v41, %v4260_v45  ;;  %v393_v23 = vperm.slane %v3644_v42, 1 }
 0x43c   :  { %v326_v20 = vadd.f32 %v324_v19, %v308_v10  ;;  %v352_v27 = vsel %vm350_vm12, %v4260_v45, %v4246_v41  ;;  %v370_v18 = vsel %vm368_vm13, %v4258_v44, %v4268_v46  ;;  %v392_v30 = vperm.slane %v3644_v42, 0  ;;  %v3646_v41 = vld [vmem:[%s7557_s5 + $0x12] ss:$8 sm:$0x3] }
 0x43d   :  { %v345_v25 = vadd.f32 %v343_v29, %v327_v36  ;;  %v387_v1 = vsel %vm7776_vm14, %v4272_v48, %v4280_v49  ;;  %v361_v13 = vmul.f32 %v357_v2, %v351_v37  ;;  %v379_v33 = vmul.f32 %v375_v17, %v369_v26 }
 0x43e   :  { %1487 = vrot.lane.b32.xlu1 %v4410_v32, %s7864_s29  ;;  %1532 = vrot.lane.b32.xlu0 %v4410_v32, %s7866_s11  ;;  %v344_v15 = vadd.f32 %v342_v31, %v326_v20  ;;  %v388_v44 = vsel %vm7776_vm14, %v4280_v49, %v4272_v48  ;;  %v360_v45 = vmul.f32 %v356_v24, %v352_v27  ;;  %v411_v19 = vperm.slane %v3645_v35, 1  ;;  %v3647_v48 = vld [vmem:[%s7557_s5 + $0x13] ss:$8 sm:$0x3] }
 0x43f   :  { %1421 = vrot.lane.b32.xlu2 %v4424_v5, %s7673_s30  ;;  %s7868_s30 = smov 126   ;;  %v363_v46 = vadd.f32 %v361_v13, %v345_v25  ;;  %v378_v38 = vmul.f32 %v374_v14, %v370_v18  ;;  %v397_v39 = vmul.f32 %v393_v23, %v387_v1  ;;  %v429_v29 = vperm.slane %v3646_v41, 1  ;;  %v3648_v13 = vld [vmem:[%s7557_s5 + $0x14] ss:$8 sm:$0x3] }
 0x440   :  { %v4695_v34 = vpop.permute.xlu1 %1130  ;;  %v4700_v43 = vpop.permute.xlu0 %1164  ;;  %v362_v17 = vadd.f32 %v360_v45, %v344_v15  ;;  %v396_v10 = vmul.f32 %v392_v30, %v388_v44  ;;  %v410_v36 = vperm.slane %v3645_v35, 0  ;;  %v405_v31 = vsel %vm7766_vm15, %v4270_v47, %v4284_v51 }
 0x441   :  { %v4702_v9 = vpop.permute.xlu2 %1147  ;;  %v381_v42 = vadd.f32 %v379_v33, %v363_v46  ;;  %v423_v24 = vsel %vm7765_vm0, %v4292_v52, %v4282_v50  ;;  %v428_v20 = vperm.slane %v3646_v41, 0  ;;  %v447_v25 = vperm.slane %v3647_v48, 1 }
 0x442   :  { %v380_v37 = vadd.f32 %v378_v38, %v362_v17  ;;  %v406_v14 = vsel %vm7766_vm15, %v4284_v51, %v4270_v47  ;;  %v424_v23 = vsel %vm7765_vm0, %v4282_v50, %v4292_v52  ;;  %v446_v27 = vperm.slane %v3647_v48, 0  ;;  %v3649_v47 = vld [vmem:[%s7557_s5 + $0x15] ss:$8 sm:$0x3] }
 0x443   :  { %v399_v26 = vadd.f32 %v397_v39, %v381_v42  ;;  %v441_v18 = vsel %vm7764_vm1, %v4296_v54, %v4304_v55  ;;  %v415_v1 = vmul.f32 %v411_v19, %v405_v31  ;;  %v433_v15 = vmul.f32 %v429_v29, %v423_v24 }
 0x444   :  { %v398_v30 = vadd.f32 %v396_v10, %v380_v37  ;;  %v442_v50 = vsel %vm7764_vm1, %v4304_v55, %v4296_v54  ;;  %v414_v51 = vmul.f32 %v410_v36, %v406_v14  ;;  %v432_v33 = vmul.f32 %v428_v20, %v424_v23  ;;  %v3650_v54 = vld [vmem:[%s7557_s5 + $0x16] ss:$8 sm:$0x3] }
 0x445   :  { %v417_v52 = vadd.f32 %v415_v1, %v399_v26  ;;  %v451_v35 = vmul.f32 %v447_v25, %v441_v18  ;;  %v465_v44 = vperm.slane %v3648_v13, 1  ;;  %v483_v45 = vperm.slane %v3649_v47, 1 }
 0x446   :  { %1506 = vrot.lane.b32.xlu1 %v4424_v5, %s7867_s8  ;;  %1551 = vrot.lane.b32.xlu0 %v4424_v5, %s7868_s30  ;;  %v416_v38 = vadd.f32 %v414_v51, %v398_v30  ;;  %v450_v19 = vmul.f32 %v446_v27, %v442_v50  ;;  %v464_v29 = vperm.slane %v3648_v13, 0  ;;  %v459_v48 = vsel %vm7704_vm2, %v4294_v53, %v4308_v57  ;;  %v3651_v27 = vld [vmem:[%s7557_s5 + $0x17] ss:$8 sm:$0x3] }
 0x447   :  { %1453 = vrot.lane.b32.xlu2 %v4410_v32, %s7675_s18  ;;  %s7869_s18 = smov 115   ;;  %v435_v39 = vadd.f32 %v433_v15, %v417_v52  ;;  %v477_v17 = vsel %vm7679_vm3, %v4316_v58, %v4306_v56  ;;  %v482_v36 = vperm.slane %v3649_v47, 0  ;;  %v501_v31 = vperm.slane %v3650_v54, 1 }
 0x448   :  { %v4743_v40 = vpop.permute.xlu1 %1149  ;;  %v4748_v49 = vpop.permute.xlu0 %1183  ;;  %v434_v42 = vadd.f32 %v432_v33, %v416_v38  ;;  %v460_v24 = vsel %vm7704_vm2, %v4308_v57, %v4294_v53  ;;  %v478_v37 = vsel %vm7679_vm3, %v4306_v56, %v4316_v58  ;;  %v500_v26 = vperm.slane %v3650_v54, 0  ;;  %v3652_v53 = vld [vmem:[%s7557_s5 + $0x20] ss:$8 sm:$0x3] }
 0x449   :  { %v4750_v2 = vpop.permute.xlu2 %1166  ;;  %v453_v10 = vadd.f32 %v451_v35, %v435_v39  ;;  %v495_v20 = vsel %vm7682_vm4, %v4320_v60, %v4328_v61  ;;  %v469_v14 = vmul.f32 %v465_v44, %v459_v48  ;;  %v487_v23 = vmul.f32 %v483_v45, %v477_v17 }
 0x44a   :  { %v452_v25 = vadd.f32 %v450_v19, %v434_v42  ;;  %v496_v56 = vsel %vm7682_vm4, %v4328_v61, %v4320_v60  ;;  %vm7683_vm3 = vcmp.lt.s32.totalorder %v4583_v21, 17  ;;  %v468_v57 = vmul.f32 %v464_v29, %v460_v24  ;;  %v3653_v60 = vld [vmem:[%s7557_s5 + $0x21] ss:$8 sm:$0x3] }
 0x44b   :  { %v471_v58 = vadd.f32 %v469_v14, %v453_v10  ;;  %v486_v18 = vmul.f32 %v482_v36, %v478_v37  ;;  %v505_v30 = vmul.f32 %v501_v31, %v495_v20  ;;  %v519_v15 = vperm.slane %v3651_v27, 1  ;;  %v3654_v31 = vld [vmem:[%s7557_s5 + $0x22] ss:$8 sm:$0x3] }
 0x44c   :  { %v537_v13 = vperm.slane %v3652_v53, 1  ;;  %v470_v50 = vadd.f32 %v468_v57, %v452_v25  ;;  %v504_v52 = vmul.f32 %v500_v26, %v496_v56  ;;  %vm7687_vm4 = vcmp.lt.s32.totalorder %v4583_v21, 16 }
 0x44d   :  { %v489_v51 = vadd.f32 %v487_v23, %v471_v58  ;;  %v518_v33 = vperm.slane %v3651_v27, 0  ;;  %v513_v35 = vsel %vm7684_vm5, %v4318_v59, %v4332_v63  ;;  %v531_v44 = vsel %vm7683_vm3, %v4340_v3, %v4330_v62 }
 0x44e   :  { %1549 = vrot.lane.b32.xlu1 %v4410_v32, %s7868_s30  ;;  %1583 = vrot.lane.b32.xlu0 %v4410_v32, %s7869_s18  ;;  %v488_v45 = vadd.f32 %v486_v18, %v470_v50  ;;  %v536_v38 = vperm.slane %v3652_v53, 0  ;;  %v555_v39 = vperm.slane %v3653_v60, 1  ;;  %v514_v19 = vsel %vm7684_vm5, %v4332_v63, %v4318_v59  ;;  %v3655_v59 = vld [vmem:[%s7557_s5 + $0x23] ss:$8 sm:$0x3] }
 0x44f   :  { %1472 = vrot.lane.b32.xlu2 %v4424_v5, %s7677_s2  ;;  %s7870_s2 = smov 125   ;;  %v507_v54 = vadd.f32 %v505_v30, %v489_v51  ;;  %v532_v29 = vsel %vm7683_vm3, %v4330_v62, %v4340_v3  ;;  %v554_v48 = vperm.slane %v3653_v60, 0  ;;  %v549_v17 = vsel %vm7687_vm4, %v4344_v6, %v4352_v11 }
 0x450   :  { %v4791_v41 = vpop.permute.xlu1 %1181  ;;  %v4796_v55 = vpop.permute.xlu0 %1215  ;;  %v506_v42 = vadd.f32 %v504_v52, %v488_v45  ;;  %v523_v10 = vmul.f32 %v519_v15, %v513_v35  ;;  %v541_v36 = vmul.f32 %v537_v13, %v531_v44  ;;  %v550_v62 = vsel %vm7687_vm4, %v4352_v11, %v4344_v6  ;;  %v3656_v6 = vld [vmem:[%s7557_s5 + $0x24] ss:$8 sm:$0x3]  ;;  %v3657_v45 = vld [vmem:[%s7557_s5 + $0x25] ss:$8 sm:$0x3] }
 0x451   :  { %v4798_v46 = vpop.permute.xlu2 %1198  ;;  %vm7691_vm3 = vcmp.lt.s32.totalorder %v4583_v21, 15  ;;  %vm7690_vm5 = vcmp.lt.s32.totalorder %v4583_v21, 14  ;;  %v522_v63 = vmul.f32 %v518_v33, %v514_v19  ;;  %v540_v24 = vmul.f32 %v536_v38, %v532_v29 }
 0x452   :  { %v525_v3 = vadd.f32 %v523_v10, %v507_v54  ;;  %v559_v37 = vmul.f32 %v555_v39, %v549_v17  ;;  %v573_v20 = vperm.slane %v3654_v31, 1  ;;  %v591_v25 = vperm.slane %v3655_v59, 1 }
 0x453   :  { %v524_v23 = vadd.f32 %v522_v63, %v506_v42  ;;  %v558_v53 = vmul.f32 %v554_v48, %v550_v62  ;;  %vm7694_vm4 = vcmp.lt.s32.totalorder %v4583_v21, 13  ;;  %v572_v56 = vperm.slane %v3654_v31, 0  ;;  %v7875_v31 = vld [vmem:[#allocation10_spill] sm:$0xff]  ;;  %v7877_v63 = vld [vmem:[#allocation9_spill] sm:$0xff] }
 0x454   :  { %v543_v27 = vadd.f32 %v541_v36, %v525_v3  ;;  %v567_v57 = vsel %vm7691_vm3, %v4342_v4, %v4356_v7  ;;  %v585_v58 = vsel %vm7690_vm5, %v4364_v8, %v4354_v12  ;;  %v590_v15 = vperm.slane %v3655_v59, 0  ;;  %v7876_v59 = vld [vmem:[#allocation8_spill] sm:$0xff]  ;;  %v7878_v3 = vld [vmem:[#allocation11_spill] sm:$0xff] }
 0x455   :  { %v542_v18 = vadd.f32 %v540_v24, %v524_v23  ;;  %v609_v13 = vperm.slane %v3656_v6, 1  ;;  %v568_v60 = vsel %vm7691_vm3, %v4356_v7, %v4342_v4  ;;  %v586_v50 = vsel %vm7690_vm5, %v4354_v12, %v4364_v8  ;;  %v3658_v4 = vld [vmem:[%s7557_s5 + $0x26] ss:$8 sm:$0x3] }
 0x456   :  { %1568 = vrot.lane.b32.xlu1 %v4424_v5, %s7870_s2  ;;  %1602 = vrot.lane.b32.xlu0 %v4424_v5, %s7871_s6  ;;  %v561_v30 = vadd.f32 %v559_v37, %v543_v27  ;;  %v608_v51 = vperm.slane %v3656_v6, 0  ;;  %v603_v52 = vsel %vm7694_vm4, %v4368_v16, %v4377_v0  ;;  %v577_v35 = vmul.f32 %v573_v20, %v567_v57 }
 0x457   :  { %1504 = vrot.lane.b32.xlu2 %v4410_v32, %s7867_s8  ;;  %v560_v33 = vadd.f32 %v558_v53, %v542_v18  ;;  %v595_v44 = vmul.f32 %v591_v25, %v585_v58  ;;  %v604_v12 = vsel %vm7694_vm4, %v4377_v0, %v4368_v16  ;;  %vm7701_vm5 = vcmp.lt.s32.totalorder %v4583_v21, 3  ;;  %v3659_v16 = vld [vmem:[%s7557_s5 + $0x27] ss:$8 sm:$0x3] }
 0x458   :  { %v4839_v1 = vpop.permute.xlu1 %1200  ;;  %v4844_v61 = vpop.permute.xlu0 %1234  ;;  %vm7696_vm3 = vcmp.lt.s32.totalorder %v4583_v21, 2  ;;  %v576_v7 = vmul.f32 %v572_v56, %v568_v60  ;;  %v579_v8 = vadd.f32 %v577_v35, %v561_v30  ;;  %v594_v54 = vmul.f32 %v590_v15, %v586_v50  ;;  %v7879_v53 = vld [vmem:[#allocation14_spill] sm:$0xff]  ;;  %v7880_v56 = vld [vmem:[#allocation13_spill] sm:$0xff] }
 0x459   :  { %v4846_v47 = vpop.permute.xlu2 %1217  ;;  %v613_v38 = vmul.f32 %v609_v13, %v603_v52  ;;  %v627_v19 = vperm.slane %v3657_v45, 1  ;;  %v645_v29 = vperm.slane %v3658_v4, 1  ;;  %v612_v10 = vmul.f32 %v608_v51, %v604_v12  ;;  %v3660_v13 = vld [vmem:[%s7557_s5 + $0x30] ss:$8 sm:$0x3] }
 0x45a   :  { %v578_v17 = vadd.f32 %v576_v7, %v560_v33  ;;  %v597_v42 = vadd.f32 %v595_v44, %v579_v8  ;;  %vm7695_vm4 = vcmp.lt.s32.totalorder %v4583_v21, 1  ;;  %v626_v36 = vperm.slane %v3657_v45, 0 }
 0x45b   :  { %v621_v62 = vsel %vm7701_vm5, %v7876_v59, %v7875_v31  ;;  %v639_v24 = vsel %vm7696_vm3, %v7878_v3, %v7877_v63  ;;  %v644_v25 = vperm.slane %v3658_v4, 0  ;;  %v663_v6 = vperm.slane %v3659_v16, 1 }
 0x45c   :  { %v596_v37 = vadd.f32 %v594_v54, %v578_v17  ;;  %v615_v20 = vadd.f32 %v613_v38, %v597_v42  ;;  %v622_v23 = vsel %vm7701_vm5, %v7875_v31, %v7876_v59  ;;  %v640_v27 = vsel %vm7696_vm3, %v7877_v63, %v7878_v3  ;;  %v3661_v38 = vld [vmem:[%s7557_s5 + $0x31] ss:$8 sm:$0x3]  ;;  %v7881_v17 = vld [vmem:[#allocation3_spill] sm:$0xff] }
 0x45d   :  { %v657_v57 = vsel %vm7695_vm4, %v7880_v56, %v7879_v53  ;;  %v631_v18 = vmul.f32 %v627_v19, %v621_v62  ;;  %v649_v30 = vmul.f32 %v645_v29, %v639_v24  ;;  %v662_v15 = vperm.slane %v3659_v16, 0  ;;  %v3662_v19 = vld [vmem:[%s7557_s5 + $0x32] ss:$8 sm:$0x3]  ;;  %v7883_v62 = vld [vmem:[#allocation2_spill] sm:$0xff] }
 0x45e   :  { %1600 = vrot.lane.b32.xlu1 %v4410_v32, %s7871_s6  ;;  %1634 = vrot.lane.b32.xlu0 %v4410_v32, %s7872_s4  ;;  %v614_v58 = vadd.f32 %v612_v10, %v596_v37  ;;  %v658_v60 = vsel %vm7695_vm4, %v7879_v53, %v7880_v56  ;;  %v630_v50 = vmul.f32 %v626_v36, %v622_v23  ;;  %v674_v44 = vperm.slane %v3660_v13, 1  ;;  %v3663_v10 = vld [vmem:[%s7557_s5 + $0x33] ss:$8 sm:$0x3] }
 0x45f   :  { %1534 = vrot.lane.b32.xlu2 %v4424_v5, %s7866_s11  ;;  %v633_v51 = vadd.f32 %v631_v18, %v615_v20  ;;  %v648_v52 = vmul.f32 %v644_v25, %v640_v27  ;;  %v667_v33 = vmul.f32 %v663_v6, %v657_v57  ;;  %v673_v8 = vperm.slane %v3660_v13, 0  ;;  %v7884_v3 = vld [vmem:[#allocation12_spill] sm:$0xff]  ;;  %v7886_v20 = vld [vmem:[#allocation17_spill] sm:$0xff]  ;;  %v7887_v25 = vld [vmem:[#allocation15_spill] sm:$0xff] }
 0x460   :  { %v4887_v26 = vpop.permute.xlu1 %1232  ;;  %v4892_v11 = vpop.permute.xlu0 %1266  ;;  %v632_v12 = vadd.f32 %v630_v50, %v614_v58  ;;  %v666_v54 = vmul.f32 %v662_v15, %v658_v60  ;;  %vm7703_vm4 = vcmp.lt.s32.totalorder %v4583_v21, 127  ;;  %vm7702_vm3 = vcmp.lt.s32.totalorder %v4583_v21, 126  ;;  %v7885_v24 = vld [vmem:[#allocation16_spill] sm:$0xff]  ;;  %v7889_v15 = vld [vmem:[#allocation19_spill] sm:$0xff] }
 0x461   :  { %v4894_v14 = vpop.permute.xlu2 %1249  ;;  %v651_v7 = vadd.f32 %v649_v30, %v633_v51  ;;  %v678_v42 = vmul.f32 %v674_v44, %v7881_v17  ;;  %v692_v31 = vperm.slane %v3661_v38, 1  ;;  %v710_v59 = vperm.slane %v3662_v19, 1  ;;  %v7890_v13 = vld [vmem:[#allocation20_spill] sm:$0xff] }
 0x462   :  { %v650_v29 = vadd.f32 %v648_v52, %v632_v12  ;;  %vm7709_vm5 = vcmp.lt.s32.totalorder %v4583_v21, 125  ;;  %v677_v63 = vmul.f32 %v673_v8, %v7883_v62  ;;  %v687_v37 = vsel %vm7703_vm4, %v7885_v24, %v7884_v3  ;;  %v3664_v12 = vld [vmem:[%s7557_s5 + $0x34] ss:$8 sm:$0x3]  ;;  %v7891_v62 = vld [vmem:[#allocation18_spill] sm:$0xff] }
 0x463   :  { %v669_v16 = vadd.f32 %v667_v33, %v651_v7  ;;  %v705_v6 = vsel %vm7702_vm3, %v7887_v25, %v7886_v20  ;;  %v691_v27 = vperm.slane %v3661_v38, 0  ;;  %v709_v53 = vperm.slane %v3662_v19, 0  ;;  %v3665_v7 = vld [vmem:[%s7557_s5 + $0x35] ss:$8 sm:$0x3] }
 0x464   :  { %v668_v36 = vadd.f32 %v666_v54, %v650_v29  ;;  %v728_v56 = vperm.slane %v3663_v10, 1  ;;  %v686_v58 = vsel %vm7703_vm4, %v7884_v3, %v7885_v24  ;;  %v704_v18 = vsel %vm7702_vm3, %v7886_v20, %v7887_v25  ;;  %v7893_v24 = vld [vmem:[#allocation23_spill] sm:$0xff] }
 0x465   :  { %v680_v23 = vadd.f32 %v678_v42, %v669_v16  ;;  %v727_v30 = vperm.slane %v3663_v10, 0  ;;  %v723_v60 = vsel %vm7709_vm5, %v7890_v13, %v7889_v15  ;;  %v696_v33 = vmul.f32 %v692_v31, %v687_v37  ;;  %v3666_v42 = vld [vmem:[%s7557_s5 + $0x36] ss:$8 sm:$0x3] }
 0x466   :  { %1619 = vrot.lane.b32.xlu1 %v4424_v5, %s7873_s21  ;;  %1653 = vrot.lane.b32.xlu0 %v4424_v5, %s7874_s22  ;;  %v679_v52 = vadd.f32 %v677_v63, %v668_v36  ;;  %v714_v44 = vmul.f32 %v710_v59, %v705_v6  ;;  %v722_v8 = vsel %vm7709_vm5, %v7889_v15, %v7890_v13  ;;  %vm7708_vm3 = vcmp.lt.s32.totalorder %v4583_v21, 115  ;;  %v7892_v63 = vld [vmem:[#allocation22_spill] sm:$0xff]  ;;  %v7894_v37 = vld [vmem:[#allocation21_spill] sm:$0xff] }
 0x467   :  { %1566 = vrot.lane.b32.xlu2 %v4410_v32, %s7870_s2  ;;  %vm7707_vm4 = vcmp.lt.s32.totalorder %v4583_v21, 114  ;;  %v695_v54 = vmul.f32 %v691_v27, %v686_v58  ;;  %v698_v38 = vadd.f32 %v696_v33, %v680_v23  ;;  %v713_v19 = vmul.f32 %v709_v53, %v704_v18  ;;  %v7897_v15 = vld [vmem:[#allocation26_spill] sm:$0xff] }
 0x468   :  { %v4935_v39 = vpop.permute.xlu1 %1251  ;;  %v4940_v0 = vpop.permute.xlu0 %1285  ;;  %v732_v29 = vmul.f32 %v728_v56, %v723_v60  ;;  %v746_v16 = vperm.slane %v3664_v12, 1  ;;  %v764_v17 = vperm.slane %v3665_v7, 1  ;;  %v731_v31 = vmul.f32 %v727_v30, %v722_v8  ;;  %v7896_v30 = vld [vmem:[#allocation25_spill] sm:$0xff]  ;;  %v3668_v8 = vld [vmem:[%s7557_s5 + $0x40] ss:$8 sm:$0x3] }
 0x469   :  { %v4942_v48 = vpop.permute.xlu2 %1268  ;;  %v697_v10 = vadd.f32 %v695_v54, %v679_v52  ;;  %v716_v36 = vadd.f32 %v714_v44, %v698_v38  ;;  %vm7716_vm2 = vcmp.lt.s32.totalorder %v4583_v21, 113  ;;  %v745_v59 = vperm.slane %v3664_v12, 0 }
 0x46a   :  { %v741_v3 = vsel %vm7708_vm3, %v7892_v63, %v7891_v62  ;;  %v759_v20 = vsel %vm7707_vm4, %v7894_v37, %v7893_v24  ;;  %v763_v23 = vperm.slane %v3665_v7, 0  ;;  %v782_v27 = vperm.slane %v3666_v42, 1  ;;  %v3667_v7 = vld [vmem:[%s7557_s5 + $0x37] ss:$8 sm:$0x3] }
 0x46b   :  { %v715_v25 = vadd.f32 %v713_v19, %v697_v10  ;;  %v734_v6 = vadd.f32 %v732_v29, %v716_v36  ;;  %v740_v56 = vsel %vm7708_vm3, %v7891_v62, %v7892_v63  ;;  %v758_v58 = vsel %vm7707_vm4, %v7893_v24, %v7894_v37  ;;  %v3669_v10 = vld [vmem:[%s7557_s5 + $0x41] ss:$8 sm:$0x3]  ;;  %v7901_v37 = vld [vmem:[#allocation29_spill] sm:$0xff] }
 0x46c   :  { %v781_v18 = vperm.slane %v3666_v42, 0  ;;  %v777_v13 = vsel %vm7716_vm2, %v7897_v15, %v7896_v30  ;;  %v750_v44 = vmul.f32 %v746_v16, %v741_v3  ;;  %v768_v12 = vmul.f32 %v764_v17, %v759_v20  ;;  %v7899_v3 = vld [vmem:[#allocation24_spill] sm:$0xff]  ;;  %v7902_v20 = vld [vmem:[#allocation27_spill] sm:$0xff] }
 0x46d   :  { %v733_v33 = vadd.f32 %v731_v31, %v715_v25  ;;  %v776_v54 = vsel %vm7716_vm2, %v7896_v30, %v7897_v15  ;;  %vm7715_vm4 = vcmp.lt.s32.totalorder %v4583_v21, 112  ;;  %vm7714_vm3 = vcmp.lt.s32.totalorder %v4583_v21, 111 }
 0x46e   :  { %1651 = vrot.lane.b32.xlu1 %v4410_v32, %s7874_s22  ;;  %1685 = vrot.lane.b32.xlu0 %v4410_v32, %s7721_s25  ;;  %v749_v38 = vmul.f32 %v745_v59, %v740_v56  ;;  %v752_v19 = vadd.f32 %v750_v44, %v734_v6  ;;  %v767_v29 = vmul.f32 %v763_v23, %v758_v58  ;;  %v800_v17 = vperm.slane %v3667_v7, 1  ;;  %v7900_v59 = vld [vmem:[#allocation28_spill] sm:$0xff] }
 0x46f   :  { %1585 = vrot.lane.b32.xlu2 %v4424_v5, %s7869_s18  ;;  %v786_v16 = vmul.f32 %v782_v27, %v777_v13  ;;  %v818_v42 = vperm.slane %v3668_v8, 1  ;;  %v785_v62 = vmul.f32 %v781_v18, %v776_v54  ;;  %vm7719_vm5 = vcmp.lt.s32.totalorder %v4583_v21, 110  ;;  %v7904_v13 = vld [vmem:[#allocation31_spill] sm:$0xff] }
 0x470   :  { %v4978_v35 = vpop.permute.xlu1 %1283  ;;  %v4980_v45 = vpop.permute.xlu0 %1317  ;;  %v751_v36 = vadd.f32 %v749_v38, %v733_v33  ;;  %v770_v31 = vadd.f32 %v768_v12, %v752_v19  ;;  %v799_v63 = vperm.slane %v3667_v7, 0  ;;  %v795_v24 = vsel %vm7715_vm4, %v7900_v59, %v7899_v3  ;;  %v7905_v33 = vld [vmem:[#allocation32_spill] sm:$0xff]  ;;  %v3670_v19 = vld [vmem:[%s7557_s5 + $0x42] ss:$8 sm:$0x3] }
 0x471   :  { %v4982_v4 = vpop.permute.xlu2 %1300  ;;  %v813_v25 = vsel %vm7714_vm3, %v7902_v20, %v7901_v37  ;;  %v817_v27 = vperm.slane %v3668_v8, 0  ;;  %v836_v56 = vperm.slane %v3669_v10, 1  ;;  %v794_v18 = vsel %vm7715_vm4, %v7899_v3, %v7900_v59  ;;  %v3672_v3 = vld [vmem:[%s7557_s5 + $0x44] ss:$8 sm:$0x3] }
 0x472   :  { %v769_v6 = vadd.f32 %v767_v29, %v751_v36  ;;  %v788_v23 = vadd.f32 %v786_v16, %v770_v31  ;;  %v812_v30 = vsel %vm7714_vm3, %v7901_v37, %v7902_v20  ;;  %v835_v15 = vperm.slane %v3669_v10, 0  ;;  %v3671_v29 = vld [vmem:[%s7557_s5 + $0x43] ss:$8 sm:$0x3] }
 0x473   :  { %v831_v44 = vsel %vm7719_vm5, %v7905_v33, %v7904_v13  ;;  %v804_v54 = vmul.f32 %v800_v17, %v795_v24  ;;  %v822_v38 = vmul.f32 %v818_v42, %v813_v25  ;;  %v830_v16 = vsel %vm7719_vm5, %v7904_v13, %v7905_v33  ;;  %v7906_v25 = vld [vmem:[#allocation30_spill] sm:$0xff] }
 0x474   :  { %v787_v8 = vadd.f32 %v785_v62, %v769_v6  ;;  %vm7718_vm3 = vcmp.lt.s32.totalorder %v4583_v21, 109  ;;  %vm7717_vm4 = vcmp.lt.s32.totalorder %v4583_v21, 99  ;;  %v803_v10 = vmul.f32 %v799_v63, %v794_v18  ;;  %v7907_v63 = vld [vmem:[#allocation34_spill] sm:$0xff] }
 0x475   :  { %v806_v17 = vadd.f32 %v804_v54, %v788_v23  ;;  %v821_v42 = vmul.f32 %v817_v27, %v812_v30  ;;  %v840_v36 = vmul.f32 %v836_v56, %v831_v44  ;;  %v854_v31 = vperm.slane %v3670_v19, 1  ;;  %v7908_v23 = vld [vmem:[#allocation35_spill] sm:$0xff]  ;;  %v7909_v27 = vld [vmem:[#allocation33_spill] sm:$0xff] }
 0x476   :  { %1670 = vrot.lane.b32.xlu1 %v4424_v5, %s7882_s28  ;;  %1704 = vrot.lane.b32.xlu0 %v4424_v5, %s7888_s12  ;;  %v872_v62 = vperm.slane %v3671_v29, 1  ;;  %v805_v59 = vadd.f32 %v803_v10, %v787_v8  ;;  %v839_v37 = vmul.f32 %v835_v15, %v830_v16  ;;  %vm7729_vm2 = vcmp.lt.s32.totalorder %v4583_v21, 98 }
 0x477   :  { %1617 = vrot.lane.b32.xlu2 %v4410_v32, %s7873_s21  ;;  %v824_v24 = vadd.f32 %v822_v38, %v806_v17  ;;  %v853_v20 = vperm.slane %v3670_v19, 0  ;;  %v849_v6 = vsel %vm7718_vm3, %v7907_v63, %v7906_v25  ;;  %v867_v56 = vsel %vm7717_vm4, %v7909_v27, %v7908_v23  ;;  %v7911_v38 = vld [vmem:[#allocation37_spill] sm:$0xff]  ;;  %v7912_v19 = vld [vmem:[#allocation38_spill] sm:$0xff] }
 0x478   :  { %v5012_v57 = vpop.permute.xlu1 %1302  ;;  %v5026_v50 = vpop.permute.xlu0 %1336  ;;  %v823_v18 = vadd.f32 %v821_v42, %v805_v59  ;;  %v871_v15 = vperm.slane %v3671_v29, 0  ;;  %v890_v13 = vperm.slane %v3672_v3, 1  ;;  %v848_v44 = vsel %vm7718_vm3, %v7906_v25, %v7907_v63  ;;  %v3673_v59 = vld [vmem:[%s7557_s5 + $0x45] ss:$8 sm:$0x3] }
 0x479   :  { %v5028_v51 = vpop.permute.xlu2 %1319  ;;  %v842_v30 = vadd.f32 %v840_v36, %v824_v24  ;;  %v866_v8 = vsel %vm7717_vm4, %v7908_v23, %v7909_v27  ;;  %v889_v54 = vperm.slane %v3672_v3, 0  ;;  %v885_v16 = vsel %vm7729_vm2, %v7912_v19, %v7911_v38  ;;  %v3674_v3 = vld [vmem:[%s7557_s5 + $0x46] ss:$8 sm:$0x3] }
 0x47a   :  { %v841_v17 = vadd.f32 %v839_v37, %v823_v18  ;;  %v858_v42 = vmul.f32 %v854_v31, %v849_v6  ;;  %v876_v36 = vmul.f32 %v872_v62, %v867_v56  ;;  %v884_v24 = vsel %vm7729_vm2, %v7911_v38, %v7912_v19  ;;  %v3675_v23 = vld [vmem:[%s7557_s5 + $0x47] ss:$8 sm:$0x3]  ;;  %v7916_v19 = vld [vmem:[#allocation36_spill] sm:$0xff] }
 0x47b   :  { %vm7726_vm4 = vcmp.lt.s32.totalorder %v4583_v21, 97  ;;  %vm7725_vm3 = vcmp.lt.s32.totalorder %v4583_v21, 96  ;;  %v857_v37 = vmul.f32 %v853_v20, %v848_v44  ;;  %v875_v62 = vmul.f32 %v871_v15, %v866_v8  ;;  %v7917_v20 = vld [vmem:[#allocation40_spill] sm:$0xff]  ;;  %v7918_v15 = vld [vmem:[#allocation41_spill] sm:$0xff] }
 0x47c   :  { %v860_v31 = vadd.f32 %v858_v42, %v842_v30  ;;  %v894_v25 = vmul.f32 %v890_v13, %v885_v16  ;;  %v908_v63 = vperm.slane %v3673_v59, 1  ;;  %v926_v6 = vperm.slane %v3674_v3, 1  ;;  %v7919_v13 = vld [vmem:[#allocation39_spill] sm:$0xff] }
 0x47d   :  { %v859_v27 = vadd.f32 %v857_v37, %v841_v17  ;;  %v893_v18 = vmul.f32 %v889_v54, %v884_v24  ;;  %vm7735_vm5 = vcmp.lt.s32.totalorder %v4583_v21, 95  ;;  %v907_v38 = vperm.slane %v3673_v59, 0  ;;  %v7922_v37 = vld [vmem:[#allocation43_spill] sm:$0xff] }
 0x47e   :  { %1702 = vrot.lane.b32.xlu1 %v4410_v32, %s7888_s12  ;;  %1736 = vrot.lane.b32.xlu0 %v4410_v32, %s7895_s26  ;;  %v878_v56 = vadd.f32 %v876_v36, %v860_v31  ;;  %v903_v30 = vsel %vm7726_vm4, %v7917_v20, %v7916_v19  ;;  %v921_v44 = vsel %vm7725_vm3, %v7919_v13, %v7918_v15  ;;  %v925_v16 = vperm.slane %v3674_v3, 0  ;;  %v7923_v31 = vld [vmem:[#allocation44_spill] sm:$0xff] }
 0x47f   :  { %1636 = vrot.lane.b32.xlu2 %v4424_v5, %s7872_s4  ;;  %v877_v8 = vadd.f32 %v875_v62, %v859_v27  ;;  %v944_v17 = vperm.slane %v3675_v23, 1  ;;  %v902_v36 = vsel %vm7726_vm4, %v7916_v19, %v7917_v20  ;;  %v920_v59 = vsel %vm7725_vm3, %v7918_v15, %v7919_v13  ;;  %v3676_v19 = vld [vmem:[%s7557_s5 + $0x50] ss:$8 sm:$0x3] }
 0x480   :  { %v5060_v53 = vpop.permute.xlu1 %1334  ;;  %v5074_v60 = vpop.permute.xlu0 %1368  ;;  %v896_v54 = vadd.f32 %v894_v25, %v878_v56  ;;  %v943_v24 = vperm.slane %v3675_v23, 0  ;;  %v939_v62 = vsel %vm7735_vm5, %v7923_v31, %v7922_v37  ;;  %v912_v56 = vmul.f32 %v908_v63, %v903_v30  ;;  %v3677_v23 = vld [vmem:[%s7557_s5 + $0x51] ss:$8 sm:$0x3] }
 0x481   :  { %v5076_v52 = vpop.permute.xlu2 %1351  ;;  %v895_v27 = vadd.f32 %v893_v18, %v877_v8  ;;  %v938_v20 = vsel %vm7735_vm5, %v7922_v37, %v7923_v31  ;;  %vm7732_vm3 = vcmp.lt.s32.totalorder %v4583_v21, 94  ;;  %vm7731_vm4 = vcmp.lt.s32.totalorder %v4583_v21, 93  ;;  %v7926_v31 = vld [vmem:[#allocation42_spill] sm:$0xff] }
 0x482   :  { %v911_v18 = vmul.f32 %v907_v38, %v902_v36  ;;  %v914_v63 = vadd.f32 %v912_v56, %v896_v54  ;;  %v948_v30 = vmul.f32 %v944_v17, %v939_v62  ;;  %v962_v15 = vperm.slane %v3676_v19, 1  ;;  %v7927_v38 = vld [vmem:[#allocation46_spill] sm:$0xff]  ;;  %v7929_v17 = vld [vmem:[#allocation45_spill] sm:$0xff] }
 0x483   :  { %v980_v13 = vperm.slane %v3677_v23, 1  ;;  %vm7783_vm2 = vcmp.lt.s32.totalorder %v4583_v21, 83  ;;  %v961_v37 = vperm.slane %v3676_v19, 0  ;;  %v957_v54 = vsel %vm7732_vm3, %v7927_v38, %v7926_v31 }
 0x484   :  { %v913_v8 = vadd.f32 %v911_v18, %v895_v27  ;;  %v956_v56 = vsel %vm7732_vm3, %v7926_v31, %v7927_v38  ;;  %v7931_v18 = vld [vmem:[#allocation49_spill] sm:$0xff]  ;;  %vm7743_vm3 = vcmp.lt.s32.totalorder %v4583_v21, 81  ;;  %vm7748_vm5 = vcmp.lt.s32.totalorder %v4583_v21, 80 }
 0x485   :  { %v3679_v31 = vld [vmem:[%s7557_s5 + $0x53] ss:$8 sm:$0x3] }
 0x486   :  { %1721 = vrot.lane.b32.xlu1 %v4424_v5, %s7898_s16  ;;  %1755 = vrot.lane.b32.xlu0 %v4424_v5, %s7903_s9 }
 0x487   :  { %1668 = vrot.lane.b32.xlu2 %v4410_v32, %s7882_s28 }
 0x488   :  { %v5108_v58 = vpop.permute.xlu1 %1353  ;;  %v5122_v12 = vpop.permute.xlu0 %1387 }
 0x489   :  { %v5124_v7 = vpop.permute.xlu2 %1370 }
 0x48e   :  { %1753 = vrot.lane.b32.xlu1 %v4410_v32, %s7903_s9  ;;  %1787 = vrot.lane.b32.xlu0 %v4410_v32, %s7750_s20 }
 0x48f   :  { %1687 = vrot.lane.b32.xlu2 %v4424_v5, %s7721_s25  ;;  %s8016_s25 = smov 18  }
 0x490   :  { %v5156_v33 = vpop.permute.xlu1 %1385  ;;  %v5170_v29 = vpop.permute.xlu0 %1419 }
 0x491   :  { %7910 = vst [vmem:[#allocation10_spill] sm:$0xff] %v5156_v33  ;;  %v5172_v10 = vpop.permute.xlu2 %1402 }
 0x492   :  { %7913 = vst [vmem:[#allocation8_spill] sm:$0xff] %v5170_v29  ;;  %v930_v29 = vmul.f32 %v926_v6, %v921_v44  ;;  %v929_v6 = vmul.f32 %v925_v16, %v920_v59  ;;  %v3678_v44 = vld [vmem:[%s7557_s5 + $0x52] ss:$8 sm:$0x3]  ;;  %v7928_v16 = vld [vmem:[#allocation47_spill] sm:$0xff] }
 0x493   :  { %7914 = vst [vmem:[#allocation9_spill] sm:$0xff] %v5172_v10  ;;  %v975_v36 = vsel %vm7731_vm4, %v7929_v17, %v7928_v16  ;;  %v998_v62 = vperm.slane %v3678_v44, 1  ;;  %v974_v19 = vsel %vm7731_vm4, %v7928_v16, %v7929_v17  ;;  %vm7744_vm4 = vcmp.lt.s32.totalorder %v4583_v21, 82  ;;  %v7943_v10 = vld [vmem:[#allocation55_spill] sm:$0xff] }
 0x494   :  { %v1016_v16 = vperm.slane %v3679_v31, 1 }
 0x496   :  { %1772 = vrot.lane.b32.xlu1 %v4424_v5, %s7915_s27  ;;  %1806 = vrot.lane.b32.xlu0 %v4424_v5, %s7920_s17 }
 0x497   :  { %1719 = vrot.lane.b32.xlu2 %v4410_v32, %s7898_s16 }
 0x498   :  { %v5204_v42 = vpop.permute.xlu1 %1404  ;;  %v5218_v3 = vpop.permute.xlu0 %1438 }
 0x499   :  { %7921 = vst [vmem:[#allocation11_spill] sm:$0xff] %v5204_v42  ;;  %v5220_v25 = vpop.permute.xlu2 %1421  ;;  %v7944_v42 = vld [vmem:[#allocation56_spill] sm:$0xff] }
 0x49a   :  { %7924 = vst [vmem:[#allocation14_spill] sm:$0xff] %v5218_v3  ;;  %v932_v3 = vadd.f32 %v930_v29, %v914_v63  ;;  %v931_v29 = vadd.f32 %v929_v6, %v913_v8  ;;  %v7932_v63 = vld [vmem:[#allocation50_spill] sm:$0xff]  ;;  %v966_v8 = vmul.f32 %v962_v15, %v957_v54 }
 0x49b   :  { %7925 = vst [vmem:[#allocation13_spill] sm:$0xff] %v5220_v25  ;;  %v947_v25 = vmul.f32 %v943_v24, %v938_v20  ;;  %v979_v24 = vperm.slane %v3677_v23, 0  ;;  %v997_v20 = vperm.slane %v3678_v44, 0  ;;  %v3680_v44 = vld [vmem:[%s7557_s5 + $0x54] ss:$8 sm:$0x3]  ;;  %v992_v38 = vsel %vm7783_vm2, %v7931_v18, %v7932_v63 }
 0x49c   :  { %v950_v59 = vadd.f32 %v948_v30, %v932_v3  ;;  %v993_v3 = vsel %vm7783_vm2, %v7932_v63, %v7931_v18  ;;  %v1034_v17 = vperm.slane %v3680_v44, 1  ;;  %v7936_v18 = vld [vmem:[#allocation5_spill] sm:$0xff] }
 0x49d   :  { %v949_v30 = vadd.f32 %v947_v25, %v931_v29  ;;  %v965_v25 = vmul.f32 %v961_v37, %v956_v56  ;;  %v1002_v54 = vmul.f32 %v998_v62, %v993_v3  ;;  %v2036_v63 = vrot.slane %v7936_v18, 4  ;;  %v7939_v56 = vld [vmem:[#allocation53_spill] sm:$0xff] }
 0x49e   :  { %1804 = vrot.lane.b32.xlu1 %v4410_v32, %s7920_s17  ;;  %1838 = vrot.lane.b32.xlu0 %v4410_v32, %s7760_s23  ;;  %v968_v15 = vadd.f32 %v966_v8, %v950_v59  ;;  %v1015_v37 = vperm.slane %v3679_v31, 0  ;;  %v7937_v59 = vld [vmem:[#allocation48_spill] sm:$0xff]  ;;  %s8024_s17 = smov 17  }
 0x49f   :  { %1738 = vrot.lane.b32.xlu2 %v4424_v5, %s7895_s26  ;;  %v967_v29 = vadd.f32 %v965_v25, %v949_v30  ;;  %v1033_v30 = vperm.slane %v3680_v44, 0 }
 0x4a0   :  { %v5252_v27 = vpop.permute.xlu1 %1436  ;;  %v5266_v23 = vpop.permute.xlu0 %1470 }
 0x4a1   :  { %7930 = vst [vmem:[#allocation3_spill] sm:$0xff] %v5252_v27  ;;  %v5268_v6 = vpop.permute.xlu2 %1453  ;;  %v984_v27 = vmul.f32 %v980_v13, %v975_v36  ;;  %v983_v13 = vmul.f32 %v979_v24, %v974_v19  ;;  %v3681_v36 = vld [vmem:[%s7557_s5 + $0x55] ss:$8 sm:$0x3]  ;;  %v7940_v19 = vld [vmem:[#allocation51_spill] sm:$0xff] }
 0x4a2   :  { %7933 = vst [vmem:[#allocation2_spill] sm:$0xff] %v5266_v23  ;;  %v7938_v24 = vld [vmem:[#allocation52_spill] sm:$0xff]  ;;  %v1029_v3 = vsel %vm7743_vm3, %v7940_v19, %v7939_v56  ;;  %v1052_v8 = vperm.slane %v3681_v36, 1  ;;  %v1028_v25 = vsel %vm7743_vm3, %v7939_v56, %v7940_v19  ;;  %vm1063_vm3 = vcmp.lt.s32.totalorder %v4583_v21, 79 }
 0x4a3   :  { %7934 = vst [vmem:[#allocation12_spill] sm:$0xff] %v5268_v6  ;;  %v986_v23 = vadd.f32 %v984_v27, %v968_v15  ;;  %v1001_v6 = vmul.f32 %v997_v20, %v992_v38  ;;  %v1011_v62 = vsel %vm7744_vm4, %v7938_v24, %v7937_v59  ;;  %v985_v27 = vadd.f32 %v983_v13, %v967_v29 }
 0x4a4   :  { %v1010_v38 = vsel %vm7744_vm4, %v7937_v59, %v7938_v24  ;;  %v1051_v15 = vperm.slane %v3681_v36, 0  ;;  %v1020_v29 = vmul.f32 %v1016_v16, %v1011_v62  ;;  %v3682_v59 = vld [vmem:[%s7557_s5 + $0x56] ss:$8 sm:$0x3]  ;;  %v1046_v24 = vsel %vm7748_vm5, %v7943_v10, %v7944_v42 }
 0x4a5   :  { %v1004_v20 = vadd.f32 %v1002_v54, %v986_v23  ;;  %v1047_v23 = vsel %vm7748_vm5, %v7944_v42, %v7943_v10  ;;  %v1003_v54 = vadd.f32 %v1001_v6, %v985_v27  ;;  %v3683_v36 = vld [vmem:[%s7557_s5 + $0x57] ss:$8 sm:$0x3]  ;;  %vm1081_vm4 = vcmp.lt.s32.totalorder %v4583_v21, 78  ;;  %v7947_v42 = vld [vmem:[#allocation54_spill] sm:$0xff] }
 0x4a6   :  { %1823 = vrot.lane.b32.xlu1 %v4424_v5, %s7935_s15  ;;  %1857 = vrot.lane.b32.xlu0 %v4424_v5, %s7941_s0  ;;  %v1019_v6 = vmul.f32 %v1015_v37, %v1010_v38  ;;  %v1056_v62 = vmul.f32 %v1052_v8, %v1047_v23  ;;  %v2037_v56 = vmax.f32 %v7936_v18, %v2036_v63  ;;  %v1070_v19 = vperm.slane %v3682_v59, 1  ;;  %v3684_v27 = vld [vmem:[%s7557_s5 + $0x60] ss:$8 sm:$0x3] }
 0x4a7   :  { %1770 = vrot.lane.b32.xlu2 %v4410_v32, %s7915_s27  ;;  %v1022_v16 = vadd.f32 %v1020_v29, %v1004_v20  ;;  %v1055_v33 = vmul.f32 %v1051_v15, %v1046_v24  ;;  %vm1099_vm5 = vcmp.lt.s32.totalorder %v4583_v21, 77  ;;  %v1069_v10 = vperm.slane %v3682_v59, 0  ;;  %v7948_v37 = vld [vmem:[#allocation58_spill] sm:$0xff]  ;;  %v7949_v63 = vld [vmem:[#allocation59_spill] sm:$0xff]  ;;  %v7950_v20 = vld [vmem:[#allocation57_spill] sm:$0xff]  ;;  %s8062_s27 = smov 109  }
 0x4a8   :  { %v5301_v31 = vpop.permute.xlu1 %1455  ;;  %v5315_v44 = vpop.permute.xlu0 %1489  ;;  %v1065_v18 = vsel %vm1063_vm3, %v7948_v37, %v7947_v42  ;;  %v1087_v38 = vperm.slane %v3683_v36, 0  ;;  %v2038_v23 = vrot.slane %v2037_v56, 2  ;;  %v1082_v29 = vsel %vm1081_vm4, %v7949_v63, %v7950_v20  ;;  %v7952_v59 = vld [vmem:[#allocation61_spill] sm:$0xff] }
 0x4a9   :  { %7942 = vst [vmem:[#allocation16_spill] sm:$0xff] %v5301_v31  ;;  %v5317_v13 = vpop.permute.xlu2 %1472  ;;  %v1038_v31 = vmul.f32 %v1034_v17, %v1029_v3  ;;  %v1037_v17 = vmul.f32 %v1033_v30, %v1028_v25  ;;  %v1088_v3 = vperm.slane %v3683_v36, 1  ;;  %v1083_v30 = vsel %vm1081_vm4, %v7950_v20, %v7949_v63 }
 0x4aa   :  { %7945 = vst [vmem:[#allocation17_spill] sm:$0xff] %v5315_v44  ;;  %v1021_v44 = vadd.f32 %v1019_v6, %v1003_v54  ;;  %v1106_v25 = vperm.slane %v3684_v27, 1  ;;  %v1064_v54 = vsel %vm1063_vm3, %v7947_v42, %v7948_v37  ;;  %v1074_v6 = vmul.f32 %v1070_v19, %v1065_v18  ;;  %v3686_v37 = vld [vmem:[%s7557_s5 + $0x62] ss:$8 sm:$0x3] }
 0x4ab   :  { %7946 = vst [vmem:[#allocation15_spill] sm:$0xff] %v5317_v13  ;;  %v1040_v13 = vadd.f32 %v1038_v31, %v1022_v16  ;;  %v1092_v16 = vmul.f32 %v1088_v3, %v1083_v30  ;;  %v1100_v42 = vsel %vm1099_vm5, %v7952_v59, %v4647_v28  ;;  %v1073_v63 = vmul.f32 %v1069_v10, %v1064_v54  ;;  %v7956_v10 = vld [vmem:[#allocation60_spill] sm:$0xff] }
 0x4ac   :  { %v1039_v8 = vadd.f32 %v1037_v17, %v1021_v44  ;;  %v1101_v44 = vsel %vm1099_vm5, %v4647_v28, %v7952_v59  ;;  %v1105_v17 = vperm.slane %v3684_v27, 0  ;;  %v2039_v19 = vmax.f32 %v2037_v56, %v2038_v23  ;;  %v3687_v27 = vld [vmem:[%s7557_s5 + $0x63] ss:$8 sm:$0x3]  ;;  %v7955_v28 = vld [vmem:[#allocation4_spill] sm:$0xff] }
 0x4ad   :  { %v1058_v31 = vadd.f32 %v1056_v62, %v1040_v13  ;;  %v3685_v62 = vld [vmem:[%s7557_s5 + $0x61] ss:$8 sm:$0x3]  ;;  %v2029_v59 = vrot.slane %v7955_v28, 4  ;;  %v1117_v56 = vsel %vm243_vm7, %v7956_v10, %v4654_v22  ;;  %v1139_v54 = vperm.slane %v3686_v37, 0 }
 0x4ae   :  { %1855 = vrot.lane.b32.xlu1 %v4410_v32, %s7941_s0  ;;  %1889 = vrot.lane.b32.xlu0 %v4410_v32, %s7752_s19  ;;  %v1057_v24 = vadd.f32 %v1055_v33, %v1039_v8  ;;  %v1110_v33 = vmul.f32 %v1106_v25, %v1101_v44  ;;  %v1123_v3 = vperm.slane %v3685_v62, 1  ;;  %v1109_v8 = vmul.f32 %v1105_v17, %v1100_v42  ;;  %s7958_s19 = smov 77   ;;  %s7993_s0 = smov 34  }
 0x4af   :  { %1789 = vrot.lane.b32.xlu2 %v4424_v5, %s7750_s20  ;;  %v1076_v20 = vadd.f32 %v1074_v6, %v1058_v31  ;;  %v7957_v31 = vld [vmem:[#allocation62_spill] sm:$0xff]  ;;  %v1118_v6 = vsel %vm243_vm7, %v4654_v22, %v7956_v10  ;;  %s7959_s20 = smov 47  }
 0x4b0   :  { %v5350_v15 = vpop.permute.xlu1 %1487  ;;  %v5364_v13 = vpop.permute.xlu0 %1532  ;;  %v1075_v18 = vadd.f32 %v1073_v63, %v1057_v24  ;;  %v2040_v24 = vrot.slane %v2039_v19, 1  ;;  %v3688_v22 = vld [vmem:[%s7557_s5 + $0x64] ss:$8 sm:$0x3] }
 0x4b1   :  { %7951 = vst [vmem:[#allocation19_spill] sm:$0xff] %v5350_v15  ;;  %v5366_v36 = vpop.permute.xlu2 %1504  ;;  %v1094_v30 = vadd.f32 %v1092_v16, %v1076_v20  ;;  %v1122_v15 = vperm.slane %v3685_v62, 0  ;;  %v1135_v16 = vsel %vm260_vm6, %v7957_v31, %v4695_v34  ;;  %v1156_v20 = vperm.slane %v3687_v27, 0 }
 0x4b2   :  { %7953 = vst [vmem:[#allocation20_spill] sm:$0xff] %v5364_v13  ;;  %v1091_v13 = vmul.f32 %v1087_v38, %v1082_v29  ;;  %v1134_v38 = vsel %vm260_vm6, %v4695_v34, %v7957_v31  ;;  %v1157_v29 = vperm.slane %v3687_v27, 1  ;;  %v1152_v34 = vsel %vm278_vm8, %v4743_v40, %v4702_v9 }
 0x4b3   :  { %7954 = vst [vmem:[#allocation18_spill] sm:$0xff] %v5366_v36  ;;  %v1140_v36 = vperm.slane %v3686_v37, 1  ;;  %v1112_v23 = vadd.f32 %v1110_v33, %v1094_v30  ;;  %v1127_v37 = vmul.f32 %v1123_v3, %v1117_v56  ;;  %v3689_v33 = vld [vmem:[%s7557_s5 + $0x65] ss:$8 sm:$0x3]  ;;  %v1143_v10 = vmul.f32 %v1139_v54, %v1135_v16 }
 0x4b4   :  { %v1093_v25 = vadd.f32 %v1091_v13, %v1075_v18  ;;  %v1151_v13 = vsel %vm278_vm8, %v4702_v9, %v4743_v40  ;;  %v1126_v18 = vmul.f32 %v1122_v15, %v1118_v6  ;;  %v5425_v3 = vmax.f32 %v2039_v19, %v2040_v24  ;;  %v3690_v56 = vld [vmem:[%s7557_s5 + $0x66] ss:$8 sm:$0x3] }
 0x4b5   :  { %v1144_v63 = vmul.f32 %v1140_v36, %v1134_v38  ;;  %v1129_v30 = vadd.f32 %v1127_v37, %v1112_v23  ;;  %v2030_v36 = vmax.f32 %v7955_v28, %v2029_v59  ;;  %v1174_v27 = vperm.slane %v3688_v22, 1 }
 0x4b6   :  { %1874 = vrot.lane.b32.xlu1 %v4424_v5, %s7756_s24  ;;  %1908 = vrot.lane.b32.xlu0 %v4424_v5, %s7758_s1  ;;  %v1111_v42 = vadd.f32 %v1109_v8, %v1093_v25  ;;  %v1161_v8 = vmul.f32 %v1157_v29, %v1151_v13  ;;  %v1160_v9 = vmul.f32 %v1156_v20, %v1152_v34  ;;  %v1191_v40 = vperm.slane %v3689_v33, 1 }
 0x4b7   :  { %1821 = vrot.lane.b32.xlu2 %v4410_v32, %s7935_s15  ;;  %v1146_v38 = vadd.f32 %v1144_v63, %v1129_v30  ;;  %v1173_v15 = vperm.slane %v3688_v22, 0  ;;  %v1168_v28 = vsel %vm296_vm9, %v4700_v43, %v4750_v2  ;;  %v1185_v19 = vsel %vm314_vm10, %v4791_v41, %v4748_v49  ;;  %s7986_s15 = smov 32  }
 0x4b8   :  { %v5396_v44 = vpop.permute.xlu1 %1506  ;;  %v5410_v17 = vpop.permute.xlu0 %1551  ;;  %v1128_v31 = vadd.f32 %v1126_v18, %v1111_v42  ;;  %v1190_v23 = vperm.slane %v3689_v33, 0  ;;  %v1208_v54 = vperm.slane %v3690_v56, 1  ;;  %v2031_v24 = vrot.slane %v2030_v36, 2 }
 0x4b9   :  { %v5412_v62 = vpop.permute.xlu2 %1534  ;;  %v1163_v25 = vadd.f32 %v1161_v8, %v1146_v38  ;;  %v1169_v6 = vsel %vm296_vm9, %v4750_v2, %v4700_v43  ;;  %v1186_v16 = vsel %vm314_vm10, %v4748_v49, %v4791_v41  ;;  %v1202_v13 = vsel %vm332_vm11, %v4798_v46, %v4839_v1  ;;  %v3691_v43 = vld [vmem:[%s7557_s5 + $0x67] ss:$8 sm:$0x3]  ;;  %v3692_v2 = vld [vmem:[%s7557_s5 + $0x70] ss:$8 sm:$0x3] }
 0x4ba   :  { %v1145_v59 = vadd.f32 %v1143_v10, %v1128_v31  ;;  %v1178_v20 = vmul.f32 %v1174_v27, %v1168_v28  ;;  %v1195_v22 = vmul.f32 %v1191_v40, %v1185_v19  ;;  %v1207_v34 = vperm.slane %v3690_v56, 0  ;;  %v3693_v27 = vld [vmem:[%s7557_s5 + $0x71] ss:$8 sm:$0x3] }
 0x4bb   :  { %v1203_v49 = vsel %vm332_vm11, %v4839_v1, %v4798_v46  ;;  %v1177_v41 = vmul.f32 %v1173_v15, %v1169_v6  ;;  %v1194_v18 = vmul.f32 %v1190_v23, %v1186_v16  ;;  %v1212_v30 = vmul.f32 %v1208_v54, %v1202_v13 }
 0x4bc   :  { %v1162_v63 = vadd.f32 %v1160_v9, %v1145_v59  ;;  %v1180_v33 = vadd.f32 %v1178_v20, %v1163_v25  ;;  %v2032_v10 = vmax.f32 %v2030_v36, %v2031_v24  ;;  %v1225_v8 = vperm.slane %v3691_v43, 1 }
 0x4bd   :  { %v1211_v38 = vmul.f32 %v1207_v34, %v1203_v49  ;;  %v1242_v9 = vperm.slane %v3692_v2, 1  ;;  %v1224_v46 = vperm.slane %v3691_v43, 0  ;;  %v1219_v1 = vsel %vm350_vm12, %v4796_v55, %v4846_v47 }
 0x4be   :  { %1906 = vrot.lane.b32.xlu1 %v4410_v32, %s7758_s1  ;;  %2092 = vrot.lane.b32.xlu0 %v5425_v3, %s7762_s13  ;;  %v1179_v56 = vadd.f32 %v1177_v41, %v1162_v63  ;;  %v1197_v31 = vadd.f32 %v1195_v22, %v1180_v33  ;;  %v1236_v36 = vsel %vm368_vm13, %v4887_v26, %v4844_v61  ;;  %v1241_v28 = vperm.slane %v3692_v2, 0  ;;  %v3696_v33 = vld [vmem:[%s7557_s5 + $0x74] ss:$8 sm:$0x3]  ;;  %s7961_s1 = smov 45   ;;  %s7965_s13 = smov 35  }
 0x4bf   :  { %1840 = vrot.lane.b32.xlu2 %v4424_v5, %s7760_s23  ;;  %v1259_v19 = vperm.slane %v3693_v27, 1  ;;  %v2033_v25 = vrot.slane %v2032_v10, 1  ;;  %v1220_v23 = vsel %vm350_vm12, %v4846_v47, %v4796_v55  ;;  %v1237_v54 = vsel %vm368_vm13, %v4844_v61, %v4887_v26  ;;  %v3694_v55 = vld [vmem:[%s7557_s5 + $0x72] ss:$8 sm:$0x3]  ;;  %s7968_s23 = smov 46  }
 0x4c0   :  { %v5444_v29 = vpop.permute.xlu1 %1549  ;;  %v5458_v42 = vpop.permute.xlu0 %1583  ;;  %v1196_v40 = vadd.f32 %v1194_v18, %v1179_v56  ;;  %v1214_v15 = vadd.f32 %v1212_v30, %v1197_v31  ;;  %v1253_v24 = vsel %vm7776_vm14, %v4894_v14, %v4935_v39  ;;  %v1229_v63 = vmul.f32 %v1225_v8, %v1219_v1  ;;  %v3695_v47 = vld [vmem:[%s7557_s5 + $0x73] ss:$8 sm:$0x3] }
 0x4c1   :  { %v5460_v37 = vpop.permute.xlu2 %1566  ;;  %v1246_v20 = vmul.f32 %v1242_v9, %v1236_v36  ;;  %v1258_v22 = vperm.slane %v3693_v27, 0  ;;  %v1254_v61 = vsel %vm7776_vm14, %v4935_v39, %v4894_v14  ;;  %v1228_v26 = vmul.f32 %v1224_v46, %v1220_v23 }
 0x4c2   :  { %v1213_v13 = vadd.f32 %v1211_v38, %v1196_v40  ;;  %v1231_v34 = vadd.f32 %v1229_v63, %v1214_v15  ;;  %v1245_v43 = vmul.f32 %v1241_v28, %v1237_v54  ;;  %v1263_v49 = vmul.f32 %v1259_v19, %v1253_v24 }
 0x4c3   :  { %v5517_v2 = vmax.f32 %v2032_v10, %v2033_v25  ;;  %v1276_v41 = vperm.slane %v3694_v55, 1  ;;  %v1262_v8 = vmul.f32 %v1258_v22, %v1254_v61  ;;  %v1293_v27 = vperm.slane %v3695_v47, 1  ;;  %v3699_v22 = vld [vmem:[%s7557_s5 + $0x77] ss:$8 sm:$0x3] }
 0x4c4   :  { %v1230_v18 = vadd.f32 %v1228_v26, %v1213_v13  ;;  %v1248_v30 = vadd.f32 %v1246_v20, %v1231_v34  ;;  %v1275_v14 = vperm.slane %v3694_v55, 0  ;;  %v1270_v39 = vsel %vm7766_vm15, %v4892_v11, %v4942_v48 }
 0x4c5   :  { %v1287_v10 = vsel %vm7765_vm0, %v4978_v35, %v4940_v0  ;;  %v1292_v38 = vperm.slane %v3695_v47, 0  ;;  %v1310_v9 = vperm.slane %v3696_v33, 1  ;;  %v1271_v1 = vsel %vm7766_vm15, %v4942_v48, %v4892_v11  ;;  %v3697_v11 = vld [vmem:[%s7557_s5 + $0x75] ss:$8 sm:$0x3] }
 0x4c6   :  { %1925 = vrot.lane.b32.xlu1 %v4424_v5, %s7958_s19  ;;  %2124 = vrot.lane.b32.xlu0 %v5425_v3, %s7959_s20  ;;  %v1247_v56 = vadd.f32 %v1245_v43, %v1230_v18  ;;  %v1265_v31 = vadd.f32 %v1263_v49, %v1248_v30  ;;  %v1288_v36 = vsel %vm7765_vm0, %v4940_v0, %v4978_v35  ;;  %v1309_v54 = vperm.slane %v3696_v33, 0  ;;  %v3698_v48 = vld [vmem:[%s7557_s5 + $0x76] ss:$8 sm:$0x3] }
 0x4c7   :  { %1872 = vrot.lane.b32.xlu2 %v4410_v32, %s7756_s24  ;;  %s7962_s24 = smov 79   ;;  %v1304_v40 = vsel %vm7764_vm1, %v4982_v4, %v5012_v57  ;;  %v1280_v25 = vmul.f32 %v1276_v41, %v1270_v39  ;;  %v1297_v23 = vmul.f32 %v1293_v27, %v1287_v10  ;;  %v1305_v0 = vsel %vm7764_vm1, %v5012_v57, %v4982_v4 }
 0x4c8   :  { %v5489_v59 = vpop.permute.xlu1 %1568  ;;  %v5503_v6 = vpop.permute.xlu0 %1602  ;;  %v1264_v19 = vadd.f32 %v1262_v8, %v1247_v56  ;;  %v1279_v35 = vmul.f32 %v1275_v14, %v1271_v1  ;;  %v1296_v13 = vmul.f32 %v1292_v38, %v1288_v36  ;;  %v1314_v63 = vmul.f32 %v1310_v9, %v1304_v40 }
 0x4c9   :  { %v5505_v16 = vpop.permute.xlu2 %1585  ;;  %v1282_v24 = vadd.f32 %v1280_v25, %v1265_v31  ;;  %v1327_v20 = vperm.slane %v3697_v11, 1  ;;  %v1313_v47 = vmul.f32 %v1309_v54, %v1305_v0  ;;  %v1344_v26 = vperm.slane %v3698_v48, 1  ;;  %v7970_v0 = vld [vmem:[#allocation10_spill] sm:$0xff] }
 0x4ca   :  { %v1281_v55 = vadd.f32 %v1279_v35, %v1264_v19  ;;  %v1326_v4 = vperm.slane %v3697_v11, 0  ;;  %vm7963_vm1 = vcmp.lt.s32.totalorder %v4583_v21, 30  ;;  %vm7964_vm0 = vcmp.lt.s32.totalorder %v4583_v21, 29  ;;  %v3702_v19 = vld [vmem:[%s7557_s5 + $0x82] ss:$8 sm:$0x3] }
 0x4cb   :  { %v1299_v61 = vadd.f32 %v1297_v23, %v1282_v24  ;;  %v1321_v57 = vsel %vm7963_vm1, %v4980_v45, %v5028_v51  ;;  %v1338_v34 = vsel %vm7964_vm0, %v5060_v53, %v5026_v50  ;;  %v1343_v41 = vperm.slane %v3698_v48, 0 }
 0x4cc   :  { %v1298_v43 = vadd.f32 %v1296_v13, %v1281_v55  ;;  %v1361_v33 = vperm.slane %v3699_v22, 1  ;;  %v1322_v30 = vsel %vm7963_vm1, %v5028_v51, %v4980_v45  ;;  %v1339_v8 = vsel %vm7964_vm0, %v5026_v50, %v5060_v53  ;;  %v3700_v45 = vld [vmem:[%s7557_s5 + $0x80] ss:$8 sm:$0x3] }
 0x4cd   :  { %v1316_v49 = vadd.f32 %v1314_v63, %v1299_v61  ;;  %vm7966_vm15 = vcmp.lt.s32.totalorder %v4583_v21, 19  ;;  %v1331_v56 = vmul.f32 %v1327_v20, %v1321_v57  ;;  %v1348_v31 = vmul.f32 %v1344_v26, %v1338_v34  ;;  %v3701_v51 = vld [vmem:[%s7557_s5 + $0x81] ss:$8 sm:$0x3] }
 0x4ce   :  { %2076 = vrot.lane.b32.xlu1 %v5425_v3, %s7960_s3  ;;  %2154 = vrot.lane.b32.xlu0 %v5517_v2, %s7961_s1  ;;  %v1355_v27 = vsel %vm7966_vm15, %v5076_v52, %v5108_v58  ;;  %v1315_v10 = vadd.f32 %v1313_v47, %v1298_v43  ;;  %v1360_v38 = vperm.slane %v3699_v22, 0  ;;  %vm7967_vm1 = vmmov %vm7966_vm15  ;;  %v1330_v53 = vmul.f32 %v1326_v4, %v1322_v30  ;;  %v7976_v61 = vld [vmem:[#allocation11_spill] sm:$0xff]  ;;  %v7977_v47 = vld [vmem:[#allocation9_spill] sm:$0xff] }
 0x4cf   :  { %1891 = vrot.lane.b32.xlu2 %v4424_v5, %s7962_s24  ;;  %v1356_v50 = vsel %vm7967_vm1, %v5108_v58, %v5076_v52  ;;  %v1333_v9 = vadd.f32 %v1331_v56, %v1316_v49  ;;  %v1347_v1 = vmul.f32 %v1343_v41, %v1339_v8  ;;  %v1365_v36 = vmul.f32 %v1361_v33, %v1355_v27  ;;  %s7973_s24 = smov 51   ;;  %v3705_v56 = vld [vmem:[%s7557_s5 + $0x85] ss:$8 sm:$0x3] }
 0x4d0   :  { %v5536_v46 = vpop.permute.xlu1 %1600  ;;  %v5550_v15 = vpop.permute.xlu0 %1634  ;;  %v1378_v40 = vperm.slane %v3700_v45, 1  ;;  %v1332_v25 = vadd.f32 %v1330_v53, %v1315_v10  ;;  %v1364_v54 = vmul.f32 %v1360_v38, %v1356_v50  ;;  %v1395_v11 = vperm.slane %v3701_v51, 1  ;;  %v7980_v53 = vld [vmem:[#allocation13_spill] sm:$0xff] }
 0x4d1   :  { %v5552_v28 = vpop.permute.xlu2 %1617  ;;  %v1350_v23 = vadd.f32 %v1348_v31, %v1333_v9  ;;  %v1377_v52 = vperm.slane %v3700_v45, 0  ;;  %vm7969_vm15 = vcmp.lt.s32.totalorder %v4583_v21, 18  ;;  %vm7971_vm0 = vcmp.lt.s32.totalorder %v4583_v21, 17  ;;  %v7981_v9 = vld [vmem:[#allocation8_spill] sm:$0xff] }
 0x4d2   :  { %v1372_v58 = vsel %vm7969_vm15, %v5074_v60, %v5124_v7  ;;  %v1389_v48 = vsel %vm7971_vm0, %v7970_v0, %v5122_v12  ;;  %v1349_v35 = vadd.f32 %v1347_v1, %v1332_v25  ;;  %v1394_v13 = vperm.slane %v3701_v51, 0  ;;  %vm7974_vm1 = vmmov %vm7969_vm15 }
 0x4d3   :  { %v1367_v24 = vadd.f32 %v1365_v36, %v1350_v23  ;;  %v1412_v63 = vperm.slane %v3702_v19, 1  ;;  %v1373_v22 = vsel %vm7974_vm1, %v5124_v7, %v5074_v60  ;;  %vm7975_vm15 = vmmov %vm7971_vm0  ;;  %vm7978_vm0 = vcmp.lt.s32.totalorder %v4583_v21, 16  ;;  %v3703_v60 = vld [vmem:[%s7557_s5 + $0x83] ss:$8 sm:$0x3] }
 0x4d4   :  { %v1390_v55 = vsel %vm7975_vm15, %v5122_v12, %v7970_v0  ;;  %v1406_v26 = vsel %vm7978_vm0, %v7977_v47, %v7976_v61  ;;  %v1366_v34 = vadd.f32 %v1364_v54, %v1349_v35  ;;  %v1382_v43 = vmul.f32 %v1378_v40, %v1372_v58  ;;  %vm7979_vm1 = vmmov %vm7978_vm0  ;;  %v3704_v7 = vld [vmem:[%s7557_s5 + $0x84] ss:$8 sm:$0x3]  ;;  %v7990_v35 = vld [vmem:[#allocation12_spill] sm:$0xff] }
 0x4d5   :  { %v1399_v49 = vmul.f32 %v1395_v11, %v1389_v48  ;;  %v1411_v41 = vperm.slane %v3702_v19, 0  ;;  %v1407_v12 = vsel %vm7979_vm1, %v7976_v61, %v7977_v47  ;;  %v1381_v33 = vmul.f32 %v1377_v52, %v1373_v22  ;;  %v7983_v36 = vld [vmem:[#allocation14_spill] sm:$0xff]  ;;  %v7984_v40 = vld [vmem:[#allocation3_spill] sm:$0xff]  ;;  %v7989_v48 = vld [vmem:[#allocation16_spill] sm:$0xff] }
 0x4d6   :  { %2122 = vrot.lane.b32.xlu1 %v5517_v2, %s7959_s20  ;;  %2172 = vrot.lane.b32.xlu0 %v5425_v3, %s7965_s13  ;;  %s7972_s20 = smov 33   ;;  %v1384_v30 = vadd.f32 %v1382_v43, %v1367_v24  ;;  %v1398_v8 = vmul.f32 %v1394_v13, %v1390_v55  ;;  %v1416_v27 = vmul.f32 %v1412_v63, %v1406_v26  ;;  %v1429_v10 = vperm.slane %v3703_v60, 1  ;;  %v3706_v26 = vld [vmem:[%s7557_s5 + $0x86] ss:$8 sm:$0x3] }
 0x4d7   :  { %1923 = vrot.lane.b32.xlu2 %v4410_v32, %s7958_s19  ;;  %v1383_v31 = vadd.f32 %v1381_v33, %v1366_v34  ;;  %v1415_v45 = vmul.f32 %v1411_v41, %v1407_v12  ;;  %v1446_v50 = vperm.slane %v3704_v7, 1  ;;  %v1428_v51 = vperm.slane %v3703_v60, 0  ;;  %v3707_v43 = vld [vmem:[%s7557_s5 + $0x87] ss:$8 sm:$0x3]  ;;  %s8105_s19 = smov 48  }
 0x4d8   :  { %v5581_v18 = vpop.permute.xlu1 %1619  ;;  %v5595_v14 = vpop.permute.xlu0 %1653  ;;  %v1401_v38 = vadd.f32 %v1399_v49, %v1384_v30  ;;  %vm7982_vm15 = vcmp.lt.s32.totalorder %v4583_v21, 15  ;;  %vm7985_vm0 = vcmp.lt.s32.totalorder %v4583_v21, 14  ;;  %v1445_v54 = vperm.slane %v3704_v7, 0  ;;  %v3708_v33 = vld [vmem:[%s7557_s5 + $0x90] ss:$8 sm:$0x3] }
 0x4d9   :  { %v5597_v39 = vpop.permute.xlu2 %1636  ;;  %v1423_v1 = vsel %vm7982_vm15, %v7981_v9, %v7980_v53  ;;  %v1440_v19 = vsel %vm7985_vm0, %v7984_v40, %v7983_v36  ;;  %v1400_v25 = vadd.f32 %v1398_v8, %v1383_v31  ;;  %v1463_v11 = vperm.slane %v3705_v56, 1  ;;  %vm7987_vm1 = vmmov %vm7982_vm15  ;;  %v7994_v31 = vld [vmem:[#allocation15_spill] sm:$0xff] }
 0x4da   :  { %v1418_v23 = vadd.f32 %v1416_v27, %v1401_v38  ;;  %v1424_v58 = vsel %vm7987_vm1, %v7980_v53, %v7981_v9  ;;  %vm7988_vm15 = vmmov %vm7985_vm0  ;;  %vm7991_vm0 = vcmp.lt.s32.totalorder %v4583_v21, 13  ;;  %v1433_v55 = vmul.f32 %v1429_v10, %v1423_v1  ;;  %v7995_v38 = vld [vmem:[#allocation2_spill] sm:$0xff] }
 0x4db   :  { %v1441_v0 = vsel %vm7988_vm15, %v7983_v36, %v7984_v40  ;;  %v1457_v24 = vsel %vm7991_vm0, %v7990_v35, %v7989_v48  ;;  %v1417_v22 = vadd.f32 %v1415_v45, %v1400_v25  ;;  %v1450_v61 = vmul.f32 %v1446_v50, %v1440_v19  ;;  %vm7992_vm1 = vmmov %vm7991_vm0  ;;  %v7997_v50 = vld [vmem:[#allocation17_spill] sm:$0xff] }
 0x4dc   :  { %v1462_v47 = vperm.slane %v3705_v56, 0  ;;  %v1458_v34 = vsel %vm7992_vm1, %v7989_v48, %v7990_v35  ;;  %v1432_v49 = vmul.f32 %v1428_v51, %v1424_v58  ;;  %v1435_v41 = vadd.f32 %v1433_v55, %v1418_v23  ;;  %v7998_v51 = vld [vmem:[#allocation19_spill] sm:$0xff]  ;;  %v3709_v55 = vld [vmem:[%s7557_s5 + $0x91] ss:$8 sm:$0x3] }
 0x4dd   :  { %v1449_v60 = vmul.f32 %v1445_v54, %v1441_v0  ;;  %v1467_v12 = vmul.f32 %v1463_v11, %v1457_v24  ;;  %v1480_v7 = vperm.slane %v3706_v26, 1  ;;  %v1497_v10 = vperm.slane %v3707_v43, 1  ;;  %v8003_v54 = vld [vmem:[#allocation18_spill] sm:$0xff] }
 0x4de   :  { %2140 = vrot.lane.b32.xlu1 %v5425_v3, %s7968_s23  ;;  %2202 = vrot.lane.b32.xlu0 %v5517_v2, %s7972_s20  ;;  %v1434_v30 = vadd.f32 %v1432_v49, %v1417_v22  ;;  %v1452_v8 = vadd.f32 %v1450_v61, %v1435_v41  ;;  %v1466_v27 = vmul.f32 %v1462_v47, %v1458_v34  ;;  %v1479_v56 = vperm.slane %v3706_v26, 0 }
 0x4df   :  { %2058 = vrot.lane.b32.xlu2 %v5517_v2, %s7973_s24  ;;  %vm7996_vm15 = vcmp.lt.s32.totalorder %v4583_v21, 3  ;;  %vm7999_vm0 = vcmp.lt.s32.totalorder %v4583_v21, 2  ;;  %v1496_v36 = vperm.slane %v3707_v43, 0  ;;  %v1514_v40 = vperm.slane %v3708_v33, 1 }
 0x4e0   :  { %v5626_v20 = vpop.permute.xlu1 %1651  ;;  %v5640_v4 = vpop.permute.xlu0 %1685  ;;  %v1474_v45 = vsel %vm7996_vm15, %v7995_v38, %v7994_v31  ;;  %v1491_v53 = vsel %vm7999_vm0, %v7998_v51, %v7997_v50  ;;  %v1451_v9 = vadd.f32 %v1449_v60, %v1434_v30  ;;  %v1469_v1 = vadd.f32 %v1467_v12, %v1452_v8  ;;  %vm8001_vm1 = vmmov %vm7996_vm15 }
 0x4e1   :  { %v5642_v57 = vpop.permute.xlu2 %1668  ;;  %v1475_v25 = vsel %vm8001_vm1, %v7994_v31, %v7995_v38  ;;  %vm8002_vm15 = vmmov %vm7999_vm0  ;;  %vm8004_vm0 = vcmp.lt.s32.totalorder %v4583_v21, 1  ;;  %v1484_v35 = vmul.f32 %v1480_v7, %v1474_v45  ;;  %v1501_v24 = vmul.f32 %v1497_v10, %v1491_v53  ;;  %v3712_v10 = vld [vmem:[%s7557_s5 + $0x94] ss:$8 sm:$0x3] }
 0x4e2   :  { %v1492_v23 = vsel %vm8002_vm15, %v7997_v50, %v7998_v51  ;;  %v1508_v11 = vsel %vm8004_vm0, %v8003_v54, %v5396_v44  ;;  %v1468_v48 = vadd.f32 %v1466_v27, %v1451_v9  ;;  %v1513_v22 = vperm.slane %v3708_v33, 0  ;;  %vm8005_vm1 = vmmov %vm8004_vm0  ;;  %v3710_v33 = vld [vmem:[%s7557_s5 + $0x92] ss:$8 sm:$0x3] }
 0x4e3   :  { %v1509_v61 = vsel %vm8005_vm1, %v5396_v44, %v8003_v54  ;;  %v1483_v47 = vmul.f32 %v1479_v56, %v1475_v25  ;;  %v1486_v26 = vadd.f32 %v1484_v35, %v1469_v1  ;;  %v1500_v34 = vmul.f32 %v1496_v36, %v1492_v23  ;;  %v3711_v44 = vld [vmem:[%s7557_s5 + $0x93] ss:$8 sm:$0x3] }
 0x4e4   :  { %v1518_v43 = vmul.f32 %v1514_v40, %v1508_v11  ;;  %v1524_v49 = vperm.slane %v3709_v55, 0  ;;  %v1517_v12 = vmul.f32 %v1513_v22, %v1509_v61  ;;  %v1525_v7 = vperm.slane %v3709_v55, 1  ;;  %v8008_v9 = vld [vmem:[#allocation20_spill] sm:$0xff] }
 0x4e5   :  { %v1485_v41 = vadd.f32 %v1483_v47, %v1468_v48  ;;  %v1503_v60 = vadd.f32 %v1501_v24, %v1486_v26  ;;  %v1542_v50 = vperm.slane %v3710_v33, 1  ;;  %v1559_v51 = vperm.slane %v3711_v44, 1  ;;  %v3713_v55 = vld [vmem:[%s7557_s5 + $0x95] ss:$8 sm:$0x3] }
 0x4e6   :  { %2170 = vrot.lane.b32.xlu1 %v5517_v2, %s7965_s13  ;;  %2220 = vrot.lane.b32.xlu0 %v5425_v3, %s7986_s15  ;;  %s8000_s13 = smov 30   ;;  %v1529_v45 = vmul.f32 %v1525_v7, %v4424_v5  ;;  %v1528_v53 = vmul.f32 %v1524_v49, %v4410_v32  ;;  %vm8009_vm15 = vcmp.lt.s32.totalorder %v4583_v21, 127  ;;  %vm8010_vm0 = vcmp.lt.s32.totalorder %v4583_v21, 126 }
 0x4e7   :  { %2060 = vrot.lane.b32.xlu2 %v5425_v3, %s7973_s24  ;;  %s8007_s24 = smov 49   ;;  %v1502_v30 = vadd.f32 %v1500_v34, %v1485_v41  ;;  %v1520_v8 = vadd.f32 %v1518_v43, %v1503_v60  ;;  %v1537_v1 = vsel %vm8009_vm15, %v5412_v62, %v8008_v9  ;;  %v1554_v36 = vsel %vm8010_vm0, %v5410_v17, %v5444_v29  ;;  %vm8011_vm1 = vmmov %vm8009_vm15 }
 0x4e8   :  { %v5671_v52 = vpop.permute.xlu1 %1670  ;;  %v5685_v13 = vpop.permute.xlu0 %1704  ;;  %v1541_v25 = vperm.slane %v3710_v33, 0  ;;  %v1558_v23 = vperm.slane %v3711_v44, 0  ;;  %v1576_v54 = vperm.slane %v3712_v10, 1  ;;  %v1536_v5 = vsel %vm8011_vm1, %v8008_v9, %v5412_v62  ;;  %vm8012_vm14 = vmmov %vm8010_vm0  ;;  %v3714_v62 = vld [vmem:[%s7557_s5 + $0x96] ss:$8 sm:$0x3] }
 0x4e9   :  { %v5687_v63 = vpop.permute.xlu2 %1687  ;;  %v1519_v38 = vadd.f32 %v1517_v12, %v1502_v30  ;;  %v1531_v40 = vadd.f32 %v1529_v45, %v1520_v8  ;;  %v1553_v32 = vsel %vm8012_vm14, %v5444_v29, %v5410_v17  ;;  %vm8013_vm15 = vcmp.lt.s32.totalorder %v4583_v21, 125 }
 0x4ea   :  { %v1571_v11 = vsel %vm8013_vm15, %v5489_v59, %v5460_v37  ;;  %v1546_v35 = vmul.f32 %v1542_v50, %v1537_v1  ;;  %v1563_v24 = vmul.f32 %v1559_v51, %v1554_v36  ;;  %v1575_v22 = vperm.slane %v3712_v10, 0  ;;  %vm8015_vm14 = vmmov %vm8013_vm15 }
 0x4eb   :  { %v1530_v48 = vadd.f32 %v1528_v53, %v1519_v38  ;;  %v1570_v17 = vsel %vm8015_vm14, %v5460_v37, %v5489_v59  ;;  %v1545_v29 = vmul.f32 %v1541_v25, %v1536_v5  ;;  %v1562_v47 = vmul.f32 %v1558_v23, %v1553_v32  ;;  %v3715_v37 = vld [vmem:[%s7557_s5 + $0x97] ss:$8 sm:$0x3]  ;;  %v3716_v25 = vld [vmem:[%s7557_s5 + $0xa0] ss:$8 sm:$0x3] }
 0x4ec   :  { %v1548_v61 = vadd.f32 %v1546_v35, %v1531_v40  ;;  %v1580_v26 = vmul.f32 %v1576_v54, %v1571_v11  ;;  %v1593_v43 = vperm.slane %v3713_v55, 1  ;;  %v1579_v12 = vmul.f32 %v1575_v22, %v1570_v17 }
 0x4ed   :  { %v1547_v41 = vadd.f32 %v1545_v29, %v1530_v48  ;;  %v1610_v7 = vperm.slane %v3714_v62, 1  ;;  %v1592_v33 = vperm.slane %v3713_v55, 0  ;;  %vm8018_vm0 = vcmp.lt.s32.totalorder %v4583_v21, 115 }
 0x4ee   :  { %2188 = vrot.lane.b32.xlu1 %v5425_v3, %s7993_s0  ;;  %2250 = vrot.lane.b32.xlu0 %v5517_v2, %s8000_s13  ;;  %v1565_v60 = vadd.f32 %v1563_v24, %v1548_v61  ;;  %v1588_v44 = vsel %vm8018_vm0, %v5505_v16, %v5458_v42  ;;  %vm8019_vm1 = vcmp.lt.s32.totalorder %v4583_v21, 114  ;;  %v1609_v38 = vperm.slane %v3714_v62, 0  ;;  %vm8020_vm15 = vmmov %vm8018_vm0 }
 0x4ef   :  { %2074 = vrot.lane.b32.xlu2 %v5517_v2, %s7960_s3  ;;  %s8006_s3 = smov 29   ;;  %v1605_v30 = vsel %vm8019_vm1, %v5503_v6, %v5536_v46  ;;  %v1564_v8 = vadd.f32 %v1562_v47, %v1547_v41  ;;  %v1627_v45 = vperm.slane %v3715_v37, 1  ;;  %v1587_v50 = vsel %vm8020_vm15, %v5458_v42, %v5505_v16  ;;  %vm8021_vm14 = vmmov %vm8019_vm1 }
 0x4f0   :  { %v5716_v19 = vpop.permute.xlu1 %1702  ;;  %v5730_v58 = vpop.permute.xlu0 %1736  ;;  %v1582_v10 = vadd.f32 %v1580_v26, %v1565_v60  ;;  %v1604_v51 = vsel %vm8021_vm14, %v5536_v46, %v5503_v6  ;;  %vm8022_vm0 = vcmp.lt.s32.totalorder %v4583_v21, 113  ;;  %v1597_v1 = vmul.f32 %v1593_v43, %v1588_v44  ;;  %v3717_v6 = vld [vmem:[%s7557_s5 + $0xa1] ss:$8 sm:$0x3] }
 0x4f1   :  { %v5732_v0 = vpop.permute.xlu2 %1719  ;;  %v1622_v53 = vsel %vm8022_vm0, %v5581_v18, %v5552_v28  ;;  %v1581_v9 = vadd.f32 %v1579_v12, %v1564_v8  ;;  %v1614_v36 = vmul.f32 %v1610_v7, %v1605_v30  ;;  %v1626_v40 = vperm.slane %v3715_v37, 0  ;;  %vm8023_vm1 = vmmov %vm8022_vm0  ;;  %v3719_v44 = vld [vmem:[%s7557_s5 + $0xa3] ss:$8 sm:$0x3] }
 0x4f2   :  { %v1621_v42 = vsel %vm8023_vm1, %v5552_v28, %v5581_v18  ;;  %v1596_v16 = vmul.f32 %v1592_v33, %v1587_v50  ;;  %v1599_v46 = vadd.f32 %v1597_v1, %v1582_v10  ;;  %v1613_v23 = vmul.f32 %v1609_v38, %v1604_v51  ;;  %v3718_v28 = vld [vmem:[%s7557_s5 + $0xa2] ss:$8 sm:$0x3] }
 0x4f3   :  { %v1631_v54 = vmul.f32 %v1627_v45, %v1622_v53  ;;  %v1644_v32 = vperm.slane %v3716_v25, 1  ;;  %v1630_v24 = vmul.f32 %v1626_v40, %v1621_v42  ;;  %v1661_v22 = vperm.slane %v3717_v6, 1 }
 0x4f4   :  { %v1598_v48 = vadd.f32 %v1596_v16, %v1581_v9  ;;  %v1616_v35 = vadd.f32 %v1614_v36, %v1599_v46  ;;  %v1643_v55 = vperm.slane %v3716_v25, 0  ;;  %vm8025_vm15 = vcmp.lt.s32.totalorder %v4583_v21, 112 }
 0x4f5   :  { %v1639_v17 = vsel %vm8025_vm15, %v5597_v39, %v5550_v15  ;;  %vm8026_vm14 = vcmp.lt.s32.totalorder %v4583_v21, 111  ;;  %v1660_v47 = vperm.slane %v3717_v6, 0  ;;  %v1678_v26 = vperm.slane %v3718_v28, 1  ;;  %vm8027_vm0 = vmmov %vm8025_vm15 }
 0x4f6   :  { %2218 = vrot.lane.b32.xlu1 %v5517_v2, %s7986_s15  ;;  %2268 = vrot.lane.b32.xlu0 %v5425_v3, %s8006_s3  ;;  %v1656_v62 = vsel %vm8026_vm14, %v5595_v14, %v5626_v20  ;;  %v1615_v29 = vadd.f32 %v1613_v23, %v1598_v48  ;;  %v1633_v61 = vadd.f32 %v1631_v54, %v1616_v35  ;;  %vm8028_vm1 = vmmov %vm8026_vm14  ;;  %vm8029_vm15 = vcmp.lt.s32.totalorder %v4583_v21, 110  ;;  %s8063_s15 = smov 94  }
 0x4f7   :  { %2090 = vrot.lane.b32.xlu2 %v5517_v2, %s8007_s24  ;;  %s8017_s24 = smov 48   ;;  %v1638_v43 = vsel %vm8027_vm0, %v5550_v15, %v5597_v39  ;;  %v1655_v37 = vsel %vm8028_vm1, %v5626_v20, %v5595_v14  ;;  %v1673_v41 = vsel %vm8029_vm15, %v5671_v52, %v5642_v57  ;;  %v1648_v12 = vmul.f32 %v1644_v32, %v1639_v17  ;;  %vm8031_vm14 = vmmov %vm8029_vm15  ;;  %v3720_v14 = vld [vmem:[%s7557_s5 + $0xa4] ss:$8 sm:$0x3] }
 0x4f8   :  { %v5753_v27 = vpop.permute.xlu1 %1721  ;;  %v5758_v56 = vpop.permute.xlu0 %1755  ;;  %v1632_v60 = vadd.f32 %v1630_v24, %v1615_v29  ;;  %v1665_v7 = vmul.f32 %v1661_v22, %v1656_v62  ;;  %v1677_v33 = vperm.slane %v3718_v28, 0  ;;  %v1672_v15 = vsel %vm8031_vm14, %v5642_v57, %v5671_v52  ;;  %v3721_v57 = vld [vmem:[%s7557_s5 + $0xa5] ss:$8 sm:$0x3] }
 0x4f9   :  { %v5760_v31 = vpop.permute.xlu2 %1738  ;;  %v1647_v39 = vmul.f32 %v1643_v55, %v1638_v43  ;;  %v1650_v20 = vadd.f32 %v1648_v12, %v1633_v61  ;;  %v1664_v30 = vmul.f32 %v1660_v47, %v1655_v37  ;;  %v1682_v8 = vmul.f32 %v1678_v26, %v1673_v41  ;;  %v3722_v24 = vld [vmem:[%s7557_s5 + $0xa6] ss:$8 sm:$0x3] }
 0x4fa   :  { %v1695_v38 = vperm.slane %v3719_v44, 1  ;;  %v1681_v53 = vmul.f32 %v1677_v33, %v1672_v15  ;;  %v1712_v9 = vperm.slane %v3720_v14, 1  ;;  %v1694_v1 = vperm.slane %v3719_v44, 0 }
 0x4fb   :  { %v1649_v50 = vadd.f32 %v1647_v39, %v1632_v60  ;;  %v1667_v51 = vadd.f32 %v1665_v7, %v1650_v20  ;;  %vm8033_vm0 = vcmp.lt.s32.totalorder %v4583_v21, 109  ;;  %vm8034_vm1 = vcmp.lt.s32.totalorder %v4583_v21, 99 }
 0x4fc   :  { %v1690_v36 = vsel %vm8033_vm0, %v5687_v63, %v5640_v4  ;;  %v1707_v40 = vsel %vm8034_vm1, %v5685_v13, %v5716_v19  ;;  %v1711_v6 = vperm.slane %v3720_v14, 0  ;;  %v1729_v16 = vperm.slane %v3721_v57, 1  ;;  %vm8035_vm15 = vmmov %vm8033_vm0 }
 0x4fd   :  { %v1666_v25 = vadd.f32 %v1664_v30, %v1649_v50  ;;  %v1684_v42 = vadd.f32 %v1682_v8, %v1667_v51  ;;  %v1689_v46 = vsel %vm8035_vm15, %v5640_v4, %v5687_v63  ;;  %vm8036_vm14 = vmmov %vm8034_vm1  ;;  %vm8037_vm0 = vcmp.lt.s32.totalorder %v4583_v21, 98 }
 0x4fe   :  { %2236 = vrot.lane.b32.xlu1 %v5425_v3, %s8014_s10  ;;  %2298 = vrot.lane.b32.xlu0 %v5517_v2, %s8016_s25  ;;  %v1706_v23 = vsel %vm8036_vm14, %v5716_v19, %v5685_v13  ;;  %v1724_v54 = vsel %vm8037_vm0, %v5753_v27, %v5732_v0  ;;  %v1699_v28 = vmul.f32 %v1695_v38, %v1690_v36  ;;  %v1728_v35 = vperm.slane %v3721_v57, 0  ;;  %vm8038_vm1 = vmmov %vm8037_vm0  ;;  %v3723_v13 = vld [vmem:[%s7557_s5 + $0xa7] ss:$8 sm:$0x3] }
 0x4ff   :  { %2106 = vrot.lane.b32.xlu2 %v5517_v2, %s8017_s24  ;;  %v1683_v32 = vadd.f32 %v1681_v53, %v1666_v25  ;;  %v1716_v48 = vmul.f32 %v1712_v9, %v1707_v40  ;;  %v1723_v4 = vsel %vm8038_vm1, %v5732_v0, %v5753_v27  ;;  %v1698_v63 = vmul.f32 %v1694_v1, %v1689_v46  ;;  %v3724_v0 = vld [vmem:[%s7557_s5 + $0xb0] ss:$8 sm:$0x3]  ;;  %v3725_v57 = vld [vmem:[%s7557_s5 + $0xb1] ss:$8 sm:$0x3] }
 0x500   :  { %v5800_v34 = vpop.permute.xlu1 %1753  ;;  %v5805_v59 = vpop.permute.xlu0 %1787  ;;  %v1701_v19 = vadd.f32 %v1699_v28, %v1684_v42  ;;  %v1715_v22 = vmul.f32 %v1711_v6, %v1706_v23  ;;  %v1733_v55 = vmul.f32 %v1729_v16, %v1724_v54  ;;  %v1746_v62 = vperm.slane %v3722_v24, 1 }
 0x501   :  { %v5807_v49 = vpop.permute.xlu2 %1770  ;;  %v1700_v61 = vadd.f32 %v1698_v63, %v1683_v32  ;;  %v1732_v26 = vmul.f32 %v1728_v35, %v1723_v4  ;;  %v1763_v43 = vperm.slane %v3723_v13, 1  ;;  %v1745_v37 = vperm.slane %v3722_v24, 0 }
 0x502   :  { %v1718_v47 = vadd.f32 %v1716_v48, %v1701_v19  ;;  %vm8040_vm15 = vcmp.lt.s32.totalorder %v4583_v21, 97  ;;  %vm8041_vm14 = vcmp.lt.s32.totalorder %v4583_v21, 96  ;;  %v1762_v33 = vperm.slane %v3723_v13, 0 }
 0x503   :  { %v1741_v41 = vsel %vm8040_vm15, %v5760_v31, %v5730_v58  ;;  %v1758_v60 = vsel %vm8041_vm14, %v5758_v56, %v5800_v34  ;;  %v1717_v12 = vadd.f32 %v1715_v22, %v1700_v61  ;;  %v1780_v44 = vperm.slane %v3724_v0, 1  ;;  %vm8042_vm0 = vmmov %vm8040_vm15  ;;  %v3728_v22 = vld [vmem:[%s7557_s5 + $0xb4] ss:$8 sm:$0x3] }
 0x504   :  { %v1735_v7 = vadd.f32 %v1733_v55, %v1718_v47  ;;  %v1740_v15 = vsel %vm8042_vm0, %v5730_v58, %v5760_v31  ;;  %vm8043_vm1 = vmmov %vm8041_vm14  ;;  %vm8044_vm15 = vcmp.lt.s32.totalorder %v4583_v21, 95  ;;  %v1750_v30 = vmul.f32 %v1746_v62, %v1741_v41 }
 0x505   :  { %v1757_v14 = vsel %vm8043_vm1, %v5800_v34, %v5758_v56  ;;  %v1734_v20 = vadd.f32 %v1732_v26, %v1717_v12  ;;  %v1767_v8 = vmul.f32 %v1763_v43, %v1758_v60  ;;  %v1779_v38 = vperm.slane %v3724_v0, 0  ;;  %vm8046_vm14 = vmmov %vm8044_vm15  ;;  %v3726_v56 = vld [vmem:[%s7557_s5 + $0xb2] ss:$8 sm:$0x3] }
 0x506   :  { %2266 = vrot.lane.b32.xlu1 %v5517_v2, %s8006_s3  ;;  %2316 = vrot.lane.b32.xlu0 %v5425_v3, %s8024_s17  ;;  %s8045_s3 = smov 16   ;;  %v1749_v31 = vmul.f32 %v1745_v37, %v1740_v15  ;;  %v1752_v34 = vadd.f32 %v1750_v30, %v1735_v7  ;;  %v1766_v50 = vmul.f32 %v1762_v33, %v1757_v14  ;;  %v1797_v9 = vperm.slane %v3725_v57, 1 }
 0x507   :  { %2108 = vrot.lane.b32.xlu2 %v5425_v3, %s8017_s24  ;;  %s8032_s24 = smov 15   ;;  %v1814_v42 = vperm.slane %v3726_v56, 1  ;;  %v1796_v6 = vperm.slane %v3725_v57, 0  ;;  %vm8048_vm0 = vcmp.lt.s32.totalorder %v4583_v21, 94  ;;  %vm8049_vm1 = vcmp.lt.s32.totalorder %v4583_v21, 93 }
 0x508   :  { %v5845_v5 = vpop.permute.xlu1 %1772  ;;  %v5850_v18 = vpop.permute.xlu0 %1806  ;;  %v1751_v36 = vadd.f32 %v1749_v31, %v1734_v20  ;;  %v1769_v40 = vadd.f32 %v1767_v8, %v1752_v34  ;;  %v1813_v32 = vperm.slane %v3726_v56, 0  ;;  %v1848_v61 = vperm.slane %v3728_v22, 1  ;;  %v3731_v56 = vld [vmem:[%s7557_s5 + $0xb7] ss:$8 sm:$0x3] }
 0x509   :  { %v5852_v11 = vpop.permute.xlu2 %1789  ;;  %v1775_v39 = vsel %vm8044_vm15, %v5845_v5, %v5807_v49  ;;  %v1774_v58 = vsel %vm8046_vm14, %v5807_v49, %v5845_v5  ;;  %v3727_v49 = vld [vmem:[%s7557_s5 + $0xb3] ss:$8 sm:$0x3]  ;;  %vm8050_vm15 = vmmov %vm8048_vm0  ;;  %v1847_v60 = vperm.slane %v3728_v22, 0 }
 0x50a   :  { %v1784_v51 = vmul.f32 %v1780_v44, %v1775_v39  ;;  %v1783_v25 = vmul.f32 %v1779_v38, %v1774_v58  ;;  %v1792_v16 = vsel %vm8048_vm0, %v5852_v11, %v5805_v59  ;;  %v1768_v23 = vadd.f32 %v1766_v50, %v1751_v36  ;;  %vm8051_vm14 = vmmov %vm8049_vm1 }
 0x50b   :  { %v1831_v28 = vperm.slane %v3727_v49, 1  ;;  %v1791_v48 = vsel %vm8050_vm15, %v5805_v59, %v5852_v11  ;;  %v1801_v13 = vmul.f32 %v1797_v9, %v1792_v16  ;;  %v1830_v19 = vperm.slane %v3727_v49, 0 }
 0x50c   :  { %v1786_v54 = vadd.f32 %v1784_v51, %v1769_v40  ;;  %v1785_v4 = vadd.f32 %v1783_v25, %v1768_v23  ;;  %v1800_v11 = vmul.f32 %v1796_v6, %v1791_v48  ;;  %vm8052_vm0 = vcmp.lt.s32.totalorder %v4583_v21, 82 }
 0x50d   :  { %vm8054_vm15 = vmmov %vm8052_vm0 }
 0x50e   :  { %2284 = vrot.lane.b32.xlu1 %v5425_v3, %s8030_s14  ;;  %2346 = vrot.lane.b32.xlu0 %v5517_v2, %s8032_s24  ;;  %v1802_v26 = vadd.f32 %v1800_v11, %v1785_v4 }
 0x50f   :  { %2138 = vrot.lane.b32.xlu2 %v5517_v2, %s7968_s23  ;;  %s8039_s23 = smov 14  }
 0x510   :  { %v5890_v10 = vpop.permute.xlu1 %1804  ;;  %v5895_v52 = vpop.permute.xlu0 %1838 }
 0x511   :  { %v5897_v45 = vpop.permute.xlu2 %1821  ;;  %v1809_v46 = vsel %vm8049_vm1, %v5850_v18, %v5890_v10  ;;  %v1808_v35 = vsel %vm8051_vm14, %v5890_v10, %v5850_v18  ;;  %v3729_v18 = vld [vmem:[%s7557_s5 + $0xb5] ss:$8 sm:$0x3]  ;;  %v1803_v10 = vadd.f32 %v1801_v13, %v1786_v54  ;;  %vm8053_vm1 = vcmp.lt.s32.totalorder %v4583_v21, 81 }
 0x512   :  { %v1818_v63 = vmul.f32 %v1814_v42, %v1809_v46  ;;  %v1817_v55 = vmul.f32 %v1813_v32, %v1808_v35  ;;  %v1865_v41 = vperm.slane %v3729_v18, 1  ;;  %v1864_v15 = vperm.slane %v3729_v18, 0  ;;  %vm8055_vm14 = vmmov %vm8053_vm1  ;;  %v3733_v42 = vld [vmem:[%s7557_s5 + $0xc1] ss:$8 sm:$0x3] }
 0x513   :  { %v1898_v54 = vperm.slane %v3731_v56, 0  ;;  %v1932_v35 = vperm.slane %v3733_v42, 0 }
 0x514   :  { %v1820_v43 = vadd.f32 %v1818_v63, %v1803_v10  ;;  %v1819_v33 = vadd.f32 %v1817_v55, %v1802_v26  ;;  %v1933_v63 = vperm.slane %v3733_v42, 1  ;;  %v8059_v26 = vlaneseq  ;;  %v3738_v42 = vld [vmem:[%s7557_s5 + $0x1] ss:$8 sm:$0x3] }
 0x516   :  { %2314 = vrot.lane.b32.xlu1 %v5517_v2, %s8024_s17  ;;  %2364 = vrot.lane.b32.xlu0 %v5425_v3, %s8039_s23  ;;  %s8057_s17 = smov 13  }
 0x517   :  { %2156 = vrot.lane.b32.xlu2 %v5425_v3, %s7961_s1  ;;  %s8047_s1 = smov 3  }
 0x518   :  { %v1824_v17 = vpop.permute.xlu1 %1823  ;;  %v5938_v27 = vpop.permute.xlu0 %1857 }
 0x519   :  { %v5940_v29 = vpop.permute.xlu2 %1840  ;;  %v1826_v24 = vsel %vm7783_vm2, %v1824_v17, %v5897_v45  ;;  %v1825_v59 = vsel %vm7783_vm2, %v5897_v45, %v1824_v17  ;;  %v3730_v45 = vld [vmem:[%s7557_s5 + $0xb6] ss:$8 sm:$0x3]  ;;  %vm8056_vm2 = vcmp.lt.s32.totalorder %v4583_v21, 80 }
 0x51a   :  { %v1835_v62 = vmul.f32 %v1831_v28, %v1826_v24  ;;  %v1834_v37 = vmul.f32 %v1830_v19, %v1825_v59  ;;  %v1843_v12 = vsel %vm8052_vm0, %v5940_v29, %v5895_v52  ;;  %v1882_v14 = vperm.slane %v3730_v45, 1  ;;  %vm8058_vm0 = vmmov %vm8056_vm2 }
 0x51b   :  { %v1842_v39 = vsel %vm8054_vm15, %v5895_v52, %v5940_v29  ;;  %v1852_v38 = vmul.f32 %v1848_v61, %v1843_v12  ;;  %v1881_v58 = vperm.slane %v3730_v45, 0  ;;  %vm8070_vm15 = vcmp.lt.s32.totalorder %v4583_v21, 34 }
 0x51c   :  { %v1837_v44 = vadd.f32 %v1835_v62, %v1820_v43  ;;  %v1836_v8 = vadd.f32 %v1834_v37, %v1819_v33  ;;  %v1851_v29 = vmul.f32 %v1847_v60, %v1842_v39 }
 0x51e   :  { %2332 = vrot.lane.b32.xlu1 %v5425_v3, %s8045_s3  ;;  %2394 = vrot.lane.b32.xlu0 %v5517_v2, %s8047_s1  ;;  %v1854_v31 = vadd.f32 %v1852_v38, %v1837_v44 }
 0x51f   :  { %2186 = vrot.lane.b32.xlu2 %v5517_v2, %s7993_s0 }
 0x520   :  { %v1856_v53 = vpop.permute.xlu1 %1855  ;;  %v5981_v5 = vpop.permute.xlu0 %1889 }
 0x521   :  { %v1873_v1 = vpop.permute.xlu2 %1872  ;;  %v1860_v7 = vsel %vm8053_vm1, %v5938_v27, %v1856_v53  ;;  %v1859_v20 = vsel %vm8055_vm14, %v1856_v53, %v5938_v27  ;;  %v3732_v27 = vld [vmem:[%s7557_s5 + $0xc0] ss:$8 sm:$0x3]  ;;  %v1899_v53 = vperm.slane %v3731_v56, 1  ;;  %vm6080_vm1 = vcmp.lt.s32.totalorder %v8059_v26, 256  ;;  %vm8071_vm14 = vmmov %vm8070_vm15 }
 0x522   :  { %v1869_v57 = vmul.f32 %v1865_v41, %v1860_v7  ;;  %v1868_v34 = vmul.f32 %v1864_v15, %v1859_v20  ;;  %v1916_v25 = vperm.slane %v3732_v27, 1  ;;  %v1915_v32 = vperm.slane %v3732_v27, 0  ;;  %v3741_v26 = vld [vmem:[%s7557_s5 + $0x4] ss:$8 sm:$0x3] }
 0x524   :  { %v1871_v36 = vadd.f32 %v1869_v57, %v1854_v31 }
 0x526   :  { %2362 = vrot.lane.b32.xlu1 %v5517_v2, %s8039_s23  ;;  %2412 = vrot.lane.b32.xlu0 %v5425_v3, %s7864_s29  ;;  %s8064_s23 = smov 93  }
 0x527   :  { %2204 = vrot.lane.b32.xlu2 %v5425_v3, %s7972_s20 }
 0x528   :  { %v1875_v0 = vpop.permute.xlu1 %1874  ;;  %v1909_v17 = vpop.permute.xlu0 %1908 }
 0x529   :  { %v1892_v47 = vpop.permute.xlu2 %1891  ;;  %v1877_v30 = vsel %vm8056_vm2, %v1875_v0, %v1873_v1  ;;  %v1876_v52 = vsel %vm8058_vm0, %v1873_v1, %v1875_v0  ;;  %v1853_v1 = vadd.f32 %v1851_v29, %v1836_v8  ;;  %vm7793_vm2 = vcmask 1040384  }
 0x52a   :  { %v1886_v50 = vmul.f32 %v1882_v14, %v1877_v30  ;;  %v1885_v40 = vmul.f32 %v1881_v58, %v1876_v52  ;;  %v1894_v6 = vsel %vm1063_vm3, %v1892_v47, %v5981_v5  ;;  %v1893_v28 = vsel %vm1063_vm3, %v5981_v5, %v1892_v47 }
 0x52b   :  { %v1870_v46 = vadd.f32 %v1868_v34, %v1853_v1  ;;  %v1903_v4 = vmul.f32 %v1899_v53, %v1894_v6  ;;  %v1902_v19 = vmul.f32 %v1898_v54, %v1893_v28  ;;  %v3739_v54 = vld [vmem:[%s7557_s5 + $0x2] ss:$8 sm:$0x3]  ;;  %v2083_v28 = vperm.slane %v3738_v42, 1 }
 0x52c   :  { %v1888_v23 = vadd.f32 %v1886_v50, %v1871_v36  ;;  %vm8074_vm0 = vcmp.lt.s32.totalorder %v4583_v21, 33 }
 0x52d   :  { %v1887_v24 = vadd.f32 %v1885_v40, %v1870_v46 }
 0x52e   :  { %2380 = vrot.lane.b32.xlu1 %v5425_v3, %s8057_s17  ;;  %2452 = vrot.lane.b32.xlu0 %v5517_v2, %s7866_s11  ;;  %v1905_v22 = vadd.f32 %v1903_v4, %v1888_v23  ;;  %v2064_v23 = vld [vmem:[%s7557_s5] ss:$8 sm:$0x3] }
 0x52f   :  { %2234 = vrot.lane.b32.xlu2 %v5517_v2, %s8014_s10  ;;  %v1904_v62 = vadd.f32 %v1902_v19, %v1887_v24  ;;  %v3740_v24 = vld [vmem:[%s7557_s5 + $0x3] ss:$8 sm:$0x3]  ;;  %v2066_v4 = vperm.slane %v2064_v23, 0  ;;  %v2099_v19 = vperm.slane %v3739_v54, 1 }
 0x530   :  { %v1907_v51 = vpop.permute.xlu1 %1906  ;;  %v6050_v9 = vpop.permute.xlu0 %2092 }
 0x531   :  { %v1924_v49 = vpop.permute.xlu2 %1923  ;;  %v1911_v16 = vsel %vm1081_vm4, %v1909_v17, %v1907_v51  ;;  %v1910_v48 = vsel %vm1081_vm4, %v1907_v51, %v1909_v17 }
 0x532   :  { %v1920_v13 = vmul.f32 %v1916_v25, %v1911_v16  ;;  %v1919_v5 = vmul.f32 %v1915_v32, %v1910_v48  ;;  %v2082_v32 = vperm.slane %v3738_v42, 0  ;;  %v8067_v42 = vld [vmem:[#allocation6_spill] sm:$0xff] }
 0x534   :  { %v1922_v0 = vadd.f32 %v1920_v13, %v1905_v22  ;;  %v1921_v17 = vadd.f32 %v1919_v5, %v1904_v62  ;;  %v2067_v13 = vperm.slane %v2064_v23, 1  ;;  %v2043_v23 = vrot.slane %v8067_v42, 4 }
 0x536   :  { %2410 = vrot.lane.b32.xlu1 %v5517_v2, %s7864_s29  ;;  %2470 = vrot.lane.b32.xlu0 %v5425_v3, %s7868_s30 }
 0x537   :  { %2252 = vrot.lane.b32.xlu2 %v5425_v3, %s8000_s13 }
 0x538   :  { %v1926_v59 = vpop.permute.xlu1 %1925  ;;  %v6075_v10 = vpop.permute.xlu0 %2124 }
 0x539   :  { %v1927_v18 = vsel %vm1099_vm5, %v1924_v49, %v1926_v59  ;;  %v1928_v11 = vsel %vm1099_vm5, %v1926_v59, %v1924_v49  ;;  %v6077_v55 = vpop.permute.xlu2 %2058 }
 0x53a   :  { %v1936_v61 = vmul.f32 %v1932_v35, %v1927_v18  ;;  %v1937_v45 = vmul.f32 %v1933_v63, %v1928_v11  ;;  %v2098_v63 = vperm.slane %v3739_v54, 0  ;;  %v2130_v54 = vperm.slane %v3741_v26, 0 }
 0x53c   :  { %v1939_v47 = vadd.f32 %v1937_v45, %v1922_v0  ;;  %v1938_v37 = vadd.f32 %v1936_v61, %v1921_v17  ;;  %v2114_v0 = vperm.slane %v3740_v24, 0  ;;  %v2115_v61 = vperm.slane %v3740_v24, 1 }
 0x53e   :  { %v1942_v41 = vrot.slane %v1939_v47, 7  ;;  %2428 = vrot.lane.b32.xlu1 %v5425_v3, %s7867_s8  ;;  %2500 = vrot.lane.b32.xlu0 %v5517_v2, %s7869_s18 }
 0x53f   :  { %2282 = vrot.lane.b32.xlu2 %v5517_v2, %s8030_s14 }
 0x540   :  { %v1944_v60 = vsel %vm7793_vm2, %v1938_v37, %v1942_v41  ;;  %v6091_v12 = vpop.permute.xlu1 %2076  ;;  %v6098_v7 = vpop.permute.xlu0 %2154 }
 0x541   :  { %1950 = vst.msk [vmem:[%s7558_s7] sm:$0x3] %vm6080_vm1, %v1944_v60  ;;  %v6100_v33 = vpop.permute.xlu2 %2060  ;;  %s8068_s7 = smov 81  }
 0x542   :  { %v2062_v22 = vsel %vm243_vm7, %v6077_v55, %v6100_v33  ;;  %v2063_v5 = vsel %vm243_vm7, %v6100_v33, %v6077_v55  ;;  %v3742_v33 = vld [vmem:[%s7557_s5 + $0x5] ss:$8 sm:$0x3] }
 0x543   :  { %v2070_v17 = vmul.f32 %v2066_v4, %v2063_v5  ;;  %v2071_v47 = vmul.f32 %v2067_v13, %v2062_v22  ;;  %v2146_v24 = vperm.slane %v3742_v33, 0  ;;  %v2147_v4 = vperm.slane %v3742_v33, 1 }
 0x546   :  { %2468 = vrot.lane.b32.xlu1 %v5517_v2, %s7868_s30  ;;  %2518 = vrot.lane.b32.xlu0 %v5425_v3, %s7871_s6 }
 0x547   :  { %2300 = vrot.lane.b32.xlu2 %v5425_v3, %s8016_s25 }
 0x548   :  { %v6108_v44 = vpop.permute.xlu1 %2122  ;;  %v6110_v15 = vpop.permute.xlu0 %2172 }
 0x549   :  { %v2075_v14 = vpop.permute.xlu2 %2074  ;;  %v2126_v13 = vsel %vm314_vm10, %v6108_v44, %v6075_v10 }
 0x54a   :  { %v2078_v48 = vsel %vm260_vm6, %v2075_v14, %v6091_v12  ;;  %v2079_v35 = vsel %vm260_vm6, %v6091_v12, %v2075_v14 }
 0x54b   :  { %v2086_v11 = vmul.f32 %v2082_v32, %v2079_v35  ;;  %v2087_v62 = vmul.f32 %v2083_v28, %v2078_v48  ;;  %v2131_v32 = vperm.slane %v3741_v26, 1  ;;  %v3743_v28 = vld [vmem:[%s7557_s5 + $0x6] ss:$8 sm:$0x3] }
 0x54d   :  { %v2088_v14 = vadd.f32 %v2086_v11, %v2070_v17  ;;  %v2163_v11 = vperm.slane %v3743_v28, 1 }
 0x54e   :  { %2486 = vrot.lane.b32.xlu1 %v5425_v3, %s7870_s2  ;;  %2548 = vrot.lane.b32.xlu0 %v5517_v2, %s7872_s4 }
 0x54f   :  { %2330 = vrot.lane.b32.xlu2 %v5517_v2, %s8045_s3 }
 0x550   :  { %v6118_v39 = vpop.permute.xlu1 %2140  ;;  %v6120_v20 = vpop.permute.xlu0 %2202 }
 0x551   :  { %v2091_v30 = vpop.permute.xlu2 %2090 }
 0x552   :  { %v2094_v59 = vsel %vm278_vm8, %v2091_v30, %v6050_v9  ;;  %v2095_v18 = vsel %vm278_vm8, %v6050_v9, %v2091_v30  ;;  %v2089_v30 = vadd.f32 %v2087_v62, %v2071_v47 }
 0x553   :  { %v2102_v37 = vmul.f32 %v2098_v63, %v2095_v18  ;;  %v2103_v41 = vmul.f32 %v2099_v19, %v2094_v59  ;;  %v2127_v63 = vsel %vm314_vm10, %v6075_v10, %v6108_v44  ;;  %v2162_v18 = vperm.slane %v3743_v28, 0  ;;  %v8069_v44 = vld [vmem:[#allocation7_spill] sm:$0xff] }
 0x554   :  { %v2044_v10 = vadd.f32 %v2043_v23, %v8067_v42  ;;  %v2050_v62 = vrot.slane %v8069_v44, 4  ;;  %v3746_v23 = vld [vmem:[%s7557_s5 + $0x11] ss:$8 sm:$0x3] }
 0x555   :  { %v2104_v48 = vadd.f32 %v2102_v37, %v2088_v14  ;;  %v2105_v35 = vadd.f32 %v2103_v41, %v2089_v30  ;;  %v3745_v41 = vld [vmem:[%s7557_s5 + $0x10] ss:$8 sm:$0x3] }
 0x556   :  { %2516 = vrot.lane.b32.xlu1 %v5517_v2, %s7871_s6  ;;  %2566 = vrot.lane.b32.xlu0 %v5425_v3, %s7874_s22  ;;  %v2045_v30 = vrot.slane %v2044_v10, 2  ;;  %v2194_v28 = vperm.slane %v3745_v41, 0 }
 0x557   :  { %2348 = vrot.lane.b32.xlu2 %v5425_v3, %s8032_s24 }
 0x558   :  { %v6128_v8 = vpop.permute.xlu1 %2170  ;;  %v6130_v38 = vpop.permute.xlu0 %2220 }
 0x559   :  { %v2107_v57 = vpop.permute.xlu2 %2106 }
 0x55e   :  { %2534 = vrot.lane.b32.xlu1 %v5425_v3, %s7873_s21  ;;  %2596 = vrot.lane.b32.xlu0 %v5517_v2, %s8062_s27 }
 0x55f   :  { %2378 = vrot.lane.b32.xlu2 %v5517_v2, %s8057_s17 }
 0x560   :  { %v6138_v58 = vpop.permute.xlu1 %2188  ;;  %v6140_v56 = vpop.permute.xlu0 %2250 }
 0x561   :  { %v2109_v52 = vpop.permute.xlu2 %2108 }
 0x562   :  { %v2110_v55 = vsel %vm296_vm9, %v2107_v57, %v2109_v52  ;;  %v2111_v45 = vsel %vm296_vm9, %v2109_v52, %v2107_v57 }
 0x563   :  { %v2118_v57 = vmul.f32 %v2114_v0, %v2111_v45  ;;  %v2119_v52 = vmul.f32 %v2115_v61, %v2110_v55  ;;  %v2134_v61 = vmul.f32 %v2130_v54, %v2127_v63  ;;  %v2135_v55 = vmul.f32 %v2131_v32, %v2126_v13  ;;  %v3744_v45 = vld [vmem:[%s7557_s5 + $0x7] ss:$8 sm:$0x3] }
 0x564   :  { %v2179_v42 = vperm.slane %v3744_v45, 1 }
 0x565   :  { %v2120_v5 = vadd.f32 %v2118_v57, %v2104_v48  ;;  %v2121_v59 = vadd.f32 %v2119_v52, %v2105_v35  ;;  %v2051_v57 = vadd.f32 %v2050_v62, %v8069_v44  ;;  %v2178_v52 = vperm.slane %v3744_v45, 0  ;;  %v3747_v44 = vld [vmem:[%s7557_s5 + $0x12] ss:$8 sm:$0x3] }
 0x566   :  { %2564 = vrot.lane.b32.xlu1 %v5517_v2, %s7874_s22  ;;  %2614 = vrot.lane.b32.xlu0 %v5425_v3, %s7888_s12  ;;  %s8065_s22 = smov 95   ;;  %v2195_v48 = vperm.slane %v3745_v41, 1  ;;  %v2174_v35 = vsel %vm368_vm13, %v6128_v8, %v6110_v15  ;;  %v2226_v41 = vperm.slane %v3747_v44, 0 }
 0x567   :  { %2396 = vrot.lane.b32.xlu2 %v5425_v3, %s8047_s1  ;;  %v2136_v33 = vadd.f32 %v2134_v61, %v2120_v5  ;;  %v2211_v5 = vperm.slane %v3746_v23, 1  ;;  %v3748_v61 = vld [vmem:[%s7557_s5 + $0x13] ss:$8 sm:$0x3] }
 0x568   :  { %v6148_v27 = vpop.permute.xlu1 %2218  ;;  %v6150_v29 = vpop.permute.xlu0 %2268 }
 0x569   :  { %v6152_v31 = vpop.permute.xlu2 %2138 }
 0x56a   :  { %v2142_v19 = vsel %vm332_vm11, %v6152_v31, %v6118_v39  ;;  %v2143_v22 = vsel %vm332_vm11, %v6118_v39, %v6152_v31 }
 0x56b   :  { %v2150_v17 = vmul.f32 %v2146_v24, %v2143_v22  ;;  %v2151_v47 = vmul.f32 %v2147_v4, %v2142_v19  ;;  %v2175_v24 = vsel %vm368_vm13, %v6110_v15, %v6128_v8  ;;  %v2210_v22 = vperm.slane %v3746_v23, 0 }
 0x56c   :  { %v2046_v15 = vadd.f32 %v2045_v30, %v2044_v10  ;;  %v2052_v8 = vrot.slane %v2051_v57, 2  ;;  %v2242_v30 = vperm.slane %v3748_v61, 0 }
 0x56d   :  { %v2152_v54 = vadd.f32 %v2150_v17, %v2136_v33  ;;  %v2227_v33 = vperm.slane %v3747_v44, 1 }
 0x56e   :  { %2582 = vrot.lane.b32.xlu1 %v5425_v3, %s7882_s28  ;;  %2644 = vrot.lane.b32.xlu0 %v5517_v2, %s7895_s26  ;;  %v2047_v17 = vrot.slane %v2046_v15, 1 }
 0x56f   :  { %2426 = vrot.lane.b32.xlu2 %v5517_v2, %s7867_s8 }
 0x570   :  { %v6160_v34 = vpop.permute.xlu1 %2236  ;;  %v6162_v50 = vpop.permute.xlu0 %2298 }
 0x571   :  { %v6164_v51 = vpop.permute.xlu2 %2156 }
 0x572   :  { %v2158_v39 = vsel %vm350_vm12, %v6098_v7, %v6164_v51  ;;  %v2159_v31 = vsel %vm350_vm12, %v6164_v51, %v6098_v7  ;;  %v2137_v7 = vadd.f32 %v2135_v55, %v2121_v59 }
 0x573   :  { %v2166_v51 = vmul.f32 %v2162_v18, %v2159_v31  ;;  %v2167_v14 = vmul.f32 %v2163_v11, %v2158_v39  ;;  %v2182_v18 = vmul.f32 %v2178_v52, %v2175_v24  ;;  %v2183_v11 = vmul.f32 %v2179_v42, %v2174_v35 }
 0x574   :  { %v2153_v32 = vadd.f32 %v2151_v47, %v2137_v7  ;;  %v2053_v47 = vadd.f32 %v2052_v8, %v2051_v57  ;;  %v3749_v7 = vld [vmem:[%s7557_s5 + $0x14] ss:$8 sm:$0x3]  ;;  %v2243_v52 = vperm.slane %v3748_v61, 1 }
 0x575   :  { %v2168_v63 = vadd.f32 %v2166_v51, %v2152_v54  ;;  %v2259_v35 = vperm.slane %v3749_v7, 1  ;;  %v3751_v8 = vld [vmem:[%s7557_s5 + $0x16] ss:$8 sm:$0x3] }
 0x576   :  { %2612 = vrot.lane.b32.xlu1 %v5517_v2, %s7888_s12  ;;  %2662 = vrot.lane.b32.xlu0 %v5425_v3, %s7903_s9  ;;  %v2169_v19 = vadd.f32 %v2167_v14, %v2153_v32  ;;  %s8088_s12 = smov 51  }
 0x577   :  { %2454 = vrot.lane.b32.xlu2 %v5425_v3, %s7866_s11  ;;  %v2184_v55 = vadd.f32 %v2182_v18, %v2168_v63  ;;  %v3750_v63 = vld [vmem:[%s7557_s5 + $0x15] ss:$8 sm:$0x3] }
 0x578   :  { %v6172_v53 = vpop.permute.xlu1 %2266  ;;  %v6174_v49 = vpop.permute.xlu0 %2316  ;;  %v2274_v44 = vperm.slane %v3750_v63, 0 }
 0x579   :  { %v6176_v1 = vpop.permute.xlu2 %2186 }
 0x57a   :  { %v2190_v4 = vsel %vm8070_vm15, %v6176_v1, %v6138_v58  ;;  %v2191_v13 = vsel %vm8071_vm14, %v6138_v58, %v6176_v1  ;;  %vm8075_vm15 = vmmov %vm8074_vm0  ;;  %vm8076_vm14 = vcmp.lt.s32.totalorder %v4583_v21, 32 }
 0x57b   :  { %v2198_v10 = vmul.f32 %v2194_v28, %v2191_v13  ;;  %v2199_v62 = vmul.f32 %v2195_v48, %v2190_v4  ;;  %v2222_v42 = vsel %vm8076_vm14, %v6148_v27, %v6130_v38  ;;  %v2258_v48 = vperm.slane %v3749_v7, 0 }
 0x57c   :  { %v2231_v13 = vmul.f32 %v2227_v33, %v2222_v42 }
 0x57d   :  { %v2200_v51 = vadd.f32 %v2198_v10, %v2184_v55  ;;  %v2275_v10 = vperm.slane %v3750_v63, 1 }
 0x57e   :  { %2630 = vrot.lane.b32.xlu1 %v5425_v3, %s7898_s16  ;;  %2692 = vrot.lane.b32.xlu0 %v5517_v2, %s8063_s15 }
 0x57f   :  { %2484 = vrot.lane.b32.xlu2 %v5517_v2, %s7870_s2  ;;  %s8066_s2 = smov 82  }
 0x580   :  { %v6184_v36 = vpop.permute.xlu1 %2284  ;;  %v6186_v40 = vpop.permute.xlu0 %2346 }
 0x581   :  { %v6188_v25 = vpop.permute.xlu2 %2204 }
 0x582   :  { %v2206_v58 = vsel %vm8074_vm0, %v6120_v20, %v6188_v25  ;;  %v2207_v1 = vsel %vm8075_vm15, %v6188_v25, %v6120_v20  ;;  %v2185_v20 = vadd.f32 %v2183_v11, %v2169_v19  ;;  %vm8077_vm0 = vmmov %vm8076_vm14  ;;  %vm8078_vm15 = vcmp.lt.s32.totalorder %v4583_v21, 31 }
 0x583   :  { %v2214_v25 = vmul.f32 %v2210_v22, %v2207_v1  ;;  %v2215_v45 = vmul.f32 %v2211_v5, %v2206_v58  ;;  %v2223_v57 = vsel %vm8077_vm0, %v6130_v38, %v6148_v27  ;;  %vm8079_vm2 = vmmov %vm8078_vm15  ;;  %v2048_v38 = vadd.f32 %v2047_v17, %v2046_v15 }
 0x584   :  { %v2201_v14 = vadd.f32 %v2199_v62, %v2185_v20  ;;  %v2054_v27 = vrot.slane %v2053_v47, 1  ;;  %vm8081_vm14 = vcmp.lt.s32.totalorder %v4583_v21, 30  ;;  %v2230_v4 = vmul.f32 %v2226_v41, %v2223_v57  ;;  %v3752_v62 = vld [vmem:[%s7557_s5 + $0x17] ss:$8 sm:$0x3] }
 0x585   :  { %v2216_v32 = vadd.f32 %v2214_v25, %v2200_v51  ;;  %v6393_v11 = vmul.f32 0.0625, %v2048_v38  ;;  %v2290_v20 = vperm.slane %v3751_v8, 0  ;;  %v2291_v25 = vperm.slane %v3751_v8, 1 }
 0x586   :  { %2660 = vrot.lane.b32.xlu1 %v5517_v2, %s7903_s9  ;;  %2710 = vrot.lane.b32.xlu0 %v5425_v3, %s8064_s23  ;;  %s8073_s9 = smov 79   ;;  %v2217_v28 = vadd.f32 %v2215_v45, %v2201_v14  ;;  %v2055_v18 = vadd.f32 %v2054_v27, %v2053_v47  ;;  %vm8083_vm0 = vcmp.lt.s32.totalorder %v4583_v21, 29  ;;  %v2306_v51 = vperm.slane %v3752_v62, 0 }
 0x587   :  { %2502 = vrot.lane.b32.xlu2 %v5425_v3, %s7869_s18  ;;  %v2232_v58 = vadd.f32 %v2230_v4, %v2216_v32  ;;  %v2270_v45 = vsel %vm8083_vm0, %v6172_v53, %v6150_v29  ;;  %v2307_v14 = vperm.slane %v3752_v62, 1  ;;  %v3755_v4 = vld [vmem:[%s7557_s5 + $0x22] ss:$8 sm:$0x3] }
 0x588   :  { %v6199_v6 = vpop.permute.xlu1 %2314  ;;  %v6201_v16 = vpop.permute.xlu0 %2364  ;;  %v2233_v1 = vadd.f32 %v2231_v13, %v2217_v28  ;;  %v6435_v32 = vmul.f32 0.0625, %v2055_v18  ;;  %v3754_v28 = vld [vmem:[%s7557_s5 + $0x21] ss:$8 sm:$0x3] }
 0x589   :  { %v6203_v46 = vpop.permute.xlu2 %2234 }
 0x58a   :  { %v2238_v23 = vsel %vm8078_vm15, %v6203_v46, %v6160_v34  ;;  %v2239_v54 = vsel %vm8079_vm2, %v6160_v34, %v6203_v46  ;;  %vm8082_vm2 = vmmov %vm8081_vm14 }
 0x58b   :  { %v2246_v19 = vmul.f32 %v2242_v30, %v2239_v54  ;;  %v2247_v22 = vmul.f32 %v2243_v52, %v2238_v23  ;;  %vm8084_vm15 = vmmov %vm8083_vm0  ;;  %vm8089_vm0 = vcmp.lt.s32.totalorder %v4583_v21, 18  ;;  %v2279_v30 = vmul.f32 %v2275_v10, %v2270_v45  ;;  %v3753_v52 = vld [vmem:[%s7557_s5 + $0x20] ss:$8 sm:$0x3] }
 0x58c   :  { %v2271_v17 = vsel %vm8084_vm15, %v6150_v29, %v6172_v53  ;;  %vm8090_vm15 = vmmov %vm8089_vm0  ;;  %v2322_v38 = vperm.slane %v3753_v52, 0  ;;  %v2323_v27 = vperm.slane %v3753_v52, 1  ;;  %v3756_v10 = vld [vmem:[%s7557_s5 + $0x23] ss:$8 sm:$0x3] }
 0x58d   :  { %v2248_v61 = vadd.f32 %v2246_v19, %v2232_v58  ;;  %v2249_v55 = vadd.f32 %v2247_v22, %v2233_v1  ;;  %v2338_v19 = vperm.slane %v3754_v28, 0  ;;  %v2339_v22 = vperm.slane %v3754_v28, 1 }
 0x58e   :  { %2678 = vrot.lane.b32.xlu1 %v5425_v3, %s8065_s22  ;;  %2740 = vrot.lane.b32.xlu0 %v5517_v2, %s8066_s2  ;;  %v2354_v1 = vperm.slane %v3755_v4, 0 }
 0x58f   :  { %2532 = vrot.lane.b32.xlu2 %v5517_v2, %s7873_s21  ;;  %s8080_s21 = smov 78  }
 0x590   :  { %v6244_v9 = vpop.permute.xlu1 %2332  ;;  %v6249_v60 = vpop.permute.xlu0 %2394 }
 0x591   :  { %v6251_v12 = vpop.permute.xlu2 %2252 }
 0x592   :  { %v2254_v34 = vsel %vm8081_vm14, %v6140_v56, %v6251_v12  ;;  %v2255_v46 = vsel %vm8082_vm2, %v6251_v12, %v6140_v56  ;;  %vm8085_vm14 = vcmp.lt.s32.totalorder %v4583_v21, 19 }
 0x593   :  { %v2262_v56 = vmul.f32 %v2258_v48, %v2255_v46  ;;  %v2263_v12 = vmul.f32 %v2259_v35, %v2254_v34  ;;  %vm8086_vm2 = vmmov %vm8085_vm14 }
 0x595   :  { %v2264_v33 = vadd.f32 %v2262_v56, %v2248_v61  ;;  %v2265_v7 = vadd.f32 %v2263_v12, %v2249_v55  ;;  %v2355_v56 = vperm.slane %v3755_v4, 1 }
 0x596   :  { %2708 = vrot.lane.b32.xlu1 %v5517_v2, %s8064_s23  ;;  %2758 = vrot.lane.b32.xlu0 %v5425_v3, %s8068_s7  ;;  %s8072_s23 = smov 83  }
 0x597   :  { %2550 = vrot.lane.b32.xlu2 %v5425_v3, %s7872_s4  ;;  %s8116_s4 = smov 45  }
 0x598   :  { %v6292_v0 = vpop.permute.xlu1 %2362  ;;  %v6297_v26 = vpop.permute.xlu0 %2412 }
 0x599   :  { %v6299_v37 = vpop.permute.xlu2 %2282 }
 0x59a   :  { %v2286_v47 = vsel %vm8085_vm14, %v6299_v37, %v6184_v36  ;;  %v2287_v41 = vsel %vm8086_vm2, %v6184_v36, %v6299_v37  ;;  %v2278_v37 = vmul.f32 %v2274_v44, %v2271_v17  ;;  %vm8091_vm14 = vcmp.lt.s32.totalorder %v4583_v21, 17 }
 0x59b   :  { %v2294_v42 = vmul.f32 %v2290_v20, %v2287_v41  ;;  %v2295_v57 = vmul.f32 %v2291_v25, %v2286_v47  ;;  %v2318_v34 = vsel %vm8091_vm14, %v6199_v6, %v6174_v49  ;;  %vm8092_vm2 = vmmov %vm8091_vm14  ;;  %vm8096_vm14 = vcmp.lt.s32.totalorder %v4583_v21, 15 }
 0x59c   :  { %v2319_v46 = vsel %vm8092_vm2, %v6174_v49, %v6199_v6  ;;  %v2327_v18 = vmul.f32 %v2323_v27, %v2318_v34  ;;  %vm8097_vm2 = vmmov %vm8096_vm14  ;;  %v3759_v34 = vld [vmem:[%s7557_s5 + $0x26] ss:$8 sm:$0x3] }
 0x59d   :  { %v2326_v12 = vmul.f32 %v2322_v38, %v2319_v46 }
 0x59e   :  { %2726 = vrot.lane.b32.xlu1 %v5425_v3, %s8072_s23  ;;  %2788 = vrot.lane.b32.xlu0 %v5517_v2, %s8073_s9 }
 0x59f   :  { %2580 = vrot.lane.b32.xlu2 %v5517_v2, %s7882_s28  ;;  %s8169_s28 = smov 110  }
 0x5a0   :  { %v6338_v59 = vpop.permute.xlu1 %2380  ;;  %v6343_v39 = vpop.permute.xlu0 %2452 }
 0x5a1   :  { %v6345_v31 = vpop.permute.xlu2 %2300 }
 0x5a2   :  { %v2302_v29 = vsel %vm8089_vm0, %v6162_v50, %v6345_v31  ;;  %v2303_v53 = vsel %vm8090_vm15, %v6345_v31, %v6162_v50  ;;  %v2280_v50 = vadd.f32 %v2278_v37, %v2264_v33  ;;  %v2281_v31 = vadd.f32 %v2279_v30, %v2265_v7 }
 0x5a3   :  { %v2310_v48 = vmul.f32 %v2306_v51, %v2303_v53  ;;  %v2311_v35 = vmul.f32 %v2307_v14, %v2302_v29  ;;  %vm8093_vm0 = vcmp.lt.s32.totalorder %v4583_v21, 16  ;;  %v2370_v7 = vperm.slane %v3756_v10, 0  ;;  %v3758_v14 = vld [vmem:[%s7557_s5 + $0x25] ss:$8 sm:$0x3] }
 0x5a4   :  { %v2296_v13 = vadd.f32 %v2294_v42, %v2280_v50  ;;  %v2297_v63 = vadd.f32 %v2295_v57, %v2281_v31  ;;  %vm8094_vm15 = vmmov %vm8093_vm0  ;;  %v2371_v51 = vperm.slane %v3756_v10, 1 }
 0x5a6   :  { %2756 = vrot.lane.b32.xlu1 %v5517_v2, %s8068_s7  ;;  %2806 = vrot.lane.b32.xlu0 %v5425_v3, %s8080_s21  ;;  %s8087_s7 = smov 80   ;;  %v2312_v49 = vadd.f32 %v2310_v48, %v2296_v13  ;;  %v2313_v6 = vadd.f32 %v2311_v35, %v2297_v63 }
 0x5a7   :  { %2598 = vrot.lane.b32.xlu2 %v5425_v3, %s8062_s27  ;;  %s8127_s27 = smov 32  }
 0x5a8   :  { %v6383_v24 = vpop.permute.xlu1 %2410  ;;  %v6388_v5 = vpop.permute.xlu0 %2470  ;;  %v2328_v17 = vadd.f32 %v2326_v12, %v2312_v49  ;;  %v2329_v47 = vadd.f32 %v2327_v18, %v2313_v6  ;;  %v2419_v49 = vperm.slane %v3759_v34, 1 }
 0x5a9   :  { %v2331_v15 = vpop.permute.xlu2 %2330 }
 0x5aa   :  { %v2334_v8 = vsel %vm8093_vm0, %v2331_v15, %v6244_v9  ;;  %v2335_v58 = vsel %vm8094_vm15, %v6244_v9, %v2331_v15  ;;  %vm8098_vm0 = vcmp.lt.s32.totalorder %v4583_v21, 126 }
 0x5ab   :  { %v2342_v62 = vmul.f32 %v2338_v19, %v2335_v58  ;;  %v2343_v61 = vmul.f32 %v2339_v22, %v2334_v8  ;;  %vm8099_vm15 = vmmov %vm8098_vm0  ;;  %v3760_v8 = vld [vmem:[%s7557_s5 + $0x27] ss:$8 sm:$0x3]  ;;  %v2418_v58 = vperm.slane %v3759_v34, 0 }
 0x5ad   :  { %v2344_v29 = vadd.f32 %v2342_v62, %v2328_v17  ;;  %v2345_v53 = vadd.f32 %v2343_v61, %v2329_v47 }
 0x5ae   :  { %2774 = vrot.lane.b32.xlu1 %v5425_v3, %s8087_s7  ;;  %2836 = vrot.lane.b32.xlu0 %v6393_v11, %s8088_s12 }
 0x5af   :  { %2628 = vrot.lane.b32.xlu2 %v5517_v2, %s7898_s16  ;;  %s8095_s16 = smov 50  }
 0x5b0   :  { %v6428_v36 = vpop.permute.xlu1 %2428  ;;  %v6433_v23 = vpop.permute.xlu0 %2500 }
 0x5b1   :  { %v2349_v54 = vpop.permute.xlu2 %2348 }
 0x5b2   :  { %v2350_v44 = vsel %vm8096_vm14, %v6186_v40, %v2349_v54  ;;  %v2351_v9 = vsel %vm8097_vm2, %v2349_v54, %v6186_v40  ;;  %v3757_v40 = vld [vmem:[%s7557_s5 + $0x24] ss:$8 sm:$0x3]  ;;  %vm8100_vm14 = vcmp.lt.s32.totalorder %v4583_v21, 14 }
 0x5b3   :  { %v2358_v41 = vmul.f32 %v2354_v1, %v2351_v9  ;;  %v2359_v33 = vmul.f32 %v2355_v56, %v2350_v44  ;;  %v2387_v37 = vperm.slane %v3757_v40, 1  ;;  %v2366_v30 = vsel %vm8100_vm14, %v6292_v0, %v6201_v16  ;;  %vm8101_vm2 = vmmov %vm8100_vm14 }
 0x5b4   :  { %v2367_v52 = vsel %vm8101_vm2, %v6201_v16, %v6292_v0  ;;  %v2402_v16 = vperm.slane %v3758_v14, 0  ;;  %v2403_v0 = vperm.slane %v3758_v14, 1  ;;  %v2375_v48 = vmul.f32 %v2371_v51, %v2366_v30 }
 0x5b5   :  { %v2360_v54 = vadd.f32 %v2358_v41, %v2344_v29  ;;  %v2361_v28 = vadd.f32 %v2359_v33, %v2345_v53  ;;  %v2374_v31 = vmul.f32 %v2370_v7, %v2367_v52  ;;  %vm8106_vm14 = vcmp.lt.s32.totalorder %v4583_v21, 3 }
 0x5b6   :  { %2804 = vrot.lane.b32.xlu1 %v5517_v2, %s8080_s21  ;;  %2854 = vrot.lane.b32.xlu0 %v6435_v32, %s8095_s16  ;;  %s8104_s21 = smov 77   ;;  %vm8107_vm2 = vmmov %vm8106_vm14  ;;  %v2434_v44 = vperm.slane %v3760_v8, 0  ;;  %v2435_v9 = vperm.slane %v3760_v8, 1 }
 0x5b7   :  { %2646 = vrot.lane.b32.xlu2 %v5425_v3, %s7895_s26  ;;  %v2376_v13 = vadd.f32 %v2374_v31, %v2360_v54  ;;  %v2377_v63 = vadd.f32 %v2375_v48, %v2361_v28  ;;  %s8110_s26 = smov 47  }
 0x5b8   :  { %v2469_v15 = vpop.permute.xlu1 %2468  ;;  %v2519_v25 = vpop.permute.xlu0 %2518 }
 0x5b9   :  { %v6475_v55 = vsel %vm8098_vm0, %v2469_v15, %v6388_v5  ;;  %v6480_v20 = vsel %vm8099_vm15, %v6388_v5, %v2469_v15  ;;  %v2379_v45 = vpop.permute.xlu2 %2378  ;;  %v2386_v5 = vperm.slane %v3757_v40, 0  ;;  %vm8102_vm0 = vcmp.lt.s32.totalorder %v4583_v21, 13  ;;  %v3761_v40 = vld [vmem:[%s7557_s5 + $0x30] ss:$8 sm:$0x3] }
 0x5ba   :  { %v2382_v42 = vsel %vm8102_vm0, %v2379_v45, %v6338_v59  ;;  %vm8103_vm15 = vmmov %vm8102_vm0  ;;  %vm8108_vm0 = vcmp.lt.s32.totalorder %v4583_v21, 2  ;;  %v2444_v14 = vperm.slane %v3761_v40, 0  ;;  %v2445_v29 = vperm.slane %v3761_v40, 1 }
 0x5bb   :  { %v2383_v57 = vsel %vm8103_vm15, %v6338_v59, %v2379_v45  ;;  %v2391_v38 = vmul.f32 %v2387_v37, %v2382_v42  ;;  %v2414_v56 = vsel %vm8108_vm0, %v6383_v24, %v6297_v26  ;;  %vm8109_vm15 = vmmov %vm8108_vm0  ;;  %vm8113_vm0 = vcmp.lt.s32.totalorder %v4583_v21, 1  ;;  %v3763_v37 = vld [vmem:[%s7557_s5 + $0x32] ss:$8 sm:$0x3] }
 0x5bc   :  { %v2390_v35 = vmul.f32 %v2386_v5, %v2383_v57  ;;  %v2423_v62 = vmul.f32 %v2419_v49, %v2414_v56  ;;  %v2476_v42 = vperm.slane %v3763_v37, 0  ;;  %v2477_v57 = vperm.slane %v3763_v37, 1 }
 0x5bd   :  { %v2393_v1 = vadd.f32 %v2391_v38, %v2377_v63  ;;  %v2448_v54 = vmul.f32 %v2444_v14, %v5517_v2  ;;  %v2449_v28 = vmul.f32 %v2445_v29, %v5425_v3 }
 0x5be   :  { %2822 = vrot.lane.b32.xlu1 %v5425_v3, %s8104_s21  ;;  %2884 = vrot.lane.b32.xlu0 %v6393_v11, %s8105_s19  ;;  %v2392_v6 = vadd.f32 %v2390_v35, %v2376_v13  ;;  %v2481_v13 = vmul.f32 %v2477_v57, %v6480_v20 }
 0x5bf   :  { %2676 = vrot.lane.b32.xlu2 %v5517_v2, %s8065_s22  ;;  %s8119_s22 = smov 35  }
 0x5c0   :  { %v6508_v50 = vpop.permute.xlu1 %2486  ;;  %v6510_v59 = vpop.permute.xlu0 %2548 }
 0x5c1   :  { %v2397_v27 = vpop.permute.xlu2 %2396 }
 0x5c2   :  { %v2398_v46 = vsel %vm8106_vm14, %v6249_v60, %v2397_v27  ;;  %v2399_v4 = vsel %vm8107_vm2, %v2397_v27, %v6249_v60  ;;  %v2415_v60 = vsel %vm8109_vm15, %v6297_v26, %v6383_v24  ;;  %vm8111_vm14 = vcmp.lt.s32.totalorder %v4583_v21, 114  ;;  %vm8114_vm15 = vmmov %vm8113_vm0 }
 0x5c3   :  { %v2406_v19 = vmul.f32 %v2402_v16, %v2399_v4  ;;  %v2407_v22 = vmul.f32 %v2403_v0, %v2398_v46  ;;  %v2422_v10 = vmul.f32 %v2418_v58, %v2415_v60  ;;  %vm8112_vm2 = vmmov %vm8111_vm14  ;;  %v3764_v46 = vld [vmem:[%s7557_s5 + $0x33] ss:$8 sm:$0x3]  ;;  %v2480_v4 = vmul.f32 %v2476_v42, %v6475_v55 }
 0x5c4   :  { %v2493_v58 = vperm.slane %v3764_v46, 1 }
 0x5c5   :  { %v2408_v12 = vadd.f32 %v2406_v19, %v2392_v6  ;;  %v2409_v18 = vadd.f32 %v2407_v22, %v2393_v1 }
 0x5c6   :  { %2852 = vrot.lane.b32.xlu1 %v6393_v11, %s8095_s16  ;;  %2902 = vrot.lane.b32.xlu0 %v6435_v32, %s8110_s26 }
 0x5c7   :  { %2694 = vrot.lane.b32.xlu2 %v5425_v3, %s8063_s15  ;;  %v2424_v41 = vadd.f32 %v2422_v10, %v2408_v12  ;;  %v2425_v33 = vadd.f32 %v2423_v62, %v2409_v18  ;;  %s8115_s15 = smov 49   ;;  %v3766_v10 = vld [vmem:[%s7557_s5 + $0x35] ss:$8 sm:$0x3] }
 0x5c8   :  { %v2517_v15 = vpop.permute.xlu1 %2516  ;;  %v2567_v24 = vpop.permute.xlu0 %2566  ;;  %v2525_v40 = vperm.slane %v3766_v10, 1 }
 0x5c9   :  { %v6540_v61 = vsel %vm8111_vm14, %v2517_v15, %v2519_v25  ;;  %v6544_v26 = vsel %vm8112_vm2, %v2519_v25, %v2517_v15  ;;  %v2427_v45 = vpop.permute.xlu2 %2426  ;;  %v3762_v25 = vld [vmem:[%s7557_s5 + $0x31] ss:$8 sm:$0x3]  ;;  %vm8117_vm14 = vcmp.lt.s32.totalorder %v4583_v21, 127 }
 0x5ca   :  { %v2430_v17 = vsel %vm8113_vm0, %v2427_v45, %v6428_v36  ;;  %v2431_v47 = vsel %vm8114_vm15, %v6428_v36, %v2427_v45  ;;  %v2460_v36 = vperm.slane %v3762_v25, 0  ;;  %v2461_v30 = vperm.slane %v3762_v25, 1  ;;  %vm8118_vm2 = vmmov %vm8117_vm14  ;;  %v3767_v25 = vld [vmem:[%s7557_s5 + $0x36] ss:$8 sm:$0x3] }
 0x5cb   :  { %v2438_v7 = vmul.f32 %v2434_v44, %v2431_v47  ;;  %v2439_v51 = vmul.f32 %v2435_v9, %v2430_v17  ;;  %vm8120_vm0 = vcmp.lt.s32.totalorder %v4583_v21, 111  ;;  %v3765_v44 = vld [vmem:[%s7557_s5 + $0x34] ss:$8 sm:$0x3]  ;;  %v2524_v45 = vperm.slane %v3766_v10, 0 }
 0x5cc   :  { %vm8121_vm15 = vmmov %vm8120_vm0  ;;  %v2509_v62 = vperm.slane %v3765_v44, 1  ;;  %v2529_v29 = vmul.f32 %v2525_v40, %v6544_v26  ;;  %v3771_v40 = vld [vmem:[%s7557_s5 + $0x42] ss:$8 sm:$0x3] }
 0x5cd   :  { %v2440_v53 = vadd.f32 %v2438_v7, %v2424_v41  ;;  %v2441_v5 = vadd.f32 %v2439_v51, %v2425_v33  ;;  %v2528_v14 = vmul.f32 %v2524_v45, %v6540_v61 }
 0x5ce   :  { %2870 = vrot.lane.b32.xlu1 %v6435_v32, %s8115_s15  ;;  %2932 = vrot.lane.b32.xlu0 %v6393_v11, %s8116_s4 }
 0x5cf   :  { %2724 = vrot.lane.b32.xlu2 %v5517_v2, %s8072_s23  ;;  %v2450_v35 = vadd.f32 %v2448_v54, %v2440_v53  ;;  %v2451_v38 = vadd.f32 %v2449_v28, %v2441_v5  ;;  %s8124_s23 = smov 46  }
 0x5d0   :  { %v6567_v52 = vpop.permute.xlu1 %2534  ;;  %v6571_v16 = vpop.permute.xlu0 %2596 }
 0x5d1   :  { %v2455_v0 = vpop.permute.xlu2 %2454 }
 0x5d2   :  { %v2456_v31 = vsel %vm8117_vm14, %v6343_v39, %v2455_v0  ;;  %v2457_v48 = vsel %vm8118_vm2, %v2455_v0, %v6343_v39  ;;  %v2492_v39 = vperm.slane %v3764_v46, 0  ;;  %vm8122_vm14 = vcmp.lt.s32.totalorder %v4583_v21, 125 }
 0x5d3   :  { %v2464_v27 = vmul.f32 %v2460_v36, %v2456_v31  ;;  %v2465_v34 = vmul.f32 %v2461_v30, %v2457_v48  ;;  %vm8123_vm2 = vmmov %vm8122_vm14  ;;  %v2541_v30 = vperm.slane %v3767_v25, 1  ;;  %v3768_v48 = vld [vmem:[%s7557_s5 + $0x37] ss:$8 sm:$0x3] }
 0x5d5   :  { %v2466_v63 = vadd.f32 %v2464_v27, %v2450_v35  ;;  %v2467_v19 = vadd.f32 %v2465_v34, %v2451_v38  ;;  %v3769_v27 = vld [vmem:[%s7557_s5 + $0x40] ss:$8 sm:$0x3]  ;;  %v2557_v34 = vperm.slane %v3768_v48, 1 }
 0x5d6   :  { %2900 = vrot.lane.b32.xlu1 %v6393_v11, %s8110_s26  ;;  %2950 = vrot.lane.b32.xlu0 %v6435_v32, %s8119_s22  ;;  %s8134_s26 = smov 29  }
 0x5d7   :  { %v2482_v22 = vadd.f32 %v2480_v4, %v2466_v63  ;;  %v2483_v8 = vadd.f32 %v2481_v13, %v2467_v19  ;;  %2742 = vrot.lane.b32.xlu2 %v5425_v3, %s8066_s2  ;;  %v2572_v4 = vperm.slane %v3769_v27, 0  ;;  %v2573_v13 = vperm.slane %v3769_v27, 1 }
 0x5d8   :  { %v2565_v49 = vpop.permute.xlu1 %2564  ;;  %v2615_v6 = vpop.permute.xlu0 %2614 }
 0x5d9   :  { %v6592_v55 = vsel %vm8120_vm0, %v2565_v49, %v2567_v24  ;;  %v6596_v20 = vsel %vm8121_vm15, %v2567_v24, %v2565_v49  ;;  %v2485_v1 = vpop.permute.xlu2 %2484  ;;  %vm8125_vm0 = vcmp.lt.s32.totalorder %v4583_v21, 115 }
 0x5da   :  { %v2488_v56 = vsel %vm8122_vm14, %v2485_v1, %v6508_v50  ;;  %v2489_v60 = vsel %vm8123_vm2, %v6508_v50, %v2485_v1  ;;  %v2508_v50 = vperm.slane %v3765_v44, 0  ;;  %vm8126_vm15 = vmmov %vm8125_vm0  ;;  %vm8128_vm14 = vcmp.lt.s32.totalorder %v4583_v21, 99 }
 0x5db   :  { %v2496_v12 = vmul.f32 %v2492_v39, %v2488_v56  ;;  %v2497_v18 = vmul.f32 %v2493_v58, %v2489_v60  ;;  %vm8129_vm2 = vmmov %vm8128_vm14  ;;  %v2576_v49 = vmul.f32 %v2572_v4, %v6592_v55 }
 0x5dd   :  { %v2498_v9 = vadd.f32 %v2496_v12, %v2482_v22  ;;  %v2499_v15 = vadd.f32 %v2497_v18, %v2483_v8 }
 0x5de   :  { %2918 = vrot.lane.b32.xlu1 %v6435_v32, %s8124_s23  ;;  %2980 = vrot.lane.b32.xlu0 %v6393_v11, %s7972_s20 }
 0x5df   :  { %2772 = vrot.lane.b32.xlu2 %v5517_v2, %s8087_s7 }
 0x5e0   :  { %v6616_v24 = vpop.permute.xlu1 %2582  ;;  %v6618_v17 = vpop.permute.xlu0 %2644 }
 0x5e1   :  { %v2503_v47 = vpop.permute.xlu2 %2502 }
 0x5e2   :  { %v2504_v41 = vsel %vm8125_vm0, %v6433_v23, %v2503_v47  ;;  %v2505_v33 = vsel %vm8126_vm15, %v2503_v47, %v6433_v23  ;;  %v2540_v23 = vperm.slane %v3767_v25, 0  ;;  %vm8130_vm0 = vcmp.lt.s32.totalorder %v4583_v21, 113 }
 0x5e3   :  { %v2512_v7 = vmul.f32 %v2508_v50, %v2504_v41  ;;  %v2513_v51 = vmul.f32 %v2509_v62, %v2505_v33  ;;  %vm8131_vm15 = vmmov %vm8130_vm0  ;;  %v3772_v33 = vld [vmem:[%s7557_s5 + $0x43] ss:$8 sm:$0x3] }
 0x5e4   :  { %v2620_v25 = vperm.slane %v3772_v33, 0 }
 0x5e5   :  { %v2514_v53 = vadd.f32 %v2512_v7, %v2498_v9  ;;  %v2515_v5 = vadd.f32 %v2513_v51, %v2499_v15  ;;  %v2605_v7 = vperm.slane %v3771_v40, 1 }
 0x5e6   :  { %2948 = vrot.lane.b32.xlu1 %v6393_v11, %s8119_s22  ;;  %2998 = vrot.lane.b32.xlu0 %v6435_v32, %s8127_s27  ;;  %s8165_s22 = smov 109  }
 0x5e7   :  { %v2530_v37 = vadd.f32 %v2528_v14, %v2514_v53  ;;  %v2531_v36 = vadd.f32 %v2529_v29, %v2515_v5  ;;  %2790 = vrot.lane.b32.xlu2 %v5425_v3, %s8073_s9  ;;  %v2621_v14 = vperm.slane %v3772_v33, 1 }
 0x5e8   :  { %v2613_v42 = vpop.permute.xlu1 %2612  ;;  %v2663_v57 = vpop.permute.xlu0 %2662 }
 0x5e9   :  { %v6639_v61 = vsel %vm8128_vm14, %v2613_v42, %v2615_v6  ;;  %v6643_v26 = vsel %vm8129_vm2, %v2615_v6, %v2613_v42  ;;  %v2533_v54 = vpop.permute.xlu2 %2532  ;;  %vm8132_vm14 = vcmp.lt.s32.totalorder %v4583_v21, 112  ;;  %v2577_v6 = vmul.f32 %v2573_v13, %v6596_v20  ;;  %v3774_v13 = vld [vmem:[%s7557_s5 + $0x45] ss:$8 sm:$0x3] }
 0x5ea   :  { %v2536_v28 = vsel %vm8130_vm0, %v2533_v54, %v6567_v52  ;;  %v2537_v3 = vsel %vm8131_vm15, %v6567_v52, %v2533_v54  ;;  %v2556_v52 = vperm.slane %v3768_v48, 0  ;;  %vm8133_vm2 = vmmov %vm8132_vm14  ;;  %vm8135_vm0 = vcmp.lt.s32.totalorder %v4583_v21, 96 }
 0x5eb   :  { %v2544_v0 = vmul.f32 %v2540_v23, %v2536_v28  ;;  %v2545_v31 = vmul.f32 %v2541_v30, %v2537_v3  ;;  %vm8136_vm15 = vmmov %vm8135_vm0  ;;  %v3773_v30 = vld [vmem:[%s7557_s5 + $0x44] ss:$8 sm:$0x3]  ;;  %v2624_v42 = vmul.f32 %v2620_v25, %v6639_v61 }
 0x5ed   :  { %v2546_v35 = vadd.f32 %v2544_v0, %v2530_v37  ;;  %v2547_v38 = vadd.f32 %v2545_v31, %v2531_v36  ;;  %v2637_v31 = vperm.slane %v3773_v30, 1 }
 0x5ee   :  { %2966 = vrot.lane.b32.xlu1 %v6435_v32, %s7993_s0  ;;  %3028 = vrot.lane.b32.xlu0 %v6393_v11, %s8000_s13 }
 0x5ef   :  { %2820 = vrot.lane.b32.xlu2 %v5517_v2, %s8104_s21  ;;  %v3770_v2 = vld [vmem:[%s7557_s5 + $0x41] ss:$8 sm:$0x3] }
 0x5f0   :  { %v6663_v46 = vpop.permute.xlu1 %2630  ;;  %v6665_v63 = vpop.permute.xlu0 %2692  ;;  %v2589_v18 = vperm.slane %v3770_v2, 1 }
 0x5f1   :  { %v2551_v19 = vpop.permute.xlu2 %2550 }
 0x5f2   :  { %v2552_v22 = vsel %vm8132_vm14, %v6510_v59, %v2551_v19  ;;  %v2553_v8 = vsel %vm8133_vm2, %v2551_v19, %v6510_v59  ;;  %v2588_v59 = vperm.slane %v3770_v2, 0  ;;  %vm8137_vm14 = vcmp.lt.s32.totalorder %v4583_v21, 110 }
 0x5f3   :  { %v2560_v39 = vmul.f32 %v2556_v52, %v2552_v22  ;;  %v2561_v58 = vmul.f32 %v2557_v34, %v2553_v8  ;;  %vm8138_vm2 = vmmov %vm8137_vm14  ;;  %v3775_v8 = vld [vmem:[%s7557_s5 + $0x46] ss:$8 sm:$0x3] }
 0x5f4   :  { %v2668_v2 = vperm.slane %v3775_v8, 0 }
 0x5f5   :  { %v2562_v1 = vadd.f32 %v2560_v39, %v2546_v35  ;;  %v2563_v56 = vadd.f32 %v2561_v58, %v2547_v38  ;;  %v2653_v39 = vperm.slane %v3774_v13, 1 }
 0x5f6   :  { %2996 = vrot.lane.b32.xlu1 %v6393_v11, %s8127_s27  ;;  %3046 = vrot.lane.b32.xlu0 %v6435_v32, %s8134_s26  ;;  %s8163_s27 = smov 111  }
 0x5f7   :  { %v2578_v60 = vadd.f32 %v2576_v49, %v2562_v1  ;;  %v2579_v12 = vadd.f32 %v2577_v6, %v2563_v56  ;;  %2838 = vrot.lane.b32.xlu2 %v6435_v32, %s8088_s12  ;;  %s8141_s12 = smov 17   ;;  %v2669_v49 = vperm.slane %v3775_v8, 1 }
 0x5f8   :  { %v2661_v44 = vpop.permute.xlu1 %2660  ;;  %v2711_v9 = vpop.permute.xlu0 %2710 }
 0x5f9   :  { %v6686_v55 = vsel %vm8135_vm0, %v2661_v44, %v2663_v57  ;;  %v6690_v20 = vsel %vm8136_vm15, %v2663_v57, %v2661_v44  ;;  %v2581_v15 = vpop.permute.xlu2 %2580  ;;  %vm8139_vm0 = vcmp.lt.s32.totalorder %v4583_v21, 109  ;;  %v2625_v57 = vmul.f32 %v2621_v14, %v6643_v26  ;;  %v3777_v14 = vld [vmem:[%s7557_s5 + $0x50] ss:$8 sm:$0x3] }
 0x5fa   :  { %v2584_v10 = vsel %vm8137_vm14, %v2581_v15, %v6616_v24  ;;  %v2585_v50 = vsel %vm8138_vm2, %v6616_v24, %v2581_v15  ;;  %v2604_v24 = vperm.slane %v3771_v40, 0  ;;  %vm8140_vm15 = vmmov %vm8139_vm0  ;;  %vm8142_vm14 = vcmp.lt.s32.totalorder %v4583_v21, 93 }
 0x5fb   :  { %v2592_v62 = vmul.f32 %v2588_v59, %v2584_v10  ;;  %v2593_v45 = vmul.f32 %v2589_v18, %v2585_v50  ;;  %vm8143_vm2 = vmmov %vm8142_vm14  ;;  %v3776_v18 = vld [vmem:[%s7557_s5 + $0x47] ss:$8 sm:$0x3]  ;;  %v2672_v44 = vmul.f32 %v2668_v2, %v6686_v55 }
 0x5fd   :  { %v2594_v47 = vadd.f32 %v2592_v62, %v2578_v60  ;;  %v2595_v41 = vadd.f32 %v2593_v45, %v2579_v12  ;;  %v2685_v45 = vperm.slane %v3776_v18, 1 }
 0x5fe   :  { %3014 = vrot.lane.b32.xlu1 %v6435_v32, %s8014_s10  ;;  %3076 = vrot.lane.b32.xlu0 %v6393_v11, %s8016_s25 }
 0x5ff   :  { %2868 = vrot.lane.b32.xlu2 %v6393_v11, %s8115_s15  ;;  %s8148_s15 = smov 14  }
 0x600   :  { %v6710_v51 = vpop.permute.xlu1 %2678  ;;  %v6712_v29 = vpop.permute.xlu0 %2740 }
 0x601   :  { %v2599_v53 = vpop.permute.xlu2 %2598 }
 0x602   :  { %v2600_v5 = vsel %vm8139_vm0, %v6571_v16, %v2599_v53  ;;  %v2601_v37 = vsel %vm8140_vm15, %v2599_v53, %v6571_v16  ;;  %v2636_v16 = vperm.slane %v3773_v30, 0  ;;  %vm8144_vm0 = vcmp.lt.s32.totalorder %v4583_v21, 98 }
 0x603   :  { %v2608_v36 = vmul.f32 %v2604_v24, %v2600_v5  ;;  %v2609_v23 = vmul.f32 %v2605_v7, %v2601_v37  ;;  %vm8145_vm15 = vmmov %vm8144_vm0  ;;  %v3778_v37 = vld [vmem:[%s7557_s5 + $0x51] ss:$8 sm:$0x3] }
 0x604   :  { %v2716_v30 = vperm.slane %v3778_v37, 0 }
 0x605   :  { %v2610_v54 = vadd.f32 %v2608_v36, %v2594_v47  ;;  %v2611_v28 = vadd.f32 %v2609_v23, %v2595_v41  ;;  %v2701_v36 = vperm.slane %v3777_v14, 1 }
 0x606   :  { %3044 = vrot.lane.b32.xlu1 %v6393_v11, %s8134_s26  ;;  %3094 = vrot.lane.b32.xlu0 %v6435_v32, %s8141_s12  ;;  %s8162_s26 = smov 112  }
 0x607   :  { %v2626_v3 = vadd.f32 %v2624_v42, %v2610_v54  ;;  %v2627_v0 = vadd.f32 %v2625_v57, %v2611_v28  ;;  %2886 = vrot.lane.b32.xlu2 %v6435_v32, %s8105_s19  ;;  %v2717_v42 = vperm.slane %v3778_v37, 1 }
 0x608   :  { %v2709_v48 = vpop.permute.xlu1 %2708  ;;  %v2759_v35 = vpop.permute.xlu0 %2758 }
 0x609   :  { %v6733_v61 = vsel %vm8142_vm14, %v2709_v48, %v2711_v9  ;;  %v6737_v26 = vsel %vm8143_vm2, %v2711_v9, %v2709_v48  ;;  %v2629_v38 = vpop.permute.xlu2 %2628  ;;  %vm8146_vm14 = vcmp.lt.s32.totalorder %v4583_v21, 97  ;;  %v2673_v9 = vmul.f32 %v2669_v49, %v6690_v20  ;;  %v3780_v49 = vld [vmem:[%s7557_s5 + $0x53] ss:$8 sm:$0x3] }
 0x60a   :  { %v2632_v27 = vsel %vm8144_vm0, %v2629_v38, %v6663_v46  ;;  %v2633_v52 = vsel %vm8145_vm15, %v6663_v46, %v2629_v38  ;;  %v2652_v46 = vperm.slane %v3774_v13, 0  ;;  %vm8147_vm2 = vmmov %vm8146_vm14  ;;  %vm8149_vm0 = vcmp.lt.s32.totalorder %v4583_v21, 81 }
 0x60b   :  { %v2640_v34 = vmul.f32 %v2636_v16, %v2632_v27  ;;  %v2641_v4 = vmul.f32 %v2637_v31, %v2633_v52  ;;  %vm8150_vm15 = vmmov %vm8149_vm0  ;;  %v3779_v31 = vld [vmem:[%s7557_s5 + $0x52] ss:$8 sm:$0x3]  ;;  %v2720_v48 = vmul.f32 %v2716_v30, %v6733_v61 }
 0x60d   :  { %v2642_v19 = vadd.f32 %v2640_v34, %v2626_v3  ;;  %v2643_v22 = vadd.f32 %v2641_v4, %v2627_v0  ;;  %v2733_v4 = vperm.slane %v3779_v31, 1 }
 0x60e   :  { %3062 = vrot.lane.b32.xlu1 %v6435_v32, %s8030_s14  ;;  %3124 = vrot.lane.b32.xlu0 %v6393_v11, %s8032_s24 }
 0x60f   :  { %2916 = vrot.lane.b32.xlu2 %v6393_v11, %s8124_s23 }
 0x610   :  { %v6757_v58 = vpop.permute.xlu1 %2726  ;;  %v6759_v6 = vpop.permute.xlu0 %2788 }
 0x611   :  { %v2647_v1 = vpop.permute.xlu2 %2646 }
 0x612   :  { %v2648_v56 = vsel %vm8146_vm14, %v6618_v17, %v2647_v1  ;;  %v2649_v60 = vsel %vm8147_vm2, %v2647_v1, %v6618_v17  ;;  %v2684_v17 = vperm.slane %v3776_v18, 0  ;;  %vm8151_vm14 = vcmp.lt.s32.totalorder %v4583_v21, 95 }
 0x613   :  { %v2656_v12 = vmul.f32 %v2652_v46, %v2648_v56  ;;  %v2657_v59 = vmul.f32 %v2653_v39, %v2649_v60  ;;  %vm8152_vm2 = vmmov %vm8151_vm14  ;;  %v3781_v60 = vld [vmem:[%s7557_s5 + $0x54] ss:$8 sm:$0x3] }
 0x614   :  { %v2764_v18 = vperm.slane %v3781_v60, 0 }
 0x615   :  { %v2658_v15 = vadd.f32 %v2656_v12, %v2642_v19  ;;  %v2659_v10 = vadd.f32 %v2657_v59, %v2643_v22  ;;  %v2749_v12 = vperm.slane %v3780_v49, 1 }
 0x616   :  { %3092 = vrot.lane.b32.xlu1 %v6393_v11, %s8141_s12  ;;  %3142 = vrot.lane.b32.xlu0 %v6435_v32, %s8148_s15  ;;  %s8171_s12 = smov 96  }
 0x617   :  { %v2674_v50 = vadd.f32 %v2672_v44, %v2658_v15  ;;  %v2675_v62 = vadd.f32 %v2673_v9, %v2659_v10  ;;  %2934 = vrot.lane.b32.xlu2 %v6435_v32, %s8116_s4  ;;  %v2765_v44 = vperm.slane %v3781_v60, 1 }
 0x618   :  { %v2757_v40 = vpop.permute.xlu1 %2756  ;;  %v2807_v47 = vpop.permute.xlu0 %2806 }
 0x619   :  { %v6780_v55 = vsel %vm8149_vm0, %v2757_v40, %v2759_v35  ;;  %v6784_v20 = vsel %vm8150_vm15, %v2759_v35, %v2757_v40  ;;  %v2677_v41 = vpop.permute.xlu2 %2676  ;;  %vm8153_vm0 = vcmp.lt.s32.totalorder %v4583_v21, 94  ;;  %v2721_v35 = vmul.f32 %v2717_v42, %v6737_v26  ;;  %v3783_v42 = vld [vmem:[%s7557_s5 + $0x56] ss:$8 sm:$0x3] }
 0x61a   :  { %v2680_v33 = vsel %vm8151_vm14, %v2677_v41, %v6710_v51  ;;  %v2681_v24 = vsel %vm8152_vm2, %v6710_v51, %v2677_v41  ;;  %v2700_v51 = vperm.slane %v3777_v14, 0  ;;  %vm8154_vm15 = vmmov %vm8153_vm0  ;;  %vm8155_vm14 = vcmp.lt.s32.totalorder %v4583_v21, 83 }
 0x61b   :  { %v2688_v7 = vmul.f32 %v2684_v17, %v2680_v33  ;;  %v2689_v25 = vmul.f32 %v2685_v45, %v2681_v24  ;;  %vm8156_vm2 = vmmov %vm8155_vm14  ;;  %v3782_v45 = vld [vmem:[%s7557_s5 + $0x55] ss:$8 sm:$0x3]  ;;  %v2768_v40 = vmul.f32 %v2764_v18, %v6780_v55 }
 0x61d   :  { %v2690_v53 = vadd.f32 %v2688_v7, %v2674_v50  ;;  %v2691_v5 = vadd.f32 %v2689_v25, %v2675_v62  ;;  %v2781_v25 = vperm.slane %v3782_v45, 1 }
 0x61e   :  { %3110 = vrot.lane.b32.xlu1 %v6435_v32, %s8045_s3  ;;  %3172 = vrot.lane.b32.xlu0 %v6393_v11, %s8047_s1 }
 0x61f   :  { %2964 = vrot.lane.b32.xlu2 %v6393_v11, %s7993_s0  ;;  %s8161_s0 = smov 125  }
 0x620   :  { %v6804_v23 = vpop.permute.xlu1 %2774  ;;  %v6806_v57 = vpop.permute.xlu0 %2836 }
 0x621   :  { %v2695_v54 = vpop.permute.xlu2 %2694 }
 0x622   :  { %v2696_v28 = vsel %vm8153_vm0, %v6665_v63, %v2695_v54  ;;  %v2697_v3 = vsel %vm8154_vm15, %v2695_v54, %v6665_v63  ;;  %v2732_v63 = vperm.slane %v3779_v31, 0  ;;  %vm8157_vm0 = vcmp.lt.s32.totalorder %v4583_v21, 82 }
 0x623   :  { %v2704_v0 = vmul.f32 %v2700_v51, %v2696_v28  ;;  %v2705_v16 = vmul.f32 %v2701_v36, %v2697_v3  ;;  %vm8158_vm15 = vmmov %vm8157_vm0  ;;  %v3784_v3 = vld [vmem:[%s7557_s5 + $0x57] ss:$8 sm:$0x3] }
 0x624   :  { %v2812_v31 = vperm.slane %v3784_v3, 0 }
 0x625   :  { %v2706_v38 = vadd.f32 %v2704_v0, %v2690_v53  ;;  %v2707_v27 = vadd.f32 %v2705_v16, %v2691_v5  ;;  %v2797_v0 = vperm.slane %v3783_v42, 1 }
 0x626   :  { %3140 = vrot.lane.b32.xlu1 %v6393_v11, %s8148_s15  ;;  %3190 = vrot.lane.b32.xlu0 %v6435_v32, %s7864_s29  ;;  %s8188_s15 = smov 81  }
 0x627   :  { %v2722_v52 = vadd.f32 %v2720_v48, %v2706_v38  ;;  %v2723_v34 = vadd.f32 %v2721_v35, %v2707_v27  ;;  %2982 = vrot.lane.b32.xlu2 %v6435_v32, %s7972_s20  ;;  %v2813_v48 = vperm.slane %v3784_v3, 1  ;;  %s8252_s20 = sld [smem:[#allocation63_spill]] }
 0x628   :  { %v2805_v13 = vpop.permute.xlu1 %2804  ;;  %v2855_v19 = vpop.permute.xlu0 %2854 }
 0x629   :  { %v6827_v61 = vsel %vm1081_vm4, %v2805_v13, %v2807_v47  ;;  %v6831_v26 = vsel %vm1081_vm4, %v2807_v47, %v2805_v13  ;;  %v2725_v22 = vpop.permute.xlu2 %2724  ;;  %v2769_v47 = vmul.f32 %v2765_v44, %v6784_v20  ;;  %v3786_v44 = vld [vmem:[%s7557_s5 + $0x61] ss:$8 sm:$0x3] }
 0x62a   :  { %v2728_v8 = vsel %vm8155_vm14, %v2725_v22, %v6757_v58  ;;  %v2729_v46 = vsel %vm8156_vm2, %v6757_v58, %v2725_v22  ;;  %v2748_v58 = vperm.slane %v3780_v49, 0  ;;  %vm8159_vm14 = vcmp.lt.s32.totalorder %v4583_v21, 80 }
 0x62b   :  { %v2736_v39 = vmul.f32 %v2732_v63, %v2728_v8  ;;  %v2737_v2 = vmul.f32 %v2733_v4, %v2729_v46  ;;  %vm8160_vm2 = vmmov %vm8159_vm14  ;;  %v3785_v4 = vld [vmem:[%s7557_s5 + $0x60] ss:$8 sm:$0x3]  ;;  %v2816_v13 = vmul.f32 %v2812_v31, %v6827_v61 }
 0x62d   :  { %v2738_v1 = vadd.f32 %v2736_v39, %v2722_v52  ;;  %v2739_v56 = vadd.f32 %v2737_v2, %v2723_v34  ;;  %v2829_v2 = vperm.slane %v3785_v4, 1 }
 0x62e   :  { %3158 = vrot.lane.b32.xlu1 %v6435_v32, %s8057_s17  ;;  %3230 = vrot.lane.b32.xlu0 %v6393_v11, %s7866_s11 }
 0x62f   :  { %3012 = vrot.lane.b32.xlu2 %v6393_v11, %s8014_s10  ;;  %s8164_s10 = smov 113  }
 0x630   :  { %v6851_v59 = vpop.permute.xlu1 %2822  ;;  %v6853_v9 = vpop.permute.xlu0 %2884 }
 0x631   :  { %v2743_v15 = vpop.permute.xlu2 %2742 }
 0x632   :  { %v2744_v10 = vsel %vm8157_vm0, %v6712_v29, %v2743_v15  ;;  %v2745_v50 = vsel %vm8158_vm15, %v2743_v15, %v6712_v29  ;;  %v2780_v29 = vperm.slane %v3782_v45, 0  ;;  %vm8181_vm0 = vcmp.lt.s32.totalorder %v4583_v21, 17 }
 0x633   :  { %v2752_v62 = vmul.f32 %v2748_v58, %v2744_v10  ;;  %v2753_v17 = vmul.f32 %v2749_v12, %v2745_v50  ;;  %v3787_v50 = vld [vmem:[%s7557_s5 + $0x62] ss:$8 sm:$0x3]  ;;  %vm8182_vm15 = vmmov %vm8181_vm0 }
 0x634   :  { %v2860_v45 = vperm.slane %v3787_v50, 0 }
 0x635   :  { %v2754_v41 = vadd.f32 %v2752_v62, %v2738_v1  ;;  %v2755_v33 = vadd.f32 %v2753_v17, %v2739_v56  ;;  %v2845_v62 = vperm.slane %v3786_v44, 1 }
 0x636   :  { %3188 = vrot.lane.b32.xlu1 %v6393_v11, %s7864_s29  ;;  %3248 = vrot.lane.b32.xlu0 %v6435_v32, %s7868_s30 }
 0x637   :  { %v2770_v24 = vadd.f32 %v2768_v40, %v2754_v41  ;;  %v2771_v7 = vadd.f32 %v2769_v47, %v2755_v33  ;;  %3030 = vrot.lane.b32.xlu2 %v6435_v32, %s8000_s13  ;;  %v2861_v40 = vperm.slane %v3787_v50, 1  ;;  %s8166_s13 = smov 99  }
 0x638   :  { %v2853_v14 = vpop.permute.xlu1 %2852  ;;  %v2903_v53 = vpop.permute.xlu0 %2902 }
 0x639   :  { %v6874_v55 = vsel %vm260_vm6, %v2853_v14, %v2855_v19  ;;  %v6878_v20 = vsel %vm260_vm6, %v2855_v19, %v2853_v14  ;;  %v2773_v5 = vpop.permute.xlu2 %2772  ;;  %v2817_v19 = vmul.f32 %v2813_v48, %v6831_v26  ;;  %v3789_v48 = vld [vmem:[%s7557_s5 + $0x64] ss:$8 sm:$0x3]  ;;  %vm8167_vm6 = vcmp.lt.s32.totalorder %v4583_v21, 32 }
 0x63a   :  { %v2776_v37 = vsel %vm8159_vm14, %v2773_v5, %v6804_v23  ;;  %v2777_v51 = vsel %vm8160_vm2, %v6804_v23, %v2773_v5  ;;  %v2796_v23 = vperm.slane %v3783_v42, 0  ;;  %v2864_v14 = vmul.f32 %v2860_v45, %v6878_v20 }
 0x63b   :  { %v2784_v36 = vmul.f32 %v2780_v29, %v2776_v37  ;;  %v2785_v30 = vmul.f32 %v2781_v25, %v2777_v51  ;;  %v3788_v25 = vld [vmem:[%s7557_s5 + $0x63] ss:$8 sm:$0x3]  ;;  %vm8183_vm14 = vcmp.lt.s32.totalorder %v4583_v21, 31 }
 0x63c   :  { %vm8184_vm2 = vmmov %vm8183_vm14 }
 0x63d   :  { %v2786_v54 = vadd.f32 %v2784_v36, %v2770_v24  ;;  %v2787_v28 = vadd.f32 %v2785_v30, %v2771_v7  ;;  %v2877_v30 = vperm.slane %v3788_v25, 1 }
 0x63e   :  { %3206 = vrot.lane.b32.xlu1 %v6435_v32, %s7867_s8  ;;  %3278 = vrot.lane.b32.xlu0 %v6393_v11, %s7869_s18 }
 0x63f   :  { %3060 = vrot.lane.b32.xlu2 %v6393_v11, %s8030_s14 }
 0x640   :  { %v6898_v16 = vpop.permute.xlu1 %2870  ;;  %v6900_v35 = vpop.permute.xlu0 %2932 }
 0x641   :  { %v2791_v38 = vpop.permute.xlu2 %2790 }
 0x642   :  { %v2792_v27 = vsel %vm1063_vm3, %v6759_v6, %v2791_v38  ;;  %v2793_v52 = vsel %vm1063_vm3, %v2791_v38, %v6759_v6  ;;  %v2828_v6 = vperm.slane %v3785_v4, 0 }
 0x643   :  { %v2800_v34 = vmul.f32 %v2796_v23, %v2792_v27  ;;  %v2801_v63 = vmul.f32 %v2797_v0, %v2793_v52  ;;  %v3790_v52 = vld [vmem:[%s7557_s5 + $0x65] ss:$8 sm:$0x3] }
 0x644   :  { %v2908_v4 = vperm.slane %v3790_v52, 0 }
 0x645   :  { %v2802_v22 = vadd.f32 %v2800_v34, %v2786_v54  ;;  %v2803_v8 = vadd.f32 %v2801_v63, %v2787_v28  ;;  %v2893_v34 = vperm.slane %v3789_v48, 1 }
 0x646   :  { %3246 = vrot.lane.b32.xlu1 %v6393_v11, %s7868_s30  ;;  %3296 = vrot.lane.b32.xlu0 %v6435_v32, %s7871_s6  ;;  %s8170_s30 = smov 97  }
 0x647   :  { %v2818_v46 = vadd.f32 %v2816_v13, %v2802_v22  ;;  %v2819_v39 = vadd.f32 %v2817_v19, %v2803_v8  ;;  %3078 = vrot.lane.b32.xlu2 %v6435_v32, %s8016_s25  ;;  %v2909_v13 = vperm.slane %v3790_v52, 1  ;;  %s8193_s25 = smov 83  }
 0x648   :  { %v2901_v49 = vpop.permute.xlu1 %2900  ;;  %v2951_v1 = vpop.permute.xlu0 %2950 }
 0x649   :  { %v6921_v61 = vsel %vm314_vm10, %v2901_v49, %v2903_v53  ;;  %v6925_v26 = vsel %vm314_vm10, %v2903_v53, %v2901_v49  ;;  %v2821_v56 = vpop.permute.xlu2 %2820  ;;  %v2865_v53 = vmul.f32 %v2861_v40, %v6874_v55  ;;  %v3792_v40 = vld [vmem:[%s7557_s5 + $0x67] ss:$8 sm:$0x3]  ;;  %vm8174_vm10 = vcmp.lt.s32.totalorder %v4583_v21, 34 }
 0x64a   :  { %v2824_v60 = vsel %vm1099_vm5, %v2821_v56, %v6851_v59  ;;  %v2825_v58 = vsel %vm1099_vm5, %v6851_v59, %v2821_v56  ;;  %v2844_v59 = vperm.slane %v3786_v44, 0  ;;  %v2912_v49 = vmul.f32 %v2908_v4, %v6925_v26 }
 0x64b   :  { %v2832_v12 = vmul.f32 %v2828_v6, %v2824_v60  ;;  %v2833_v18 = vmul.f32 %v2829_v2, %v2825_v58  ;;  %v3791_v2 = vld [vmem:[%s7557_s5 + $0x66] ss:$8 sm:$0x3] }
 0x64d   :  { %v2834_v15 = vadd.f32 %v2832_v12, %v2818_v46  ;;  %v2835_v10 = vadd.f32 %v2833_v18, %v2819_v39  ;;  %v2924_v12 = vperm.slane %v3791_v2, 0  ;;  %v2925_v18 = vperm.slane %v3791_v2, 1 }
 0x64e   :  { %3264 = vrot.lane.b32.xlu1 %v6435_v32, %s8161_s0  ;;  %3326 = vrot.lane.b32.xlu0 %v6393_v11, %s8162_s26 }
 0x64f   :  { %3108 = vrot.lane.b32.xlu2 %v6393_v11, %s8045_s3 }
 0x650   :  { %v6945_v17 = vpop.permute.xlu1 %2918  ;;  %v6947_v47 = vpop.permute.xlu0 %2980 }
 0x651   :  { %v2839_v41 = vpop.permute.xlu2 %2838 }
 0x652   :  { %v2840_v33 = vsel %vm243_vm7, %v6806_v57, %v2839_v41  ;;  %v2841_v24 = vsel %vm243_vm7, %v2839_v41, %v6806_v57  ;;  %v2876_v57 = vperm.slane %v3788_v25, 0  ;;  %vm8168_vm7 = vmmov %vm8167_vm6 }
 0x653   :  { %v2848_v7 = vmul.f32 %v2844_v59, %v2841_v24  ;;  %v2849_v29 = vmul.f32 %v2845_v62, %v2840_v33  ;;  %v3793_v24 = vld [vmem:[%s7557_s5 + $0x70] ss:$8 sm:$0x3] }
 0x654   :  { %v2956_v25 = vperm.slane %v3793_v24, 0 }
 0x655   :  { %v2850_v5 = vadd.f32 %v2848_v7, %v2834_v15  ;;  %v2851_v37 = vadd.f32 %v2849_v29, %v2835_v10  ;;  %v2941_v7 = vperm.slane %v3792_v40, 1 }
 0x656   :  { %3294 = vrot.lane.b32.xlu1 %v6393_v11, %s7871_s6  ;;  %3344 = vrot.lane.b32.xlu0 %v6435_v32, %s8163_s27  ;;  %s8177_s6 = smov 94  }
 0x657   :  { %v2866_v51 = vadd.f32 %v2864_v14, %v2850_v5  ;;  %v2867_v36 = vadd.f32 %v2865_v53, %v2851_v37  ;;  %3126 = vrot.lane.b32.xlu2 %v6435_v32, %s8032_s24  ;;  %v2957_v14 = vperm.slane %v3793_v24, 1 }
 0x658   :  { %v2949_v42 = vpop.permute.xlu1 %2948  ;;  %v2999_v54 = vpop.permute.xlu0 %2998 }
 0x659   :  { %v6968_v20 = vsel %vm368_vm13, %v2949_v42, %v2951_v1  ;;  %v6972_v55 = vsel %vm368_vm13, %v2951_v1, %v2949_v42  ;;  %v2869_v28 = vpop.permute.xlu2 %2868  ;;  %v2913_v1 = vmul.f32 %v2909_v13, %v6921_v61  ;;  %v3795_v13 = vld [vmem:[%s7557_s5 + $0x72] ss:$8 sm:$0x3] }
 0x65a   :  { %v2872_v3 = vsel %vm278_vm8, %v2869_v28, %v6898_v16  ;;  %v2873_v23 = vsel %vm278_vm8, %v6898_v16, %v2869_v28  ;;  %v2892_v16 = vperm.slane %v3789_v48, 0  ;;  %v2960_v42 = vmul.f32 %v2956_v25, %v6972_v55  ;;  %v3798_v25 = vld [vmem:[%s7557_s5 + $0x75] ss:$8 sm:$0x3] }
 0x65b   :  { %v2880_v0 = vmul.f32 %v2876_v57, %v2873_v23  ;;  %v2881_v31 = vmul.f32 %v2877_v30, %v2872_v3  ;;  %v3794_v30 = vld [vmem:[%s7557_s5 + $0x71] ss:$8 sm:$0x3]  ;;  %vm8172_vm8 = vcmp.lt.s32.totalorder %v4583_v21, 29 }
 0x65d   :  { %v2882_v38 = vadd.f32 %v2880_v0, %v2866_v51  ;;  %v2883_v27 = vadd.f32 %v2881_v31, %v2867_v36  ;;  %v2972_v0 = vperm.slane %v3794_v30, 0  ;;  %v2973_v31 = vperm.slane %v3794_v30, 1 }
 0x65e   :  { %3312 = vrot.lane.b32.xlu1 %v6435_v32, %s8164_s10  ;;  %3374 = vrot.lane.b32.xlu0 %v6393_v11, %s8165_s22 }
 0x65f   :  { %3156 = vrot.lane.b32.xlu2 %v6393_v11, %s8057_s17 }
 0x660   :  { %v6992_v63 = vpop.permute.xlu1 %2966  ;;  %v6994_v19 = vpop.permute.xlu0 %3028 }
 0x661   :  { %v2887_v22 = vpop.permute.xlu2 %2886 }
 0x662   :  { %v2888_v8 = vsel %vm296_vm9, %v6853_v9, %v2887_v22  ;;  %v2889_v46 = vsel %vm296_vm9, %v2887_v22, %v6853_v9  ;;  %vm8173_vm9 = vmmov %vm8172_vm8 }
 0x663   :  { %v2896_v39 = vmul.f32 %v2892_v16, %v2889_v46  ;;  %v2897_v6 = vmul.f32 %v2893_v34, %v2888_v8  ;;  %v3796_v46 = vld [vmem:[%s7557_s5 + $0x73] ss:$8 sm:$0x3] }
 0x664   :  { %v3004_v2 = vperm.slane %v3796_v46, 0 }
 0x665   :  { %v2898_v56 = vadd.f32 %v2896_v39, %v2882_v38  ;;  %v2899_v60 = vadd.f32 %v2897_v6, %v2883_v27  ;;  %v2989_v39 = vperm.slane %v3795_v13, 1 }
 0x666   :  { %3342 = vrot.lane.b32.xlu1 %v6393_v11, %s8163_s27  ;;  %3392 = vrot.lane.b32.xlu0 %v6435_v32, %s8166_s13  ;;  %s8176_s27 = smov 98  }
 0x667   :  { %3174 = vrot.lane.b32.xlu2 %v6435_v32, %s8047_s1  ;;  %v2914_v9 = vadd.f32 %v2912_v49, %v2898_v56  ;;  %v2915_v58 = vadd.f32 %v2913_v1, %v2899_v60  ;;  %v3005_v49 = vperm.slane %v3796_v46, 1 }
 0x668   :  { %v2997_v44 = vpop.permute.xlu1 %2996  ;;  %v3047_v15 = vpop.permute.xlu0 %3046 }
 0x669   :  { %v7015_v26 = vsel %vm8167_vm6, %v2997_v44, %v2999_v54  ;;  %v7019_v61 = vsel %vm8168_vm7, %v2999_v54, %v2997_v44  ;;  %v2917_v10 = vpop.permute.xlu2 %2916  ;;  %v2961_v54 = vmul.f32 %v2957_v14, %v6968_v20  ;;  %vm8186_vm6 = vcmp.lt.s32.totalorder %v4583_v21, 30 }
 0x66a   :  { %v2920_v50 = vsel %vm332_vm11, %v2917_v10, %v6945_v17  ;;  %v2921_v59 = vsel %vm332_vm11, %v6945_v17, %v2917_v10  ;;  %v2940_v17 = vperm.slane %v3792_v40, 0  ;;  %vm8175_vm11 = vmmov %vm8174_vm10  ;;  %v3009_v44 = vmul.f32 %v3005_v49, %v7015_v26 }
 0x66b   :  { %v2928_v62 = vmul.f32 %v2924_v12, %v2921_v59  ;;  %v2929_v45 = vmul.f32 %v2925_v18, %v2920_v50  ;;  %v3797_v12 = vld [vmem:[%s7557_s5 + $0x74] ss:$8 sm:$0x3]  ;;  %v3008_v18 = vmul.f32 %v3004_v2, %v7019_v61  ;;  %vm8187_vm7 = vmmov %vm8186_vm6  ;;  %v3801_v2 = vld [vmem:[%s7557_s5 + $0x80] ss:$8 sm:$0x3] }
 0x66d   :  { %v2930_v41 = vadd.f32 %v2928_v62, %v2914_v9  ;;  %v2931_v33 = vadd.f32 %v2929_v45, %v2915_v58  ;;  %v3020_v62 = vperm.slane %v3797_v12, 0  ;;  %v3021_v45 = vperm.slane %v3797_v12, 1 }
 0x66e   :  { %3360 = vrot.lane.b32.xlu1 %v6435_v32, %s8169_s28  ;;  %3422 = vrot.lane.b32.xlu0 %v6393_v11, %s8170_s30 }
 0x66f   :  { %3204 = vrot.lane.b32.xlu2 %v6393_v11, %s7867_s8 }
 0x670   :  { %v7039_v29 = vpop.permute.xlu1 %3014  ;;  %v7041_v5 = vpop.permute.xlu0 %3076 }
 0x671   :  { %v2935_v53 = vpop.permute.xlu2 %2934 }
 0x672   :  { %v2936_v37 = vsel %vm350_vm12, %v6900_v35, %v2935_v53  ;;  %v2937_v51 = vsel %vm350_vm12, %v2935_v53, %v6900_v35  ;;  %vm8178_vm12 = vcmp.lt.s32.totalorder %v4583_v21, 33 }
 0x673   :  { %v2944_v36 = vmul.f32 %v2940_v17, %v2937_v51  ;;  %v2945_v57 = vmul.f32 %v2941_v7, %v2936_v37  ;;  %vm8179_vm13 = vmmov %vm8178_vm12  ;;  %v3799_v37 = vld [vmem:[%s7557_s5 + $0x76] ss:$8 sm:$0x3]  ;;  %v3037_v51 = vperm.slane %v3798_v25, 1 }
 0x674   :  { %v3052_v30 = vperm.slane %v3799_v37, 0 }
 0x675   :  { %v2946_v28 = vadd.f32 %v2944_v36, %v2930_v41  ;;  %v2947_v3 = vadd.f32 %v2945_v57, %v2931_v33 }
 0x676   :  { %3390 = vrot.lane.b32.xlu1 %v6393_v11, %s8166_s13  ;;  %3440 = vrot.lane.b32.xlu0 %v6435_v32, %s8171_s12  ;;  %s8185_s13 = smov 95  }
 0x677   :  { %3232 = vrot.lane.b32.xlu2 %v6435_v32, %s7866_s11  ;;  %v2962_v35 = vadd.f32 %v2960_v42, %v2946_v28  ;;  %v2963_v23 = vadd.f32 %v2961_v54, %v2947_v3  ;;  %v3053_v42 = vperm.slane %v3799_v37, 1  ;;  %s8196_s11 = smov 78  }
 0x678   :  { %v3045_v48 = vpop.permute.xlu1 %3044  ;;  %v3095_v4 = vpop.permute.xlu0 %3094 }
 0x679   :  { %v7062_v55 = vsel %vm8172_vm8, %v3045_v48, %v3047_v15  ;;  %v7066_v20 = vsel %vm8173_vm9, %v3047_v15, %v3045_v48  ;;  %v2965_v38 = vpop.permute.xlu2 %2964  ;;  %vm8189_vm8 = vcmp.lt.s32.totalorder %v4583_v21, 14 }
 0x67a   :  { %v2968_v27 = vsel %vm8174_vm10, %v2965_v38, %v6992_v63  ;;  %v2969_v52 = vsel %vm8175_vm11, %v6992_v63, %v2965_v38  ;;  %v2988_v63 = vperm.slane %v3795_v13, 0  ;;  %v3057_v48 = vmul.f32 %v3053_v42, %v7062_v55  ;;  %vm8190_vm9 = vmmov %vm8189_vm8 }
 0x67b   :  { %v2976_v16 = vmul.f32 %v2972_v0, %v2969_v52  ;;  %v2977_v34 = vmul.f32 %v2973_v31, %v2968_v27  ;;  %v3800_v0 = vld [vmem:[%s7557_s5 + $0x77] ss:$8 sm:$0x3]  ;;  %v3056_v31 = vmul.f32 %v3052_v30, %v7066_v20  ;;  %vm8191_vm10 = vcmp.lt.s32.totalorder %v4583_v21, 19 }
 0x67c   :  { %vm8192_vm11 = vmmov %vm8191_vm10 }
 0x67d   :  { %v2978_v22 = vadd.f32 %v2976_v16, %v2962_v35  ;;  %v2979_v8 = vadd.f32 %v2977_v34, %v2963_v23  ;;  %v3068_v16 = vperm.slane %v3800_v0, 0  ;;  %v3069_v34 = vperm.slane %v3800_v0, 1 }
 0x67e   :  { %3408 = vrot.lane.b32.xlu1 %v6435_v32, %s8176_s27  ;;  %3470 = vrot.lane.b32.xlu0 %v6393_v11, %s8177_s6 }
 0x67f   :  { %3262 = vrot.lane.b32.xlu2 %v6393_v11, %s8161_s0  ;;  %s8180_s0 = smov 93  }
 0x680   :  { %v7086_v6 = vpop.permute.xlu1 %3062  ;;  %v7099_v50 = vpop.permute.xlu0 %3124 }
 0x681   :  { %v2983_v1 = vpop.permute.xlu2 %2982 }
 0x682   :  { %v2984_v56 = vsel %vm8178_vm12, %v6947_v47, %v2983_v1  ;;  %v2985_v60 = vsel %vm8179_vm13, %v2983_v1, %v6947_v47  ;;  %vm8194_vm12 = vcmp.lt.s32.totalorder %v4583_v21, 18 }
 0x683   :  { %v2992_v9 = vmul.f32 %v2988_v63, %v2985_v60  ;;  %v2993_v58 = vmul.f32 %v2989_v39, %v2984_v56  ;;  %v3802_v56 = vld [vmem:[%s7557_s5 + $0x81] ss:$8 sm:$0x3]  ;;  %v3085_v60 = vperm.slane %v3801_v2, 1  ;;  %vm8195_vm13 = vmmov %vm8194_vm12 }
 0x684   :  { %v3101_v12 = vperm.slane %v3802_v56, 1 }
 0x685   :  { %v2994_v15 = vadd.f32 %v2992_v9, %v2978_v22  ;;  %v2995_v10 = vadd.f32 %v2993_v58, %v2979_v8  ;;  %v3100_v58 = vperm.slane %v3802_v56, 0 }
 0x686   :  { %3438 = vrot.lane.b32.xlu1 %v6393_v11, %s8171_s12  ;;  %3488 = vrot.lane.b32.xlu0 %v6435_v32, %s8180_s0 }
 0x687   :  { %3280 = vrot.lane.b32.xlu2 %v6435_v32, %s7869_s18  ;;  %v3010_v47 = vadd.f32 %v3008_v18, %v2994_v15  ;;  %v3011_v59 = vadd.f32 %v3009_v44, %v2995_v10 }
 0x688   :  { %v3093_v61 = vpop.permute.xlu1 %3092  ;;  %v3143_v36 = vpop.permute.xlu0 %3142 }
 0x689   :  { %v7109_v26 = vsel %vm8181_vm0, %v3093_v61, %v3095_v4  ;;  %v7113_v40 = vsel %vm8182_vm15, %v3095_v4, %v3093_v61  ;;  %v3013_v41 = vpop.permute.xlu2 %3012  ;;  %vm8197_vm0 = vcmp.lt.s32.totalorder %v4583_v21, 2 }
 0x68a   :  { %v3016_v33 = vsel %vm8183_vm14, %v3013_v41, %v7039_v29  ;;  %v3017_v24 = vsel %vm8184_vm2, %v7039_v29, %v3013_v41  ;;  %v3036_v29 = vperm.slane %v3798_v25, 0  ;;  %v3105_v61 = vmul.f32 %v3101_v12, %v7109_v26  ;;  %vm8198_vm15 = vmmov %vm8197_vm0 }
 0x68b   :  { %v3024_v17 = vmul.f32 %v3020_v62, %v3017_v24  ;;  %v3025_v7 = vmul.f32 %v3021_v45, %v3016_v33  ;;  %v3803_v62 = vld [vmem:[%s7557_s5 + $0x82] ss:$8 sm:$0x3]  ;;  %v3104_v45 = vmul.f32 %v3100_v58, %v7113_v40  ;;  %vm8199_vm14 = vcmp.lt.s32.totalorder %v4583_v21, 16 }
 0x68c   :  { %vm8200_vm2 = vmmov %vm8199_vm14  ;;  %v3807_v58 = vld [vmem:[%s7557_s5 + $0x86] ss:$8 sm:$0x3] }
 0x68d   :  { %v3026_v14 = vadd.f32 %v3024_v17, %v3010_v47  ;;  %v3027_v53 = vadd.f32 %v3025_v7, %v3011_v59  ;;  %v3116_v17 = vperm.slane %v3803_v62, 0  ;;  %v3117_v7 = vperm.slane %v3803_v62, 1 }
 0x68e   :  { %3456 = vrot.lane.b32.xlu1 %v6435_v32, %s8185_s13  ;;  %3518 = vrot.lane.b32.xlu0 %v6393_v11, %s8066_s2 }
 0x68f   :  { %3310 = vrot.lane.b32.xlu2 %v6393_v11, %s8164_s10 }
 0x690   :  { %v7133_v57 = vpop.permute.xlu1 %3110  ;;  %v7160_v22 = vpop.permute.xlu0 %3172 }
 0x691   :  { %v3031_v54 = vpop.permute.xlu2 %3030 }
 0x692   :  { %v3032_v28 = vsel %vm8186_vm6, %v6994_v19, %v3031_v54  ;;  %v3033_v3 = vsel %vm8187_vm7, %v3031_v54, %v6994_v19  ;;  %v3805_v54 = vld [vmem:[%s7557_s5 + $0x84] ss:$8 sm:$0x3]  ;;  %vm8201_vm6 = vcmp.lt.s32.totalorder %v4583_v21, 15 }
 0x693   :  { %v3040_v35 = vmul.f32 %v3036_v29, %v3033_v3  ;;  %v3041_v23 = vmul.f32 %v3037_v51, %v3032_v28  ;;  %v3149_v0 = vperm.slane %v3805_v54, 1  ;;  %vm8202_vm7 = vmmov %vm8201_vm6 }
 0x695   :  { %v3042_v38 = vadd.f32 %v3040_v35, %v3026_v14  ;;  %v3043_v27 = vadd.f32 %v3041_v23, %v3027_v53  ;;  %v3148_v23 = vperm.slane %v3805_v54, 0 }
 0x696   :  { %3486 = vrot.lane.b32.xlu1 %v6393_v11, %s8180_s0  ;;  %3536 = vrot.lane.b32.xlu0 %v6435_v32, %s8188_s15 }
 0x697   :  { %3328 = vrot.lane.b32.xlu2 %v6435_v32, %s8162_s26  ;;  %v3058_v19 = vadd.f32 %v3056_v31, %v3042_v38  ;;  %v3059_v52 = vadd.f32 %v3057_v48, %v3043_v27 }
 0x698   :  { %v3141_v4 = vpop.permute.xlu1 %3140  ;;  %v3191_v59 = vpop.permute.xlu0 %3190 }
 0x699   :  { %v7154_v20 = vsel %vm8189_vm8, %v3141_v4, %v3143_v36  ;;  %v7158_v55 = vsel %vm8190_vm9, %v3143_v36, %v3141_v4  ;;  %v3061_v13 = vpop.permute.xlu2 %3060  ;;  %v3804_v36 = vld [vmem:[%s7557_s5 + $0x83] ss:$8 sm:$0x3]  ;;  %vm8203_vm8 = vcmp.lt.s32.totalorder %v4583_v21, 126 }
 0x69a   :  { %v3064_v8 = vsel %vm8191_vm10, %v3061_v13, %v7086_v6  ;;  %v3065_v46 = vsel %vm8192_vm11, %v7086_v6, %v3061_v13  ;;  %v3084_v6 = vperm.slane %v3801_v2, 0  ;;  %v3133_v3 = vperm.slane %v3804_v36, 1  ;;  %vm8204_vm9 = vmmov %vm8203_vm8 }
 0x69b   :  { %v3072_v63 = vmul.f32 %v3068_v16, %v3065_v46  ;;  %v3073_v39 = vmul.f32 %v3069_v34, %v3064_v8  ;;  %v3152_v16 = vmul.f32 %v3148_v23, %v7158_v55  ;;  %v3153_v34 = vmul.f32 %v3149_v0, %v7154_v20 }
 0x69c   :  { %vm8205_vm10 = vcmp.lt.s32.totalorder %v4583_v21, 13 }
 0x69d   :  { %v3074_v49 = vadd.f32 %v3072_v63, %v3058_v19  ;;  %v3075_v1 = vadd.f32 %v3073_v39, %v3059_v52  ;;  %v3806_v52 = vld [vmem:[%s7557_s5 + $0x85] ss:$8 sm:$0x3]  ;;  %vm8206_vm11 = vmmov %vm8205_vm10 }
 0x69e   :  { %3504 = vrot.lane.b32.xlu1 %v6435_v32, %s8193_s25  ;;  %3566 = vrot.lane.b32.xlu0 %v6393_v11, %s8073_s9  ;;  %v3164_v46 = vperm.slane %v3806_v52, 0  ;;  %v3165_v63 = vperm.slane %v3806_v52, 1 }
 0x69f   :  { %3358 = vrot.lane.b32.xlu2 %v6393_v11, %s8169_s28 }
 0x6a0   :  { %v7180_v9 = vpop.permute.xlu1 %3158  ;;  %v7217_v28 = vpop.permute.xlu0 %3230 }
 0x6a1   :  { %v3079_v18 = vpop.permute.xlu2 %3078 }
 0x6a2   :  { %v3080_v44 = vsel %vm8194_vm12, %v7041_v5, %v3079_v18  ;;  %v3081_v15 = vsel %vm8195_vm13, %v3079_v18, %v7041_v5  ;;  %vm8207_vm12 = vcmp.lt.s32.totalorder %v4583_v21, 3 }
 0x6a3   :  { %v3088_v10 = vmul.f32 %v3084_v6, %v3081_v15  ;;  %v3089_v47 = vmul.f32 %v3085_v60, %v3080_v44  ;;  %v3808_v44 = vld [vmem:[%s7557_s5 + $0x87] ss:$8 sm:$0x3]  ;;  %v3180_v15 = vperm.slane %v3807_v58, 0  ;;  %vm8208_vm13 = vmmov %vm8207_vm12 }
 0x6a5   :  { %v3090_v41 = vadd.f32 %v3088_v10, %v3074_v49  ;;  %v3091_v33 = vadd.f32 %v3089_v47, %v3075_v1  ;;  %v3196_v47 = vperm.slane %v3808_v44, 0 }
 0x6a6   :  { %3534 = vrot.lane.b32.xlu1 %v6393_v11, %s8188_s15  ;;  %3584 = vrot.lane.b32.xlu0 %v6435_v32, %s8196_s11 }
 0x6a7   :  { %3376 = vrot.lane.b32.xlu2 %v6435_v32, %s8165_s22  ;;  %v3106_v5 = vadd.f32 %v3104_v45, %v3090_v41  ;;  %v3107_v24 = vadd.f32 %v3105_v61, %v3091_v33 }
 0x6a8   :  { %v3189_v25 = vpop.permute.xlu1 %3188  ;;  %v3249_v39 = vpop.permute.xlu0 %3248 }
 0x6a9   :  { %v7201_v40 = vsel %vm8197_vm0, %v3189_v25, %v3191_v59  ;;  %v3193_v26 = vsel %vm8198_vm15, %v3191_v59, %v3189_v25  ;;  %v3109_v14 = vpop.permute.xlu2 %3108  ;;  %v3197_v59 = vperm.slane %v3808_v44, 1  ;;  %vm8209_vm0 = vcmp.lt.s32.totalorder %v4583_v21, 1 }
 0x6aa   :  { %v3112_v53 = vsel %vm8199_vm14, %v3109_v14, %v7133_v57  ;;  %v3113_v37 = vsel %vm8200_vm2, %v7133_v57, %v3109_v14  ;;  %v3132_v57 = vperm.slane %v3804_v36, 0  ;;  %vm8210_vm15 = vmmov %vm8209_vm0  ;;  %vm8211_vm14 = vcmp.lt.s32.totalorder %v4583_v21, 127 }
 0x6ab   :  { %v3120_v29 = vmul.f32 %v3116_v17, %v3113_v37  ;;  %v3121_v51 = vmul.f32 %v3117_v7, %v3112_v53  ;;  %v3200_v17 = vmul.f32 %v3196_v47, %v3193_v26  ;;  %v3201_v7 = vmul.f32 %v3197_v59, %v7201_v40  ;;  %v3810_v40 = vld [vmem:[%s7557_s5 + $0x91] ss:$8 sm:$0x3]  ;;  %vm8212_vm2 = vmmov %vm8211_vm14 }
 0x6ad   :  { %v3122_v30 = vadd.f32 %v3120_v29, %v3106_v5  ;;  %v3123_v42 = vadd.f32 %v3121_v51, %v3107_v24  ;;  %v3809_v24 = vld [vmem:[%s7557_s5 + $0x90] ss:$8 sm:$0x3] }
 0x6ae   :  { %3552 = vrot.lane.b32.xlu1 %v6435_v32, %s8087_s7  ;;  %v3212_v29 = vperm.slane %v3809_v24, 0 }
 0x6af   :  { %3406 = vrot.lane.b32.xlu2 %v6393_v11, %s8176_s27 }
 0x6b0   :  { %v3207_v35 = vpop.permute.xlu1 %3206  ;;  %v7268_v41 = vpop.permute.xlu0 %3278 }
 0x6b1   :  { %v3127_v31 = vpop.permute.xlu2 %3126 }
 0x6b2   :  { %v3128_v48 = vsel %vm8201_vm6, %v7099_v50, %v3127_v31  ;;  %v3129_v38 = vsel %vm8202_vm7, %v3127_v31, %v7099_v50  ;;  %v3222_v31 = vperm.slane %v3810_v40, 0  ;;  %vm8213_vm6 = vcmp.lt.s32.totalorder %v4583_v21, 125 }
 0x6b3   :  { %v3136_v27 = vmul.f32 %v3132_v57, %v3129_v38  ;;  %v3137_v19 = vmul.f32 %v3133_v3, %v3128_v48  ;;  %v3811_v57 = vld [vmem:[%s7557_s5 + $0x92] ss:$8 sm:$0x3]  ;;  %v3223_v48 = vperm.slane %v3810_v40, 1  ;;  %vm8214_vm7 = vmmov %vm8213_vm6 }
 0x6b4   :  { %v3812_v38 = vld [vmem:[%s7557_s5 + $0x93] ss:$8 sm:$0x3] }
 0x6b5   :  { %v3138_v4 = vadd.f32 %v3136_v27, %v3122_v30  ;;  %v3139_v13 = vadd.f32 %v3137_v19, %v3123_v42  ;;  %v3239_v27 = vperm.slane %v3811_v57, 1  ;;  %v3254_v19 = vperm.slane %v3812_v38, 0 }
 0x6b6   :  { %3582 = vrot.lane.b32.xlu1 %v6393_v11, %s8196_s11  ;;  %v3255_v52 = vperm.slane %v3812_v38, 1 }
 0x6b7   :  { %3424 = vrot.lane.b32.xlu2 %v6435_v32, %s8170_s30  ;;  %v3154_v8 = vadd.f32 %v3152_v16, %v3138_v4  ;;  %v3155_v50 = vadd.f32 %v3153_v34, %v3139_v13  ;;  %v3226_v34 = vmul.f32 %v3222_v31, %v6393_v11  ;;  %v3227_v4 = vmul.f32 %v3223_v48, %v6435_v32 }
 0x6b8   :  { %v3247_v2 = vpop.permute.xlu1 %3246  ;;  %v3297_v3 = vpop.permute.xlu0 %3296 }
 0x6b9   :  { %v7240_v49 = vsel %vm8203_vm8, %v3247_v2, %v3249_v39  ;;  %v7244_v20 = vsel %vm8204_vm9, %v3249_v39, %v3247_v2  ;;  %v3157_v55 = vpop.permute.xlu2 %3156  ;;  %vm8215_vm8 = vcmp.lt.s32.totalorder %v4583_v21, 114 }
 0x6ba   :  { %v3160_v1 = vsel %vm8205_vm10, %v3157_v55, %v7180_v9  ;;  %v3161_v56 = vsel %vm8206_vm11, %v7180_v9, %v3157_v55  ;;  %v3181_v9 = vperm.slane %v3807_v58, 1  ;;  %v3813_v55 = vld [vmem:[%s7557_s5 + $0x94] ss:$8 sm:$0x3]  ;;  %vm8216_vm9 = vmmov %vm8215_vm8  ;;  %vm8217_vm10 = vcmp.lt.s32.totalorder %v4583_v21, 115 }
 0x6bb   :  { %v3168_v6 = vmul.f32 %v3164_v46, %v3161_v56  ;;  %v3169_v60 = vmul.f32 %v3165_v63, %v3160_v1  ;;  %v3258_v1 = vmul.f32 %v3254_v19, %v7240_v49  ;;  %v3259_v56 = vmul.f32 %v3255_v52, %v7244_v20  ;;  %vm8218_vm11 = vmmov %vm8217_vm10 }
 0x6bc   :  { %v3271_v44 = vperm.slane %v3813_v55, 1 }
 0x6bd   :  { %v3170_v12 = vadd.f32 %v3168_v6, %v3154_v8  ;;  %v3171_v18 = vadd.f32 %v3169_v60, %v3155_v50 }
 0x6be   :  { %3600 = vrot.lane.b32.xlu1 %v6435_v32, %s8104_s21 }
 0x6bf   :  { %3454 = vrot.lane.b32.xlu2 %v6393_v11, %s8185_s13 }
 0x6c0   :  { %v3265_v10 = vpop.permute.xlu1 %3264  ;;  %v7306_v58 = vpop.permute.xlu0 %3326 }
 0x6c1   :  { %v3175_v62 = vpop.permute.xlu2 %3174 }
 0x6c2   :  { %v3176_v45 = vsel %vm8207_vm12, %v7160_v22, %v3175_v62  ;;  %v3177_v61 = vsel %vm8208_vm13, %v3175_v62, %v7160_v22  ;;  %v3213_v22 = vperm.slane %v3809_v24, 1  ;;  %v3814_v62 = vld [vmem:[%s7557_s5 + $0x95] ss:$8 sm:$0x3]  ;;  %vm8219_vm12 = vcmp.lt.s32.totalorder %v4583_v21, 113 }
 0x6c3   :  { %v3184_v33 = vmul.f32 %v3180_v15, %v3177_v61  ;;  %v3185_v5 = vmul.f32 %v3181_v9, %v3176_v45  ;;  %v3287_v24 = vperm.slane %v3814_v62, 1  ;;  %vm8220_vm13 = vmmov %vm8219_vm12 }
 0x6c5   :  { %v3186_v25 = vadd.f32 %v3184_v33, %v3170_v12  ;;  %v3187_v14 = vadd.f32 %v3185_v5, %v3171_v18  ;;  %v3270_v18 = vperm.slane %v3813_v55, 0  ;;  %v3815_v33 = vld [vmem:[%s7557_s5 + $0x96] ss:$8 sm:$0x3]  ;;  %v3286_v5 = vperm.slane %v3814_v62, 0 }
 0x6c7   :  { %3472 = vrot.lane.b32.xlu2 %v6435_v32, %s8177_s6  ;;  %v3202_v53 = vadd.f32 %v3200_v17, %v3186_v25  ;;  %v3203_v37 = vadd.f32 %v3201_v7, %v3187_v14  ;;  %v3303_v17 = vperm.slane %v3815_v33, 1 }
 0x6c8   :  { %v3295_v51 = vpop.permute.xlu1 %3294  ;;  %v7324_v7 = vpop.permute.xlu0 %3344 }
 0x6c9   :  { %v3205_v36 = vpop.permute.xlu2 %3204  ;;  %v3298_v14 = vsel %vm8215_vm8, %v3295_v51, %v3297_v3  ;;  %vm8227_vm8 = vcmp.lt.s32.totalorder %v4583_v21, 109 }
 0x6ca   :  { %v3208_v30 = vsel %vm8209_vm0, %v3205_v36, %v3207_v35  ;;  %v3209_v42 = vsel %vm8210_vm15, %v3207_v35, %v3205_v36  ;;  %v3238_v35 = vperm.slane %v3811_v57, 0  ;;  %vm8221_vm0 = vcmp.lt.s32.totalorder %v4583_v21, 112 }
 0x6cb   :  { %v3216_v26 = vmul.f32 %v3212_v29, %v3209_v42  ;;  %v3217_v54 = vmul.f32 %v3213_v22, %v3208_v30  ;;  %vm8222_vm15 = vmmov %vm8221_vm0 }
 0x6cd   :  { %v3218_v23 = vadd.f32 %v3216_v26, %v3202_v53  ;;  %v3219_v0 = vadd.f32 %v3217_v54, %v3203_v37  ;;  %v3299_v53 = vsel %vm8216_vm9, %v3297_v3, %v3295_v51  ;;  %vm8228_vm9 = vmmov %vm8227_vm8 }
 0x6ce   :  { %v3307_v42 = vmul.f32 %v3303_v17, %v3299_v53 }
 0x6cf   :  { %3502 = vrot.lane.b32.xlu2 %v6393_v11, %s8193_s25  ;;  %v3228_v46 = vadd.f32 %v3226_v34, %v3218_v23  ;;  %v3229_v63 = vadd.f32 %v3227_v4, %v3219_v0 }
 0x6d0   :  { %v7291_v16 = vpop.permute.xlu1 %3312  ;;  %v3375_v23 = vpop.permute.xlu0 %3374 }
 0x6d1   :  { %v3233_v13 = vpop.permute.xlu2 %3232 }
 0x6d2   :  { %v3234_v8 = vsel %vm8211_vm14, %v7217_v28, %v3233_v13  ;;  %v3235_v50 = vsel %vm8212_vm2, %v3233_v13, %v7217_v28  ;;  %vm8223_vm14 = vcmp.lt.s32.totalorder %v4583_v21, 111  ;;  %vm8224_vm2 = vcmp.lt.s32.totalorder %v4583_v21, 110 }
 0x6d3   :  { %v3242_v39 = vmul.f32 %v3238_v35, %v3234_v8  ;;  %v3243_v2 = vmul.f32 %v3239_v27, %v3235_v50  ;;  %v3817_v8 = vld [vmem:[%s7557_s5 + $0xa0] ss:$8 sm:$0x3] }
 0x6d5   :  { %v3244_v6 = vadd.f32 %v3242_v39, %v3228_v46  ;;  %v3245_v60 = vadd.f32 %v3243_v2, %v3229_v63  ;;  %v3335_v39 = vperm.slane %v3817_v8, 1 }
 0x6d7   :  { %3520 = vrot.lane.b32.xlu2 %v6435_v32, %s8066_s2  ;;  %v3260_v28 = vadd.f32 %v3258_v1, %v3244_v6  ;;  %v3261_v12 = vadd.f32 %v3259_v56, %v3245_v60  ;;  %v3334_v6 = vperm.slane %v3817_v8, 0 }
 0x6d8   :  { %v7314_v47 = vpop.permute.xlu1 %3342  ;;  %v7342_v31 = vpop.permute.xlu0 %3392 }
 0x6d9   :  { %v3263_v15 = vpop.permute.xlu2 %3262 }
 0x6da   :  { %v3266_v9 = vsel %vm8213_vm6, %v3263_v15, %v3265_v10  ;;  %v3267_v49 = vsel %vm8214_vm7, %v3265_v10, %v3263_v15  ;;  %v3302_v10 = vperm.slane %v3815_v33, 0  ;;  %v3820_v15 = vld [vmem:[%s7557_s5 + $0xa3] ss:$8 sm:$0x3]  ;;  %vm8225_vm6 = vmmov %vm8223_vm14 }
 0x6db   :  { %v3274_v20 = vmul.f32 %v3270_v18, %v3266_v9  ;;  %v3275_v59 = vmul.f32 %v3271_v44, %v3267_v49  ;;  %v3346_v17 = vsel %vm8225_vm6, %v7314_v47, %v7324_v7  ;;  %vm8226_vm7 = vmmov %vm8224_vm2 }
 0x6dc   :  { %v3306_v30 = vmul.f32 %v3302_v10, %v3298_v14  ;;  %v3383_v10 = vperm.slane %v3820_v15, 1 }
 0x6dd   :  { %v3276_v45 = vadd.f32 %v3274_v20, %v3260_v28  ;;  %v3277_v61 = vadd.f32 %v3275_v59, %v3261_v12  ;;  %v3818_v28 = vld [vmem:[%s7557_s5 + $0xa1] ss:$8 sm:$0x3] }
 0x6de   :  { %v3351_v9 = vperm.slane %v3818_v28, 1 }
 0x6df   :  { %3550 = vrot.lane.b32.xlu2 %v6393_v11, %s8087_s7 }
 0x6e0   :  { %v3361_v40 = vpop.permute.xlu1 %3360  ;;  %v7346_v35 = vpop.permute.xlu0 %3422 }
 0x6e1   :  { %v3281_v25 = vpop.permute.xlu2 %3280 }
 0x6e2   :  { %v3282_v37 = vsel %vm8217_vm10, %v7268_v41, %v3281_v25  ;;  %v3283_v29 = vsel %vm8218_vm11, %v3281_v25, %v7268_v41  ;;  %vm8229_vm10 = vcmp.lt.s32.totalorder %v4583_v21, 99  ;;  %vm8230_vm11 = vcmp.lt.s32.totalorder %v4583_v21, 98 }
 0x6e3   :  { %v3290_v22 = vmul.f32 %v3286_v5, %v3282_v37  ;;  %v3291_v36 = vmul.f32 %v3287_v24, %v3283_v29  ;;  %v3821_v37 = vld [vmem:[%s7557_s5 + $0xa4] ss:$8 sm:$0x3] }
 0x6e5   :  { %v3292_v26 = vadd.f32 %v3290_v22, %v3276_v45  ;;  %v3293_v54 = vadd.f32 %v3291_v36, %v3277_v61  ;;  %v3350_v45 = vperm.slane %v3818_v28, 0  ;;  %v3382_v36 = vperm.slane %v3820_v15, 0 }
 0x6e7   :  { %3568 = vrot.lane.b32.xlu2 %v6435_v32, %s8073_s9  ;;  %v3308_v57 = vadd.f32 %v3306_v30, %v3292_v26  ;;  %v3309_v51 = vadd.f32 %v3307_v42, %v3293_v54 }
 0x6e8   :  { %v7338_v0 = vpop.permute.xlu1 %3390  ;;  %v7350_v32 = vpop.permute.xlu0 %3440 }
 0x6e9   :  { %v3311_v3 = vpop.permute.xlu2 %3310 }
 0x6ea   :  { %v3315_v46 = vsel %vm8219_vm12, %v7291_v16, %v3311_v3  ;;  %v3314_v55 = vsel %vm8220_vm13, %v3311_v3, %v7291_v16  ;;  %v3819_v16 = vld [vmem:[%s7557_s5 + $0xa2] ss:$8 sm:$0x3]  ;;  %v3823_v3 = vld [vmem:[%s7557_s5 + $0xa6] ss:$8 sm:$0x3]  ;;  %vm8231_vm12 = vmmov %vm8229_vm10 }
 0x6eb   :  { %v3367_v62 = vperm.slane %v3819_v16, 1  ;;  %v3366_v24 = vperm.slane %v3819_v16, 0  ;;  %vm8232_vm13 = vmmov %vm8230_vm11  ;;  %v3824_v16 = vld [vmem:[%s7557_s5 + $0xa7] ss:$8 sm:$0x3]  ;;  %v3430_v15 = vperm.slane %v3823_v3, 0 }
 0x6ef   :  { %3598 = vrot.lane.b32.xlu2 %v6393_v11, %s8104_s21  ;;  %v3816_v11 = vld [vmem:[%s7557_s5 + $0x97] ss:$8 sm:$0x3] }
 0x6f0   :  { %v7344_v48 = vpop.permute.xlu1 %3408  ;;  %v7361_v13 = vpop.permute.xlu0 %3470  ;;  %v3319_v50 = vperm.slane %v3816_v11, 1  ;;  %v3318_v63 = vperm.slane %v3816_v11, 0 }
 0x6f1   :  { %v3329_v41 = vpop.permute.xlu2 %3328 }
 0x6f2   :  { %v3331_v1 = vsel %vm8221_vm0, %v3329_v41, %v7306_v58  ;;  %v3323_v56 = vmul.f32 %v3319_v50, %v3315_v46  ;;  %v3330_v12 = vsel %vm8222_vm15, %v7306_v58, %v3329_v41  ;;  %v3322_v18 = vmul.f32 %v3318_v63, %v3314_v55 }
 0x6f3   :  { %v3339_v44 = vmul.f32 %v3335_v39, %v3331_v1  ;;  %v3338_v20 = vmul.f32 %v3334_v6, %v3330_v12  ;;  %v3347_v58 = vsel %vm8223_vm14, %v7324_v7, %v7314_v47  ;;  %v3822_v7 = vld [vmem:[%s7557_s5 + $0xa5] ss:$8 sm:$0x3]  ;;  %v3398_v50 = vperm.slane %v3821_v37, 0 }
 0x6f4   :  { %v3325_v49 = vadd.f32 %v3323_v56, %v3309_v51  ;;  %v3324_v33 = vadd.f32 %v3322_v18, %v3308_v57  ;;  %v3355_v53 = vmul.f32 %v3351_v9, %v3347_v58  ;;  %v3399_v51 = vperm.slane %v3821_v37, 1  ;;  %v3826_v58 = vld [vmem:[%s7557_s5 + $0xb1] ss:$8 sm:$0x3] }
 0x6f5   :  { %v3415_v8 = vperm.slane %v3822_v7, 1  ;;  %v3414_v55 = vperm.slane %v3822_v7, 0  ;;  %v3431_v1 = vperm.slane %v3823_v3, 1  ;;  %v3394_v56 = vsel %vm8231_vm12, %v7338_v0, %v7342_v31 }
 0x6f6   :  { %v3341_v5 = vadd.f32 %v3339_v44, %v3325_v49  ;;  %v3340_v29 = vadd.f32 %v3338_v20, %v3324_v33  ;;  %vm8233_vm0 = vcmp.lt.s32.totalorder %v4583_v21, 97  ;;  %vm8235_vm14 = vcmp.lt.s32.totalorder %v4583_v21, 96 }
 0x6f7   :  { %vm8234_vm15 = vmmov %vm8233_vm0 }
 0x6f8   :  { %v7348_v19 = vpop.permute.xlu1 %3438  ;;  %v7391_v59 = vpop.permute.xlu0 %3488  ;;  %v3357_v26 = vadd.f32 %v3355_v53, %v3341_v5  ;;  %v3479_v53 = vperm.slane %v3826_v58, 1  ;;  %vm8237_vm6 = vmmov %vm8235_vm14 }
 0x6f9   :  { %v3359_v38 = vpop.permute.xlu2 %3358  ;;  %v3442_v37 = vsel %vm8237_vm6, %v7348_v19, %v7350_v32 }
 0x6fa   :  { %v3363_v61 = vsel %vm8224_vm2, %v3361_v40, %v3359_v38  ;;  %v3362_v25 = vsel %vm8226_vm7, %v3359_v38, %v3361_v40  ;;  %v3354_v40 = vmul.f32 %v3350_v45, %v3346_v17  ;;  %v3447_v45 = vperm.slane %v3824_v16, 1 }
 0x6fb   :  { %v3371_v22 = vmul.f32 %v3367_v62, %v3363_v61  ;;  %v3370_v54 = vmul.f32 %v3366_v24, %v3362_v25  ;;  %vm8236_vm2 = vcmp.lt.s32.totalorder %v4583_v21, 95 }
 0x6fc   :  { %v3356_v41 = vadd.f32 %v3354_v40, %v3340_v29  ;;  %vm8238_vm7 = vmmov %vm8236_vm2 }
 0x6fd   :  { %v3373_v38 = vadd.f32 %v3371_v22, %v3357_v26 }
 0x6fe   :  { %v3372_v46 = vadd.f32 %v3370_v54, %v3356_v41  ;;  %v3478_v54 = vperm.slane %v3826_v58, 0 }
 0x700   :  { %v7354_v34 = vpop.permute.xlu1 %3456  ;;  %v7428_v63 = vpop.permute.xlu0 %3518 }
 0x701   :  { %v3377_v27 = vpop.permute.xlu2 %3376 }
 0x702   :  { %v3379_v14 = vsel %vm8227_vm8, %v3377_v27, %v3375_v23  ;;  %v3378_v47 = vsel %vm8228_vm9, %v3375_v23, %v3377_v27  ;;  %v3395_v23 = vsel %vm8229_vm10, %v7342_v31, %v7338_v0  ;;  %v3825_v31 = vld [vmem:[%s7557_s5 + $0xb0] ss:$8 sm:$0x3]  ;;  %vm8239_vm8 = vcmp.lt.s32.totalorder %v4583_v21, 94 }
 0x703   :  { %v3387_v57 = vmul.f32 %v3383_v10, %v3379_v14  ;;  %v3386_v11 = vmul.f32 %v3382_v36, %v3378_v47  ;;  %v3403_v12 = vmul.f32 %v3399_v51, %v3395_v23  ;;  %v3463_v24 = vperm.slane %v3825_v31, 1  ;;  %v3827_v47 = vld [vmem:[%s7557_s5 + $0xb2] ss:$8 sm:$0x3]  ;;  %vm8240_vm9 = vmmov %vm8239_vm8 }
 0x704   :  { %v3462_v14 = vperm.slane %v3825_v31, 0  ;;  %v3495_v41 = vperm.slane %v3827_v47, 1  ;;  %vm8241_vm10 = vcmp.lt.s32.totalorder %v4583_v21, 93 }
 0x705   :  { %v3389_v39 = vadd.f32 %v3387_v57, %v3373_v38  ;;  %v3388_v18 = vadd.f32 %v3386_v11, %v3372_v46  ;;  %v3829_v38 = vld [vmem:[%s7557_s5 + $0xb4] ss:$8 sm:$0x3]  ;;  %v3494_v46 = vperm.slane %v3827_v47, 0  ;;  %vm8243_vm12 = vmmov %vm8241_vm10 }
 0x708   :  { %v7369_v2 = vpop.permute.xlu1 %3486  ;;  %v3537_v7 = vpop.permute.xlu0 %3536 }
 0x709   :  { %v7352_v52 = vpop.permute.xlu2 %3406 }
 0x70a   :  { %v3411_v27 = vsel %vm8230_vm11, %v7344_v48, %v7352_v52  ;;  %v3410_v6 = vsel %vm8232_vm13, %v7352_v52, %v7344_v48  ;;  %v3402_v48 = vmul.f32 %v3398_v50, %v3394_v56  ;;  %v3405_v52 = vadd.f32 %v3403_v12, %v3389_v39 }
 0x70b   :  { %v3419_v44 = vmul.f32 %v3415_v8, %v3411_v27  ;;  %v3418_v49 = vmul.f32 %v3414_v55, %v3410_v6  ;;  %vm8242_vm11 = vcmp.lt.s32.totalorder %v4583_v21, 83  ;;  %v3527_v56 = vperm.slane %v3829_v38, 1 }
 0x70c   :  { %v3404_v61 = vadd.f32 %v3402_v48, %v3388_v18  ;;  %v3490_v6 = vsel %vm8243_vm12, %v7369_v2, %v7391_v59  ;;  %vm8244_vm13 = vmmov %vm8242_vm11  ;;  %v3830_v18 = vld [vmem:[%s7557_s5 + $0xb5] ss:$8 sm:$0x3] }
 0x70d   :  { %v3421_v33 = vadd.f32 %v3419_v44, %v3405_v52 }
 0x70e   :  { %v3420_v17 = vadd.f32 %v3418_v49, %v3404_v61 }
 0x710   :  { %v7410_v30 = vpop.permute.xlu1 %3504 }
 0x711   :  { %v7356_v4 = vpop.permute.xlu2 %3424 }
 0x712   :  { %v3427_v28 = vsel %vm8233_vm0, %v7356_v4, %v7346_v35  ;;  %v3426_v0 = vsel %vm8234_vm15, %v7346_v35, %v7356_v4  ;;  %v3446_v35 = vperm.slane %v3824_v16, 0  ;;  %v3443_v4 = vsel %vm8235_vm14, %v7350_v32, %v7348_v19  ;;  %v3828_v32 = vld [vmem:[%s7557_s5 + $0xb3] ss:$8 sm:$0x3] }
 0x713   :  { %v3435_v20 = vmul.f32 %v3431_v1, %v3427_v28  ;;  %v3434_v5 = vmul.f32 %v3430_v15, %v3426_v0  ;;  %v3451_v36 = vmul.f32 %v3447_v45, %v3443_v4  ;;  %v3511_v27 = vperm.slane %v3828_v32, 1  ;;  %v3832_v45 = vld [vmem:[%s7557_s5 + $0xb7] ss:$8 sm:$0x3] }
 0x714   :  { %v3510_v1 = vperm.slane %v3828_v32, 0  ;;  %vm8245_vm0 = vcmp.lt.s32.totalorder %v4583_v21, 82  ;;  %v3526_v0 = vperm.slane %v3829_v38, 0  ;;  %vm8247_vm14 = vcmp.lt.s32.totalorder %v4583_v21, 81 }
 0x715   :  { %v3437_v25 = vadd.f32 %v3435_v20, %v3421_v33  ;;  %v3436_v40 = vadd.f32 %v3434_v5, %v3420_v17  ;;  %vm8246_vm15 = vmmov %vm8245_vm0  ;;  %v3543_v20 = vperm.slane %v3830_v18, 1  ;;  %v3574_v47 = vperm.slane %v3832_v45, 0 }
 0x716   :  { %vm8249_vm6 = vmmov %vm8247_vm14 }
 0x718   :  { %v7452_v62 = vpop.permute.xlu1 %3534 }
 0x719   :  { %v7377_v60 = vpop.permute.xlu2 %3454 }
 0x71a   :  { %v3459_v10 = vsel %vm8236_vm2, %v7354_v34, %v7377_v60  ;;  %v3458_v29 = vsel %vm8238_vm7, %v7377_v60, %v7354_v34  ;;  %v3450_v34 = vmul.f32 %v3446_v35, %v3442_v37  ;;  %v3453_v60 = vadd.f32 %v3451_v36, %v3437_v25 }
 0x71b   :  { %v3467_v26 = vmul.f32 %v3463_v24, %v3459_v10  ;;  %v3466_v51 = vmul.f32 %v3462_v14, %v3458_v29  ;;  %v3542_v24 = vperm.slane %v3830_v18, 0  ;;  %vm8248_vm2 = vcmp.lt.s32.totalorder %v4583_v21, 80 }
 0x71c   :  { %v3452_v11 = vadd.f32 %v3450_v34, %v3436_v40  ;;  %v3575_v14 = vperm.slane %v3832_v45, 1  ;;  %vm8250_vm7 = vmmov %vm8248_vm2  ;;  %v3834_v34 = vld [vmem:[%s7557_s5 + $0xc1] ss:$8 sm:$0x3] }
 0x71d   :  { %v3469_v8 = vadd.f32 %v3467_v26, %v3453_v60  ;;  %v3833_v26 = vld [vmem:[%s7557_s5 + $0xc0] ss:$8 sm:$0x3] }
 0x71e   :  { %v3468_v39 = vadd.f32 %v3466_v51, %v3452_v11  ;;  %v3591_v51 = vperm.slane %v3833_v26, 1  ;;  %v3590_v11 = vperm.slane %v3833_v26, 0 }
 0x720   :  { %v3553_v50 = vpop.permute.xlu1 %3552 }
 0x721   :  { %v3473_v42 = vpop.permute.xlu2 %3472 }
 0x722   :  { %v3475_v22 = vsel %vm8239_vm8, %v3473_v42, %v7361_v13  ;;  %v3474_v19 = vsel %vm8240_vm9, %v7361_v13, %v3473_v42  ;;  %v3491_v13 = vsel %vm8241_vm10, %v7391_v59, %v7369_v2  ;;  %v3831_v59 = vld [vmem:[%s7557_s5 + $0xb6] ss:$8 sm:$0x3] }
 0x723   :  { %v3483_v3 = vmul.f32 %v3479_v53, %v3475_v22  ;;  %v3482_v23 = vmul.f32 %v3478_v54, %v3474_v19  ;;  %v3499_v16 = vmul.f32 %v3495_v41, %v3491_v13  ;;  %v3559_v5 = vperm.slane %v3831_v59, 1 }
 0x724   :  { %v3558_v25 = vperm.slane %v3831_v59, 0  ;;  %v3538_v53 = vsel %vm8249_vm6, %v7452_v62, %v3537_v7 }
 0x725   :  { %v3485_v55 = vadd.f32 %v3483_v3, %v3469_v8  ;;  %v3484_v44 = vadd.f32 %v3482_v23, %v3468_v39  ;;  %v3546_v19 = vmul.f32 %v3542_v24, %v3538_v53 }
 0x727   :  { %v3501_v48 = vadd.f32 %v3499_v16, %v3485_v55 }
 0x728   :  { %v3583_v4 = vpop.permute.xlu1 %3582 }
 0x729   :  { %v3503_v9 = vpop.permute.xlu2 %3502 }
 0x72a   :  { %v3507_v42 = vsel %vm8242_vm11, %v7410_v30, %v3503_v9  ;;  %v3506_v28 = vsel %vm8244_vm13, %v3503_v9, %v7410_v30  ;;  %v3498_v30 = vmul.f32 %v3494_v46, %v3490_v6  ;;  %v3567_v9 = vpop.permute.xlu0 %3566  ;;  %v3607_v46 = vperm.slane %v3834_v34, 1 }
 0x72b   :  { %v3515_v15 = vmul.f32 %v3511_v27, %v3507_v42  ;;  %v3514_v52 = vmul.f32 %v3510_v1, %v3506_v28  ;;  %v3606_v27 = vperm.slane %v3834_v34, 0 }
 0x72c   :  { %v3500_v58 = vadd.f32 %v3498_v30, %v3484_v44 }
 0x72d   :  { %v3517_v61 = vadd.f32 %v3515_v15, %v3501_v48 }
 0x72e   :  { %v3516_v10 = vadd.f32 %v3514_v52, %v3500_v58 }
 0x730   :  { %v3601_v39 = vpop.permute.xlu1 %3600 }
 0x731   :  { %v3521_v57 = vpop.permute.xlu2 %3520 }
 0x732   :  { %v3523_v12 = vsel %vm8245_vm0, %v3521_v57, %v7428_v63  ;;  %v3522_v2 = vsel %vm8246_vm15, %v7428_v63, %v3521_v57  ;;  %v3539_v63 = vsel %vm8247_vm14, %v3537_v7, %v7452_v62  ;;  %v3585_v60 = vpop.permute.xlu0 %3584 }
 0x733   :  { %v3531_v49 = vmul.f32 %v3527_v56, %v3523_v12  ;;  %v3530_v33 = vmul.f32 %v3526_v0, %v3522_v2  ;;  %v3547_v29 = vmul.f32 %v3543_v20, %v3539_v63  ;;  %v3587_v8 = vsel %vm1081_vm4, %v3585_v60, %v3583_v4 }
 0x734   :  { %v3586_v13 = vsel %vm1081_vm4, %v3583_v4, %v3585_v60  ;;  %v3595_v42 = vmul.f32 %v3591_v51, %v3587_v8 }
 0x735   :  { %v3533_v17 = vadd.f32 %v3531_v49, %v3517_v61  ;;  %v3532_v22 = vadd.f32 %v3530_v33, %v3516_v10  ;;  %v3594_v28 = vmul.f32 %v3590_v11, %v3586_v13 }
 0x737   :  { %v3549_v62 = vadd.f32 %v3547_v29, %v3533_v17  ;;  %v3548_v3 = vadd.f32 %v3546_v19, %v3532_v22 }
 0x739   :  { %v3551_v31 = vpop.permute.xlu2 %3550 }
 0x73a   :  { %v3555_v35 = vsel %vm8248_vm2, %v3553_v50, %v3551_v31  ;;  %v3554_v37 = vsel %vm8250_vm7, %v3551_v31, %v3553_v50 }
 0x73b   :  { %v3563_v36 = vmul.f32 %v3559_v5, %v3555_v35  ;;  %v3562_v7 = vmul.f32 %v3558_v25, %v3554_v37 }
 0x73d   :  { %v3565_v41 = vadd.f32 %v3563_v36, %v3549_v62  ;;  %v3564_v50 = vadd.f32 %v3562_v7, %v3548_v3 }
 0x741   :  { %v3569_v40 = vpop.permute.xlu2 %3568 }
 0x742   :  { %v3570_v54 = vsel %vm1063_vm3, %v3567_v9, %v3569_v40  ;;  %v3571_v57 = vsel %vm1063_vm3, %v3569_v40, %v3567_v9  ;;  %vm8251_vm3 = vcmask 1040384  }
 0x743   :  { %v3579_v32 = vmul.f32 %v3575_v14, %v3571_v57  ;;  %v3578_v38 = vmul.f32 %v3574_v47, %v3570_v54 }
 0x745   :  { %v3581_v23 = vadd.f32 %v3579_v32, %v3565_v41  ;;  %v3580_v55 = vadd.f32 %v3578_v38, %v3564_v50 }
 0x747   :  { %v3597_v12 = vadd.f32 %v3595_v42, %v3581_v23  ;;  %v3596_v44 = vadd.f32 %v3594_v28, %v3580_v55 }
 0x749   :  { %v3599_v1 = vpop.permute.xlu2 %3598 }
 0x74a   :  { %v3602_v56 = vsel %vm1099_vm5, %v3599_v1, %v3601_v39  ;;  %v3603_v6 = vsel %vm1099_vm5, %v3601_v39, %v3599_v1 }
 0x74b   :  { %v3610_v16 = vmul.f32 %v3606_v27, %v3602_v56  ;;  %v3611_v18 = vmul.f32 %v3607_v46, %v3603_v6 }
 0x74d   :  { %v3613_v15 = vadd.f32 %v3611_v18, %v3597_v12  ;;  %v3612_v0 = vadd.f32 %v3610_v16, %v3596_v44 }
 0x74f   :  { %v3616_v31 = vrot.slane %v3613_v15, 7 }
 0x751   :  { %v3617_v2 = vsel %vm8251_vm3, %v3612_v0, %v3616_v31 }
 0x752   :  { %3835 = vst.msk [vmem:[%s8252_s20 + $0x2] sm:$0x3] %vm6080_vm1, %v3617_v2 }

</bundles_post_ra>
